<compile_context>
chip_gen: v7x
topology: tpu7x:2x2x1
jax: 0.10.0
libtpu: 0.0.40
codegen_flags: <defaults>
</compile_context>

<pallas_src>
import functools

import jax
import jax.numpy as jnp
from jax import lax
from jax.experimental import pallas as pl
from jax.experimental.pallas import tpu as pltpu

PADS = (3, 0, 7, 0, 9)                                   # Conv2d paddings, layers 1..5
SUB_CONSTS = (1000.0, 4000.0, 1100.0, 5000.0, 9000.0)    # constants subtracted post-conv
CHANNELS = (22, 24, 32, 64, 80, 192)                     # cin of layer 1, then couts


def _fused_kernel(x_ref,
                  w1_ref, b1_ref, w2_ref, b2_ref, w3_ref, b3_ref,
                  w4_ref, b4_ref, w5_ref, b5_ref, rings_ref,
                  o_ref, *, s0):
    s5 = s0 + 2 * sum(PADS)
    t1 = PADS[4]                        # 9  : outermost ring width (conv5 pad)
    t2 = PADS[4] + PADS[2]              # 16 : + conv3-pad ring
    t3 = PADS[4] + PADS[2] + PADS[0]    # 19 : + conv1-pad ring -> interior starts here
    c5 = o_ref.shape[0]

    # Per-channel ring constants (precomputed on host, input-independent):
    #   col 0 = conv5-pad ring, col 1 = conv3-pad ring (propagated through conv4..5),
    #   col 2 = conv1-pad ring (propagated through conv2..5).
    r9 = rings_ref[:, 0:1]
    r7 = rings_ref[:, 1:2]
    r3 = rings_ref[:, 2:3]

    # Row templates selected by column depth (distance to nearest vertical edge).
    col = lax.broadcasted_iota(jnp.int32, (1, s5), 1)
    dcol = jnp.minimum(col, s5 - 1 - col)
    row_b = jnp.where(dcol < t1, r9, r7)                            # row depth in [t1, t2)
    row_c = jnp.where(dcol < t1, r9, jnp.where(dcol < t2, r7, r3))  # row depth >= t2

    # ---------- border assembly: pure broadcast stores, no matmuls ----------
    # Top / bottom t1-row bands: every pixel is the conv5-pad ring constant.
    o_ref[:, 0:t1 * s5] = jnp.broadcast_to(r9, (c5, t1 * s5))
    o_ref[:, (s5 - t1) * s5:s5 * s5] = jnp.broadcast_to(r9, (c5, t1 * s5))
    # Rows whose depth is in [t1, t2).
    for r in list(range(t1, t2)) + list(range(s5 - t2, s5 - t1)):
        o_ref[:, r * s5:(r + 1) * s5] = row_b
    # Rows whose depth is >= t2 (also lays the left/right border of the interior
    # rows; their centre s0 columns are overwritten by the matmul result below).
    for r in range(t2, s5 - t2):
        o_ref[:, r * s5:(r + 1) * s5] = row_c

    # ---------- interior: 5-layer 1x1-conv chain on the original s0 x s0 pixels ----------
    ws = (w1_ref[...], w2_ref[...], w3_ref[...], w4_ref[...], w5_ref[...])   # bf16
    bcs = (b1_ref[...], b2_ref[...], b3_ref[...], b4_ref[...], b5_ref[...])  # f32 (bias - const)
    n_layers = len(ws)
    # Chunk along the lane (pixel) axis in whole interior rows; ~512 lanes per chunk
    # when possible so each MXU weight push is reused across many lanes.  At the
    # test size (s0=16) this is a single chunk of 256 lanes.
    rows_per_chunk = max(1, min(s0, 512 // s0))
    for r0 in range(0, s0, rows_per_chunk):
        nr = min(rows_per_chunk, s0 - r0)
        a = x_ref[:, r0 * s0:(r0 + nr) * s0].astype(jnp.bfloat16)
        y = None
        for li in range(n_layers):
            y = jnp.dot(ws[li], a, preferred_element_type=jnp.float32) + bcs[li]
            y = jnp.maximum(y, 0.0)                      # (bias - const) add + ReLU in f32
            if li + 1 < n_layers:
                a = y.astype(jnp.bfloat16)               # bf16 operands for the MXU
        for k in range(nr):
            off = (t3 + r0 + k) * s5 + t3
            o_ref[:, off:off + s0] = y[:, k * s0:(k + 1) * s0]


def _ring_vectors(w2d, bc):
    """Per-channel output values of the three padded rings (input-independent)."""
    relu = lambda t: jnp.maximum(t, 0.0)
    # conv1 padding ring, propagated through layers 2..5
    v = relu(bc[0])
    for li in range(1, 5):
        v = relu(w2d[li] @ v + bc[li])
    ring_c1 = v
    # conv3 padding ring, propagated through layers 4..5
    v = relu(bc[2])
    for li in range(3, 5):
        v = relu(w2d[li] @ v + bc[li])
    ring_c3 = v
    # conv5 padding ring
    ring_c5 = relu(bc[4])
    return jnp.stack([ring_c5, ring_c3, ring_c1], axis=1)    # (192, 3) f32


@jax.jit
def model_forward(params, x_nchw):
    n, c0, h0, w0 = x_nchw.shape
    assert h0 == w0, "square spatial input expected"
    s0 = h0
    s5 = s0 + 2 * sum(PADS)
    c5 = params[-1][0].shape[0]

    w2d = [w.reshape(w.shape[0], w.shape[1]).astype(jnp.float32) for (w, _) in params]
    bc = [b.astype(jnp.float32) - c for (_, b), c in zip(params, SUB_CONSTS)]
    rings = _ring_vectors(w2d, bc)                            # tiny matvecs, host side

    # NCHW is already (C, H*W) per image in this layout -- no transpose needed.
    x2d = x_nchw.reshape(n, c0, s0 * s0)

    flat_inputs = [x2d]
    in_specs = [pl.BlockSpec((None, c0, s0 * s0), lambda i: (i, 0, 0))]
    for w, b in zip(w2d, bc):
        cout, cin = w.shape
        flat_inputs += [w.astype(jnp.bfloat16), b.reshape(cout, 1)]   # bf16 weights on host
        in_specs += [pl.BlockSpec((cout, cin), lambda i: (0, 0)),
                     pl.BlockSpec((cout, 1), lambda i: (0, 0))]
    flat_inputs.append(rings)
    in_specs.append(pl.BlockSpec((c5, 3), lambda i: (0, 0)))

    kernel = functools.partial(_fused_kernel, s0=s0)

    out2d = pl.pallas_call(
        kernel,
        out_shape=jax.ShapeDtypeStruct((n, c5, s5 * s5), jnp.float32),
        grid_spec=pltpu.PrefetchScalarGridSpec(
            num_scalar_prefetch=0,
            grid=(n,),
            in_specs=in_specs,
            out_specs=pl.BlockSpec((None, c5, s5 * s5), lambda i: (i, 0, 0)),
        ),
        compiler_params=pltpu.CompilerParams(
            dimension_semantics=("parallel",)),   # batch images are independent
    )(*flat_inputs)

    return out2d.reshape(n, c5, s5, s5)


def init_conv_params(key, cout, cin, sub_const):
    """Synthetic Conv2d(cin, cout, 1) params.  The bias is offset by the layer's
    subtracted constant so post-(bias - const) activations are O(1) and nonzero:
    module semantics are unchanged, but the self-test actually exercises the
    conv / ring-propagation / interior-placement paths instead of comparing zeros."""
    kw, kb = jax.random.split(key)
    bound = 1.0 / jnp.sqrt(cin)
    w = jax.random.uniform(kw, (cout, cin, 1, 1), jnp.float32, -bound, bound)
    b = sub_const + jax.random.uniform(kb, (cout,), jnp.float32, 0.5, 1.5)
    return w, b


def _reference(params, x):
    """Pure-JAX f32 reference of the PyTorch forward (pad -> 1x1 conv -> -c -> relu)."""
    for (w, b), pad, c in zip(params, PADS, SUB_CONSTS):
        if pad:
            x = jnp.pad(x, ((0, 0), (0, 0), (pad, pad), (pad, pad)))
        y = jnp.einsum("oi,nihw->nohw", w.reshape(w.shape[0], w.shape[1]), x)
        y = y + b.reshape(1, -1, 1, 1) - c
        x = jnp.maximum(y, 0.0)
    return x


if __name__ == "__main__":
    key = jax.random.PRNGKey(0)
    kx, *kl = jax.random.split(key, 6)

    # Small spatial size (16x16), batch 2 (lets the output DMA of image 0 pipeline
    # with image 1's compute); channel counts fixed by the module definition.
    x1 = jax.random.normal(kx, (2, CHANNELS[0], 16, 16), dtype=jnp.float32)

    params = tuple(
        init_conv_params(k, CHANNELS[i + 1], CHANNELS[i], SUB_CONSTS[i])
        for i, k in enumerate(kl))

    out = jax.block_until_ready(model_forward(params, x1))
    # spatial: 16 +6 -> 22, +0 -> 22, +14 -> 36, +0 -> 36, +18 -> 54
    assert out.shape == (2, 192, 54, 54), out.shape

    ref = jax.block_until_ready(_reference(params, x1))
    # bf16 MXU operands with f32 accumulation on O(1) activations: <~1e-2 abs error.
    assert jnp.allclose(out, ref, atol=5e-2, rtol=2e-2), \
        float(jnp.max(jnp.abs(out - ref)))

    print("KERNEL_OK")
</pallas_src>

<mosaic_0001>
module attributes {stable_mosaic.version = 11 : i64} {
  func.func @_fused_kernel(%arg0: i32, %arg1: memref<1x22x256xf32, #tpu.memory_space<vmem>>, %arg2: memref<24x22xbf16, #tpu.memory_space<vmem>>, %arg3: memref<24x1xf32, #tpu.memory_space<vmem>>, %arg4: memref<32x24xbf16, #tpu.memory_space<vmem>>, %arg5: memref<32x1xf32, #tpu.memory_space<vmem>>, %arg6: memref<64x32xbf16, #tpu.memory_space<vmem>>, %arg7: memref<64x1xf32, #tpu.memory_space<vmem>>, %arg8: memref<80x64xbf16, #tpu.memory_space<vmem>>, %arg9: memref<80x1xf32, #tpu.memory_space<vmem>>, %arg10: memref<192x80xbf16, #tpu.memory_space<vmem>>, %arg11: memref<192x1xf32, #tpu.memory_space<vmem>>, %arg12: memref<192x3xf32, #tpu.memory_space<vmem>>, %arg13: memref<1x192x2916xf32, #tpu.memory_space<vmem>>) attributes {dimension_semantics = [#tpu.dimension_semantics<parallel>], iteration_bounds = array<i64: 2>, scalar_prefetch = 0 : i64, scratch_operands = 0 : i64, tpu.core_type = #tpu.core_type<tc>, window_params = [{transform_indices = @transform_0, window_bounds = array<i64: 1, 22, 256>}, {pipeline_mode = #tpu.pipeline_mode<synchronous>, transform_indices = @transform_1, window_bounds = array<i64: 24, 22>}, {pipeline_mode = #tpu.pipeline_mode<synchronous>, transform_indices = @transform_2, window_bounds = array<i64: 24, 1>}, {pipeline_mode = #tpu.pipeline_mode<synchronous>, transform_indices = @transform_3, window_bounds = array<i64: 32, 24>}, {pipeline_mode = #tpu.pipeline_mode<synchronous>, transform_indices = @transform_4, window_bounds = array<i64: 32, 1>}, {pipeline_mode = #tpu.pipeline_mode<synchronous>, transform_indices = @transform_5, window_bounds = array<i64: 64, 32>}, {pipeline_mode = #tpu.pipeline_mode<synchronous>, transform_indices = @transform_6, window_bounds = array<i64: 64, 1>}, {pipeline_mode = #tpu.pipeline_mode<synchronous>, transform_indices = @transform_7, window_bounds = array<i64: 80, 64>}, {pipeline_mode = #tpu.pipeline_mode<synchronous>, transform_indices = @transform_8, window_bounds = array<i64: 80, 1>}, {pipeline_mode = #tpu.pipeline_mode<synchronous>, transform_indices = @transform_9, window_bounds = array<i64: 192, 80>}, {pipeline_mode = #tpu.pipeline_mode<synchronous>, transform_indices = @transform_10, window_bounds = array<i64: 192, 1>}, {pipeline_mode = #tpu.pipeline_mode<synchronous>, transform_indices = @transform_11, window_bounds = array<i64: 192, 3>}, {transform_indices = @transform_12, window_bounds = array<i64: 1, 192, 2916>}]} {
    %c0 = arith.constant 0 : index
    %c0_0 = arith.constant 0 : index
    %0 = vector.load %arg12[%c0, %c0_0] : memref<192x3xf32, #tpu.memory_space<vmem>>, vector<192x1xf32>
    %c0_1 = arith.constant 0 : index
    %c1 = arith.constant 1 : index
    %1 = vector.load %arg12[%c0_1, %c1] : memref<192x3xf32, #tpu.memory_space<vmem>>, vector<192x1xf32>
    %c0_2 = arith.constant 0 : index
    %c2 = arith.constant 2 : index
    %2 = vector.load %arg12[%c0_2, %c2] : memref<192x3xf32, #tpu.memory_space<vmem>>, vector<192x1xf32>
    %3 = tpu.iota {dimensions = array<i32: 1>} : vector<1x54xi32>
    %c53_i32 = arith.constant 53 : i32
    %4 = vector.broadcast %c53_i32 : i32 to vector<1x54xi32>
    %5 = arith.subi %4, %3 : vector<1x54xi32>
    %6 = arith.minsi %3, %5 : vector<1x54xi32>
    %c9_i32 = arith.constant 9 : i32
    %7 = vector.broadcast %c9_i32 : i32 to vector<1x54xi32>
    %8 = arith.cmpi slt, %6, %7 : vector<1x54xi32>
    %9 = vector.shape_cast %8 : vector<1x54xi1> to vector<1x54xi1>
    %10 = vector.broadcast %9 : vector<1x54xi1> to vector<192x54xi1>
    %11 = vector.shape_cast %0 : vector<192x1xf32> to vector<192x1xf32>
    %12 = vector.broadcast %11 : vector<192x1xf32> to vector<192x54xf32>
    %13 = vector.shape_cast %1 : vector<192x1xf32> to vector<192x1xf32>
    %14 = vector.broadcast %13 : vector<192x1xf32> to vector<192x54xf32>
    %15 = arith.select %10, %12, %14 : vector<192x54xi1>, vector<192x54xf32>
    %c9_i32_3 = arith.constant 9 : i32
    %16 = vector.broadcast %c9_i32_3 : i32 to vector<1x54xi32>
    %17 = arith.cmpi slt, %6, %16 : vector<1x54xi32>
    %c16_i32 = arith.constant 16 : i32
    %18 = vector.broadcast %c16_i32 : i32 to vector<1x54xi32>
    %19 = arith.cmpi slt, %6, %18 : vector<1x54xi32>
    %20 = vector.shape_cast %19 : vector<1x54xi1> to vector<1x54xi1>
    %21 = vector.broadcast %20 : vector<1x54xi1> to vector<192x54xi1>
    %22 = vector.shape_cast %1 : vector<192x1xf32> to vector<192x1xf32>
    %23 = vector.broadcast %22 : vector<192x1xf32> to vector<192x54xf32>
    %24 = vector.shape_cast %2 : vector<192x1xf32> to vector<192x1xf32>
    %25 = vector.broadcast %24 : vector<192x1xf32> to vector<192x54xf32>
    %26 = arith.select %21, %23, %25 : vector<192x54xi1>, vector<192x54xf32>
    %27 = vector.shape_cast %17 : vector<1x54xi1> to vector<1x54xi1>
    %28 = vector.broadcast %27 : vector<1x54xi1> to vector<192x54xi1>
    %29 = vector.shape_cast %0 : vector<192x1xf32> to vector<192x1xf32>
    %30 = vector.broadcast %29 : vector<192x1xf32> to vector<192x54xf32>
    %31 = arith.select %28, %30, %26 : vector<192x54xi1>, vector<192x54xf32>
    %32 = vector.shape_cast %0 : vector<192x1xf32> to vector<192x1xf32>
    %33 = vector.broadcast %32 : vector<192x1xf32> to vector<192x486xf32>
    %c0_4 = arith.constant 0 : index
    %c0_5 = arith.constant 0 : index
    %c0_6 = arith.constant 0 : index
    %34 = vector.load %arg13[%c0_4, %c0_5, %c0_6] : memref<1x192x2916xf32, #tpu.memory_space<vmem>>, vector<1x192x486xf32>
    %35 = vector.shape_cast %34 : vector<1x192x486xf32> to vector<192x486xf32>
    %36 = vector.shape_cast %33 : vector<192x486xf32> to vector<1x192x486xf32>
    tpu.vector_store %arg13[%c0_4, %c0_5, %c0_6], %36 {strides = array<i32>} : memref<1x192x2916xf32, #tpu.memory_space<vmem>>, vector<1x192x486xf32>,
    %37 = vector.shape_cast %0 : vector<192x1xf32> to vector<192x1xf32>
    %38 = vector.broadcast %37 : vector<192x1xf32> to vector<192x486xf32>
    %c0_7 = arith.constant 0 : index
    %c0_8 = arith.constant 0 : index
    %c2430 = arith.constant 2430 : index
    %39 = vector.load %arg13[%c0_7, %c0_8, %c2430] : memref<1x192x2916xf32, #tpu.memory_space<vmem>>, vector<1x192x486xf32>
    %40 = vector.shape_cast %39 : vector<1x192x486xf32> to vector<192x486xf32>
    %41 = vector.shape_cast %38 : vector<192x486xf32> to vector<1x192x486xf32>
    tpu.vector_store %arg13[%c0_7, %c0_8, %c2430], %41 {strides = array<i32>} : memref<1x192x2916xf32, #tpu.memory_space<vmem>>, vector<1x192x486xf32>,
    %c0_9 = arith.constant 0 : index
    %c0_10 = arith.constant 0 : index
    %c486 = arith.constant 486 : index
    %42 = vector.load %arg13[%c0_9, %c0_10, %c486] : memref<1x192x2916xf32, #tpu.memory_space<vmem>>, vector<1x192x54xf32>
    %43 = vector.shape_cast %42 : vector<1x192x54xf32> to vector<192x54xf32>
    %44 = vector.shape_cast %15 : vector<192x54xf32> to vector<1x192x54xf32>
    tpu.vector_store %arg13[%c0_9, %c0_10, %c486], %44 {strides = array<i32>} : memref<1x192x2916xf32, #tpu.memory_space<vmem>>, vector<1x192x54xf32>,
    %c0_11 = arith.constant 0 : index
    %c0_12 = arith.constant 0 : index
    %c540 = arith.constant 540 : index
    %45 = vector.load %arg13[%c0_11, %c0_12, %c540] : memref<1x192x2916xf32, #tpu.memory_space<vmem>>, vector<1x192x54xf32>
    %46 = vector.shape_cast %45 : vector<1x192x54xf32> to vector<192x54xf32>
    %47 = vector.shape_cast %15 : vector<192x54xf32> to vector<1x192x54xf32>
    tpu.vector_store %arg13[%c0_11, %c0_12, %c540], %47 {strides = array<i32>} : memref<1x192x2916xf32, #tpu.memory_space<vmem>>, vector<1x192x54xf32>,
    %c0_13 = arith.constant 0 : index
    %c0_14 = arith.constant 0 : index
    %c594 = arith.constant 594 : index
    %48 = vector.load %arg13[%c0_13, %c0_14, %c594] : memref<1x192x2916xf32, #tpu.memory_space<vmem>>, vector<1x192x54xf32>
    %49 = vector.shape_cast %48 : vector<1x192x54xf32> to vector<192x54xf32>
    %50 = vector.shape_cast %15 : vector<192x54xf32> to vector<1x192x54xf32>
    tpu.vector_store %arg13[%c0_13, %c0_14, %c594], %50 {strides = array<i32>} : memref<1x192x2916xf32, #tpu.memory_space<vmem>>, vector<1x192x54xf32>,
    %c0_15 = arith.constant 0 : index
    %c0_16 = arith.constant 0 : index
    %c648 = arith.constant 648 : index
    %51 = vector.load %arg13[%c0_15, %c0_16, %c648] : memref<1x192x2916xf32, #tpu.memory_space<vmem>>, vector<1x192x54xf32>
    %52 = vector.shape_cast %51 : vector<1x192x54xf32> to vector<192x54xf32>
    %53 = vector.shape_cast %15 : vector<192x54xf32> to vector<1x192x54xf32>
    tpu.vector_store %arg13[%c0_15, %c0_16, %c648], %53 {strides = array<i32>} : memref<1x192x2916xf32, #tpu.memory_space<vmem>>, vector<1x192x54xf32>,
    %c0_17 = arith.constant 0 : index
    %c0_18 = arith.constant 0 : index
    %c702 = arith.constant 702 : index
    %54 = vector.load %arg13[%c0_17, %c0_18, %c702] : memref<1x192x2916xf32, #tpu.memory_space<vmem>>, vector<1x192x54xf32>
    %55 = vector.shape_cast %54 : vector<1x192x54xf32> to vector<192x54xf32>
    %56 = vector.shape_cast %15 : vector<192x54xf32> to vector<1x192x54xf32>
    tpu.vector_store %arg13[%c0_17, %c0_18, %c702], %56 {strides = array<i32>} : memref<1x192x2916xf32, #tpu.memory_space<vmem>>, vector<1x192x54xf32>,
    %c0_19 = arith.constant 0 : index
    %c0_20 = arith.constant 0 : index
    %c756 = arith.constant 756 : index
    %57 = vector.load %arg13[%c0_19, %c0_20, %c756] : memref<1x192x2916xf32, #tpu.memory_space<vmem>>, vector<1x192x54xf32>
    %58 = vector.shape_cast %57 : vector<1x192x54xf32> to vector<192x54xf32>
    %59 = vector.shape_cast %15 : vector<192x54xf32> to vector<1x192x54xf32>
    tpu.vector_store %arg13[%c0_19, %c0_20, %c756], %59 {strides = array<i32>} : memref<1x192x2916xf32, #tpu.memory_space<vmem>>, vector<1x192x54xf32>,
    %c0_21 = arith.constant 0 : index
    %c0_22 = arith.constant 0 : index
    %c810 = arith.constant 810 : index
    %60 = vector.load %arg13[%c0_21, %c0_22, %c810] : memref<1x192x2916xf32, #tpu.memory_space<vmem>>, vector<1x192x54xf32>
    %61 = vector.shape_cast %60 : vector<1x192x54xf32> to vector<192x54xf32>
    %62 = vector.shape_cast %15 : vector<192x54xf32> to vector<1x192x54xf32>
    tpu.vector_store %arg13[%c0_21, %c0_22, %c810], %62 {strides = array<i32>} : memref<1x192x2916xf32, #tpu.memory_space<vmem>>, vector<1x192x54xf32>,
    %c0_23 = arith.constant 0 : index
    %c0_24 = arith.constant 0 : index
    %c2052 = arith.constant 2052 : index
    %63 = vector.load %arg13[%c0_23, %c0_24, %c2052] : memref<1x192x2916xf32, #tpu.memory_space<vmem>>, vector<1x192x54xf32>
    %64 = vector.shape_cast %63 : vector<1x192x54xf32> to vector<192x54xf32>
    %65 = vector.shape_cast %15 : vector<192x54xf32> to vector<1x192x54xf32>
    tpu.vector_store %arg13[%c0_23, %c0_24, %c2052], %65 {strides = array<i32>} : memref<1x192x2916xf32, #tpu.memory_space<vmem>>, vector<1x192x54xf32>,
    %c0_25 = arith.constant 0 : index
    %c0_26 = arith.constant 0 : index
    %c2106 = arith.constant 2106 : index
    %66 = vector.load %arg13[%c0_25, %c0_26, %c2106] : memref<1x192x2916xf32, #tpu.memory_space<vmem>>, vector<1x192x54xf32>
    %67 = vector.shape_cast %66 : vector<1x192x54xf32> to vector<192x54xf32>
    %68 = vector.shape_cast %15 : vector<192x54xf32> to vector<1x192x54xf32>
    tpu.vector_store %arg13[%c0_25, %c0_26, %c2106], %68 {strides = array<i32>} : memref<1x192x2916xf32, #tpu.memory_space<vmem>>, vector<1x192x54xf32>,
    %c0_27 = arith.constant 0 : index
    %c0_28 = arith.constant 0 : index
    %c2160 = arith.constant 2160 : index
    %69 = vector.load %arg13[%c0_27, %c0_28, %c2160] : memref<1x192x2916xf32, #tpu.memory_space<vmem>>, vector<1x192x54xf32>
    %70 = vector.shape_cast %69 : vector<1x192x54xf32> to vector<192x54xf32>
    %71 = vector.shape_cast %15 : vector<192x54xf32> to vector<1x192x54xf32>
    tpu.vector_store %arg13[%c0_27, %c0_28, %c2160], %71 {strides = array<i32>} : memref<1x192x2916xf32, #tpu.memory_space<vmem>>, vector<1x192x54xf32>,
    %c0_29 = arith.constant 0 : index
    %c0_30 = arith.constant 0 : index
    %c2214 = arith.constant 2214 : index
    %72 = vector.load %arg13[%c0_29, %c0_30, %c2214] : memref<1x192x2916xf32, #tpu.memory_space<vmem>>, vector<1x192x54xf32>
    %73 = vector.shape_cast %72 : vector<1x192x54xf32> to vector<192x54xf32>
    %74 = vector.shape_cast %15 : vector<192x54xf32> to vector<1x192x54xf32>
    tpu.vector_store %arg13[%c0_29, %c0_30, %c2214], %74 {strides = array<i32>} : memref<1x192x2916xf32, #tpu.memory_space<vmem>>, vector<1x192x54xf32>,
    %c0_31 = arith.constant 0 : index
    %c0_32 = arith.constant 0 : index
    %c2268 = arith.constant 2268 : index
    %75 = vector.load %arg13[%c0_31, %c0_32, %c2268] : memref<1x192x2916xf32, #tpu.memory_space<vmem>>, vector<1x192x54xf32>
    %76 = vector.shape_cast %75 : vector<1x192x54xf32> to vector<192x54xf32>
    %77 = vector.shape_cast %15 : vector<192x54xf32> to vector<1x192x54xf32>
    tpu.vector_store %arg13[%c0_31, %c0_32, %c2268], %77 {strides = array<i32>} : memref<1x192x2916xf32, #tpu.memory_space<vmem>>, vector<1x192x54xf32>,
    %c0_33 = arith.constant 0 : index
    %c0_34 = arith.constant 0 : index
    %c2322 = arith.constant 2322 : index
    %78 = vector.load %arg13[%c0_33, %c0_34, %c2322] : memref<1x192x2916xf32, #tpu.memory_space<vmem>>, vector<1x192x54xf32>
    %79 = vector.shape_cast %78 : vector<1x192x54xf32> to vector<192x54xf32>
    %80 = vector.shape_cast %15 : vector<192x54xf32> to vector<1x192x54xf32>
    tpu.vector_store %arg13[%c0_33, %c0_34, %c2322], %80 {strides = array<i32>} : memref<1x192x2916xf32, #tpu.memory_space<vmem>>, vector<1x192x54xf32>,
    %c0_35 = arith.constant 0 : index
    %c0_36 = arith.constant 0 : index
    %c2376 = arith.constant 2376 : index
    %81 = vector.load %arg13[%c0_35, %c0_36, %c2376] : memref<1x192x2916xf32, #tpu.memory_space<vmem>>, vector<1x192x54xf32>
    %82 = vector.shape_cast %81 : vector<1x192x54xf32> to vector<192x54xf32>
    %83 = vector.shape_cast %15 : vector<192x54xf32> to vector<1x192x54xf32>
    tpu.vector_store %arg13[%c0_35, %c0_36, %c2376], %83 {strides = array<i32>} : memref<1x192x2916xf32, #tpu.memory_space<vmem>>, vector<1x192x54xf32>,
    %c0_37 = arith.constant 0 : index
    %c0_38 = arith.constant 0 : index
    %c864 = arith.constant 864 : index
    %84 = vector.load %arg13[%c0_37, %c0_38, %c864] : memref<1x192x2916xf32, #tpu.memory_space<vmem>>, vector<1x192x54xf32>
    %85 = vector.shape_cast %84 : vector<1x192x54xf32> to vector<192x54xf32>
    %86 = vector.shape_cast %31 : vector<192x54xf32> to vector<1x192x54xf32>
    tpu.vector_store %arg13[%c0_37, %c0_38, %c864], %86 {strides = array<i32>} : memref<1x192x2916xf32, #tpu.memory_space<vmem>>, vector<1x192x54xf32>,
    %c0_39 = arith.constant 0 : index
    %c0_40 = arith.constant 0 : index
    %c918 = arith.constant 918 : index
    %87 = vector.load %arg13[%c0_39, %c0_40, %c918] : memref<1x192x2916xf32, #tpu.memory_space<vmem>>, vector<1x192x54xf32>
    %88 = vector.shape_cast %87 : vector<1x192x54xf32> to vector<192x54xf32>
    %89 = vector.shape_cast %31 : vector<192x54xf32> to vector<1x192x54xf32>
    tpu.vector_store %arg13[%c0_39, %c0_40, %c918], %89 {strides = array<i32>} : memref<1x192x2916xf32, #tpu.memory_space<vmem>>, vector<1x192x54xf32>,
    %c0_41 = arith.constant 0 : index
    %c0_42 = arith.constant 0 : index
    %c972 = arith.constant 972 : index
    %90 = vector.load %arg13[%c0_41, %c0_42, %c972] : memref<1x192x2916xf32, #tpu.memory_space<vmem>>, vector<1x192x54xf32>
    %91 = vector.shape_cast %90 : vector<1x192x54xf32> to vector<192x54xf32>
    %92 = vector.shape_cast %31 : vector<192x54xf32> to vector<1x192x54xf32>
    tpu.vector_store %arg13[%c0_41, %c0_42, %c972], %92 {strides = array<i32>} : memref<1x192x2916xf32, #tpu.memory_space<vmem>>, vector<1x192x54xf32>,
    %c0_43 = arith.constant 0 : index
    %c0_44 = arith.constant 0 : index
    %c1026 = arith.constant 1026 : index
    %93 = vector.load %arg13[%c0_43, %c0_44, %c1026] : memref<1x192x2916xf32, #tpu.memory_space<vmem>>, vector<1x192x54xf32>
    %94 = vector.shape_cast %93 : vector<1x192x54xf32> to vector<192x54xf32>
    %95 = vector.shape_cast %31 : vector<192x54xf32> to vector<1x192x54xf32>
    tpu.vector_store %arg13[%c0_43, %c0_44, %c1026], %95 {strides = array<i32>} : memref<1x192x2916xf32, #tpu.memory_space<vmem>>, vector<1x192x54xf32>,
    %c0_45 = arith.constant 0 : index
    %c0_46 = arith.constant 0 : index
    %c1080 = arith.constant 1080 : index
    %96 = vector.load %arg13[%c0_45, %c0_46, %c1080] : memref<1x192x2916xf32, #tpu.memory_space<vmem>>, vector<1x192x54xf32>
    %97 = vector.shape_cast %96 : vector<1x192x54xf32> to vector<192x54xf32>
    %98 = vector.shape_cast %31 : vector<192x54xf32> to vector<1x192x54xf32>
    tpu.vector_store %arg13[%c0_45, %c0_46, %c1080], %98 {strides = array<i32>} : memref<1x192x2916xf32, #tpu.memory_space<vmem>>, vector<1x192x54xf32>,
    %c0_47 = arith.constant 0 : index
    %c0_48 = arith.constant 0 : index
    %c1134 = arith.constant 1134 : index
    %99 = vector.load %arg13[%c0_47, %c0_48, %c1134] : memref<1x192x2916xf32, #tpu.memory_space<vmem>>, vector<1x192x54xf32>
    %100 = vector.shape_cast %99 : vector<1x192x54xf32> to vector<192x54xf32>
    %101 = vector.shape_cast %31 : vector<192x54xf32> to vector<1x192x54xf32>
    tpu.vector_store %arg13[%c0_47, %c0_48, %c1134], %101 {strides = array<i32>} : memref<1x192x2916xf32, #tpu.memory_space<vmem>>, vector<1x192x54xf32>,
    %c0_49 = arith.constant 0 : index
    %c0_50 = arith.constant 0 : index
    %c1188 = arith.constant 1188 : index
    %102 = vector.load %arg13[%c0_49, %c0_50, %c1188] : memref<1x192x2916xf32, #tpu.memory_space<vmem>>, vector<1x192x54xf32>
    %103 = vector.shape_cast %102 : vector<1x192x54xf32> to vector<192x54xf32>
    %104 = vector.shape_cast %31 : vector<192x54xf32> to vector<1x192x54xf32>
    tpu.vector_store %arg13[%c0_49, %c0_50, %c1188], %104 {strides = array<i32>} : memref<1x192x2916xf32, #tpu.memory_space<vmem>>, vector<1x192x54xf32>,
    %c0_51 = arith.constant 0 : index
    %c0_52 = arith.constant 0 : index
    %c1242 = arith.constant 1242 : index
    %105 = vector.load %arg13[%c0_51, %c0_52, %c1242] : memref<1x192x2916xf32, #tpu.memory_space<vmem>>, vector<1x192x54xf32>
    %106 = vector.shape_cast %105 : vector<1x192x54xf32> to vector<192x54xf32>
    %107 = vector.shape_cast %31 : vector<192x54xf32> to vector<1x192x54xf32>
    tpu.vector_store %arg13[%c0_51, %c0_52, %c1242], %107 {strides = array<i32>} : memref<1x192x2916xf32, #tpu.memory_space<vmem>>, vector<1x192x54xf32>,
    %c0_53 = arith.constant 0 : index
    %c0_54 = arith.constant 0 : index
    %c1296 = arith.constant 1296 : index
    %108 = vector.load %arg13[%c0_53, %c0_54, %c1296] : memref<1x192x2916xf32, #tpu.memory_space<vmem>>, vector<1x192x54xf32>
    %109 = vector.shape_cast %108 : vector<1x192x54xf32> to vector<192x54xf32>
    %110 = vector.shape_cast %31 : vector<192x54xf32> to vector<1x192x54xf32>
    tpu.vector_store %arg13[%c0_53, %c0_54, %c1296], %110 {strides = array<i32>} : memref<1x192x2916xf32, #tpu.memory_space<vmem>>, vector<1x192x54xf32>,
    %c0_55 = arith.constant 0 : index
    %c0_56 = arith.constant 0 : index
    %c1350 = arith.constant 1350 : index
    %111 = vector.load %arg13[%c0_55, %c0_56, %c1350] : memref<1x192x2916xf32, #tpu.memory_space<vmem>>, vector<1x192x54xf32>
    %112 = vector.shape_cast %111 : vector<1x192x54xf32> to vector<192x54xf32>
    %113 = vector.shape_cast %31 : vector<192x54xf32> to vector<1x192x54xf32>
    tpu.vector_store %arg13[%c0_55, %c0_56, %c1350], %113 {strides = array<i32>} : memref<1x192x2916xf32, #tpu.memory_space<vmem>>, vector<1x192x54xf32>,
    %c0_57 = arith.constant 0 : index
    %c0_58 = arith.constant 0 : index
    %c1404 = arith.constant 1404 : index
    %114 = vector.load %arg13[%c0_57, %c0_58, %c1404] : memref<1x192x2916xf32, #tpu.memory_space<vmem>>, vector<1x192x54xf32>
    %115 = vector.shape_cast %114 : vector<1x192x54xf32> to vector<192x54xf32>
    %116 = vector.shape_cast %31 : vector<192x54xf32> to vector<1x192x54xf32>
    tpu.vector_store %arg13[%c0_57, %c0_58, %c1404], %116 {strides = array<i32>} : memref<1x192x2916xf32, #tpu.memory_space<vmem>>, vector<1x192x54xf32>,
    %c0_59 = arith.constant 0 : index
    %c0_60 = arith.constant 0 : index
    %c1458 = arith.constant 1458 : index
    %117 = vector.load %arg13[%c0_59, %c0_60, %c1458] : memref<1x192x2916xf32, #tpu.memory_space<vmem>>, vector<1x192x54xf32>
    %118 = vector.shape_cast %117 : vector<1x192x54xf32> to vector<192x54xf32>
    %119 = vector.shape_cast %31 : vector<192x54xf32> to vector<1x192x54xf32>
    tpu.vector_store %arg13[%c0_59, %c0_60, %c1458], %119 {strides = array<i32>} : memref<1x192x2916xf32, #tpu.memory_space<vmem>>, vector<1x192x54xf32>,
    %c0_61 = arith.constant 0 : index
    %c0_62 = arith.constant 0 : index
    %c1512 = arith.constant 1512 : index
    %120 = vector.load %arg13[%c0_61, %c0_62, %c1512] : memref<1x192x2916xf32, #tpu.memory_space<vmem>>, vector<1x192x54xf32>
    %121 = vector.shape_cast %120 : vector<1x192x54xf32> to vector<192x54xf32>
    %122 = vector.shape_cast %31 : vector<192x54xf32> to vector<1x192x54xf32>
    tpu.vector_store %arg13[%c0_61, %c0_62, %c1512], %122 {strides = array<i32>} : memref<1x192x2916xf32, #tpu.memory_space<vmem>>, vector<1x192x54xf32>,
    %c0_63 = arith.constant 0 : index
    %c0_64 = arith.constant 0 : index
    %c1566 = arith.constant 1566 : index
    %123 = vector.load %arg13[%c0_63, %c0_64, %c1566] : memref<1x192x2916xf32, #tpu.memory_space<vmem>>, vector<1x192x54xf32>
    %124 = vector.shape_cast %123 : vector<1x192x54xf32> to vector<192x54xf32>
    %125 = vector.shape_cast %31 : vector<192x54xf32> to vector<1x192x54xf32>
    tpu.vector_store %arg13[%c0_63, %c0_64, %c1566], %125 {strides = array<i32>} : memref<1x192x2916xf32, #tpu.memory_space<vmem>>, vector<1x192x54xf32>,
    %c0_65 = arith.constant 0 : index
    %c0_66 = arith.constant 0 : index
    %c1620 = arith.constant 1620 : index
    %126 = vector.load %arg13[%c0_65, %c0_66, %c1620] : memref<1x192x2916xf32, #tpu.memory_space<vmem>>, vector<1x192x54xf32>
    %127 = vector.shape_cast %126 : vector<1x192x54xf32> to vector<192x54xf32>
    %128 = vector.shape_cast %31 : vector<192x54xf32> to vector<1x192x54xf32>
    tpu.vector_store %arg13[%c0_65, %c0_66, %c1620], %128 {strides = array<i32>} : memref<1x192x2916xf32, #tpu.memory_space<vmem>>, vector<1x192x54xf32>,
    %c0_67 = arith.constant 0 : index
    %c0_68 = arith.constant 0 : index
    %c1674 = arith.constant 1674 : index
    %129 = vector.load %arg13[%c0_67, %c0_68, %c1674] : memref<1x192x2916xf32, #tpu.memory_space<vmem>>, vector<1x192x54xf32>
    %130 = vector.shape_cast %129 : vector<1x192x54xf32> to vector<192x54xf32>
    %131 = vector.shape_cast %31 : vector<192x54xf32> to vector<1x192x54xf32>
    tpu.vector_store %arg13[%c0_67, %c0_68, %c1674], %131 {strides = array<i32>} : memref<1x192x2916xf32, #tpu.memory_space<vmem>>, vector<1x192x54xf32>,
    %c0_69 = arith.constant 0 : index
    %c0_70 = arith.constant 0 : index
    %c1728 = arith.constant 1728 : index
    %132 = vector.load %arg13[%c0_69, %c0_70, %c1728] : memref<1x192x2916xf32, #tpu.memory_space<vmem>>, vector<1x192x54xf32>
    %133 = vector.shape_cast %132 : vector<1x192x54xf32> to vector<192x54xf32>
    %134 = vector.shape_cast %31 : vector<192x54xf32> to vector<1x192x54xf32>
    tpu.vector_store %arg13[%c0_69, %c0_70, %c1728], %134 {strides = array<i32>} : memref<1x192x2916xf32, #tpu.memory_space<vmem>>, vector<1x192x54xf32>,
    %c0_71 = arith.constant 0 : index
    %c0_72 = arith.constant 0 : index
    %c1782 = arith.constant 1782 : index
    %135 = vector.load %arg13[%c0_71, %c0_72, %c1782] : memref<1x192x2916xf32, #tpu.memory_space<vmem>>, vector<1x192x54xf32>
    %136 = vector.shape_cast %135 : vector<1x192x54xf32> to vector<192x54xf32>
    %137 = vector.shape_cast %31 : vector<192x54xf32> to vector<1x192x54xf32>
    tpu.vector_store %arg13[%c0_71, %c0_72, %c1782], %137 {strides = array<i32>} : memref<1x192x2916xf32, #tpu.memory_space<vmem>>, vector<1x192x54xf32>,
    %c0_73 = arith.constant 0 : index
    %c0_74 = arith.constant 0 : index
    %c1836 = arith.constant 1836 : index
    %138 = vector.load %arg13[%c0_73, %c0_74, %c1836] : memref<1x192x2916xf32, #tpu.memory_space<vmem>>, vector<1x192x54xf32>
    %139 = vector.shape_cast %138 : vector<1x192x54xf32> to vector<192x54xf32>
    %140 = vector.shape_cast %31 : vector<192x54xf32> to vector<1x192x54xf32>
    tpu.vector_store %arg13[%c0_73, %c0_74, %c1836], %140 {strides = array<i32>} : memref<1x192x2916xf32, #tpu.memory_space<vmem>>, vector<1x192x54xf32>,
    %c0_75 = arith.constant 0 : index
    %c0_76 = arith.constant 0 : index
    %c1890 = arith.constant 1890 : index
    %141 = vector.load %arg13[%c0_75, %c0_76, %c1890] : memref<1x192x2916xf32, #tpu.memory_space<vmem>>, vector<1x192x54xf32>
    %142 = vector.shape_cast %141 : vector<1x192x54xf32> to vector<192x54xf32>
    %143 = vector.shape_cast %31 : vector<192x54xf32> to vector<1x192x54xf32>
    tpu.vector_store %arg13[%c0_75, %c0_76, %c1890], %143 {strides = array<i32>} : memref<1x192x2916xf32, #tpu.memory_space<vmem>>, vector<1x192x54xf32>,
    %c0_77 = arith.constant 0 : index
    %c0_78 = arith.constant 0 : index
    %c1944 = arith.constant 1944 : index
    %144 = vector.load %arg13[%c0_77, %c0_78, %c1944] : memref<1x192x2916xf32, #tpu.memory_space<vmem>>, vector<1x192x54xf32>
    %145 = vector.shape_cast %144 : vector<1x192x54xf32> to vector<192x54xf32>
    %146 = vector.shape_cast %31 : vector<192x54xf32> to vector<1x192x54xf32>
    tpu.vector_store %arg13[%c0_77, %c0_78, %c1944], %146 {strides = array<i32>} : memref<1x192x2916xf32, #tpu.memory_space<vmem>>, vector<1x192x54xf32>,
    %c0_79 = arith.constant 0 : index
    %c0_80 = arith.constant 0 : index
    %c1998 = arith.constant 1998 : index
    %147 = vector.load %arg13[%c0_79, %c0_80, %c1998] : memref<1x192x2916xf32, #tpu.memory_space<vmem>>, vector<1x192x54xf32>
    %148 = vector.shape_cast %147 : vector<1x192x54xf32> to vector<192x54xf32>
    %149 = vector.shape_cast %31 : vector<192x54xf32> to vector<1x192x54xf32>
    tpu.vector_store %arg13[%c0_79, %c0_80, %c1998], %149 {strides = array<i32>} : memref<1x192x2916xf32, #tpu.memory_space<vmem>>, vector<1x192x54xf32>,
    %c0_81 = arith.constant 0 : index
    %c0_82 = arith.constant 0 : index
    %150 = vector.load %arg2[%c0_81, %c0_82] : memref<24x22xbf16, #tpu.memory_space<vmem>>, vector<24x22xbf16>
    %c0_83 = arith.constant 0 : index
    %c0_84 = arith.constant 0 : index
    %151 = vector.load %arg4[%c0_83, %c0_84] : memref<32x24xbf16, #tpu.memory_space<vmem>>, vector<32x24xbf16>
    %c0_85 = arith.constant 0 : index
    %c0_86 = arith.constant 0 : index
    %152 = vector.load %arg6[%c0_85, %c0_86] : memref<64x32xbf16, #tpu.memory_space<vmem>>, vector<64x32xbf16>
    %c0_87 = arith.constant 0 : index
    %c0_88 = arith.constant 0 : index
    %153 = vector.load %arg8[%c0_87, %c0_88] : memref<80x64xbf16, #tpu.memory_space<vmem>>, vector<80x64xbf16>
    %c0_89 = arith.constant 0 : index
    %c0_90 = arith.constant 0 : index
    %154 = vector.load %arg10[%c0_89, %c0_90] : memref<192x80xbf16, #tpu.memory_space<vmem>>, vector<192x80xbf16>
    %c0_91 = arith.constant 0 : index
    %c0_92 = arith.constant 0 : index
    %155 = vector.load %arg3[%c0_91, %c0_92] : memref<24x1xf32, #tpu.memory_space<vmem>>, vector<24x1xf32>
    %c0_93 = arith.constant 0 : index
    %c0_94 = arith.constant 0 : index
    %156 = vector.load %arg5[%c0_93, %c0_94] : memref<32x1xf32, #tpu.memory_space<vmem>>, vector<32x1xf32>
    %c0_95 = arith.constant 0 : index
    %c0_96 = arith.constant 0 : index
    %157 = vector.load %arg7[%c0_95, %c0_96] : memref<64x1xf32, #tpu.memory_space<vmem>>, vector<64x1xf32>
    %c0_97 = arith.constant 0 : index
    %c0_98 = arith.constant 0 : index
    %158 = vector.load %arg9[%c0_97, %c0_98] : memref<80x1xf32, #tpu.memory_space<vmem>>, vector<80x1xf32>
    %c0_99 = arith.constant 0 : index
    %c0_100 = arith.constant 0 : index
    %159 = vector.load %arg11[%c0_99, %c0_100] : memref<192x1xf32, #tpu.memory_space<vmem>>, vector<192x1xf32>
    %c0_101 = arith.constant 0 : index
    %c0_102 = arith.constant 0 : index
    %c0_103 = arith.constant 0 : index
    %160 = vector.load %arg1[%c0_101, %c0_102, %c0_103] : memref<1x22x256xf32, #tpu.memory_space<vmem>>, vector<1x22x256xf32>
    %161 = vector.shape_cast %160 : vector<1x22x256xf32> to vector<22x256xf32>
    %162 = arith.truncf %161 : vector<22x256xf32> to vector<22x256xbf16>
    %cst = arith.constant dense<0.000000e+00> : vector<24x256xf32>
    %163 = tpu.matmul %150, %162, %cst {dimension_numbers = #tpu.dot_dimension_numbers<[1], [0], [0], [1], [0, 0, 1, 1], [], []>} : vector<24x22xbf16>, vector<22x256xbf16>, vector<24x256xf32> -> vector<24x256xf32>
    %164 = vector.broadcast %155 : vector<24x1xf32> to vector<24x256xf32>
    %165 = arith.addf %163, %164 : vector<24x256xf32>
    %cst_104 = arith.constant 0.000000e+00 : f32
    %166 = vector.broadcast %cst_104 : f32 to vector<24x256xf32>
    %167 = arith.maximumf %165, %166 : vector<24x256xf32>
    %168 = arith.truncf %167 : vector<24x256xf32> to vector<24x256xbf16>
    %cst_105 = arith.constant dense<0.000000e+00> : vector<32x256xf32>
    %169 = tpu.matmul %151, %168, %cst_105 {dimension_numbers = #tpu.dot_dimension_numbers<[1], [0], [0], [1], [0, 0, 1, 1], [], []>} : vector<32x24xbf16>, vector<24x256xbf16>, vector<32x256xf32> -> vector<32x256xf32>
    %170 = vector.broadcast %156 : vector<32x1xf32> to vector<32x256xf32>
    %171 = arith.addf %169, %170 : vector<32x256xf32>
    %cst_106 = arith.constant 0.000000e+00 : f32
    %172 = vector.broadcast %cst_106 : f32 to vector<32x256xf32>
    %173 = arith.maximumf %171, %172 : vector<32x256xf32>
    %174 = arith.truncf %173 : vector<32x256xf32> to vector<32x256xbf16>
    %cst_107 = arith.constant dense<0.000000e+00> : vector<64x256xf32>
    %175 = tpu.matmul %152, %174, %cst_107 {dimension_numbers = #tpu.dot_dimension_numbers<[1], [0], [0], [1], [0, 0, 1, 1], [], []>} : vector<64x32xbf16>, vector<32x256xbf16>, vector<64x256xf32> -> vector<64x256xf32>
    %176 = vector.broadcast %157 : vector<64x1xf32> to vector<64x256xf32>
    %177 = arith.addf %175, %176 : vector<64x256xf32>
    %cst_108 = arith.constant 0.000000e+00 : f32
    %178 = vector.broadcast %cst_108 : f32 to vector<64x256xf32>
    %179 = arith.maximumf %177, %178 : vector<64x256xf32>
    %180 = arith.truncf %179 : vector<64x256xf32> to vector<64x256xbf16>
    %cst_109 = arith.constant dense<0.000000e+00> : vector<80x256xf32>
    %181 = tpu.matmul %153, %180, %cst_109 {dimension_numbers = #tpu.dot_dimension_numbers<[1], [0], [0], [1], [0, 0, 1, 1], [], []>} : vector<80x64xbf16>, vector<64x256xbf16>, vector<80x256xf32> -> vector<80x256xf32>
    %182 = vector.broadcast %158 : vector<80x1xf32> to vector<80x256xf32>
    %183 = arith.addf %181, %182 : vector<80x256xf32>
    %cst_110 = arith.constant 0.000000e+00 : f32
    %184 = vector.broadcast %cst_110 : f32 to vector<80x256xf32>
    %185 = arith.maximumf %183, %184 : vector<80x256xf32>
    %186 = arith.truncf %185 : vector<80x256xf32> to vector<80x256xbf16>
    %cst_111 = arith.constant dense<0.000000e+00> : vector<192x256xf32>
    %187 = tpu.matmul %154, %186, %cst_111 {dimension_numbers = #tpu.dot_dimension_numbers<[1], [0], [0], [1], [0, 0, 1, 1], [], []>} : vector<192x80xbf16>, vector<80x256xbf16>, vector<192x256xf32> -> vector<192x256xf32>
    %188 = vector.broadcast %159 : vector<192x1xf32> to vector<192x256xf32>
    %189 = arith.addf %187, %188 : vector<192x256xf32>
    %cst_112 = arith.constant 0.000000e+00 : f32
    %190 = vector.broadcast %cst_112 : f32 to vector<192x256xf32>
    %191 = arith.maximumf %189, %190 : vector<192x256xf32>
    %192 = vector.extract_strided_slice %191 {offsets = [0, 0], sizes = [192, 16], strides = [1, 1]} : vector<192x256xf32> to vector<192x16xf32>
    %c0_113 = arith.constant 0 : index
    %c0_114 = arith.constant 0 : index
    %c1045 = arith.constant 1045 : index
    %193 = vector.load %arg13[%c0_113, %c0_114, %c1045] : memref<1x192x2916xf32, #tpu.memory_space<vmem>>, vector<1x192x16xf32>
    %194 = vector.shape_cast %193 : vector<1x192x16xf32> to vector<192x16xf32>
    %195 = vector.shape_cast %192 : vector<192x16xf32> to vector<1x192x16xf32>
    tpu.vector_store %arg13[%c0_113, %c0_114, %c1045], %195 {strides = array<i32>} : memref<1x192x2916xf32, #tpu.memory_space<vmem>>, vector<1x192x16xf32>,
    %196 = vector.extract_strided_slice %191 {offsets = [0, 16], sizes = [192, 16], strides = [1, 1]} : vector<192x256xf32> to vector<192x16xf32>
    %c0_115 = arith.constant 0 : index
    %c0_116 = arith.constant 0 : index
    %c1099 = arith.constant 1099 : index
    %197 = vector.load %arg13[%c0_115, %c0_116, %c1099] : memref<1x192x2916xf32, #tpu.memory_space<vmem>>, vector<1x192x16xf32>
    %198 = vector.shape_cast %197 : vector<1x192x16xf32> to vector<192x16xf32>
    %199 = vector.shape_cast %196 : vector<192x16xf32> to vector<1x192x16xf32>
    tpu.vector_store %arg13[%c0_115, %c0_116, %c1099], %199 {strides = array<i32>} : memref<1x192x2916xf32, #tpu.memory_space<vmem>>, vector<1x192x16xf32>,
    %200 = vector.extract_strided_slice %191 {offsets = [0, 32], sizes = [192, 16], strides = [1, 1]} : vector<192x256xf32> to vector<192x16xf32>
    %c0_117 = arith.constant 0 : index
    %c0_118 = arith.constant 0 : index
    %c1153 = arith.constant 1153 : index
    %201 = vector.load %arg13[%c0_117, %c0_118, %c1153] : memref<1x192x2916xf32, #tpu.memory_space<vmem>>, vector<1x192x16xf32>
    %202 = vector.shape_cast %201 : vector<1x192x16xf32> to vector<192x16xf32>
    %203 = vector.shape_cast %200 : vector<192x16xf32> to vector<1x192x16xf32>
    tpu.vector_store %arg13[%c0_117, %c0_118, %c1153], %203 {strides = array<i32>} : memref<1x192x2916xf32, #tpu.memory_space<vmem>>, vector<1x192x16xf32>,
    %204 = vector.extract_strided_slice %191 {offsets = [0, 48], sizes = [192, 16], strides = [1, 1]} : vector<192x256xf32> to vector<192x16xf32>
    %c0_119 = arith.constant 0 : index
    %c0_120 = arith.constant 0 : index
    %c1207 = arith.constant 1207 : index
    %205 = vector.load %arg13[%c0_119, %c0_120, %c1207] : memref<1x192x2916xf32, #tpu.memory_space<vmem>>, vector<1x192x16xf32>
    %206 = vector.shape_cast %205 : vector<1x192x16xf32> to vector<192x16xf32>
    %207 = vector.shape_cast %204 : vector<192x16xf32> to vector<1x192x16xf32>
    tpu.vector_store %arg13[%c0_119, %c0_120, %c1207], %207 {strides = array<i32>} : memref<1x192x2916xf32, #tpu.memory_space<vmem>>, vector<1x192x16xf32>,
    %208 = vector.extract_strided_slice %191 {offsets = [0, 64], sizes = [192, 16], strides = [1, 1]} : vector<192x256xf32> to vector<192x16xf32>
    %c0_121 = arith.constant 0 : index
    %c0_122 = arith.constant 0 : index
    %c1261 = arith.constant 1261 : index
    %209 = vector.load %arg13[%c0_121, %c0_122, %c1261] : memref<1x192x2916xf32, #tpu.memory_space<vmem>>, vector<1x192x16xf32>
    %210 = vector.shape_cast %209 : vector<1x192x16xf32> to vector<192x16xf32>
    %211 = vector.shape_cast %208 : vector<192x16xf32> to vector<1x192x16xf32>
    tpu.vector_store %arg13[%c0_121, %c0_122, %c1261], %211 {strides = array<i32>} : memref<1x192x2916xf32, #tpu.memory_space<vmem>>, vector<1x192x16xf32>,
    %212 = vector.extract_strided_slice %191 {offsets = [0, 80], sizes = [192, 16], strides = [1, 1]} : vector<192x256xf32> to vector<192x16xf32>
    %c0_123 = arith.constant 0 : index
    %c0_124 = arith.constant 0 : index
    %c1315 = arith.constant 1315 : index
    %213 = vector.load %arg13[%c0_123, %c0_124, %c1315] : memref<1x192x2916xf32, #tpu.memory_space<vmem>>, vector<1x192x16xf32>
    %214 = vector.shape_cast %213 : vector<1x192x16xf32> to vector<192x16xf32>
    %215 = vector.shape_cast %212 : vector<192x16xf32> to vector<1x192x16xf32>
    tpu.vector_store %arg13[%c0_123, %c0_124, %c1315], %215 {strides = array<i32>} : memref<1x192x2916xf32, #tpu.memory_space<vmem>>, vector<1x192x16xf32>,
    %216 = vector.extract_strided_slice %191 {offsets = [0, 96], sizes = [192, 16], strides = [1, 1]} : vector<192x256xf32> to vector<192x16xf32>
    %c0_125 = arith.constant 0 : index
    %c0_126 = arith.constant 0 : index
    %c1369 = arith.constant 1369 : index
    %217 = vector.load %arg13[%c0_125, %c0_126, %c1369] : memref<1x192x2916xf32, #tpu.memory_space<vmem>>, vector<1x192x16xf32>
    %218 = vector.shape_cast %217 : vector<1x192x16xf32> to vector<192x16xf32>
    %219 = vector.shape_cast %216 : vector<192x16xf32> to vector<1x192x16xf32>
    tpu.vector_store %arg13[%c0_125, %c0_126, %c1369], %219 {strides = array<i32>} : memref<1x192x2916xf32, #tpu.memory_space<vmem>>, vector<1x192x16xf32>,
    %220 = vector.extract_strided_slice %191 {offsets = [0, 112], sizes = [192, 16], strides = [1, 1]} : vector<192x256xf32> to vector<192x16xf32>
    %c0_127 = arith.constant 0 : index
    %c0_128 = arith.constant 0 : index
    %c1423 = arith.constant 1423 : index
    %221 = vector.load %arg13[%c0_127, %c0_128, %c1423] : memref<1x192x2916xf32, #tpu.memory_space<vmem>>, vector<1x192x16xf32>
    %222 = vector.shape_cast %221 : vector<1x192x16xf32> to vector<192x16xf32>
    %223 = vector.shape_cast %220 : vector<192x16xf32> to vector<1x192x16xf32>
    tpu.vector_store %arg13[%c0_127, %c0_128, %c1423], %223 {strides = array<i32>} : memref<1x192x2916xf32, #tpu.memory_space<vmem>>, vector<1x192x16xf32>,
    %224 = vector.extract_strided_slice %191 {offsets = [0, 128], sizes = [192, 16], strides = [1, 1]} : vector<192x256xf32> to vector<192x16xf32>
    %c0_129 = arith.constant 0 : index
    %c0_130 = arith.constant 0 : index
    %c1477 = arith.constant 1477 : index
    %225 = vector.load %arg13[%c0_129, %c0_130, %c1477] : memref<1x192x2916xf32, #tpu.memory_space<vmem>>, vector<1x192x16xf32>
    %226 = vector.shape_cast %225 : vector<1x192x16xf32> to vector<192x16xf32>
    %227 = vector.shape_cast %224 : vector<192x16xf32> to vector<1x192x16xf32>
    tpu.vector_store %arg13[%c0_129, %c0_130, %c1477], %227 {strides = array<i32>} : memref<1x192x2916xf32, #tpu.memory_space<vmem>>, vector<1x192x16xf32>,
    %228 = vector.extract_strided_slice %191 {offsets = [0, 144], sizes = [192, 16], strides = [1, 1]} : vector<192x256xf32> to vector<192x16xf32>
    %c0_131 = arith.constant 0 : index
    %c0_132 = arith.constant 0 : index
    %c1531 = arith.constant 1531 : index
    %229 = vector.load %arg13[%c0_131, %c0_132, %c1531] : memref<1x192x2916xf32, #tpu.memory_space<vmem>>, vector<1x192x16xf32>
    %230 = vector.shape_cast %229 : vector<1x192x16xf32> to vector<192x16xf32>
    %231 = vector.shape_cast %228 : vector<192x16xf32> to vector<1x192x16xf32>
    tpu.vector_store %arg13[%c0_131, %c0_132, %c1531], %231 {strides = array<i32>} : memref<1x192x2916xf32, #tpu.memory_space<vmem>>, vector<1x192x16xf32>,
    %232 = vector.extract_strided_slice %191 {offsets = [0, 160], sizes = [192, 16], strides = [1, 1]} : vector<192x256xf32> to vector<192x16xf32>
    %c0_133 = arith.constant 0 : index
    %c0_134 = arith.constant 0 : index
    %c1585 = arith.constant 1585 : index
    %233 = vector.load %arg13[%c0_133, %c0_134, %c1585] : memref<1x192x2916xf32, #tpu.memory_space<vmem>>, vector<1x192x16xf32>
    %234 = vector.shape_cast %233 : vector<1x192x16xf32> to vector<192x16xf32>
    %235 = vector.shape_cast %232 : vector<192x16xf32> to vector<1x192x16xf32>
    tpu.vector_store %arg13[%c0_133, %c0_134, %c1585], %235 {strides = array<i32>} : memref<1x192x2916xf32, #tpu.memory_space<vmem>>, vector<1x192x16xf32>,
    %236 = vector.extract_strided_slice %191 {offsets = [0, 176], sizes = [192, 16], strides = [1, 1]} : vector<192x256xf32> to vector<192x16xf32>
    %c0_135 = arith.constant 0 : index
    %c0_136 = arith.constant 0 : index
    %c1639 = arith.constant 1639 : index
    %237 = vector.load %arg13[%c0_135, %c0_136, %c1639] : memref<1x192x2916xf32, #tpu.memory_space<vmem>>, vector<1x192x16xf32>
    %238 = vector.shape_cast %237 : vector<1x192x16xf32> to vector<192x16xf32>
    %239 = vector.shape_cast %236 : vector<192x16xf32> to vector<1x192x16xf32>
    tpu.vector_store %arg13[%c0_135, %c0_136, %c1639], %239 {strides = array<i32>} : memref<1x192x2916xf32, #tpu.memory_space<vmem>>, vector<1x192x16xf32>,
    %240 = vector.extract_strided_slice %191 {offsets = [0, 192], sizes = [192, 16], strides = [1, 1]} : vector<192x256xf32> to vector<192x16xf32>
    %c0_137 = arith.constant 0 : index
    %c0_138 = arith.constant 0 : index
    %c1693 = arith.constant 1693 : index
    %241 = vector.load %arg13[%c0_137, %c0_138, %c1693] : memref<1x192x2916xf32, #tpu.memory_space<vmem>>, vector<1x192x16xf32>
    %242 = vector.shape_cast %241 : vector<1x192x16xf32> to vector<192x16xf32>
    %243 = vector.shape_cast %240 : vector<192x16xf32> to vector<1x192x16xf32>
    tpu.vector_store %arg13[%c0_137, %c0_138, %c1693], %243 {strides = array<i32>} : memref<1x192x2916xf32, #tpu.memory_space<vmem>>, vector<1x192x16xf32>,
    %244 = vector.extract_strided_slice %191 {offsets = [0, 208], sizes = [192, 16], strides = [1, 1]} : vector<192x256xf32> to vector<192x16xf32>
    %c0_139 = arith.constant 0 : index
    %c0_140 = arith.constant 0 : index
    %c1747 = arith.constant 1747 : index
    %245 = vector.load %arg13[%c0_139, %c0_140, %c1747] : memref<1x192x2916xf32, #tpu.memory_space<vmem>>, vector<1x192x16xf32>
    %246 = vector.shape_cast %245 : vector<1x192x16xf32> to vector<192x16xf32>
    %247 = vector.shape_cast %244 : vector<192x16xf32> to vector<1x192x16xf32>
    tpu.vector_store %arg13[%c0_139, %c0_140, %c1747], %247 {strides = array<i32>} : memref<1x192x2916xf32, #tpu.memory_space<vmem>>, vector<1x192x16xf32>,
    %248 = vector.extract_strided_slice %191 {offsets = [0, 224], sizes = [192, 16], strides = [1, 1]} : vector<192x256xf32> to vector<192x16xf32>
    %c0_141 = arith.constant 0 : index
    %c0_142 = arith.constant 0 : index
    %c1801 = arith.constant 1801 : index
    %249 = vector.load %arg13[%c0_141, %c0_142, %c1801] : memref<1x192x2916xf32, #tpu.memory_space<vmem>>, vector<1x192x16xf32>
    %250 = vector.shape_cast %249 : vector<1x192x16xf32> to vector<192x16xf32>
    %251 = vector.shape_cast %248 : vector<192x16xf32> to vector<1x192x16xf32>
    tpu.vector_store %arg13[%c0_141, %c0_142, %c1801], %251 {strides = array<i32>} : memref<1x192x2916xf32, #tpu.memory_space<vmem>>, vector<1x192x16xf32>,
    %252 = vector.extract_strided_slice %191 {offsets = [0, 240], sizes = [192, 16], strides = [1, 1]} : vector<192x256xf32> to vector<192x16xf32>
    %c0_143 = arith.constant 0 : index
    %c0_144 = arith.constant 0 : index
    %c1855 = arith.constant 1855 : index
    %253 = vector.load %arg13[%c0_143, %c0_144, %c1855] : memref<1x192x2916xf32, #tpu.memory_space<vmem>>, vector<1x192x16xf32>
    %254 = vector.shape_cast %253 : vector<1x192x16xf32> to vector<192x16xf32>
    %255 = vector.shape_cast %252 : vector<192x16xf32> to vector<1x192x16xf32>
    tpu.vector_store %arg13[%c0_143, %c0_144, %c1855], %255 {strides = array<i32>} : memref<1x192x2916xf32, #tpu.memory_space<vmem>>, vector<1x192x16xf32>,
    return
  }
  func.func @transform_0(%arg0: i32) -> (i32, i32, i32) {
    %c0_i32 = arith.constant 0 : i32
    %c0_i32_0 = arith.constant 0 : i32
    %c0_i32_1 = arith.constant 0 : i32
    return %arg0, %c0_i32, %c0_i32_0 : i32, i32, i32
  }
  func.func @transform_1(%arg0: i32) -> (i32, i32) {
    %c0_i32 = arith.constant 0 : i32
    %c0_i32_0 = arith.constant 0 : i32
    %c0_i32_1 = arith.constant 0 : i32
    return %c0_i32, %c0_i32_0 : i32, i32
  }
  func.func @transform_2(%arg0: i32) -> (i32, i32) {
    %c0_i32 = arith.constant 0 : i32
    %c0_i32_0 = arith.constant 0 : i32
    %c0_i32_1 = arith.constant 0 : i32
    return %c0_i32, %c0_i32_0 : i32, i32
  }
  func.func @transform_3(%arg0: i32) -> (i32, i32) {
    %c0_i32 = arith.constant 0 : i32
    %c0_i32_0 = arith.constant 0 : i32
    %c0_i32_1 = arith.constant 0 : i32
    return %c0_i32, %c0_i32_0 : i32, i32
  }
  func.func @transform_4(%arg0: i32) -> (i32, i32) {
    %c0_i32 = arith.constant 0 : i32
    %c0_i32_0 = arith.constant 0 : i32
    %c0_i32_1 = arith.constant 0 : i32
    return %c0_i32, %c0_i32_0 : i32, i32
  }
  func.func @transform_5(%arg0: i32) -> (i32, i32) {
    %c0_i32 = arith.constant 0 : i32
    %c0_i32_0 = arith.constant 0 : i32
    %c0_i32_1 = arith.constant 0 : i32
    return %c0_i32, %c0_i32_0 : i32, i32
  }
  func.func @transform_6(%arg0: i32) -> (i32, i32) {
    %c0_i32 = arith.constant 0 : i32
    %c0_i32_0 = arith.constant 0 : i32
    %c0_i32_1 = arith.constant 0 : i32
    return %c0_i32, %c0_i32_0 : i32, i32
  }
  func.func @transform_7(%arg0: i32) -> (i32, i32) {
    %c0_i32 = arith.constant 0 : i32
    %c0_i32_0 = arith.constant 0 : i32
    %c0_i32_1 = arith.constant 0 : i32
    return %c0_i32, %c0_i32_0 : i32, i32
  }
  func.func @transform_8(%arg0: i32) -> (i32, i32) {
    %c0_i32 = arith.constant 0 : i32
    %c0_i32_0 = arith.constant 0 : i32
    %c0_i32_1 = arith.constant 0 : i32
    return %c0_i32, %c0_i32_0 : i32, i32
  }
  func.func @transform_9(%arg0: i32) -> (i32, i32) {
    %c0_i32 = arith.constant 0 : i32
    %c0_i32_0 = arith.constant 0 : i32
    %c0_i32_1 = arith.constant 0 : i32
    return %c0_i32, %c0_i32_0 : i32, i32
  }
  func.func @transform_10(%arg0: i32) -> (i32, i32) {
    %c0_i32 = arith.constant 0 : i32
    %c0_i32_0 = arith.constant 0 : i32
    %c0_i32_1 = arith.constant 0 : i32
    return %c0_i32, %c0_i32_0 : i32, i32
  }
  func.func @transform_11(%arg0: i32) -> (i32, i32) {
    %c0_i32 = arith.constant 0 : i32
    %c0_i32_0 = arith.constant 0 : i32
    %c0_i32_1 = arith.constant 0 : i32
    return %c0_i32, %c0_i32_0 : i32, i32
  }
  func.func @transform_12(%arg0: i32) -> (i32, i32, i32) {
    %c0_i32 = arith.constant 0 : i32
    %c0_i32_0 = arith.constant 0 : i32
    %c0_i32_1 = arith.constant 0 : i32
    return %arg0, %c0_i32, %c0_i32_0 : i32, i32, i32
  }
}

</mosaic_0001>

<bundles_post_ra>
// kernel: model_forward.1
= control target key start
LH: loop header
LB: loop body
LE: loop exit
PB: predicated region body
PF: predicated region fallthrough
CT: control target
= control target key end

     0   :  { %s8073_s21 = smov 0   ;;  %s15424_s0 = inlined_call_operand.vmem [shape: f32[2,22,256], index: 0, kind: input, shape index: {}]   ;;  %s15425_s1 = inlined_call_operand.vmem [shape: bf16[24,22], index: 1, kind: input, shape index: {}]   ;;  %s15426_s2 = inlined_call_operand.vmem [shape: f32[24,1], index: 2, kind: input, shape index: {}]   ;;  %s15427_s3 = inlined_call_operand.vmem [shape: bf16[32,24], index: 3, kind: input, shape index: {}]   ;;  %s15428_s4 = inlined_call_operand.vmem [shape: f32[32,1], index: 4, kind: input, shape index: {}]   ;;  %s15429_s5 = inlined_call_operand.vmem [shape: bf16[64,32], index: 5, kind: input, shape index: {}]   ;;  %s15430_s6 = inlined_call_operand.vmem [shape: f32[64,1], index: 6, kind: input, shape index: {}]   ;;  %s15431_s7 = inlined_call_operand.vmem [shape: bf16[80,64], index: 7, kind: input, shape index: {}]   ;;  %s15432_s8 = inlined_call_operand.vmem [shape: f32[80,1], index: 8, kind: input, shape index: {}]   ;;  %s15433_s9 = inlined_call_operand.vmem [shape: bf16[192,80], index: 9, kind: input, shape index: {}]   ;;  %s15434_s10 = inlined_call_operand.vmem [shape: f32[192,1], index: 10, kind: input, shape index: {}]   ;;  %s15435_s11 = inlined_call_operand.vmem [shape: f32[192,3], index: 11, kind: input, shape index: {}]   ;;  %s15436_s12 = inlined_call_operand.vmem [shape: f32[2,192,2916], index: 12, kind: output, shape index: {}]  }
   0x1 LB: > { %s7753_s22 = sadd.s32 4294967295, %s7951_s21   ;;  %p7757_p0 = scmp.ge.s32.totalorder %s7951_s21, 1  ;;  %s7951_s21 = sphi %s8073_s21, %s22_s21  }
   0x2   : > { %p362_p1 = scmp.lt.s32.totalorder %s7951_s21, 3 }
   0x4   : > { %p363_p2 = pnand %p7757_p0, %p362_p1 }
   0x6   : > { %366 = sbr.rel (%p363_p2) target bundleno = 3795 (0xed3), region = 68 }
   0xd   : > { %v8084_v0 = vld [vmem:[%s15435_s11 + $0x10] sm:$0xff]  ;;  %v8089_v1 = vld [vmem:[%s15435_s11] sm:$0xff]  ;;  %v7953_v2 = vmov 1   ;;  %v15437_v3 = vmov 0   ;;  %v8097_v4 = vld [vmem:[%s15435_s11 + $0x18] sm:$0xff]  ;;  %v7955_v16 = vmov 2   ;;  %v439_v60 = vlaneseq }
   0xe   : > { %7890 = vset.pattern.permute.xlu0 %v7953_v2  ;;  %7889 = vset.pattern.permute.xlu1 %v15437_v3  ;;  %v8106_v5 = vld [vmem:[%s15435_s11 + $0x28] sm:$0xff]  ;;  %v8111_v6 = vld [vmem:[%s15435_s11 + $0x38] sm:$0xff]  ;;  %v419_v17 = vld [vmem:[%s15435_s11 + $0x20] sm:$0xff]  ;;  %p404_p3 = scmp.lt.s32.totalorder %s7753_s22, 1  ;;  %vm936_vm0 = vcmask 818176   ;;  %vm837_vm1 = vcmask 834560  }
   0xf   : > { %459 = vperm.xlu1 %7889, %v8084_v0   ;;  %568 = vperm.xlu0 %7890, %v8089_v1   ;;  %v8118_v7 = vld [vmem:[%s15435_s11 + $0x48] sm:$0xff]  ;;  %v8125_v8 = vld [vmem:[%s15435_s11 + $0x58] sm:$0xff]  ;;  %v421_v18 = vld [vmem:[%s15435_s11 + $0x30] sm:$0xff]  ;;  %vm931_vm2 = vcmask 1048560   ;;  %v440_v63 = vand.u32 127, %v439_v60  ;;  %s7956_s27 = smov 102  }
  0x10   : > { %5144 = vmatprep.mubr.bf16.mxu0 %v15437_v3  ;;  %5248 = vmatprep.mubr.bf16.mxu1 %v15437_v3  ;;  %v8132_v9 = vld [vmem:[%s15435_s11 + $0x68] sm:$0xff]  ;;  %v8141_v10 = vld [vmem:[%s15435_s11 + $0x78] sm:$0xff]  ;;  %v423_v19 = vld [vmem:[%s15435_s11 + $0x40] sm:$0xff]  ;;  %s15504_s22 = smov (!%p404_p3, %s7753_s22), 1  ;;  %s7957_s28 = smov 28   ;;  %vm1149_vm5 = vcmask 1048368  }
  0x11   : > { %v8148_v11 = vld [vmem:[%s15435_s11 + $0x88] sm:$0xff]  ;;  %v8155_v12 = vld [vmem:[%s15435_s11 + $0x98] sm:$0xff]  ;;  %v425_v20 = vld [vmem:[%s15435_s11 + $0x50] sm:$0xff]  ;;  %s7825_s23 = smul.u32 4416, %s15504_s22  ;;  %s7958_s29 = smov 82   ;;  %vm1151_vm6 = vcmask 228352  }
  0x12   : > { %v8162_v13 = vld [vmem:[%s15435_s11 + $0xa8] sm:$0xff]  ;;  %v8169_v14 = vld [vmem:[%s15435_s11 + $0xb8] sm:$0xff]  ;;  %v427_v21 = vld [vmem:[%s15435_s11 + $0x60] sm:$0xff]  ;;  %s7959_s30 = smov 8   ;;  %vm1271_vm7 = vcmask 670944   ;;  %s7960_s13 = smov 62  }
  0x13   : > { %464 = vperm.xlu1 %7889, %v8097_v4   ;;  %580 = vperm.xlu0 %7890, %v8097_v4   ;;  %v416_v15 = vld [vmem:[%s15435_s11 + $0x8] sm:$0xff]  ;;  %v429_v22 = vld [vmem:[%s15435_s11 + $0x70] sm:$0xff]  ;;  %v431_v23 = vld [vmem:[%s15435_s11 + $0x80] sm:$0xff]  ;;  %s8230_s26 = scalar_lea.vmem %s15436_s12, %s7825_s23  ;;  %vm1368_vm8 = vcmask 1048208   ;;  %vm1370_vm9 = vcmask 64512   ;;  %s7961_s14 = smov 116  }
  0x14   : > { %v433_v24 = vld [vmem:[%s15435_s11 + $0x90] sm:$0xff]  ;;  %v435_v25 = vld [vmem:[%s15435_s11 + $0xa0] sm:$0xff]  ;;  %vm1490_vm10 = vcmask 506944   ;;  %s7962_s15 = smov 42   ;;  %vm1587_vm11 = vcmask 949744   ;;  %s7963_s16 = smov 4  }
  0x15   : > { %v8207_v26 = vld [vmem:[%s15435_s11 + $0xb0] sm:$0xff]  ;;  %vm1684_vm12 = vcmask 1048480   ;;  %vm1686_vm13 = vcmask 343040   ;;  %s7964_s17 = smov 58   ;;  %vm1806_vm14 = vcmask 785744   ;;  %s7965_s18 = smov 112  }
  0x16   : > { %vm1903_vm15 = vcmask 474144   ;;  %s7966_s19 = smov 38   ;;  %s7967_s20 = smov 92  }
  0x17   : > { %474 = vperm.xlu1 %7889, %v8106_v5   ;;  %588 = vperm.xlu0 %7890, %v8106_v5   ;;  %s7968_s23 = smov 18   ;;  %s7969_s24 = smov 72  }
  0x18   : > { %s7970_s25 = smov 96  }
  0x1b   : > { %484 = vperm.xlu1 %7889, %v8111_v6   ;;  %596 = vperm.xlu0 %7890, %v8111_v6  }
  0x1f   : > { %494 = vperm.xlu1 %7889, %v8118_v7   ;;  %604 = vperm.xlu0 %7890, %v8118_v7  }
  0x23   : > { %504 = vperm.xlu1 %7889, %v8125_v8   ;;  %612 = vperm.xlu0 %7890, %v8125_v8  }
  0x27   : > { %514 = vperm.xlu1 %7889, %v8132_v9   ;;  %620 = vperm.xlu0 %7890, %v8132_v9  }
  0x2b   : > { %524 = vperm.xlu1 %7889, %v8141_v10   ;;  %628 = vperm.xlu0 %7890, %v8141_v10  }
  0x2f   : > { %534 = vperm.xlu1 %7889, %v8148_v11   ;;  %636 = vperm.xlu0 %7890, %v8148_v11  }
  0x33   : > { %544 = vperm.xlu1 %7889, %v8155_v12   ;;  %644 = vperm.xlu0 %7890, %v8155_v12  }
  0x37   : > { %554 = vperm.xlu1 %7889, %v8162_v13   ;;  %652 = vperm.xlu0 %7890, %v8162_v13  }
  0x3b   : > { %564 = vperm.xlu1 %7889, %v8169_v14   ;;  %660 = vperm.xlu0 %7890, %v8169_v14  }
  0x3f   : > { %7891 = vset.pattern.permute.xlu1 %v7953_v2  ;;  %7893 = vset.pattern.permute.xlu0 %v7955_v16 }
  0x40   : > { %572 = vperm.xlu1 %7891, %v416_v15   ;;  %695 = vperm.xlu0 %7893, %v416_v15  }
  0x44   : > { %576 = vperm.xlu1 %7891, %v8084_v0   ;;  %707 = vperm.xlu0 %7893, %v419_v17  }
  0x48   : > { %584 = vperm.xlu1 %7891, %v419_v17   ;;  %715 = vperm.xlu0 %7893, %v421_v18  }
  0x4c   : > { %592 = vperm.xlu1 %7891, %v421_v18   ;;  %723 = vperm.xlu0 %7893, %v423_v19  }
  0x50   : > { %600 = vperm.xlu1 %7891, %v423_v19   ;;  %731 = vperm.xlu0 %7893, %v425_v20  }
  0x54   : > { %608 = vperm.xlu1 %7891, %v425_v20   ;;  %739 = vperm.xlu0 %7893, %v427_v21  }
  0x58   : > { %616 = vperm.xlu1 %7891, %v427_v21   ;;  %747 = vperm.xlu0 %7893, %v429_v22  }
  0x5c   : > { %624 = vperm.xlu1 %7891, %v429_v22   ;;  %755 = vperm.xlu0 %7893, %v431_v23  }
  0x60   : > { %632 = vperm.xlu1 %7891, %v431_v23   ;;  %763 = vperm.xlu0 %7893, %v433_v24  }
  0x64   : > { %640 = vperm.xlu1 %7891, %v433_v24   ;;  %771 = vperm.xlu0 %7893, %v435_v25  }
  0x68   : > { %648 = vperm.xlu1 %7891, %v435_v25   ;;  %779 = vperm.xlu0 %7893, %v8207_v26  }
  0x6c   : > { %656 = vperm.xlu1 %7891, %v8207_v26   ;;  %7894 = vset.pattern.permute.xlu0 %v15437_v3 }
  0x6d   : > { %449 = vperm.xlu0 %7894, %v8089_v1  }
  0x70   : > { %7892 = vset.pattern.permute.xlu1 %v7955_v16 }
  0x71   : > { %691 = vperm.xlu1 %7892, %v8089_v1   ;;  %454 = vperm.xlu0 %7894, %v416_v15   ;;  %v441_v1 = vsub.s32 53, %v440_v63 }
  0x73   : > { %vm442_vm3 = vcmp.lt.s32.totalorder %v440_v63, %v441_v1 }
  0x75   : > { %699 = vperm.xlu1 %7892, %v8084_v0   ;;  %469 = vperm.xlu0 %7894, %v419_v17  }
  0x79   : > { %703 = vperm.xlu1 %7892, %v8097_v4   ;;  %479 = vperm.xlu0 %7894, %v421_v18  }
  0x7d   : > { %711 = vperm.xlu1 %7892, %v8106_v5   ;;  %489 = vperm.xlu0 %7894, %v423_v19  }
  0x81   : > { %719 = vperm.xlu1 %7892, %v8111_v6   ;;  %499 = vperm.xlu0 %7894, %v425_v20  }
  0x85   : > { %727 = vperm.xlu1 %7892, %v8118_v7   ;;  %509 = vperm.xlu0 %7894, %v427_v21   ;;  %v8572_v7 = vsel %vm442_vm3, %v440_v63, %v441_v1  ;;  %vm2219_vm3 = vcmask 752944  }
  0x86   : > { %vm444_vm4 = vcmp.lt.s32.totalorder %v8572_v7, 9 }
  0x89   : > { %735 = vperm.xlu1 %7892, %v8125_v8   ;;  %519 = vperm.xlu0 %7894, %v429_v22  }
  0x8d   : > { %743 = vperm.xlu1 %7892, %v8132_v9   ;;  %529 = vperm.xlu0 %7894, %v431_v23  }
  0x8e   : > { %v8233_v27 = vpop.permute.xlu1 %459  ;;  %v8235_v28 = vpop.permute.xlu0 %568 }
  0x8f   : > { %843 = vst [vmem:[%s8230_s26 + $0x170] sm:$0xff] %v8233_v27  ;;  %844 = vst [vmem:[%s8230_s26 + $0x178] sm:$0xff] %v8233_v27 }
  0x90   : > { %845 = vst [vmem:[%s8230_s26 + $0x180] sm:$0xff] %v8233_v27  ;;  %944 = vst [vmem:[%s8230_s26 + $0x208] sm:$0xff] %v8233_v27 }
  0x91   : > { %945 = vst [vmem:[%s8230_s26 + $0x210] sm:$0xff] %v8233_v27  ;;  %946 = vst [vmem:[%s8230_s26 + $0x218] sm:$0xff] %v8233_v27  ;;  %751 = vperm.xlu1 %7892, %v8141_v10   ;;  %539 = vperm.xlu0 %7894, %v433_v24  }
  0x92   : > { %947 = vst.msk [vmem:[%s8230_s26 + $0x220] sm:$0xff] %vm936_vm0, %v8233_v27  ;;  %v8259_v29 = vpop.permute.xlu1 %464  ;;  %v8261_v30 = vpop.permute.xlu0 %580 }
  0x93   : > { %846 = vst.msk [vmem:[%s8230_s26 + $0x188] sm:$0xff] %vm837_vm1, %v8233_v27  ;;  %847 = vst [vmem:[%s8230_s26 + $0x228] sm:$0xff] %v8259_v29  ;;  %v8629_v16 = vsel %vm444_vm4, %v8259_v29, %v8261_v30 }
  0x94   : > { %943 = vst.msk [vmem:[%s8230_s26 + $0x200] sm:$0xff] %vm931_vm2, %v8233_v27  ;;  %848 = vst [vmem:[%s8230_s26 + $0x230] sm:$0xff] %v8259_v29 }
  0x95   : > { %849 = vst [vmem:[%s8230_s26 + $0x238] sm:$0xff] %v8259_v29  ;;  %949 = vst [vmem:[%s8230_s26 + $0x2c0] sm:$0xff] %v8259_v29  ;;  %759 = vperm.xlu1 %7892, %v8148_v11   ;;  %549 = vperm.xlu0 %7894, %v435_v25  }
  0x96   : > { %950 = vst [vmem:[%s8230_s26 + $0x2c8] sm:$0xff] %v8259_v29  ;;  %951 = vst [vmem:[%s8230_s26 + $0x2d0] sm:$0xff] %v8259_v29  ;;  %v8285_v31 = vpop.permute.xlu1 %474  ;;  %v8287_v32 = vpop.permute.xlu0 %588 }
  0x97   : > { %952 = vst.msk [vmem:[%s8230_s26 + $0x2d8] sm:$0xff] %vm936_vm0, %v8259_v29  ;;  %855 = vst [vmem:[%s8230_s26 + $0x398] sm:$0xff] %v8285_v31  ;;  %v8656_v19 = vsel %vm444_vm4, %v8285_v31, %v8287_v32 }
  0x98   : > { %850 = vst.msk [vmem:[%s8230_s26 + $0x240] sm:$0xff] %vm837_vm1, %v8259_v29  ;;  %856 = vst [vmem:[%s8230_s26 + $0x3a0] sm:$0xff] %v8285_v31 }
  0x99   : > { %948 = vst.msk [vmem:[%s8230_s26 + $0x2b8] sm:$0xff] %vm931_vm2, %v8259_v29  ;;  %857 = vst [vmem:[%s8230_s26 + $0x3a8] sm:$0xff] %v8285_v31  ;;  %767 = vperm.xlu1 %7892, %v8155_v12   ;;  %559 = vperm.xlu0 %7894, %v8207_v26  }
  0x9a   : > { %959 = vst [vmem:[%s8230_s26 + $0x430] sm:$0xff] %v8285_v31  ;;  %960 = vst [vmem:[%s8230_s26 + $0x438] sm:$0xff] %v8285_v31  ;;  %v8312_v33 = vpop.permute.xlu1 %484  ;;  %v8314_v34 = vpop.permute.xlu0 %596 }
  0x9b   : > { %961 = vst [vmem:[%s8230_s26 + $0x440] sm:$0xff] %v8285_v31  ;;  %962 = vst.msk [vmem:[%s8230_s26 + $0x448] sm:$0xff] %vm936_vm0, %v8285_v31  ;;  %v8685_v23 = vsel %vm444_vm4, %v8312_v33, %v8314_v34 }
  0x9c   : > { %858 = vst.msk [vmem:[%s8230_s26 + $0x3b0] sm:$0xff] %vm837_vm1, %v8285_v31  ;;  %863 = vst [vmem:[%s8230_s26 + $0x508] sm:$0xff] %v8312_v33 }
  0x9d   : > { %958 = vst.msk [vmem:[%s8230_s26 + $0x428] sm:$0xff] %vm931_vm2, %v8285_v31  ;;  %864 = vst [vmem:[%s8230_s26 + $0x510] sm:$0xff] %v8312_v33  ;;  %775 = vperm.xlu1 %7892, %v8162_v13  }
  0x9e   : > { %865 = vst [vmem:[%s8230_s26 + $0x518] sm:$0xff] %v8312_v33  ;;  %969 = vst [vmem:[%s8230_s26 + $0x5a0] sm:$0xff] %v8312_v33  ;;  %v8338_v35 = vpop.permute.xlu1 %494  ;;  %v8340_v36 = vpop.permute.xlu0 %604 }
  0x9f   : > { %970 = vst [vmem:[%s8230_s26 + $0x5a8] sm:$0xff] %v8312_v33  ;;  %971 = vst [vmem:[%s8230_s26 + $0x5b0] sm:$0xff] %v8312_v33 }
  0xa0   : > { %972 = vst.msk [vmem:[%s8230_s26 + $0x5b8] sm:$0xff] %vm936_vm0, %v8312_v33  ;;  %871 = vst [vmem:[%s8230_s26 + $0x678] sm:$0xff] %v8338_v35 }
  0xa1   : > { %866 = vst.msk [vmem:[%s8230_s26 + $0x520] sm:$0xff] %vm837_vm1, %v8312_v33  ;;  %872 = vst [vmem:[%s8230_s26 + $0x680] sm:$0xff] %v8338_v35  ;;  %783 = vperm.xlu1 %7892, %v8169_v14  }
  0xa2   : > { %968 = vst.msk [vmem:[%s8230_s26 + $0x598] sm:$0xff] %vm931_vm2, %v8312_v33  ;;  %873 = vst [vmem:[%s8230_s26 + $0x688] sm:$0xff] %v8338_v35  ;;  %v8364_v37 = vpop.permute.xlu1 %504  ;;  %v8366_v38 = vpop.permute.xlu0 %612 }
  0xa3   : > { %979 = vst [vmem:[%s8230_s26 + $0x710] sm:$0xff] %v8338_v35  ;;  %980 = vst [vmem:[%s8230_s26 + $0x718] sm:$0xff] %v8338_v35  ;;  %v8741_v33 = vsel %vm444_vm4, %v8364_v37, %v8366_v38 }
  0xa4   : > { %981 = vst [vmem:[%s8230_s26 + $0x720] sm:$0xff] %v8338_v35  ;;  %982 = vst.msk [vmem:[%s8230_s26 + $0x728] sm:$0xff] %vm936_vm0, %v8338_v35 }
  0xa5   : > { %874 = vst.msk [vmem:[%s8230_s26 + $0x690] sm:$0xff] %vm837_vm1, %v8338_v35  ;;  %879 = vst [vmem:[%s8230_s26 + $0x7e8] sm:$0xff] %v8364_v37  ;;  %7895 = vset.pattern.permute.xlu1 %v15437_v3 }
  0xa6   : > { %978 = vst.msk [vmem:[%s8230_s26 + $0x708] sm:$0xff] %vm931_vm2, %v8338_v35  ;;  %880 = vst [vmem:[%s8230_s26 + $0x7f0] sm:$0xff] %v8364_v37  ;;  %v8390_v39 = vpop.permute.xlu1 %514  ;;  %v8392_v40 = vpop.permute.xlu0 %620 }
  0xa7   : > { %881 = vst [vmem:[%s8230_s26 + $0x7f8] sm:$0xff] %v8364_v37  ;;  %989 = vst [vmem:[%s8230_s26 + $0x880] sm:$0xff] %v8364_v37  ;;  %v8770_v63 = vsel %vm444_vm4, %v8390_v39, %v8392_v40 }
  0xa8   : > { %990 = vst [vmem:[%s8230_s26 + $0x888] sm:$0xff] %v8364_v37  ;;  %991 = vst [vmem:[%s8230_s26 + $0x890] sm:$0xff] %v8364_v37 }
  0xa9   : > { %992 = vst.msk [vmem:[%s8230_s26 + $0x898] sm:$0xff] %vm936_vm0, %v8364_v37  ;;  %887 = vst [vmem:[%s8230_s26 + $0x958] sm:$0xff] %v8390_v39 }
  0xaa   : > { %882 = vst.msk [vmem:[%s8230_s26 + $0x800] sm:$0xff] %vm837_vm1, %v8364_v37  ;;  %888 = vst [vmem:[%s8230_s26 + $0x960] sm:$0xff] %v8390_v39  ;;  %v8415_v41 = vpop.permute.xlu1 %524  ;;  %v8417_v42 = vpop.permute.xlu0 %628 }
  0xab   : > { %988 = vst.msk [vmem:[%s8230_s26 + $0x878] sm:$0xff] %vm931_vm2, %v8364_v37  ;;  %889 = vst [vmem:[%s8230_s26 + $0x968] sm:$0xff] %v8390_v39 }
  0xac   : > { %999 = vst [vmem:[%s8230_s26 + $0x9f0] sm:$0xff] %v8390_v39  ;;  %1000 = vst [vmem:[%s8230_s26 + $0x9f8] sm:$0xff] %v8390_v39 }
  0xad   : > { %1001 = vst [vmem:[%s8230_s26 + $0xa00] sm:$0xff] %v8390_v39  ;;  %1002 = vst.msk [vmem:[%s8230_s26 + $0xa08] sm:$0xff] %vm936_vm0, %v8390_v39 }
  0xae   : > { %890 = vst.msk [vmem:[%s8230_s26 + $0x970] sm:$0xff] %vm837_vm1, %v8390_v39  ;;  %895 = vst [vmem:[%s8230_s26 + $0xac8] sm:$0xff] %v8415_v41  ;;  %v8440_v43 = vpop.permute.xlu1 %534  ;;  %v8442_v44 = vpop.permute.xlu0 %636 }
  0xaf   : > { %998 = vst.msk [vmem:[%s8230_s26 + $0x9e8] sm:$0xff] %vm931_vm2, %v8390_v39  ;;  %896 = vst [vmem:[%s8230_s26 + $0xad0] sm:$0xff] %v8415_v41 }
  0xb0   : > { %897 = vst [vmem:[%s8230_s26 + $0xad8] sm:$0xff] %v8415_v41  ;;  %1009 = vst [vmem:[%s8230_s26 + $0xb60] sm:$0xff] %v8415_v41 }
  0xb1   : > { %1010 = vst [vmem:[%s8230_s26 + $0xb68] sm:$0xff] %v8415_v41  ;;  %1011 = vst [vmem:[%s8230_s26 + $0xb70] sm:$0xff] %v8415_v41 }
  0xb2   : > { %1012 = vst.msk [vmem:[%s8230_s26 + $0xb78] sm:$0xff] %vm936_vm0, %v8415_v41  ;;  %15450 = vst [vmem:[#allocation2_spill] sm:$0xff] %v8442_v44  ;;  %v8465_v45 = vpop.permute.xlu1 %544  ;;  %v8467_v46 = vpop.permute.xlu0 %644 }
  0xb3   : > { %898 = vst.msk [vmem:[%s8230_s26 + $0xae0] sm:$0xff] %vm837_vm1, %v8415_v41  ;;  %903 = vst [vmem:[%s8230_s26 + $0xc38] sm:$0xff] %v8440_v43 }
  0xb4   : > { %1008 = vst.msk [vmem:[%s8230_s26 + $0xb58] sm:$0xff] %vm931_vm2, %v8415_v41  ;;  %904 = vst [vmem:[%s8230_s26 + $0xc40] sm:$0xff] %v8440_v43 }
  0xb5   : > { %905 = vst [vmem:[%s8230_s26 + $0xc48] sm:$0xff] %v8440_v43  ;;  %1019 = vst [vmem:[%s8230_s26 + $0xcd0] sm:$0xff] %v8440_v43 }
  0xb6   : > { %1020 = vst [vmem:[%s8230_s26 + $0xcd8] sm:$0xff] %v8440_v43  ;;  %1021 = vst [vmem:[%s8230_s26 + $0xce0] sm:$0xff] %v8440_v43  ;;  %v8490_v47 = vpop.permute.xlu1 %554  ;;  %v8492_v48 = vpop.permute.xlu0 %652 }
  0xb7   : > { %1022 = vst.msk [vmem:[%s8230_s26 + $0xce8] sm:$0xff] %vm936_vm0, %v8440_v43  ;;  %15451 = vst [vmem:[#allocation3_spill] sm:$0xff] %v8467_v46 }
  0xb8   : > { %906 = vst.msk [vmem:[%s8230_s26 + $0xc50] sm:$0xff] %vm837_vm1, %v8440_v43  ;;  %911 = vst [vmem:[%s8230_s26 + $0xda8] sm:$0xff] %v8465_v45 }
  0xb9   : > { %1018 = vst.msk [vmem:[%s8230_s26 + $0xcc8] sm:$0xff] %vm931_vm2, %v8440_v43  ;;  %912 = vst [vmem:[%s8230_s26 + $0xdb0] sm:$0xff] %v8465_v45 }
  0xba   : > { %913 = vst [vmem:[%s8230_s26 + $0xdb8] sm:$0xff] %v8465_v45  ;;  %1029 = vst [vmem:[%s8230_s26 + $0xe40] sm:$0xff] %v8465_v45  ;;  %v8515_v49 = vpop.permute.xlu1 %564  ;;  %v8517_v50 = vpop.permute.xlu0 %660 }
  0xbb   : > { %1030 = vst [vmem:[%s8230_s26 + $0xe48] sm:$0xff] %v8465_v45  ;;  %1031 = vst [vmem:[%s8230_s26 + $0xe50] sm:$0xff] %v8465_v45 }
  0xbc   : > { %1032 = vst.msk [vmem:[%s8230_s26 + $0xe58] sm:$0xff] %vm936_vm0, %v8465_v45  ;;  %15452 = vst [vmem:[#allocation4_spill] sm:$0xff] %v8492_v48 }
  0xbd   : > { %914 = vst.msk [vmem:[%s8230_s26 + $0xdc0] sm:$0xff] %vm837_vm1, %v8465_v45  ;;  %919 = vst [vmem:[%s8230_s26 + $0xf18] sm:$0xff] %v8490_v47 }
  0xbe   : > { %1028 = vst.msk [vmem:[%s8230_s26 + $0xe38] sm:$0xff] %vm931_vm2, %v8465_v45  ;;  %920 = vst [vmem:[%s8230_s26 + $0xf20] sm:$0xff] %v8490_v47 }
  0xbf   : > { %921 = vst [vmem:[%s8230_s26 + $0xf28] sm:$0xff] %v8490_v47  ;;  %1039 = vst [vmem:[%s8230_s26 + $0xfb0] sm:$0xff] %v8490_v47  ;;  %v8540_v51 = vpop.permute.xlu0 %695  ;;  %v8550_v56 = vpop.permute.xlu1 %572 }
  0xc0   : > { %1040 = vst [vmem:[%s8230_s26 + $0xfb8] sm:$0xff] %v8490_v47  ;;  %1041 = vst [vmem:[%s8230_s26 + $0xfc0] sm:$0xff] %v8490_v47 }
  0xc1   : > { %1042 = vst.msk [vmem:[%s8230_s26 + $0xfc8] sm:$0xff] %vm936_vm0, %v8490_v47  ;;  %15453 = vst [vmem:[#allocation5_spill] sm:$0xff] %v8517_v50 }
  0xc2   : > { %922 = vst.msk [vmem:[%s8230_s26 + $0xf30] sm:$0xff] %vm837_vm1, %v8490_v47  ;;  %927 = vst [vmem:[%s8230_s26 + $0x1088] sm:$0xff] %v8515_v49 }
  0xc3   : > { %1038 = vst.msk [vmem:[%s8230_s26 + $0xfa8] sm:$0xff] %vm931_vm2, %v8490_v47  ;;  %928 = vst [vmem:[%s8230_s26 + $0x1090] sm:$0xff] %v8515_v49  ;;  %v8542_v52 = vpop.permute.xlu0 %707  ;;  %v8554_v58 = vpop.permute.xlu1 %576 }
  0xc4   : > { %929 = vst [vmem:[%s8230_s26 + $0x1098] sm:$0xff] %v8515_v49  ;;  %1049 = vst [vmem:[%s8230_s26 + $0x1120] sm:$0xff] %v8515_v49  ;;  %v8600_v12 = vsel %vm444_vm4, %v8233_v27, %v8554_v58  ;;  %v8714_v27 = vsel %vm444_vm4, %v8338_v35, %v8340_v36 }
  0xc5   : > { %1050 = vst [vmem:[%s8230_s26 + $0x1128] sm:$0xff] %v8515_v49  ;;  %1051 = vst [vmem:[%s8230_s26 + $0x1130] sm:$0xff] %v8515_v49 }
  0xc6   : > { %1052 = vst.msk [vmem:[%s8230_s26 + $0x1138] sm:$0xff] %vm936_vm0, %v8515_v49 }
  0xc7   : > { %930 = vst.msk [vmem:[%s8230_s26 + $0x10a0] sm:$0xff] %vm837_vm1, %v8515_v49  ;;  %v8544_v53 = vpop.permute.xlu0 %715  ;;  %v8560_v62 = vpop.permute.xlu1 %584 }
  0xc8   : > { %1048 = vst.msk [vmem:[%s8230_s26 + $0x1118] sm:$0xff] %vm931_vm2, %v8515_v49 }
  0xcb   : > { %v8546_v54 = vpop.permute.xlu0 %723  ;;  %v8564_v2 = vpop.permute.xlu1 %592 }
  0xcf   : > { %v8548_v55 = vpop.permute.xlu0 %731  ;;  %v8570_v6 = vpop.permute.xlu1 %600 }
  0xd3   : > { %v8552_v57 = vpop.permute.xlu0 %739  ;;  %v8592_v10 = vpop.permute.xlu1 %608 }
  0xd7   : > { %v8556_v59 = vpop.permute.xlu0 %747  ;;  %v8623_v14 = vpop.permute.xlu1 %616 }
  0xdb   : > { %v8558_v61 = vpop.permute.xlu0 %755  ;;  %v8675_v21 = vpop.permute.xlu1 %624 }
  0xdf   : > { %v8562_v0 = vpop.permute.xlu0 %763  ;;  %v8708_v25 = vpop.permute.xlu1 %632 }
  0xe0   : > { %15454 = vst [vmem:[#allocation6_spill] sm:$0xff] %v8562_v0 }
  0xe3   : > { %v8566_v4 = vpop.permute.xlu0 %771  ;;  %v8760_v37 = vpop.permute.xlu1 %640 }
  0xe4   : > { %15455 = vst [vmem:[#allocation7_spill] sm:$0xff] %v8566_v4  ;;  %15457 = vst [vmem:[#allocation9_spill] sm:$0xff] %v8760_v37 }
  0xe7   : > { %v8568_v5 = vpop.permute.xlu0 %779  ;;  %v8793_v39 = vpop.permute.xlu1 %648 }
  0xe8   : > { %15456 = vst [vmem:[#allocation8_spill] sm:$0xff] %v8568_v5  ;;  %15458 = vst [vmem:[#allocation10_spill] sm:$0xff] %v8793_v39 }
  0xec   : > { %v450_v8 = vpop.permute.xlu0 %449 }
  0xed   : > { %v8578_v9 = vsel %vm444_vm4, %v450_v8, %v8235_v28  ;;  %834 = vst [vmem:[%s8230_s26] sm:$0xff] %v450_v8  ;;  %835 = vst [vmem:[%s8230_s26 + $0x8] sm:$0xff] %v450_v8 }
  0xee   : > { %836 = vst [vmem:[%s8230_s26 + $0x10] sm:$0xff] %v450_v8  ;;  %933 = vst [vmem:[%s8230_s26 + $0x98] sm:$0xff] %v450_v8  ;;  %1077 = vrot.lane.b32.xlu0 %v8578_v9, %s7956_s27 }
  0xef   : > { %934 = vst [vmem:[%s8230_s26 + $0xa0] sm:$0xff] %v450_v8  ;;  %935 = vst [vmem:[%s8230_s26 + $0xa8] sm:$0xff] %v450_v8 }
  0xf0   : > { %937 = vst.msk [vmem:[%s8230_s26 + $0xb0] sm:$0xff] %vm936_vm0, %v450_v8  ;;  %v455_v11 = vpop.permute.xlu0 %454 }
  0xf1   : > { %838 = vst.msk [vmem:[%s8230_s26 + $0x18] sm:$0xff] %vm837_vm1, %v450_v8  ;;  %v8605_v13 = vsel %vm444_vm4, %v455_v11, %v8550_v56  ;;  %839 = vst [vmem:[%s8230_s26 + $0xb8] sm:$0xff] %v455_v11 }
  0xf2   : > { %932 = vst.msk [vmem:[%s8230_s26 + $0x90] sm:$0xff] %vm931_vm2, %v450_v8  ;;  %840 = vst [vmem:[%s8230_s26 + $0xc0] sm:$0xff] %v455_v11  ;;  %1081 = vrot.lane.b32.xlu0 %v8600_v12, %s7956_s27  ;;  %1079 = vrot.lane.b32.xlu1 %v8605_v13, %s7956_s27 }
  0xf3   : > { %841 = vst [vmem:[%s8230_s26 + $0xc8] sm:$0xff] %v455_v11  ;;  %939 = vst [vmem:[%s8230_s26 + $0x150] sm:$0xff] %v455_v11 }
  0xf4   : > { %940 = vst [vmem:[%s8230_s26 + $0x158] sm:$0xff] %v455_v11  ;;  %941 = vst [vmem:[%s8230_s26 + $0x160] sm:$0xff] %v455_v11  ;;  %v470_v15 = vpop.permute.xlu0 %469 }
  0xf5   : > { %942 = vst.msk [vmem:[%s8230_s26 + $0x168] sm:$0xff] %vm936_vm0, %v455_v11  ;;  %v8634_v17 = vsel %vm444_vm4, %v470_v15, %v8560_v62  ;;  %851 = vst [vmem:[%s8230_s26 + $0x2e0] sm:$0xff] %v470_v15 }
  0xf6   : > { %842 = vst.msk [vmem:[%s8230_s26 + $0xd0] sm:$0xff] %vm837_vm1, %v455_v11  ;;  %852 = vst [vmem:[%s8230_s26 + $0x2e8] sm:$0xff] %v470_v15  ;;  %1083 = vrot.lane.b32.xlu1 %v8629_v16, %s7956_s27  ;;  %1085 = vrot.lane.b32.xlu0 %v8634_v17, %s7956_s27 }
  0xf7   : > { %938 = vst.msk [vmem:[%s8230_s26 + $0x148] sm:$0xff] %vm931_vm2, %v455_v11  ;;  %853 = vst [vmem:[%s8230_s26 + $0x2f0] sm:$0xff] %v470_v15  ;;  %v8799_v11 = vsel %vm444_vm4, %v8415_v41, %v8417_v42 }
  0xf8   : > { %954 = vst [vmem:[%s8230_s26 + $0x378] sm:$0xff] %v470_v15  ;;  %955 = vst [vmem:[%s8230_s26 + $0x380] sm:$0xff] %v470_v15  ;;  %v480_v18 = vpop.permute.xlu0 %479 }
  0xf9   : > { %956 = vst [vmem:[%s8230_s26 + $0x388] sm:$0xff] %v470_v15  ;;  %957 = vst.msk [vmem:[%s8230_s26 + $0x390] sm:$0xff] %vm936_vm0, %v470_v15  ;;  %v8661_v20 = vsel %vm444_vm4, %v480_v18, %v8564_v2 }
  0xfa   : > { %854 = vst.msk [vmem:[%s8230_s26 + $0x2f8] sm:$0xff] %vm837_vm1, %v470_v15  ;;  %859 = vst [vmem:[%s8230_s26 + $0x450] sm:$0xff] %v480_v18  ;;  %1087 = vrot.lane.b32.xlu1 %v8656_v19, %s7956_s27  ;;  %1089 = vrot.lane.b32.xlu0 %v8661_v20, %s7956_s27 }
  0xfb   : > { %953 = vst.msk [vmem:[%s8230_s26 + $0x370] sm:$0xff] %vm931_vm2, %v470_v15  ;;  %860 = vst [vmem:[%s8230_s26 + $0x458] sm:$0xff] %v480_v18 }
  0xfc   : > { %861 = vst [vmem:[%s8230_s26 + $0x460] sm:$0xff] %v480_v18  ;;  %964 = vst [vmem:[%s8230_s26 + $0x4e8] sm:$0xff] %v480_v18  ;;  %v490_v22 = vpop.permute.xlu0 %489 }
  0xfd   : > { %965 = vst [vmem:[%s8230_s26 + $0x4f0] sm:$0xff] %v480_v18  ;;  %966 = vst [vmem:[%s8230_s26 + $0x4f8] sm:$0xff] %v480_v18  ;;  %v8690_v24 = vsel %vm444_vm4, %v490_v22, %v8570_v6 }
  0xfe   : > { %967 = vst.msk [vmem:[%s8230_s26 + $0x500] sm:$0xff] %vm936_vm0, %v480_v18  ;;  %867 = vst [vmem:[%s8230_s26 + $0x5c0] sm:$0xff] %v490_v22  ;;  %1091 = vrot.lane.b32.xlu1 %v8685_v23, %s7956_s27  ;;  %1093 = vrot.lane.b32.xlu0 %v8690_v24, %s7956_s27 }
  0xff   : > { %862 = vst.msk [vmem:[%s8230_s26 + $0x468] sm:$0xff] %vm837_vm1, %v480_v18  ;;  %868 = vst [vmem:[%s8230_s26 + $0x5c8] sm:$0xff] %v490_v22 }
 0x100   : > { %963 = vst.msk [vmem:[%s8230_s26 + $0x4e0] sm:$0xff] %vm931_vm2, %v480_v18  ;;  %869 = vst [vmem:[%s8230_s26 + $0x5d0] sm:$0xff] %v490_v22  ;;  %v500_v26 = vpop.permute.xlu0 %499  ;;  %v8826_v18 = vsel %vm444_vm4, %v8440_v43, %v8442_v44  ;;  %v8845_v43 = vpop.permute.xlu1 %656 }
 0x101   : > { %974 = vst [vmem:[%s8230_s26 + $0x658] sm:$0xff] %v490_v22  ;;  %975 = vst [vmem:[%s8230_s26 + $0x660] sm:$0xff] %v490_v22  ;;  %v8719_v29 = vsel %vm444_vm4, %v500_v26, %v8592_v10 }
 0x102   : > { %976 = vst [vmem:[%s8230_s26 + $0x668] sm:$0xff] %v490_v22  ;;  %977 = vst.msk [vmem:[%s8230_s26 + $0x670] sm:$0xff] %vm936_vm0, %v490_v22  ;;  %1095 = vrot.lane.b32.xlu1 %v8714_v27, %s7956_s27  ;;  %1097 = vrot.lane.b32.xlu0 %v8719_v29, %s7956_s27 }
 0x103   : > { %870 = vst.msk [vmem:[%s8230_s26 + $0x5d8] sm:$0xff] %vm837_vm1, %v490_v22  ;;  %875 = vst [vmem:[%s8230_s26 + $0x730] sm:$0xff] %v500_v26 }
 0x104   : > { %973 = vst.msk [vmem:[%s8230_s26 + $0x650] sm:$0xff] %vm931_vm2, %v490_v22  ;;  %876 = vst [vmem:[%s8230_s26 + $0x738] sm:$0xff] %v500_v26  ;;  %v510_v31 = vpop.permute.xlu0 %509 }
 0x105   : > { %877 = vst [vmem:[%s8230_s26 + $0x740] sm:$0xff] %v500_v26  ;;  %984 = vst [vmem:[%s8230_s26 + $0x7c8] sm:$0xff] %v500_v26  ;;  %v8746_v35 = vsel %vm444_vm4, %v510_v31, %v8623_v14 }
 0x106   : > { %985 = vst [vmem:[%s8230_s26 + $0x7d0] sm:$0xff] %v500_v26  ;;  %986 = vst [vmem:[%s8230_s26 + $0x7d8] sm:$0xff] %v500_v26  ;;  %1099 = vrot.lane.b32.xlu1 %v8741_v33, %s7956_s27  ;;  %1101 = vrot.lane.b32.xlu0 %v8746_v35, %s7956_s27 }
 0x107   : > { %987 = vst.msk [vmem:[%s8230_s26 + $0x7e0] sm:$0xff] %vm936_vm0, %v500_v26  ;;  %883 = vst [vmem:[%s8230_s26 + $0x8a0] sm:$0xff] %v510_v31 }
 0x108   : > { %878 = vst.msk [vmem:[%s8230_s26 + $0x748] sm:$0xff] %vm837_vm1, %v500_v26  ;;  %884 = vst [vmem:[%s8230_s26 + $0x8a8] sm:$0xff] %v510_v31  ;;  %v520_v60 = vpop.permute.xlu0 %519 }
 0x109   : > { %983 = vst.msk [vmem:[%s8230_s26 + $0x7c0] sm:$0xff] %vm931_vm2, %v500_v26  ;;  %885 = vst [vmem:[%s8230_s26 + $0x8b0] sm:$0xff] %v510_v31  ;;  %v8775_v1 = vsel %vm444_vm4, %v520_v60, %v8675_v21 }
 0x10a   : > { %994 = vst [vmem:[%s8230_s26 + $0x938] sm:$0xff] %v510_v31  ;;  %995 = vst [vmem:[%s8230_s26 + $0x940] sm:$0xff] %v510_v31  ;;  %1103 = vrot.lane.b32.xlu1 %v8770_v63, %s7956_s27  ;;  %1105 = vrot.lane.b32.xlu0 %v8775_v1, %s7956_s27 }
 0x10b   : > { %996 = vst [vmem:[%s8230_s26 + $0x948] sm:$0xff] %v510_v31  ;;  %997 = vst.msk [vmem:[%s8230_s26 + $0x950] sm:$0xff] %vm936_vm0, %v510_v31 }
 0x10c   : > { %886 = vst.msk [vmem:[%s8230_s26 + $0x8b8] sm:$0xff] %vm837_vm1, %v510_v31  ;;  %891 = vst [vmem:[%s8230_s26 + $0xa10] sm:$0xff] %v520_v60  ;;  %v530_v8 = vpop.permute.xlu0 %529 }
 0x10d   : > { %993 = vst.msk [vmem:[%s8230_s26 + $0x930] sm:$0xff] %vm931_vm2, %v510_v31  ;;  %892 = vst [vmem:[%s8230_s26 + $0xa18] sm:$0xff] %v520_v60  ;;  %v8804_v15 = vsel %vm444_vm4, %v530_v8, %v8708_v25  ;;  %v8855_v31 = vsel %vm444_vm4, %v8465_v45, %v8467_v46  ;;  %v8878_v45 = vpop.permute.xlu1 %691 }
 0x10e   : > { %893 = vst [vmem:[%s8230_s26 + $0xa20] sm:$0xff] %v520_v60  ;;  %1004 = vst [vmem:[%s8230_s26 + $0xaa8] sm:$0xff] %v520_v60  ;;  %1107 = vrot.lane.b32.xlu1 %v8799_v11, %s7956_s27  ;;  %1109 = vrot.lane.b32.xlu0 %v8804_v15, %s7956_s27 }
 0x10f   : > { %1005 = vst [vmem:[%s8230_s26 + $0xab0] sm:$0xff] %v520_v60  ;;  %1006 = vst [vmem:[%s8230_s26 + $0xab8] sm:$0xff] %v520_v60 }
 0x110   : > { %1007 = vst.msk [vmem:[%s8230_s26 + $0xac0] sm:$0xff] %vm936_vm0, %v520_v60  ;;  %899 = vst [vmem:[%s8230_s26 + $0xb80] sm:$0xff] %v530_v8  ;;  %v540_v41 = vpop.permute.xlu0 %539 }
 0x111   : > { %894 = vst.msk [vmem:[%s8230_s26 + $0xa28] sm:$0xff] %vm837_vm1, %v520_v60  ;;  %900 = vst [vmem:[%s8230_s26 + $0xb88] sm:$0xff] %v530_v8  ;;  %v8831_v22 = vsel %vm444_vm4, %v540_v41, %v8760_v37 }
 0x112   : > { %1003 = vst.msk [vmem:[%s8230_s26 + $0xaa0] sm:$0xff] %vm931_vm2, %v520_v60  ;;  %901 = vst [vmem:[%s8230_s26 + $0xb90] sm:$0xff] %v530_v8  ;;  %1111 = vrot.lane.b32.xlu1 %v8826_v18, %s7956_s27  ;;  %1113 = vrot.lane.b32.xlu0 %v8831_v22, %s7956_s27 }
 0x113   : > { %1014 = vst [vmem:[%s8230_s26 + $0xc18] sm:$0xff] %v530_v8  ;;  %1015 = vst [vmem:[%s8230_s26 + $0xc20] sm:$0xff] %v530_v8 }
 0x114   : > { %1016 = vst [vmem:[%s8230_s26 + $0xc28] sm:$0xff] %v530_v8  ;;  %1017 = vst.msk [vmem:[%s8230_s26 + $0xc30] sm:$0xff] %vm936_vm0, %v530_v8  ;;  %v550_v26 = vpop.permute.xlu0 %549 }
 0x115   : > { %902 = vst.msk [vmem:[%s8230_s26 + $0xb98] sm:$0xff] %vm837_vm1, %v530_v8  ;;  %907 = vst [vmem:[%s8230_s26 + $0xcf0] sm:$0xff] %v540_v41  ;;  %v8860_v60 = vsel %vm444_vm4, %v550_v26, %v8793_v39 }
 0x116   : > { %1013 = vst.msk [vmem:[%s8230_s26 + $0xc10] sm:$0xff] %vm931_vm2, %v530_v8  ;;  %908 = vst [vmem:[%s8230_s26 + $0xcf8] sm:$0xff] %v540_v41  ;;  %1115 = vrot.lane.b32.xlu1 %v8855_v31, %s7956_s27  ;;  %1117 = vrot.lane.b32.xlu0 %v8860_v60, %s7956_s27 }
 0x117   : > { %909 = vst [vmem:[%s8230_s26 + $0xd00] sm:$0xff] %v540_v41  ;;  %1024 = vst [vmem:[%s8230_s26 + $0xd88] sm:$0xff] %v540_v41 }
 0x118   : > { %1025 = vst [vmem:[%s8230_s26 + $0xd90] sm:$0xff] %v540_v41  ;;  %1026 = vst [vmem:[%s8230_s26 + $0xd98] sm:$0xff] %v540_v41  ;;  %v560_v8 = vpop.permute.xlu0 %559 }
 0x119   : > { %1027 = vst.msk [vmem:[%s8230_s26 + $0xda0] sm:$0xff] %vm936_vm0, %v540_v41  ;;  %15459 = vst [vmem:[#allocation11_spill] sm:$0xff] %v8845_v43  ;;  %v8889_v3 = vsel %vm444_vm4, %v560_v8, %v8845_v43 }
 0x11a   : > { %910 = vst.msk [vmem:[%s8230_s26 + $0xd08] sm:$0xff] %vm837_vm1, %v540_v41  ;;  %915 = vst [vmem:[%s8230_s26 + $0xe60] sm:$0xff] %v550_v26  ;;  %1121 = vrot.lane.b32.xlu0 %v8889_v3, %s7956_s27 }
 0x11b   : > { %1023 = vst.msk [vmem:[%s8230_s26 + $0xd80] sm:$0xff] %vm931_vm2, %v540_v41  ;;  %916 = vst [vmem:[%s8230_s26 + $0xe68] sm:$0xff] %v550_v26  ;;  %v8884_v41 = vsel %vm444_vm4, %v8490_v47, %v8492_v48  ;;  %v8911_v47 = vsel %vm444_vm4, %v8515_v49, %v8517_v50 }
 0x11c   : > { %917 = vst [vmem:[%s8230_s26 + $0xe70] sm:$0xff] %v550_v26  ;;  %1034 = vst [vmem:[%s8230_s26 + $0xef8] sm:$0xff] %v550_v26  ;;  %1119 = vrot.lane.b32.xlu1 %v8884_v41, %s7956_s27 }
 0x11d   : > { %1035 = vst [vmem:[%s8230_s26 + $0xf00] sm:$0xff] %v550_v26  ;;  %1036 = vst [vmem:[%s8230_s26 + $0xf08] sm:$0xff] %v550_v26 }
 0x11e   : > { %1037 = vst.msk [vmem:[%s8230_s26 + $0xf10] sm:$0xff] %vm936_vm0, %v550_v26  ;;  %923 = vst [vmem:[%s8230_s26 + $0xfd0] sm:$0xff] %v560_v8  ;;  %1199 = vrot.lane.b32.xlu0 %v8578_v9, %s7957_s28 }
 0x11f   : > { %918 = vst.msk [vmem:[%s8230_s26 + $0xe78] sm:$0xff] %vm837_vm1, %v550_v26  ;;  %924 = vst [vmem:[%s8230_s26 + $0xfd8] sm:$0xff] %v560_v8 }
 0x120   : > { %1033 = vst.msk [vmem:[%s8230_s26 + $0xef0] sm:$0xff] %vm931_vm2, %v550_v26  ;;  %925 = vst [vmem:[%s8230_s26 + $0xfe0] sm:$0xff] %v560_v8  ;;  %v8913_v26 = vpop.permute.xlu1 %699  ;;  %1123 = vrot.lane.b32.xlu1 %v8911_v47, %s7956_s27  ;;  %s7971_s27 = smov 22  }
 0x121   : > { %1044 = vst [vmem:[%s8230_s26 + $0x1068] sm:$0xff] %v560_v8  ;;  %1045 = vst [vmem:[%s8230_s26 + $0x1070] sm:$0xff] %v560_v8 }
 0x122   : > { %1046 = vst [vmem:[%s8230_s26 + $0x1078] sm:$0xff] %v560_v8  ;;  %1047 = vst.msk [vmem:[%s8230_s26 + $0x1080] sm:$0xff] %vm936_vm0, %v560_v8  ;;  %1203 = vrot.lane.b32.xlu0 %v8600_v12, %s7957_s28  ;;  %vm2000_vm0 = vcmask 916944  }
 0x123   : > { %926 = vst.msk [vmem:[%s8230_s26 + $0xfe8] sm:$0xff] %vm837_vm1, %v560_v8  ;;  %vm2097_vm1 = vcmask 1048448  }
 0x124   : > { %1043 = vst.msk [vmem:[%s8230_s26 + $0x1060] sm:$0xff] %vm931_vm2, %v560_v8  ;;  %1201 = vrot.lane.b32.xlu1 %v8605_v13, %s7957_s28  ;;  %v8923_v8 = vpop.permute.xlu1 %703  ;;  %vm2099_vm2 = vcmask 310272  }
 0x126   : > { %1207 = vrot.lane.b32.xlu0 %v8634_v17, %s7957_s28 }
 0x128   : > { %1205 = vrot.lane.b32.xlu1 %v8629_v16, %s7957_s28  ;;  %v8929_v49 = vpop.permute.xlu1 %711 }
 0x12a   : > { %1211 = vrot.lane.b32.xlu0 %v8661_v20, %s7957_s28 }
 0x12c   : > { %1209 = vrot.lane.b32.xlu1 %v8656_v19, %s7957_s28  ;;  %v8939_v50 = vpop.permute.xlu1 %719 }
 0x12e   : > { %1215 = vrot.lane.b32.xlu0 %v8690_v24, %s7957_s28 }
 0x130   : > { %1213 = vrot.lane.b32.xlu1 %v8685_v23, %s7957_s28  ;;  %v8945_v43 = vpop.permute.xlu1 %727 }
 0x132   : > { %1219 = vrot.lane.b32.xlu0 %v8719_v29, %s7957_s28 }
 0x134   : > { %1217 = vrot.lane.b32.xlu1 %v8714_v27, %s7957_s28  ;;  %v8955_v5 = vpop.permute.xlu1 %735 }
 0x136   : > { %1223 = vrot.lane.b32.xlu0 %v8746_v35, %s7957_s28 }
 0x138   : > { %1221 = vrot.lane.b32.xlu1 %v8741_v33, %s7957_s28  ;;  %v8961_v48 = vpop.permute.xlu1 %743 }
 0x13a   : > { %1227 = vrot.lane.b32.xlu0 %v8775_v1, %s7957_s28 }
 0x13c   : > { %1225 = vrot.lane.b32.xlu1 %v8770_v63, %s7957_s28  ;;  %v8971_v39 = vpop.permute.xlu1 %751 }
 0x13e   : > { %1231 = vrot.lane.b32.xlu0 %v8804_v15, %s7957_s28 }
 0x140   : > { %1229 = vrot.lane.b32.xlu1 %v8799_v11, %s7957_s28  ;;  %v8977_v4 = vpop.permute.xlu1 %759 }
 0x142   : > { %1235 = vrot.lane.b32.xlu0 %v8831_v22, %s7957_s28 }
 0x144   : > { %1233 = vrot.lane.b32.xlu1 %v8826_v18, %s7957_s28  ;;  %v8987_v46 = vpop.permute.xlu1 %767 }
 0x145   : > { %15460 = vst [vmem:[#allocation12_spill] sm:$0xff] %v8987_v46 }
 0x146   : > { %1239 = vrot.lane.b32.xlu0 %v8860_v60, %s7957_s28 }
 0x148   : > { %1237 = vrot.lane.b32.xlu1 %v8855_v31, %s7957_s28  ;;  %v8993_v37 = vpop.permute.xlu1 %775 }
 0x149   : > { %15461 = vst [vmem:[#allocation13_spill] sm:$0xff] %v8993_v37 }
 0x14a   : > { %1243 = vrot.lane.b32.xlu0 %v8889_v3, %s7957_s28 }
 0x14c   : > { %1241 = vrot.lane.b32.xlu1 %v8884_v41, %s7957_s28  ;;  %v9003_v46 = vpop.permute.xlu1 %783 }
 0x14d   : > { %15462 = vst [vmem:[#allocation14_spill] sm:$0xff] %v9003_v46 }
 0x14e   : > { %1296 = vrot.lane.b32.xlu0 %v8578_v9, %s7958_s29 }
 0x150   : > { %1245 = vrot.lane.b32.xlu1 %v8911_v47, %s7957_s28  ;;  %s7972_s28 = smov 76  }
 0x152   : > { %1300 = vrot.lane.b32.xlu0 %v8600_v12, %s7958_s29 }
 0x154   : > { %1298 = vrot.lane.b32.xlu1 %v8605_v13, %s7958_s29 }
 0x156   : > { %1304 = vrot.lane.b32.xlu0 %v8634_v17, %s7958_s29 }
 0x158   : > { %1302 = vrot.lane.b32.xlu1 %v8629_v16, %s7958_s29 }
 0x15a   : > { %1308 = vrot.lane.b32.xlu0 %v8661_v20, %s7958_s29 }
 0x15c   : > { %1306 = vrot.lane.b32.xlu1 %v8656_v19, %s7958_s29 }
 0x15e   : > { %1312 = vrot.lane.b32.xlu0 %v8690_v24, %s7958_s29 }
 0x160   : > { %1310 = vrot.lane.b32.xlu1 %v8685_v23, %s7958_s29  ;;  %v1078_v37 = vpop.permute.xlu0 %1077 }
 0x161   : > { %1150 = vst.msk [vmem:[%s8230_s26 + $0x18] sm:$0xff] %vm1149_vm5, %v1078_v37 }
 0x162   : > { %1152 = vst.msk [vmem:[%s8230_s26 + $0x20] sm:$0xff] %vm1151_vm6, %v1078_v37  ;;  %1316 = vrot.lane.b32.xlu0 %v8719_v29, %s7958_s29 }
 0x164   : > { %1314 = vrot.lane.b32.xlu1 %v8714_v27, %s7958_s29  ;;  %v1080_v0 = vpop.permute.xlu1 %1079  ;;  %v1082_v44 = vpop.permute.xlu0 %1081 }
 0x165   : > { %1153 = vst.msk [vmem:[%s8230_s26 + $0xd0] sm:$0xff] %vm1149_vm5, %v1080_v0  ;;  %1155 = vst.msk [vmem:[%s8230_s26 + $0x188] sm:$0xff] %vm1149_vm5, %v1082_v44 }
 0x166   : > { %1154 = vst.msk [vmem:[%s8230_s26 + $0xd8] sm:$0xff] %vm1151_vm6, %v1080_v0  ;;  %1156 = vst.msk [vmem:[%s8230_s26 + $0x190] sm:$0xff] %vm1151_vm6, %v1082_v44  ;;  %1320 = vrot.lane.b32.xlu0 %v8746_v35, %s7958_s29 }
 0x168   : > { %1318 = vrot.lane.b32.xlu1 %v8741_v33, %s7958_s29  ;;  %v1084_v37 = vpop.permute.xlu1 %1083  ;;  %v1086_v46 = vpop.permute.xlu0 %1085 }
 0x169   : > { %1157 = vst.msk [vmem:[%s8230_s26 + $0x240] sm:$0xff] %vm1149_vm5, %v1084_v37  ;;  %1159 = vst.msk [vmem:[%s8230_s26 + $0x2f8] sm:$0xff] %vm1149_vm5, %v1086_v46 }
 0x16a   : > { %1158 = vst.msk [vmem:[%s8230_s26 + $0x248] sm:$0xff] %vm1151_vm6, %v1084_v37  ;;  %1160 = vst.msk [vmem:[%s8230_s26 + $0x300] sm:$0xff] %vm1151_vm6, %v1086_v46  ;;  %1324 = vrot.lane.b32.xlu0 %v8775_v1, %s7958_s29 }
 0x16c   : > { %1322 = vrot.lane.b32.xlu1 %v8770_v63, %s7958_s29  ;;  %v1088_v44 = vpop.permute.xlu1 %1087  ;;  %v1090_v0 = vpop.permute.xlu0 %1089 }
 0x16d   : > { %1161 = vst.msk [vmem:[%s8230_s26 + $0x3b0] sm:$0xff] %vm1149_vm5, %v1088_v44  ;;  %1163 = vst.msk [vmem:[%s8230_s26 + $0x468] sm:$0xff] %vm1149_vm5, %v1090_v0 }
 0x16e   : > { %1162 = vst.msk [vmem:[%s8230_s26 + $0x3b8] sm:$0xff] %vm1151_vm6, %v1088_v44  ;;  %1164 = vst.msk [vmem:[%s8230_s26 + $0x470] sm:$0xff] %vm1151_vm6, %v1090_v0  ;;  %1328 = vrot.lane.b32.xlu0 %v8804_v15, %s7958_s29 }
 0x170   : > { %1326 = vrot.lane.b32.xlu1 %v8799_v11, %s7958_s29  ;;  %v1092_v46 = vpop.permute.xlu1 %1091  ;;  %v1094_v37 = vpop.permute.xlu0 %1093 }
 0x171   : > { %1165 = vst.msk [vmem:[%s8230_s26 + $0x520] sm:$0xff] %vm1149_vm5, %v1092_v46  ;;  %1167 = vst.msk [vmem:[%s8230_s26 + $0x5d8] sm:$0xff] %vm1149_vm5, %v1094_v37 }
 0x172   : > { %1166 = vst.msk [vmem:[%s8230_s26 + $0x528] sm:$0xff] %vm1151_vm6, %v1092_v46  ;;  %1168 = vst.msk [vmem:[%s8230_s26 + $0x5e0] sm:$0xff] %vm1151_vm6, %v1094_v37  ;;  %1332 = vrot.lane.b32.xlu0 %v8831_v22, %s7958_s29 }
 0x174   : > { %1330 = vrot.lane.b32.xlu1 %v8826_v18, %s7958_s29  ;;  %v1096_v44 = vpop.permute.xlu1 %1095  ;;  %v1098_v0 = vpop.permute.xlu0 %1097 }
 0x175   : > { %1169 = vst.msk [vmem:[%s8230_s26 + $0x690] sm:$0xff] %vm1149_vm5, %v1096_v44  ;;  %1171 = vst.msk [vmem:[%s8230_s26 + $0x748] sm:$0xff] %vm1149_vm5, %v1098_v0 }
 0x176   : > { %1170 = vst.msk [vmem:[%s8230_s26 + $0x698] sm:$0xff] %vm1151_vm6, %v1096_v44  ;;  %1172 = vst.msk [vmem:[%s8230_s26 + $0x750] sm:$0xff] %vm1151_vm6, %v1098_v0  ;;  %1336 = vrot.lane.b32.xlu0 %v8860_v60, %s7958_s29 }
 0x178   : > { %1334 = vrot.lane.b32.xlu1 %v8855_v31, %s7958_s29  ;;  %v1100_v46 = vpop.permute.xlu1 %1099  ;;  %v1102_v37 = vpop.permute.xlu0 %1101 }
 0x179   : > { %1173 = vst.msk [vmem:[%s8230_s26 + $0x800] sm:$0xff] %vm1149_vm5, %v1100_v46  ;;  %1175 = vst.msk [vmem:[%s8230_s26 + $0x8b8] sm:$0xff] %vm1149_vm5, %v1102_v37 }
 0x17a   : > { %1174 = vst.msk [vmem:[%s8230_s26 + $0x808] sm:$0xff] %vm1151_vm6, %v1100_v46  ;;  %1176 = vst.msk [vmem:[%s8230_s26 + $0x8c0] sm:$0xff] %vm1151_vm6, %v1102_v37  ;;  %1340 = vrot.lane.b32.xlu0 %v8889_v3, %s7958_s29 }
 0x17c   : > { %1338 = vrot.lane.b32.xlu1 %v8884_v41, %s7958_s29  ;;  %v1104_v44 = vpop.permute.xlu1 %1103  ;;  %v1106_v0 = vpop.permute.xlu0 %1105 }
 0x17d   : > { %1177 = vst.msk [vmem:[%s8230_s26 + $0x970] sm:$0xff] %vm1149_vm5, %v1104_v44  ;;  %1179 = vst.msk [vmem:[%s8230_s26 + $0xa28] sm:$0xff] %vm1149_vm5, %v1106_v0 }
 0x17e   : > { %1178 = vst.msk [vmem:[%s8230_s26 + $0x978] sm:$0xff] %vm1151_vm6, %v1104_v44  ;;  %1180 = vst.msk [vmem:[%s8230_s26 + $0xa30] sm:$0xff] %vm1151_vm6, %v1106_v0  ;;  %1418 = vrot.lane.b32.xlu0 %v8578_v9, %s7959_s30 }
 0x180   : > { %1342 = vrot.lane.b32.xlu1 %v8911_v47, %s7958_s29  ;;  %v1108_v46 = vpop.permute.xlu1 %1107  ;;  %v1110_v37 = vpop.permute.xlu0 %1109  ;;  %s7973_s29 = smov 2  }
 0x181   : > { %1181 = vst.msk [vmem:[%s8230_s26 + $0xae0] sm:$0xff] %vm1149_vm5, %v1108_v46  ;;  %1183 = vst.msk [vmem:[%s8230_s26 + $0xb98] sm:$0xff] %vm1149_vm5, %v1110_v37 }
 0x182   : > { %1182 = vst.msk [vmem:[%s8230_s26 + $0xae8] sm:$0xff] %vm1151_vm6, %v1108_v46  ;;  %1184 = vst.msk [vmem:[%s8230_s26 + $0xba0] sm:$0xff] %vm1151_vm6, %v1110_v37  ;;  %1422 = vrot.lane.b32.xlu0 %v8600_v12, %s7959_s30 }
 0x184   : > { %1420 = vrot.lane.b32.xlu1 %v8605_v13, %s7959_s30  ;;  %v1112_v44 = vpop.permute.xlu1 %1111  ;;  %v1114_v0 = vpop.permute.xlu0 %1113 }
 0x185   : > { %1185 = vst.msk [vmem:[%s8230_s26 + $0xc50] sm:$0xff] %vm1149_vm5, %v1112_v44  ;;  %1187 = vst.msk [vmem:[%s8230_s26 + $0xd08] sm:$0xff] %vm1149_vm5, %v1114_v0 }
 0x186   : > { %1186 = vst.msk [vmem:[%s8230_s26 + $0xc58] sm:$0xff] %vm1151_vm6, %v1112_v44  ;;  %1188 = vst.msk [vmem:[%s8230_s26 + $0xd10] sm:$0xff] %vm1151_vm6, %v1114_v0  ;;  %1426 = vrot.lane.b32.xlu0 %v8634_v17, %s7959_s30 }
 0x188   : > { %1424 = vrot.lane.b32.xlu1 %v8629_v16, %s7959_s30  ;;  %v1116_v46 = vpop.permute.xlu1 %1115  ;;  %v1118_v37 = vpop.permute.xlu0 %1117 }
 0x189   : > { %1189 = vst.msk [vmem:[%s8230_s26 + $0xdc0] sm:$0xff] %vm1149_vm5, %v1116_v46  ;;  %1191 = vst.msk [vmem:[%s8230_s26 + $0xe78] sm:$0xff] %vm1149_vm5, %v1118_v37 }
 0x18a   : > { %1190 = vst.msk [vmem:[%s8230_s26 + $0xdc8] sm:$0xff] %vm1151_vm6, %v1116_v46  ;;  %1192 = vst.msk [vmem:[%s8230_s26 + $0xe80] sm:$0xff] %vm1151_vm6, %v1118_v37  ;;  %1430 = vrot.lane.b32.xlu0 %v8661_v20, %s7959_s30 }
 0x18c   : > { %1428 = vrot.lane.b32.xlu1 %v8656_v19, %s7959_s30  ;;  %v1122_v0 = vpop.permute.xlu0 %1121 }
 0x18d   : > { %1195 = vst.msk [vmem:[%s8230_s26 + $0xfe8] sm:$0xff] %vm1149_vm5, %v1122_v0 }
 0x18e   : > { %v1120_v44 = vpop.permute.xlu1 %1119  ;;  %1196 = vst.msk [vmem:[%s8230_s26 + $0xff0] sm:$0xff] %vm1151_vm6, %v1122_v0  ;;  %1434 = vrot.lane.b32.xlu0 %v8690_v24, %s7959_s30 }
 0x18f   : > { %1193 = vst.msk [vmem:[%s8230_s26 + $0xf30] sm:$0xff] %vm1149_vm5, %v1120_v44 }
 0x190   : > { %1194 = vst.msk [vmem:[%s8230_s26 + $0xf38] sm:$0xff] %vm1151_vm6, %v1120_v44  ;;  %1432 = vrot.lane.b32.xlu1 %v8685_v23, %s7959_s30  ;;  %v1200_v37 = vpop.permute.xlu0 %1199 }
 0x191   : > { %1272 = vst.msk [vmem:[%s8230_s26 + $0x20] sm:$0xff] %vm1271_vm7, %v1200_v37 }
 0x192   : > { %v1124_v46 = vpop.permute.xlu1 %1123  ;;  %1438 = vrot.lane.b32.xlu0 %v8719_v29, %s7959_s30 }
 0x193   : > { %1197 = vst.msk [vmem:[%s8230_s26 + $0x10a0] sm:$0xff] %vm1149_vm5, %v1124_v46  ;;  %vm2316_vm5 = vcmask 1048288  }
 0x194   : > { %1198 = vst.msk [vmem:[%s8230_s26 + $0x10a8] sm:$0xff] %vm1151_vm6, %v1124_v46  ;;  %1436 = vrot.lane.b32.xlu1 %v8714_v27, %s7959_s30  ;;  %v1204_v0 = vpop.permute.xlu0 %1203  ;;  %vm2318_vm6 = vcmask 146432  }
 0x195   : > { %1274 = vst.msk [vmem:[%s8230_s26 + $0x190] sm:$0xff] %vm1271_vm7, %v1204_v0 }
 0x196   : > { %v1202_v44 = vpop.permute.xlu1 %1201  ;;  %1442 = vrot.lane.b32.xlu0 %v8746_v35, %s7959_s30 }
 0x197   : > { %1273 = vst.msk [vmem:[%s8230_s26 + $0xd8] sm:$0xff] %vm1271_vm7, %v1202_v44 }
 0x198   : > { %1440 = vrot.lane.b32.xlu1 %v8741_v33, %s7959_s30  ;;  %v1208_v37 = vpop.permute.xlu0 %1207 }
 0x199   : > { %1276 = vst.msk [vmem:[%s8230_s26 + $0x300] sm:$0xff] %vm1271_vm7, %v1208_v37 }
 0x19a   : > { %v1206_v46 = vpop.permute.xlu1 %1205  ;;  %1446 = vrot.lane.b32.xlu0 %v8775_v1, %s7959_s30 }
 0x19b   : > { %1275 = vst.msk [vmem:[%s8230_s26 + $0x248] sm:$0xff] %vm1271_vm7, %v1206_v46 }
 0x19c   : > { %1444 = vrot.lane.b32.xlu1 %v8770_v63, %s7959_s30  ;;  %v1212_v0 = vpop.permute.xlu0 %1211 }
 0x19d   : > { %1278 = vst.msk [vmem:[%s8230_s26 + $0x470] sm:$0xff] %vm1271_vm7, %v1212_v0 }
 0x19e   : > { %v1210_v44 = vpop.permute.xlu1 %1209  ;;  %1450 = vrot.lane.b32.xlu0 %v8804_v15, %s7959_s30 }
 0x19f   : > { %1277 = vst.msk [vmem:[%s8230_s26 + $0x3b8] sm:$0xff] %vm1271_vm7, %v1210_v44 }
 0x1a0   : > { %1448 = vrot.lane.b32.xlu1 %v8799_v11, %s7959_s30  ;;  %v1216_v37 = vpop.permute.xlu0 %1215 }
 0x1a1   : > { %1280 = vst.msk [vmem:[%s8230_s26 + $0x5e0] sm:$0xff] %vm1271_vm7, %v1216_v37 }
 0x1a2   : > { %v1214_v46 = vpop.permute.xlu1 %1213  ;;  %1454 = vrot.lane.b32.xlu0 %v8831_v22, %s7959_s30 }
 0x1a3   : > { %1279 = vst.msk [vmem:[%s8230_s26 + $0x528] sm:$0xff] %vm1271_vm7, %v1214_v46 }
 0x1a4   : > { %1452 = vrot.lane.b32.xlu1 %v8826_v18, %s7959_s30  ;;  %v1220_v0 = vpop.permute.xlu0 %1219 }
 0x1a5   : > { %1282 = vst.msk [vmem:[%s8230_s26 + $0x750] sm:$0xff] %vm1271_vm7, %v1220_v0 }
 0x1a6   : > { %v1218_v44 = vpop.permute.xlu1 %1217  ;;  %1458 = vrot.lane.b32.xlu0 %v8860_v60, %s7959_s30 }
 0x1a7   : > { %1281 = vst.msk [vmem:[%s8230_s26 + $0x698] sm:$0xff] %vm1271_vm7, %v1218_v44 }
 0x1a8   : > { %1456 = vrot.lane.b32.xlu1 %v8855_v31, %s7959_s30  ;;  %v1224_v37 = vpop.permute.xlu0 %1223 }
 0x1a9   : > { %1284 = vst.msk [vmem:[%s8230_s26 + $0x8c0] sm:$0xff] %vm1271_vm7, %v1224_v37 }
 0x1aa   : > { %v1222_v46 = vpop.permute.xlu1 %1221  ;;  %1462 = vrot.lane.b32.xlu0 %v8889_v3, %s7959_s30 }
 0x1ab   : > { %1283 = vst.msk [vmem:[%s8230_s26 + $0x808] sm:$0xff] %vm1271_vm7, %v1222_v46 }
 0x1ac   : > { %1460 = vrot.lane.b32.xlu1 %v8884_v41, %s7959_s30  ;;  %v1228_v0 = vpop.permute.xlu0 %1227 }
 0x1ad   : > { %1286 = vst.msk [vmem:[%s8230_s26 + $0xa30] sm:$0xff] %vm1271_vm7, %v1228_v0 }
 0x1ae   : > { %v1226_v44 = vpop.permute.xlu1 %1225  ;;  %1515 = vrot.lane.b32.xlu0 %v8578_v9, %s7960_s13 }
 0x1af   : > { %1285 = vst.msk [vmem:[%s8230_s26 + $0x978] sm:$0xff] %vm1271_vm7, %v1226_v44 }
 0x1b0   : > { %1464 = vrot.lane.b32.xlu1 %v8911_v47, %s7959_s30  ;;  %v1232_v37 = vpop.permute.xlu0 %1231  ;;  %s7974_s30 = smov 56  }
 0x1b1   : > { %1288 = vst.msk [vmem:[%s8230_s26 + $0xba0] sm:$0xff] %vm1271_vm7, %v1232_v37 }
 0x1b2   : > { %v1230_v46 = vpop.permute.xlu1 %1229  ;;  %1519 = vrot.lane.b32.xlu0 %v8600_v12, %s7960_s13 }
 0x1b3   : > { %1287 = vst.msk [vmem:[%s8230_s26 + $0xae8] sm:$0xff] %vm1271_vm7, %v1230_v46 }
 0x1b4   : > { %1517 = vrot.lane.b32.xlu1 %v8605_v13, %s7960_s13  ;;  %v1236_v0 = vpop.permute.xlu0 %1235 }
 0x1b5   : > { %1290 = vst.msk [vmem:[%s8230_s26 + $0xd10] sm:$0xff] %vm1271_vm7, %v1236_v0 }
 0x1b6   : > { %v1234_v44 = vpop.permute.xlu1 %1233  ;;  %1523 = vrot.lane.b32.xlu0 %v8634_v17, %s7960_s13 }
 0x1b7   : > { %1289 = vst.msk [vmem:[%s8230_s26 + $0xc58] sm:$0xff] %vm1271_vm7, %v1234_v44 }
 0x1b8   : > { %1521 = vrot.lane.b32.xlu1 %v8629_v16, %s7960_s13  ;;  %v1240_v37 = vpop.permute.xlu0 %1239 }
 0x1b9   : > { %1292 = vst.msk [vmem:[%s8230_s26 + $0xe80] sm:$0xff] %vm1271_vm7, %v1240_v37 }
 0x1ba   : > { %v1238_v46 = vpop.permute.xlu1 %1237  ;;  %1527 = vrot.lane.b32.xlu0 %v8661_v20, %s7960_s13 }
 0x1bb   : > { %1291 = vst.msk [vmem:[%s8230_s26 + $0xdc8] sm:$0xff] %vm1271_vm7, %v1238_v46 }
 0x1bc   : > { %1525 = vrot.lane.b32.xlu1 %v8656_v19, %s7960_s13  ;;  %v1244_v0 = vpop.permute.xlu0 %1243 }
 0x1bd   : > { %1294 = vst.msk [vmem:[%s8230_s26 + $0xff0] sm:$0xff] %vm1271_vm7, %v1244_v0 }
 0x1be   : > { %v1242_v44 = vpop.permute.xlu1 %1241  ;;  %1531 = vrot.lane.b32.xlu0 %v8690_v24, %s7960_s13 }
 0x1bf   : > { %1293 = vst.msk [vmem:[%s8230_s26 + $0xf38] sm:$0xff] %vm1271_vm7, %v1242_v44 }
 0x1c0   : > { %1529 = vrot.lane.b32.xlu1 %v8685_v23, %s7960_s13  ;;  %v1297_v37 = vpop.permute.xlu0 %1296 }
 0x1c1   : > { %1369 = vst.msk [vmem:[%s8230_s26 + $0x20] sm:$0xff] %vm1368_vm8, %v1297_v37 }
 0x1c2   : > { %v1246_v46 = vpop.permute.xlu1 %1245  ;;  %1371 = vst.msk [vmem:[%s8230_s26 + $0x28] sm:$0xff] %vm1370_vm9, %v1297_v37  ;;  %1535 = vrot.lane.b32.xlu0 %v8719_v29, %s7960_s13 }
 0x1c3   : > { %1295 = vst.msk [vmem:[%s8230_s26 + $0x10a8] sm:$0xff] %vm1271_vm7, %v1246_v46  ;;  %vm687_vm7 = vcmp.lt.s32.totalorder %v8572_v7, 16 }
 0x1c4   : > { %1533 = vrot.lane.b32.xlu1 %v8714_v27, %s7960_s13  ;;  %v1301_v0 = vpop.permute.xlu0 %1300 }
 0x1c5   : > { %1374 = vst.msk [vmem:[%s8230_s26 + $0x190] sm:$0xff] %vm1368_vm8, %v1301_v0 }
 0x1c6   : > { %v1299_v44 = vpop.permute.xlu1 %1298  ;;  %1375 = vst.msk [vmem:[%s8230_s26 + $0x198] sm:$0xff] %vm1370_vm9, %v1301_v0  ;;  %1539 = vrot.lane.b32.xlu0 %v8746_v35, %s7960_s13 }
 0x1c7   : > { %1372 = vst.msk [vmem:[%s8230_s26 + $0xd8] sm:$0xff] %vm1368_vm8, %v1299_v44 }
 0x1c8   : > { %1373 = vst.msk [vmem:[%s8230_s26 + $0xe0] sm:$0xff] %vm1370_vm9, %v1299_v44  ;;  %1537 = vrot.lane.b32.xlu1 %v8741_v33, %s7960_s13  ;;  %v1305_v37 = vpop.permute.xlu0 %1304 }
 0x1c9   : > { %1378 = vst.msk [vmem:[%s8230_s26 + $0x300] sm:$0xff] %vm1368_vm8, %v1305_v37 }
 0x1ca   : > { %v1303_v46 = vpop.permute.xlu1 %1302  ;;  %1379 = vst.msk [vmem:[%s8230_s26 + $0x308] sm:$0xff] %vm1370_vm9, %v1305_v37  ;;  %1543 = vrot.lane.b32.xlu0 %v8775_v1, %s7960_s13 }
 0x1cb   : > { %1376 = vst.msk [vmem:[%s8230_s26 + $0x248] sm:$0xff] %vm1368_vm8, %v1303_v46 }
 0x1cc   : > { %1377 = vst.msk [vmem:[%s8230_s26 + $0x250] sm:$0xff] %vm1370_vm9, %v1303_v46  ;;  %1541 = vrot.lane.b32.xlu1 %v8770_v63, %s7960_s13  ;;  %v1309_v0 = vpop.permute.xlu0 %1308 }
 0x1cd   : > { %1382 = vst.msk [vmem:[%s8230_s26 + $0x470] sm:$0xff] %vm1368_vm8, %v1309_v0 }
 0x1ce   : > { %v1307_v44 = vpop.permute.xlu1 %1306  ;;  %1383 = vst.msk [vmem:[%s8230_s26 + $0x478] sm:$0xff] %vm1370_vm9, %v1309_v0  ;;  %1547 = vrot.lane.b32.xlu0 %v8804_v15, %s7960_s13 }
 0x1cf   : > { %1380 = vst.msk [vmem:[%s8230_s26 + $0x3b8] sm:$0xff] %vm1368_vm8, %v1307_v44 }
 0x1d0   : > { %1381 = vst.msk [vmem:[%s8230_s26 + $0x3c0] sm:$0xff] %vm1370_vm9, %v1307_v44  ;;  %1545 = vrot.lane.b32.xlu1 %v8799_v11, %s7960_s13  ;;  %v1313_v37 = vpop.permute.xlu0 %1312 }
 0x1d1   : > { %1386 = vst.msk [vmem:[%s8230_s26 + $0x5e0] sm:$0xff] %vm1368_vm8, %v1313_v37 }
 0x1d2   : > { %v1311_v46 = vpop.permute.xlu1 %1310  ;;  %1387 = vst.msk [vmem:[%s8230_s26 + $0x5e8] sm:$0xff] %vm1370_vm9, %v1313_v37  ;;  %1551 = vrot.lane.b32.xlu0 %v8831_v22, %s7960_s13 }
 0x1d3   : > { %1384 = vst.msk [vmem:[%s8230_s26 + $0x528] sm:$0xff] %vm1368_vm8, %v1311_v46 }
 0x1d4   : > { %1385 = vst.msk [vmem:[%s8230_s26 + $0x530] sm:$0xff] %vm1370_vm9, %v1311_v46  ;;  %1549 = vrot.lane.b32.xlu1 %v8826_v18, %s7960_s13  ;;  %v1317_v0 = vpop.permute.xlu0 %1316 }
 0x1d5   : > { %1390 = vst.msk [vmem:[%s8230_s26 + $0x750] sm:$0xff] %vm1368_vm8, %v1317_v0 }
 0x1d6   : > { %v1315_v44 = vpop.permute.xlu1 %1314  ;;  %1391 = vst.msk [vmem:[%s8230_s26 + $0x758] sm:$0xff] %vm1370_vm9, %v1317_v0  ;;  %1555 = vrot.lane.b32.xlu0 %v8860_v60, %s7960_s13 }
 0x1d7   : > { %1388 = vst.msk [vmem:[%s8230_s26 + $0x698] sm:$0xff] %vm1368_vm8, %v1315_v44 }
 0x1d8   : > { %1389 = vst.msk [vmem:[%s8230_s26 + $0x6a0] sm:$0xff] %vm1370_vm9, %v1315_v44  ;;  %1553 = vrot.lane.b32.xlu1 %v8855_v31, %s7960_s13  ;;  %v1321_v37 = vpop.permute.xlu0 %1320 }
 0x1d9   : > { %1394 = vst.msk [vmem:[%s8230_s26 + $0x8c0] sm:$0xff] %vm1368_vm8, %v1321_v37 }
 0x1da   : > { %v1319_v46 = vpop.permute.xlu1 %1318  ;;  %1395 = vst.msk [vmem:[%s8230_s26 + $0x8c8] sm:$0xff] %vm1370_vm9, %v1321_v37  ;;  %1559 = vrot.lane.b32.xlu0 %v8889_v3, %s7960_s13 }
 0x1db   : > { %1392 = vst.msk [vmem:[%s8230_s26 + $0x808] sm:$0xff] %vm1368_vm8, %v1319_v46 }
 0x1dc   : > { %1393 = vst.msk [vmem:[%s8230_s26 + $0x810] sm:$0xff] %vm1370_vm9, %v1319_v46  ;;  %1557 = vrot.lane.b32.xlu1 %v8884_v41, %s7960_s13  ;;  %v1325_v0 = vpop.permute.xlu0 %1324 }
 0x1dd   : > { %1398 = vst.msk [vmem:[%s8230_s26 + $0xa30] sm:$0xff] %vm1368_vm8, %v1325_v0 }
 0x1de   : > { %v1323_v44 = vpop.permute.xlu1 %1322  ;;  %1399 = vst.msk [vmem:[%s8230_s26 + $0xa38] sm:$0xff] %vm1370_vm9, %v1325_v0  ;;  %1612 = vrot.lane.b32.xlu0 %v8578_v9, %s7961_s14 }
 0x1df   : > { %1396 = vst.msk [vmem:[%s8230_s26 + $0x978] sm:$0xff] %vm1368_vm8, %v1323_v44 }
 0x1e0   : > { %1397 = vst.msk [vmem:[%s8230_s26 + $0x980] sm:$0xff] %vm1370_vm9, %v1323_v44  ;;  %1561 = vrot.lane.b32.xlu1 %v8911_v47, %s7960_s13  ;;  %v1329_v37 = vpop.permute.xlu0 %1328  ;;  %s7975_s13 = smov 110  }
 0x1e1   : > { %1402 = vst.msk [vmem:[%s8230_s26 + $0xba0] sm:$0xff] %vm1368_vm8, %v1329_v37 }
 0x1e2   : > { %v1327_v46 = vpop.permute.xlu1 %1326  ;;  %1403 = vst.msk [vmem:[%s8230_s26 + $0xba8] sm:$0xff] %vm1370_vm9, %v1329_v37  ;;  %1616 = vrot.lane.b32.xlu0 %v8600_v12, %s7961_s14 }
 0x1e3   : > { %1400 = vst.msk [vmem:[%s8230_s26 + $0xae8] sm:$0xff] %vm1368_vm8, %v1327_v46 }
 0x1e4   : > { %1401 = vst.msk [vmem:[%s8230_s26 + $0xaf0] sm:$0xff] %vm1370_vm9, %v1327_v46  ;;  %1614 = vrot.lane.b32.xlu1 %v8605_v13, %s7961_s14  ;;  %v1333_v0 = vpop.permute.xlu0 %1332 }
 0x1e5   : > { %1406 = vst.msk [vmem:[%s8230_s26 + $0xd10] sm:$0xff] %vm1368_vm8, %v1333_v0 }
 0x1e6   : > { %v1331_v44 = vpop.permute.xlu1 %1330  ;;  %1407 = vst.msk [vmem:[%s8230_s26 + $0xd18] sm:$0xff] %vm1370_vm9, %v1333_v0  ;;  %1620 = vrot.lane.b32.xlu0 %v8634_v17, %s7961_s14 }
 0x1e7   : > { %1404 = vst.msk [vmem:[%s8230_s26 + $0xc58] sm:$0xff] %vm1368_vm8, %v1331_v44 }
 0x1e8   : > { %1405 = vst.msk [vmem:[%s8230_s26 + $0xc60] sm:$0xff] %vm1370_vm9, %v1331_v44  ;;  %1618 = vrot.lane.b32.xlu1 %v8629_v16, %s7961_s14  ;;  %v1337_v37 = vpop.permute.xlu0 %1336 }
 0x1e9   : > { %1410 = vst.msk [vmem:[%s8230_s26 + $0xe80] sm:$0xff] %vm1368_vm8, %v1337_v37 }
 0x1ea   : > { %v1335_v46 = vpop.permute.xlu1 %1334  ;;  %1411 = vst.msk [vmem:[%s8230_s26 + $0xe88] sm:$0xff] %vm1370_vm9, %v1337_v37  ;;  %1624 = vrot.lane.b32.xlu0 %v8661_v20, %s7961_s14 }
 0x1eb   : > { %1408 = vst.msk [vmem:[%s8230_s26 + $0xdc8] sm:$0xff] %vm1368_vm8, %v1335_v46 }
 0x1ec   : > { %1409 = vst.msk [vmem:[%s8230_s26 + $0xdd0] sm:$0xff] %vm1370_vm9, %v1335_v46  ;;  %1622 = vrot.lane.b32.xlu1 %v8656_v19, %s7961_s14  ;;  %v1341_v0 = vpop.permute.xlu0 %1340 }
 0x1ed   : > { %1414 = vst.msk [vmem:[%s8230_s26 + $0xff0] sm:$0xff] %vm1368_vm8, %v1341_v0 }
 0x1ee   : > { %v1339_v44 = vpop.permute.xlu1 %1338  ;;  %1415 = vst.msk [vmem:[%s8230_s26 + $0xff8] sm:$0xff] %vm1370_vm9, %v1341_v0  ;;  %1628 = vrot.lane.b32.xlu0 %v8690_v24, %s7961_s14 }
 0x1ef   : > { %1412 = vst.msk [vmem:[%s8230_s26 + $0xf38] sm:$0xff] %vm1368_vm8, %v1339_v44 }
 0x1f0   : > { %1413 = vst.msk [vmem:[%s8230_s26 + $0xf40] sm:$0xff] %vm1370_vm9, %v1339_v44  ;;  %1626 = vrot.lane.b32.xlu1 %v8685_v23, %s7961_s14  ;;  %v1419_v37 = vpop.permute.xlu0 %1418 }
 0x1f1   : > { %1491 = vst.msk [vmem:[%s8230_s26 + $0x28] sm:$0xff] %vm1490_vm10, %v1419_v37 }
 0x1f2   : > { %v1343_v46 = vpop.permute.xlu1 %1342  ;;  %1632 = vrot.lane.b32.xlu0 %v8719_v29, %s7961_s14 }
 0x1f3   : > { %1416 = vst.msk [vmem:[%s8230_s26 + $0x10a8] sm:$0xff] %vm1368_vm8, %v1343_v46  ;;  %vm2438_vm8 = vcmask 588944  }
 0x1f4   : > { %1417 = vst.msk [vmem:[%s8230_s26 + $0x10b0] sm:$0xff] %vm1370_vm9, %v1343_v46  ;;  %1630 = vrot.lane.b32.xlu1 %v8714_v27, %s7961_s14  ;;  %v1423_v0 = vpop.permute.xlu0 %1422  ;;  %vm2656_vm9 = vcmask 1048320  }
 0x1f5   : > { %1493 = vst.msk [vmem:[%s8230_s26 + $0x198] sm:$0xff] %vm1490_vm10, %v1423_v0 }
 0x1f6   : > { %v1421_v44 = vpop.permute.xlu1 %1420  ;;  %1636 = vrot.lane.b32.xlu0 %v8746_v35, %s7961_s14 }
 0x1f7   : > { %1492 = vst.msk [vmem:[%s8230_s26 + $0xe0] sm:$0xff] %vm1490_vm10, %v1421_v44 }
 0x1f8   : > { %1634 = vrot.lane.b32.xlu1 %v8741_v33, %s7961_s14  ;;  %v1427_v37 = vpop.permute.xlu0 %1426 }
 0x1f9   : > { %1495 = vst.msk [vmem:[%s8230_s26 + $0x308] sm:$0xff] %vm1490_vm10, %v1427_v37 }
 0x1fa   : > { %v1425_v46 = vpop.permute.xlu1 %1424  ;;  %1640 = vrot.lane.b32.xlu0 %v8775_v1, %s7961_s14 }
 0x1fb   : > { %1494 = vst.msk [vmem:[%s8230_s26 + $0x250] sm:$0xff] %vm1490_vm10, %v1425_v46 }
 0x1fc   : > { %1638 = vrot.lane.b32.xlu1 %v8770_v63, %s7961_s14  ;;  %v1431_v0 = vpop.permute.xlu0 %1430 }
 0x1fd   : > { %1497 = vst.msk [vmem:[%s8230_s26 + $0x478] sm:$0xff] %vm1490_vm10, %v1431_v0 }
 0x1fe   : > { %v1429_v44 = vpop.permute.xlu1 %1428  ;;  %1644 = vrot.lane.b32.xlu0 %v8804_v15, %s7961_s14 }
 0x1ff   : > { %1496 = vst.msk [vmem:[%s8230_s26 + $0x3c0] sm:$0xff] %vm1490_vm10, %v1429_v44 }
 0x200   : > { %1642 = vrot.lane.b32.xlu1 %v8799_v11, %s7961_s14  ;;  %v1435_v37 = vpop.permute.xlu0 %1434 }
 0x201   : > { %1499 = vst.msk [vmem:[%s8230_s26 + $0x5e8] sm:$0xff] %vm1490_vm10, %v1435_v37 }
 0x202   : > { %v1433_v46 = vpop.permute.xlu1 %1432  ;;  %1648 = vrot.lane.b32.xlu0 %v8831_v22, %s7961_s14 }
 0x203   : > { %1498 = vst.msk [vmem:[%s8230_s26 + $0x530] sm:$0xff] %vm1490_vm10, %v1433_v46 }
 0x204   : > { %1646 = vrot.lane.b32.xlu1 %v8826_v18, %s7961_s14  ;;  %v1439_v0 = vpop.permute.xlu0 %1438 }
 0x205   : > { %1501 = vst.msk [vmem:[%s8230_s26 + $0x758] sm:$0xff] %vm1490_vm10, %v1439_v0 }
 0x206   : > { %v1437_v44 = vpop.permute.xlu1 %1436  ;;  %1652 = vrot.lane.b32.xlu0 %v8860_v60, %s7961_s14 }
 0x207   : > { %1500 = vst.msk [vmem:[%s8230_s26 + $0x6a0] sm:$0xff] %vm1490_vm10, %v1437_v44 }
 0x208   : > { %1650 = vrot.lane.b32.xlu1 %v8855_v31, %s7961_s14  ;;  %v1443_v37 = vpop.permute.xlu0 %1442 }
 0x209   : > { %1503 = vst.msk [vmem:[%s8230_s26 + $0x8c8] sm:$0xff] %vm1490_vm10, %v1443_v37 }
 0x20a   : > { %v1441_v46 = vpop.permute.xlu1 %1440  ;;  %1656 = vrot.lane.b32.xlu0 %v8889_v3, %s7961_s14 }
 0x20b   : > { %1502 = vst.msk [vmem:[%s8230_s26 + $0x810] sm:$0xff] %vm1490_vm10, %v1441_v46 }
 0x20c   : > { %1654 = vrot.lane.b32.xlu1 %v8884_v41, %s7961_s14  ;;  %v1447_v0 = vpop.permute.xlu0 %1446 }
 0x20d   : > { %1505 = vst.msk [vmem:[%s8230_s26 + $0xa38] sm:$0xff] %vm1490_vm10, %v1447_v0 }
 0x20e   : > { %v1445_v44 = vpop.permute.xlu1 %1444  ;;  %1734 = vrot.lane.b32.xlu0 %v8578_v9, %s7962_s15 }
 0x20f   : > { %1504 = vst.msk [vmem:[%s8230_s26 + $0x980] sm:$0xff] %vm1490_vm10, %v1445_v44 }
 0x210   : > { %1658 = vrot.lane.b32.xlu1 %v8911_v47, %s7961_s14  ;;  %v1451_v37 = vpop.permute.xlu0 %1450  ;;  %s7976_s14 = smov 36  }
 0x211   : > { %1507 = vst.msk [vmem:[%s8230_s26 + $0xba8] sm:$0xff] %vm1490_vm10, %v1451_v37 }
 0x212   : > { %v1449_v46 = vpop.permute.xlu1 %1448  ;;  %1738 = vrot.lane.b32.xlu0 %v8600_v12, %s7962_s15 }
 0x213   : > { %1506 = vst.msk [vmem:[%s8230_s26 + $0xaf0] sm:$0xff] %vm1490_vm10, %v1449_v46 }
 0x214   : > { %1736 = vrot.lane.b32.xlu1 %v8605_v13, %s7962_s15  ;;  %v1455_v0 = vpop.permute.xlu0 %1454 }
 0x215   : > { %1509 = vst.msk [vmem:[%s8230_s26 + $0xd18] sm:$0xff] %vm1490_vm10, %v1455_v0 }
 0x216   : > { %v1453_v44 = vpop.permute.xlu1 %1452  ;;  %1742 = vrot.lane.b32.xlu0 %v8634_v17, %s7962_s15 }
 0x217   : > { %1508 = vst.msk [vmem:[%s8230_s26 + $0xc60] sm:$0xff] %vm1490_vm10, %v1453_v44 }
 0x218   : > { %1740 = vrot.lane.b32.xlu1 %v8629_v16, %s7962_s15  ;;  %v1459_v37 = vpop.permute.xlu0 %1458 }
 0x219   : > { %1511 = vst.msk [vmem:[%s8230_s26 + $0xe88] sm:$0xff] %vm1490_vm10, %v1459_v37 }
 0x21a   : > { %v1457_v46 = vpop.permute.xlu1 %1456  ;;  %1746 = vrot.lane.b32.xlu0 %v8661_v20, %s7962_s15 }
 0x21b   : > { %1510 = vst.msk [vmem:[%s8230_s26 + $0xdd0] sm:$0xff] %vm1490_vm10, %v1457_v46 }
 0x21c   : > { %1744 = vrot.lane.b32.xlu1 %v8656_v19, %s7962_s15  ;;  %v1463_v0 = vpop.permute.xlu0 %1462 }
 0x21d   : > { %1513 = vst.msk [vmem:[%s8230_s26 + $0xff8] sm:$0xff] %vm1490_vm10, %v1463_v0 }
 0x21e   : > { %v1461_v44 = vpop.permute.xlu1 %1460  ;;  %1750 = vrot.lane.b32.xlu0 %v8690_v24, %s7962_s15 }
 0x21f   : > { %1512 = vst.msk [vmem:[%s8230_s26 + $0xf40] sm:$0xff] %vm1490_vm10, %v1461_v44 }
 0x220   : > { %1748 = vrot.lane.b32.xlu1 %v8685_v23, %s7962_s15  ;;  %v1516_v37 = vpop.permute.xlu0 %1515 }
 0x221   : > { %1588 = vst.msk [vmem:[%s8230_s26 + $0x28] sm:$0xff] %vm1587_vm11, %v1516_v37 }
 0x222   : > { %v1465_v46 = vpop.permute.xlu1 %1464  ;;  %1754 = vrot.lane.b32.xlu0 %v8719_v29, %s7962_s15 }
 0x223   : > { %1514 = vst.msk [vmem:[%s8230_s26 + $0x10b0] sm:$0xff] %vm1490_vm10, %v1465_v46  ;;  %vm2658_vm10 = vcmask 179200  }
 0x224   : > { %1752 = vrot.lane.b32.xlu1 %v8714_v27, %s7962_s15  ;;  %v1520_v0 = vpop.permute.xlu0 %1519 }
 0x225   : > { %1590 = vst.msk [vmem:[%s8230_s26 + $0x198] sm:$0xff] %vm1587_vm11, %v1520_v0 }
 0x226   : > { %v1518_v44 = vpop.permute.xlu1 %1517  ;;  %1758 = vrot.lane.b32.xlu0 %v8746_v35, %s7962_s15 }
 0x227   : > { %1589 = vst.msk [vmem:[%s8230_s26 + $0xe0] sm:$0xff] %vm1587_vm11, %v1518_v44 }
 0x228   : > { %1756 = vrot.lane.b32.xlu1 %v8741_v33, %s7962_s15  ;;  %v1524_v37 = vpop.permute.xlu0 %1523 }
 0x229   : > { %1592 = vst.msk [vmem:[%s8230_s26 + $0x308] sm:$0xff] %vm1587_vm11, %v1524_v37 }
 0x22a   : > { %v1522_v46 = vpop.permute.xlu1 %1521  ;;  %1762 = vrot.lane.b32.xlu0 %v8775_v1, %s7962_s15 }
 0x22b   : > { %1591 = vst.msk [vmem:[%s8230_s26 + $0x250] sm:$0xff] %vm1587_vm11, %v1522_v46 }
 0x22c   : > { %1760 = vrot.lane.b32.xlu1 %v8770_v63, %s7962_s15  ;;  %v1528_v0 = vpop.permute.xlu0 %1527 }
 0x22d   : > { %1594 = vst.msk [vmem:[%s8230_s26 + $0x478] sm:$0xff] %vm1587_vm11, %v1528_v0 }
 0x22e   : > { %v1526_v44 = vpop.permute.xlu1 %1525  ;;  %1766 = vrot.lane.b32.xlu0 %v8804_v15, %s7962_s15 }
 0x22f   : > { %1593 = vst.msk [vmem:[%s8230_s26 + $0x3c0] sm:$0xff] %vm1587_vm11, %v1526_v44 }
 0x230   : > { %1764 = vrot.lane.b32.xlu1 %v8799_v11, %s7962_s15  ;;  %v1532_v37 = vpop.permute.xlu0 %1531 }
 0x231   : > { %1596 = vst.msk [vmem:[%s8230_s26 + $0x5e8] sm:$0xff] %vm1587_vm11, %v1532_v37 }
 0x232   : > { %v1530_v46 = vpop.permute.xlu1 %1529  ;;  %1770 = vrot.lane.b32.xlu0 %v8831_v22, %s7962_s15 }
 0x233   : > { %1595 = vst.msk [vmem:[%s8230_s26 + $0x530] sm:$0xff] %vm1587_vm11, %v1530_v46 }
 0x234   : > { %1768 = vrot.lane.b32.xlu1 %v8826_v18, %s7962_s15  ;;  %v1536_v0 = vpop.permute.xlu0 %1535 }
 0x235   : > { %1598 = vst.msk [vmem:[%s8230_s26 + $0x758] sm:$0xff] %vm1587_vm11, %v1536_v0 }
 0x236   : > { %v1534_v44 = vpop.permute.xlu1 %1533  ;;  %1774 = vrot.lane.b32.xlu0 %v8860_v60, %s7962_s15 }
 0x237   : > { %1597 = vst.msk [vmem:[%s8230_s26 + $0x6a0] sm:$0xff] %vm1587_vm11, %v1534_v44 }
 0x238   : > { %1772 = vrot.lane.b32.xlu1 %v8855_v31, %s7962_s15  ;;  %v1540_v37 = vpop.permute.xlu0 %1539 }
 0x239   : > { %1600 = vst.msk [vmem:[%s8230_s26 + $0x8c8] sm:$0xff] %vm1587_vm11, %v1540_v37 }
 0x23a   : > { %v1538_v46 = vpop.permute.xlu1 %1537  ;;  %1778 = vrot.lane.b32.xlu0 %v8889_v3, %s7962_s15 }
 0x23b   : > { %1599 = vst.msk [vmem:[%s8230_s26 + $0x810] sm:$0xff] %vm1587_vm11, %v1538_v46 }
 0x23c   : > { %1776 = vrot.lane.b32.xlu1 %v8884_v41, %s7962_s15  ;;  %v1544_v0 = vpop.permute.xlu0 %1543 }
 0x23d   : > { %1602 = vst.msk [vmem:[%s8230_s26 + $0xa38] sm:$0xff] %vm1587_vm11, %v1544_v0 }
 0x23e   : > { %v1542_v44 = vpop.permute.xlu1 %1541  ;;  %1831 = vrot.lane.b32.xlu0 %v8578_v9, %s7963_s16 }
 0x23f   : > { %1601 = vst.msk [vmem:[%s8230_s26 + $0x980] sm:$0xff] %vm1587_vm11, %v1542_v44 }
 0x240   : > { %1780 = vrot.lane.b32.xlu1 %v8911_v47, %s7962_s15  ;;  %v1548_v37 = vpop.permute.xlu0 %1547  ;;  %s7977_s15 = smov 90  }
 0x241   : > { %1604 = vst.msk [vmem:[%s8230_s26 + $0xba8] sm:$0xff] %vm1587_vm11, %v1548_v37 }
 0x242   : > { %v1546_v46 = vpop.permute.xlu1 %1545  ;;  %1835 = vrot.lane.b32.xlu0 %v8600_v12, %s7963_s16 }
 0x243   : > { %1603 = vst.msk [vmem:[%s8230_s26 + $0xaf0] sm:$0xff] %vm1587_vm11, %v1546_v46 }
 0x244   : > { %1833 = vrot.lane.b32.xlu1 %v8605_v13, %s7963_s16  ;;  %v1552_v0 = vpop.permute.xlu0 %1551 }
 0x245   : > { %1606 = vst.msk [vmem:[%s8230_s26 + $0xd18] sm:$0xff] %vm1587_vm11, %v1552_v0 }
 0x246   : > { %v1550_v44 = vpop.permute.xlu1 %1549  ;;  %1839 = vrot.lane.b32.xlu0 %v8634_v17, %s7963_s16 }
 0x247   : > { %1605 = vst.msk [vmem:[%s8230_s26 + $0xc60] sm:$0xff] %vm1587_vm11, %v1550_v44 }
 0x248   : > { %1837 = vrot.lane.b32.xlu1 %v8629_v16, %s7963_s16  ;;  %v1556_v37 = vpop.permute.xlu0 %1555 }
 0x249   : > { %1608 = vst.msk [vmem:[%s8230_s26 + $0xe88] sm:$0xff] %vm1587_vm11, %v1556_v37 }
 0x24a   : > { %v1554_v46 = vpop.permute.xlu1 %1553  ;;  %1843 = vrot.lane.b32.xlu0 %v8661_v20, %s7963_s16 }
 0x24b   : > { %1607 = vst.msk [vmem:[%s8230_s26 + $0xdd0] sm:$0xff] %vm1587_vm11, %v1554_v46 }
 0x24c   : > { %1841 = vrot.lane.b32.xlu1 %v8656_v19, %s7963_s16  ;;  %v1560_v0 = vpop.permute.xlu0 %1559 }
 0x24d   : > { %1610 = vst.msk [vmem:[%s8230_s26 + $0xff8] sm:$0xff] %vm1587_vm11, %v1560_v0 }
 0x24e   : > { %v1558_v44 = vpop.permute.xlu1 %1557  ;;  %1847 = vrot.lane.b32.xlu0 %v8690_v24, %s7963_s16 }
 0x24f   : > { %1609 = vst.msk [vmem:[%s8230_s26 + $0xf40] sm:$0xff] %vm1587_vm11, %v1558_v44 }
 0x250   : > { %1845 = vrot.lane.b32.xlu1 %v8685_v23, %s7963_s16  ;;  %v1613_v37 = vpop.permute.xlu0 %1612 }
 0x251   : > { %1685 = vst.msk [vmem:[%s8230_s26 + $0x28] sm:$0xff] %vm1684_vm12, %v1613_v37 }
 0x252   : > { %v1562_v46 = vpop.permute.xlu1 %1561  ;;  %1687 = vst.msk [vmem:[%s8230_s26 + $0x30] sm:$0xff] %vm1686_vm13, %v1613_v37  ;;  %1851 = vrot.lane.b32.xlu0 %v8719_v29, %s7963_s16 }
 0x253   : > { %1611 = vst.msk [vmem:[%s8230_s26 + $0x10b0] sm:$0xff] %vm1587_vm11, %v1562_v46  ;;  %vm2778_vm11 = vcmask 621744  }
 0x254   : > { %1849 = vrot.lane.b32.xlu1 %v8714_v27, %s7963_s16  ;;  %v1617_v0 = vpop.permute.xlu0 %1616 }
 0x255   : > { %1690 = vst.msk [vmem:[%s8230_s26 + $0x198] sm:$0xff] %vm1684_vm12, %v1617_v0 }
 0x256   : > { %v1615_v44 = vpop.permute.xlu1 %1614  ;;  %1691 = vst.msk [vmem:[%s8230_s26 + $0x1a0] sm:$0xff] %vm1686_vm13, %v1617_v0  ;;  %1855 = vrot.lane.b32.xlu0 %v8746_v35, %s7963_s16 }
 0x257   : > { %1688 = vst.msk [vmem:[%s8230_s26 + $0xe0] sm:$0xff] %vm1684_vm12, %v1615_v44 }
 0x258   : > { %1689 = vst.msk [vmem:[%s8230_s26 + $0xe8] sm:$0xff] %vm1686_vm13, %v1615_v44  ;;  %1853 = vrot.lane.b32.xlu1 %v8741_v33, %s7963_s16  ;;  %v1621_v37 = vpop.permute.xlu0 %1620 }
 0x259   : > { %1694 = vst.msk [vmem:[%s8230_s26 + $0x308] sm:$0xff] %vm1684_vm12, %v1621_v37 }
 0x25a   : > { %v1619_v46 = vpop.permute.xlu1 %1618  ;;  %1695 = vst.msk [vmem:[%s8230_s26 + $0x310] sm:$0xff] %vm1686_vm13, %v1621_v37  ;;  %1859 = vrot.lane.b32.xlu0 %v8775_v1, %s7963_s16 }
 0x25b   : > { %1692 = vst.msk [vmem:[%s8230_s26 + $0x250] sm:$0xff] %vm1684_vm12, %v1619_v46 }
 0x25c   : > { %1693 = vst.msk [vmem:[%s8230_s26 + $0x258] sm:$0xff] %vm1686_vm13, %v1619_v46  ;;  %1857 = vrot.lane.b32.xlu1 %v8770_v63, %s7963_s16  ;;  %v1625_v0 = vpop.permute.xlu0 %1624 }
 0x25d   : > { %1698 = vst.msk [vmem:[%s8230_s26 + $0x478] sm:$0xff] %vm1684_vm12, %v1625_v0 }
 0x25e   : > { %v1623_v44 = vpop.permute.xlu1 %1622  ;;  %1699 = vst.msk [vmem:[%s8230_s26 + $0x480] sm:$0xff] %vm1686_vm13, %v1625_v0  ;;  %1863 = vrot.lane.b32.xlu0 %v8804_v15, %s7963_s16 }
 0x25f   : > { %1696 = vst.msk [vmem:[%s8230_s26 + $0x3c0] sm:$0xff] %vm1684_vm12, %v1623_v44 }
 0x260   : > { %1697 = vst.msk [vmem:[%s8230_s26 + $0x3c8] sm:$0xff] %vm1686_vm13, %v1623_v44  ;;  %1861 = vrot.lane.b32.xlu1 %v8799_v11, %s7963_s16  ;;  %v1629_v37 = vpop.permute.xlu0 %1628 }
 0x261   : > { %1702 = vst.msk [vmem:[%s8230_s26 + $0x5e8] sm:$0xff] %vm1684_vm12, %v1629_v37 }
 0x262   : > { %v1627_v46 = vpop.permute.xlu1 %1626  ;;  %1703 = vst.msk [vmem:[%s8230_s26 + $0x5f0] sm:$0xff] %vm1686_vm13, %v1629_v37  ;;  %1867 = vrot.lane.b32.xlu0 %v8831_v22, %s7963_s16 }
 0x263   : > { %1700 = vst.msk [vmem:[%s8230_s26 + $0x530] sm:$0xff] %vm1684_vm12, %v1627_v46 }
 0x264   : > { %1701 = vst.msk [vmem:[%s8230_s26 + $0x538] sm:$0xff] %vm1686_vm13, %v1627_v46  ;;  %1865 = vrot.lane.b32.xlu1 %v8826_v18, %s7963_s16  ;;  %v1633_v0 = vpop.permute.xlu0 %1632 }
 0x265   : > { %1706 = vst.msk [vmem:[%s8230_s26 + $0x758] sm:$0xff] %vm1684_vm12, %v1633_v0 }
 0x266   : > { %v1631_v44 = vpop.permute.xlu1 %1630  ;;  %1707 = vst.msk [vmem:[%s8230_s26 + $0x760] sm:$0xff] %vm1686_vm13, %v1633_v0  ;;  %1871 = vrot.lane.b32.xlu0 %v8860_v60, %s7963_s16 }
 0x267   : > { %1704 = vst.msk [vmem:[%s8230_s26 + $0x6a0] sm:$0xff] %vm1684_vm12, %v1631_v44 }
 0x268   : > { %1705 = vst.msk [vmem:[%s8230_s26 + $0x6a8] sm:$0xff] %vm1686_vm13, %v1631_v44  ;;  %1869 = vrot.lane.b32.xlu1 %v8855_v31, %s7963_s16  ;;  %v1637_v37 = vpop.permute.xlu0 %1636 }
 0x269   : > { %1710 = vst.msk [vmem:[%s8230_s26 + $0x8c8] sm:$0xff] %vm1684_vm12, %v1637_v37 }
 0x26a   : > { %v1635_v46 = vpop.permute.xlu1 %1634  ;;  %1711 = vst.msk [vmem:[%s8230_s26 + $0x8d0] sm:$0xff] %vm1686_vm13, %v1637_v37  ;;  %1875 = vrot.lane.b32.xlu0 %v8889_v3, %s7963_s16 }
 0x26b   : > { %1708 = vst.msk [vmem:[%s8230_s26 + $0x810] sm:$0xff] %vm1684_vm12, %v1635_v46 }
 0x26c   : > { %1709 = vst.msk [vmem:[%s8230_s26 + $0x818] sm:$0xff] %vm1686_vm13, %v1635_v46  ;;  %1873 = vrot.lane.b32.xlu1 %v8884_v41, %s7963_s16  ;;  %v1641_v0 = vpop.permute.xlu0 %1640 }
 0x26d   : > { %1714 = vst.msk [vmem:[%s8230_s26 + $0xa38] sm:$0xff] %vm1684_vm12, %v1641_v0 }
 0x26e   : > { %v1639_v44 = vpop.permute.xlu1 %1638  ;;  %1715 = vst.msk [vmem:[%s8230_s26 + $0xa40] sm:$0xff] %vm1686_vm13, %v1641_v0  ;;  %1928 = vrot.lane.b32.xlu0 %v8578_v9, %s7964_s17 }
 0x26f   : > { %1712 = vst.msk [vmem:[%s8230_s26 + $0x980] sm:$0xff] %vm1684_vm12, %v1639_v44 }
 0x270   : > { %1713 = vst.msk [vmem:[%s8230_s26 + $0x988] sm:$0xff] %vm1686_vm13, %v1639_v44  ;;  %1877 = vrot.lane.b32.xlu1 %v8911_v47, %s7963_s16  ;;  %v1645_v37 = vpop.permute.xlu0 %1644  ;;  %s7978_s16 = smov 16  }
 0x271   : > { %1718 = vst.msk [vmem:[%s8230_s26 + $0xba8] sm:$0xff] %vm1684_vm12, %v1645_v37 }
 0x272   : > { %v1643_v46 = vpop.permute.xlu1 %1642  ;;  %1719 = vst.msk [vmem:[%s8230_s26 + $0xbb0] sm:$0xff] %vm1686_vm13, %v1645_v37  ;;  %1932 = vrot.lane.b32.xlu0 %v8600_v12, %s7964_s17 }
 0x273   : > { %1716 = vst.msk [vmem:[%s8230_s26 + $0xaf0] sm:$0xff] %vm1684_vm12, %v1643_v46 }
 0x274   : > { %1717 = vst.msk [vmem:[%s8230_s26 + $0xaf8] sm:$0xff] %vm1686_vm13, %v1643_v46  ;;  %1930 = vrot.lane.b32.xlu1 %v8605_v13, %s7964_s17  ;;  %v1649_v0 = vpop.permute.xlu0 %1648 }
 0x275   : > { %1722 = vst.msk [vmem:[%s8230_s26 + $0xd18] sm:$0xff] %vm1684_vm12, %v1649_v0 }
 0x276   : > { %v1647_v44 = vpop.permute.xlu1 %1646  ;;  %1723 = vst.msk [vmem:[%s8230_s26 + $0xd20] sm:$0xff] %vm1686_vm13, %v1649_v0  ;;  %1936 = vrot.lane.b32.xlu0 %v8634_v17, %s7964_s17 }
 0x277   : > { %1720 = vst.msk [vmem:[%s8230_s26 + $0xc60] sm:$0xff] %vm1684_vm12, %v1647_v44 }
 0x278   : > { %1721 = vst.msk [vmem:[%s8230_s26 + $0xc68] sm:$0xff] %vm1686_vm13, %v1647_v44  ;;  %1934 = vrot.lane.b32.xlu1 %v8629_v16, %s7964_s17  ;;  %v1653_v37 = vpop.permute.xlu0 %1652 }
 0x279   : > { %1726 = vst.msk [vmem:[%s8230_s26 + $0xe88] sm:$0xff] %vm1684_vm12, %v1653_v37 }
 0x27a   : > { %v1651_v46 = vpop.permute.xlu1 %1650  ;;  %1727 = vst.msk [vmem:[%s8230_s26 + $0xe90] sm:$0xff] %vm1686_vm13, %v1653_v37  ;;  %1940 = vrot.lane.b32.xlu0 %v8661_v20, %s7964_s17 }
 0x27b   : > { %1724 = vst.msk [vmem:[%s8230_s26 + $0xdd0] sm:$0xff] %vm1684_vm12, %v1651_v46 }
 0x27c   : > { %1725 = vst.msk [vmem:[%s8230_s26 + $0xdd8] sm:$0xff] %vm1686_vm13, %v1651_v46  ;;  %1938 = vrot.lane.b32.xlu1 %v8656_v19, %s7964_s17  ;;  %v1657_v0 = vpop.permute.xlu0 %1656 }
 0x27d   : > { %1730 = vst.msk [vmem:[%s8230_s26 + $0xff8] sm:$0xff] %vm1684_vm12, %v1657_v0 }
 0x27e   : > { %v1655_v44 = vpop.permute.xlu1 %1654  ;;  %1731 = vst.msk [vmem:[%s8230_s26 + $0x1000] sm:$0xff] %vm1686_vm13, %v1657_v0  ;;  %1944 = vrot.lane.b32.xlu0 %v8690_v24, %s7964_s17 }
 0x27f   : > { %1728 = vst.msk [vmem:[%s8230_s26 + $0xf40] sm:$0xff] %vm1684_vm12, %v1655_v44 }
 0x280   : > { %1729 = vst.msk [vmem:[%s8230_s26 + $0xf48] sm:$0xff] %vm1686_vm13, %v1655_v44  ;;  %1942 = vrot.lane.b32.xlu1 %v8685_v23, %s7964_s17  ;;  %v1735_v37 = vpop.permute.xlu0 %1734 }
 0x281   : > { %1807 = vst.msk [vmem:[%s8230_s26 + $0x30] sm:$0xff] %vm1806_vm14, %v1735_v37 }
 0x282   : > { %v1659_v46 = vpop.permute.xlu1 %1658  ;;  %1948 = vrot.lane.b32.xlu0 %v8719_v29, %s7964_s17 }
 0x283   : > { %1732 = vst.msk [vmem:[%s8230_s26 + $0x10b0] sm:$0xff] %vm1684_vm12, %v1659_v46  ;;  %vm2875_vm12 = vcmask 1048160  }
 0x284   : > { %1733 = vst.msk [vmem:[%s8230_s26 + $0x10b8] sm:$0xff] %vm1686_vm13, %v1659_v46  ;;  %1946 = vrot.lane.b32.xlu1 %v8714_v27, %s7964_s17  ;;  %v1739_v0 = vpop.permute.xlu0 %1738  ;;  %vm2877_vm13 = vcmask 15360  }
 0x285   : > { %1809 = vst.msk [vmem:[%s8230_s26 + $0x1a0] sm:$0xff] %vm1806_vm14, %v1739_v0 }
 0x286   : > { %v1737_v44 = vpop.permute.xlu1 %1736  ;;  %1952 = vrot.lane.b32.xlu0 %v8746_v35, %s7964_s17 }
 0x287   : > { %1808 = vst.msk [vmem:[%s8230_s26 + $0xe8] sm:$0xff] %vm1806_vm14, %v1737_v44 }
 0x288   : > { %1950 = vrot.lane.b32.xlu1 %v8741_v33, %s7964_s17  ;;  %v1743_v37 = vpop.permute.xlu0 %1742 }
 0x289   : > { %1811 = vst.msk [vmem:[%s8230_s26 + $0x310] sm:$0xff] %vm1806_vm14, %v1743_v37 }
 0x28a   : > { %v1741_v46 = vpop.permute.xlu1 %1740  ;;  %1956 = vrot.lane.b32.xlu0 %v8775_v1, %s7964_s17 }
 0x28b   : > { %1810 = vst.msk [vmem:[%s8230_s26 + $0x258] sm:$0xff] %vm1806_vm14, %v1741_v46 }
 0x28c   : > { %1954 = vrot.lane.b32.xlu1 %v8770_v63, %s7964_s17  ;;  %v1747_v0 = vpop.permute.xlu0 %1746 }
 0x28d   : > { %1813 = vst.msk [vmem:[%s8230_s26 + $0x480] sm:$0xff] %vm1806_vm14, %v1747_v0 }
 0x28e   : > { %v1745_v44 = vpop.permute.xlu1 %1744  ;;  %1960 = vrot.lane.b32.xlu0 %v8804_v15, %s7964_s17 }
 0x28f   : > { %1812 = vst.msk [vmem:[%s8230_s26 + $0x3c8] sm:$0xff] %vm1806_vm14, %v1745_v44 }
 0x290   : > { %1958 = vrot.lane.b32.xlu1 %v8799_v11, %s7964_s17  ;;  %v1751_v37 = vpop.permute.xlu0 %1750 }
 0x291   : > { %1815 = vst.msk [vmem:[%s8230_s26 + $0x5f0] sm:$0xff] %vm1806_vm14, %v1751_v37 }
 0x292   : > { %v1749_v46 = vpop.permute.xlu1 %1748  ;;  %1964 = vrot.lane.b32.xlu0 %v8831_v22, %s7964_s17 }
 0x293   : > { %1814 = vst.msk [vmem:[%s8230_s26 + $0x538] sm:$0xff] %vm1806_vm14, %v1749_v46 }
 0x294   : > { %1962 = vrot.lane.b32.xlu1 %v8826_v18, %s7964_s17  ;;  %v1755_v0 = vpop.permute.xlu0 %1754 }
 0x295   : > { %1817 = vst.msk [vmem:[%s8230_s26 + $0x760] sm:$0xff] %vm1806_vm14, %v1755_v0 }
 0x296   : > { %v1753_v44 = vpop.permute.xlu1 %1752  ;;  %1968 = vrot.lane.b32.xlu0 %v8860_v60, %s7964_s17 }
 0x297   : > { %1816 = vst.msk [vmem:[%s8230_s26 + $0x6a8] sm:$0xff] %vm1806_vm14, %v1753_v44 }
 0x298   : > { %1966 = vrot.lane.b32.xlu1 %v8855_v31, %s7964_s17  ;;  %v1759_v37 = vpop.permute.xlu0 %1758 }
 0x299   : > { %1819 = vst.msk [vmem:[%s8230_s26 + $0x8d0] sm:$0xff] %vm1806_vm14, %v1759_v37 }
 0x29a   : > { %v1757_v46 = vpop.permute.xlu1 %1756  ;;  %1972 = vrot.lane.b32.xlu0 %v8889_v3, %s7964_s17 }
 0x29b   : > { %1818 = vst.msk [vmem:[%s8230_s26 + $0x818] sm:$0xff] %vm1806_vm14, %v1757_v46 }
 0x29c   : > { %1970 = vrot.lane.b32.xlu1 %v8884_v41, %s7964_s17  ;;  %v1763_v0 = vpop.permute.xlu0 %1762 }
 0x29d   : > { %1821 = vst.msk [vmem:[%s8230_s26 + $0xa40] sm:$0xff] %vm1806_vm14, %v1763_v0 }
 0x29e   : > { %v1761_v44 = vpop.permute.xlu1 %1760  ;;  %2025 = vrot.lane.b32.xlu0 %v8578_v9, %s7965_s18 }
 0x29f   : > { %1820 = vst.msk [vmem:[%s8230_s26 + $0x988] sm:$0xff] %vm1806_vm14, %v1761_v44 }
 0x2a0   : > { %1974 = vrot.lane.b32.xlu1 %v8911_v47, %s7964_s17  ;;  %v1767_v37 = vpop.permute.xlu0 %1766  ;;  %s7979_s17 = smov 70  }
 0x2a1   : > { %1823 = vst.msk [vmem:[%s8230_s26 + $0xbb0] sm:$0xff] %vm1806_vm14, %v1767_v37 }
 0x2a2   : > { %v1765_v46 = vpop.permute.xlu1 %1764  ;;  %2029 = vrot.lane.b32.xlu0 %v8600_v12, %s7965_s18 }
 0x2a3   : > { %1822 = vst.msk [vmem:[%s8230_s26 + $0xaf8] sm:$0xff] %vm1806_vm14, %v1765_v46 }
 0x2a4   : > { %2027 = vrot.lane.b32.xlu1 %v8605_v13, %s7965_s18  ;;  %v1771_v0 = vpop.permute.xlu0 %1770 }
 0x2a5   : > { %1825 = vst.msk [vmem:[%s8230_s26 + $0xd20] sm:$0xff] %vm1806_vm14, %v1771_v0 }
 0x2a6   : > { %v1769_v44 = vpop.permute.xlu1 %1768  ;;  %2033 = vrot.lane.b32.xlu0 %v8634_v17, %s7965_s18 }
 0x2a7   : > { %1824 = vst.msk [vmem:[%s8230_s26 + $0xc68] sm:$0xff] %vm1806_vm14, %v1769_v44 }
 0x2a8   : > { %2031 = vrot.lane.b32.xlu1 %v8629_v16, %s7965_s18  ;;  %v1775_v37 = vpop.permute.xlu0 %1774 }
 0x2a9   : > { %1827 = vst.msk [vmem:[%s8230_s26 + $0xe90] sm:$0xff] %vm1806_vm14, %v1775_v37 }
 0x2aa   : > { %v1773_v46 = vpop.permute.xlu1 %1772  ;;  %2037 = vrot.lane.b32.xlu0 %v8661_v20, %s7965_s18 }
 0x2ab   : > { %1826 = vst.msk [vmem:[%s8230_s26 + $0xdd8] sm:$0xff] %vm1806_vm14, %v1773_v46 }
 0x2ac   : > { %2035 = vrot.lane.b32.xlu1 %v8656_v19, %s7965_s18  ;;  %v1779_v0 = vpop.permute.xlu0 %1778 }
 0x2ad   : > { %1829 = vst.msk [vmem:[%s8230_s26 + $0x1000] sm:$0xff] %vm1806_vm14, %v1779_v0 }
 0x2ae   : > { %v1777_v44 = vpop.permute.xlu1 %1776  ;;  %2041 = vrot.lane.b32.xlu0 %v8690_v24, %s7965_s18 }
 0x2af   : > { %1828 = vst.msk [vmem:[%s8230_s26 + $0xf48] sm:$0xff] %vm1806_vm14, %v1777_v44 }
 0x2b0   : > { %2039 = vrot.lane.b32.xlu1 %v8685_v23, %s7965_s18  ;;  %v1832_v37 = vpop.permute.xlu0 %1831 }
 0x2b1   : > { %1904 = vst.msk [vmem:[%s8230_s26 + $0x80] sm:$0xff] %vm1903_vm15, %v1832_v37 }
 0x2b2   : > { %v1781_v46 = vpop.permute.xlu1 %1780  ;;  %2045 = vrot.lane.b32.xlu0 %v8719_v29, %s7965_s18 }
 0x2b3   : > { %1830 = vst.msk [vmem:[%s8230_s26 + $0x10b8] sm:$0xff] %vm1806_vm14, %v1781_v46  ;;  %vm2997_vm14 = vcmask 457744  }
 0x2b4   : > { %2043 = vrot.lane.b32.xlu1 %v8714_v27, %s7965_s18  ;;  %v1836_v0 = vpop.permute.xlu0 %1835 }
 0x2b5   : > { %1906 = vst.msk [vmem:[%s8230_s26 + $0x1f0] sm:$0xff] %vm1903_vm15, %v1836_v0 }
 0x2b6   : > { %v1834_v44 = vpop.permute.xlu1 %1833  ;;  %2049 = vrot.lane.b32.xlu0 %v8746_v35, %s7965_s18 }
 0x2b7   : > { %1905 = vst.msk [vmem:[%s8230_s26 + $0x138] sm:$0xff] %vm1903_vm15, %v1834_v44 }
 0x2b8   : > { %2047 = vrot.lane.b32.xlu1 %v8741_v33, %s7965_s18  ;;  %v1840_v37 = vpop.permute.xlu0 %1839 }
 0x2b9   : > { %1908 = vst.msk [vmem:[%s8230_s26 + $0x360] sm:$0xff] %vm1903_vm15, %v1840_v37 }
 0x2ba   : > { %v1838_v46 = vpop.permute.xlu1 %1837  ;;  %2053 = vrot.lane.b32.xlu0 %v8775_v1, %s7965_s18 }
 0x2bb   : > { %1907 = vst.msk [vmem:[%s8230_s26 + $0x2a8] sm:$0xff] %vm1903_vm15, %v1838_v46 }
 0x2bc   : > { %2051 = vrot.lane.b32.xlu1 %v8770_v63, %s7965_s18  ;;  %v1844_v0 = vpop.permute.xlu0 %1843 }
 0x2bd   : > { %1910 = vst.msk [vmem:[%s8230_s26 + $0x4d0] sm:$0xff] %vm1903_vm15, %v1844_v0 }
 0x2be   : > { %v1842_v44 = vpop.permute.xlu1 %1841  ;;  %2057 = vrot.lane.b32.xlu0 %v8804_v15, %s7965_s18 }
 0x2bf   : > { %1909 = vst.msk [vmem:[%s8230_s26 + $0x418] sm:$0xff] %vm1903_vm15, %v1842_v44 }
 0x2c0   : > { %2055 = vrot.lane.b32.xlu1 %v8799_v11, %s7965_s18  ;;  %v1848_v37 = vpop.permute.xlu0 %1847 }
 0x2c1   : > { %1912 = vst.msk [vmem:[%s8230_s26 + $0x640] sm:$0xff] %vm1903_vm15, %v1848_v37 }
 0x2c2   : > { %v1846_v46 = vpop.permute.xlu1 %1845  ;;  %2061 = vrot.lane.b32.xlu0 %v8831_v22, %s7965_s18 }
 0x2c3   : > { %1911 = vst.msk [vmem:[%s8230_s26 + $0x588] sm:$0xff] %vm1903_vm15, %v1846_v46 }
 0x2c4   : > { %2059 = vrot.lane.b32.xlu1 %v8826_v18, %s7965_s18  ;;  %v1852_v0 = vpop.permute.xlu0 %1851 }
 0x2c5   : > { %1914 = vst.msk [vmem:[%s8230_s26 + $0x7b0] sm:$0xff] %vm1903_vm15, %v1852_v0 }
 0x2c6   : > { %v1850_v44 = vpop.permute.xlu1 %1849  ;;  %2065 = vrot.lane.b32.xlu0 %v8860_v60, %s7965_s18 }
 0x2c7   : > { %1913 = vst.msk [vmem:[%s8230_s26 + $0x6f8] sm:$0xff] %vm1903_vm15, %v1850_v44 }
 0x2c8   : > { %2063 = vrot.lane.b32.xlu1 %v8855_v31, %s7965_s18  ;;  %v1856_v37 = vpop.permute.xlu0 %1855 }
 0x2c9   : > { %1916 = vst.msk [vmem:[%s8230_s26 + $0x920] sm:$0xff] %vm1903_vm15, %v1856_v37 }
 0x2ca   : > { %v1854_v46 = vpop.permute.xlu1 %1853  ;;  %2069 = vrot.lane.b32.xlu0 %v8889_v3, %s7965_s18 }
 0x2cb   : > { %1915 = vst.msk [vmem:[%s8230_s26 + $0x868] sm:$0xff] %vm1903_vm15, %v1854_v46 }
 0x2cc   : > { %2067 = vrot.lane.b32.xlu1 %v8884_v41, %s7965_s18  ;;  %v1860_v0 = vpop.permute.xlu0 %1859 }
 0x2cd   : > { %1918 = vst.msk [vmem:[%s8230_s26 + $0xa90] sm:$0xff] %vm1903_vm15, %v1860_v0 }
 0x2ce   : > { %v1858_v44 = vpop.permute.xlu1 %1857  ;;  %2147 = vrot.lane.b32.xlu0 %v8578_v9, %s7966_s19 }
 0x2cf   : > { %1917 = vst.msk [vmem:[%s8230_s26 + $0x9d8] sm:$0xff] %vm1903_vm15, %v1858_v44 }
 0x2d0   : > { %2071 = vrot.lane.b32.xlu1 %v8911_v47, %s7965_s18  ;;  %v1864_v37 = vpop.permute.xlu0 %1863  ;;  %s7980_s18 = smov 124  }
 0x2d1   : > { %1920 = vst.msk [vmem:[%s8230_s26 + $0xc00] sm:$0xff] %vm1903_vm15, %v1864_v37 }
 0x2d2   : > { %v1862_v46 = vpop.permute.xlu1 %1861  ;;  %2151 = vrot.lane.b32.xlu0 %v8600_v12, %s7966_s19 }
 0x2d3   : > { %1919 = vst.msk [vmem:[%s8230_s26 + $0xb48] sm:$0xff] %vm1903_vm15, %v1862_v46 }
 0x2d4   : > { %2149 = vrot.lane.b32.xlu1 %v8605_v13, %s7966_s19  ;;  %v1868_v0 = vpop.permute.xlu0 %1867 }
 0x2d5   : > { %1922 = vst.msk [vmem:[%s8230_s26 + $0xd70] sm:$0xff] %vm1903_vm15, %v1868_v0 }
 0x2d6   : > { %v1866_v44 = vpop.permute.xlu1 %1865  ;;  %2155 = vrot.lane.b32.xlu0 %v8634_v17, %s7966_s19 }
 0x2d7   : > { %1921 = vst.msk [vmem:[%s8230_s26 + $0xcb8] sm:$0xff] %vm1903_vm15, %v1866_v44 }
 0x2d8   : > { %2153 = vrot.lane.b32.xlu1 %v8629_v16, %s7966_s19  ;;  %v1872_v37 = vpop.permute.xlu0 %1871 }
 0x2d9   : > { %1924 = vst.msk [vmem:[%s8230_s26 + $0xee0] sm:$0xff] %vm1903_vm15, %v1872_v37 }
 0x2da   : > { %v1870_v46 = vpop.permute.xlu1 %1869  ;;  %2159 = vrot.lane.b32.xlu0 %v8661_v20, %s7966_s19 }
 0x2db   : > { %1923 = vst.msk [vmem:[%s8230_s26 + $0xe28] sm:$0xff] %vm1903_vm15, %v1870_v46 }
 0x2dc   : > { %2157 = vrot.lane.b32.xlu1 %v8656_v19, %s7966_s19  ;;  %v1876_v0 = vpop.permute.xlu0 %1875 }
 0x2dd   : > { %1926 = vst.msk [vmem:[%s8230_s26 + $0x1050] sm:$0xff] %vm1903_vm15, %v1876_v0 }
 0x2de   : > { %v1874_v44 = vpop.permute.xlu1 %1873  ;;  %2163 = vrot.lane.b32.xlu0 %v8690_v24, %s7966_s19 }
 0x2df   : > { %1925 = vst.msk [vmem:[%s8230_s26 + $0xf98] sm:$0xff] %vm1903_vm15, %v1874_v44 }
 0x2e0   : > { %2161 = vrot.lane.b32.xlu1 %v8685_v23, %s7966_s19  ;;  %v1929_v37 = vpop.permute.xlu0 %1928 }
 0x2e1   : > { %2001 = vst.msk [vmem:[%s8230_s26 + $0x80] sm:$0xff] %vm2000_vm0, %v1929_v37 }
 0x2e2   : > { %v1878_v46 = vpop.permute.xlu1 %1877  ;;  %2167 = vrot.lane.b32.xlu0 %v8719_v29, %s7966_s19 }
 0x2e3   : > { %1927 = vst.msk [vmem:[%s8230_s26 + $0x1108] sm:$0xff] %vm1903_vm15, %v1878_v46  ;;  %vm3094_vm15 = vcmask 900544  }
 0x2e4   : > { %2165 = vrot.lane.b32.xlu1 %v8714_v27, %s7966_s19  ;;  %v1933_v0 = vpop.permute.xlu0 %1932 }
 0x2e5   : > { %2003 = vst.msk [vmem:[%s8230_s26 + $0x1f0] sm:$0xff] %vm2000_vm0, %v1933_v0 }
 0x2e6   : > { %v1931_v44 = vpop.permute.xlu1 %1930  ;;  %2171 = vrot.lane.b32.xlu0 %v8746_v35, %s7966_s19 }
 0x2e7   : > { %2002 = vst.msk [vmem:[%s8230_s26 + $0x138] sm:$0xff] %vm2000_vm0, %v1931_v44 }
 0x2e8   : > { %2169 = vrot.lane.b32.xlu1 %v8741_v33, %s7966_s19  ;;  %v1937_v37 = vpop.permute.xlu0 %1936 }
 0x2e9   : > { %2005 = vst.msk [vmem:[%s8230_s26 + $0x360] sm:$0xff] %vm2000_vm0, %v1937_v37 }
 0x2ea   : > { %v1935_v46 = vpop.permute.xlu1 %1934  ;;  %2175 = vrot.lane.b32.xlu0 %v8775_v1, %s7966_s19 }
 0x2eb   : > { %2004 = vst.msk [vmem:[%s8230_s26 + $0x2a8] sm:$0xff] %vm2000_vm0, %v1935_v46 }
 0x2ec   : > { %2173 = vrot.lane.b32.xlu1 %v8770_v63, %s7966_s19  ;;  %v1941_v0 = vpop.permute.xlu0 %1940 }
 0x2ed   : > { %2007 = vst.msk [vmem:[%s8230_s26 + $0x4d0] sm:$0xff] %vm2000_vm0, %v1941_v0 }
 0x2ee   : > { %v1939_v44 = vpop.permute.xlu1 %1938  ;;  %2179 = vrot.lane.b32.xlu0 %v8804_v15, %s7966_s19 }
 0x2ef   : > { %2006 = vst.msk [vmem:[%s8230_s26 + $0x418] sm:$0xff] %vm2000_vm0, %v1939_v44 }
 0x2f0   : > { %2177 = vrot.lane.b32.xlu1 %v8799_v11, %s7966_s19  ;;  %v1945_v37 = vpop.permute.xlu0 %1944 }
 0x2f1   : > { %2009 = vst.msk [vmem:[%s8230_s26 + $0x640] sm:$0xff] %vm2000_vm0, %v1945_v37 }
 0x2f2   : > { %v1943_v46 = vpop.permute.xlu1 %1942  ;;  %2183 = vrot.lane.b32.xlu0 %v8831_v22, %s7966_s19 }
 0x2f3   : > { %2008 = vst.msk [vmem:[%s8230_s26 + $0x588] sm:$0xff] %vm2000_vm0, %v1943_v46 }
 0x2f4   : > { %2181 = vrot.lane.b32.xlu1 %v8826_v18, %s7966_s19  ;;  %v1949_v0 = vpop.permute.xlu0 %1948 }
 0x2f5   : > { %2011 = vst.msk [vmem:[%s8230_s26 + $0x7b0] sm:$0xff] %vm2000_vm0, %v1949_v0 }
 0x2f6   : > { %v1947_v44 = vpop.permute.xlu1 %1946  ;;  %2187 = vrot.lane.b32.xlu0 %v8860_v60, %s7966_s19 }
 0x2f7   : > { %2010 = vst.msk [vmem:[%s8230_s26 + $0x6f8] sm:$0xff] %vm2000_vm0, %v1947_v44 }
 0x2f8   : > { %2185 = vrot.lane.b32.xlu1 %v8855_v31, %s7966_s19  ;;  %v1953_v37 = vpop.permute.xlu0 %1952 }
 0x2f9   : > { %2013 = vst.msk [vmem:[%s8230_s26 + $0x920] sm:$0xff] %vm2000_vm0, %v1953_v37 }
 0x2fa   : > { %v1951_v46 = vpop.permute.xlu1 %1950  ;;  %2191 = vrot.lane.b32.xlu0 %v8889_v3, %s7966_s19 }
 0x2fb   : > { %2012 = vst.msk [vmem:[%s8230_s26 + $0x868] sm:$0xff] %vm2000_vm0, %v1951_v46 }
 0x2fc   : > { %2189 = vrot.lane.b32.xlu1 %v8884_v41, %s7966_s19  ;;  %v1957_v0 = vpop.permute.xlu0 %1956 }
 0x2fd   : > { %2015 = vst.msk [vmem:[%s8230_s26 + $0xa90] sm:$0xff] %vm2000_vm0, %v1957_v0 }
 0x2fe   : > { %v1955_v44 = vpop.permute.xlu1 %1954  ;;  %2244 = vrot.lane.b32.xlu0 %v8578_v9, %s7967_s20 }
 0x2ff   : > { %2014 = vst.msk [vmem:[%s8230_s26 + $0x9d8] sm:$0xff] %vm2000_vm0, %v1955_v44 }
 0x300   : > { %2193 = vrot.lane.b32.xlu1 %v8911_v47, %s7966_s19  ;;  %v1961_v37 = vpop.permute.xlu0 %1960  ;;  %s7981_s19 = smov 50  }
 0x301   : > { %2017 = vst.msk [vmem:[%s8230_s26 + $0xc00] sm:$0xff] %vm2000_vm0, %v1961_v37 }
 0x302   : > { %v1959_v46 = vpop.permute.xlu1 %1958  ;;  %2248 = vrot.lane.b32.xlu0 %v8600_v12, %s7967_s20 }
 0x303   : > { %2016 = vst.msk [vmem:[%s8230_s26 + $0xb48] sm:$0xff] %vm2000_vm0, %v1959_v46 }
 0x304   : > { %2246 = vrot.lane.b32.xlu1 %v8605_v13, %s7967_s20  ;;  %v1965_v0 = vpop.permute.xlu0 %1964 }
 0x305   : > { %2019 = vst.msk [vmem:[%s8230_s26 + $0xd70] sm:$0xff] %vm2000_vm0, %v1965_v0 }
 0x306   : > { %v1963_v44 = vpop.permute.xlu1 %1962  ;;  %2252 = vrot.lane.b32.xlu0 %v8634_v17, %s7967_s20 }
 0x307   : > { %2018 = vst.msk [vmem:[%s8230_s26 + $0xcb8] sm:$0xff] %vm2000_vm0, %v1963_v44 }
 0x308   : > { %2250 = vrot.lane.b32.xlu1 %v8629_v16, %s7967_s20  ;;  %v1969_v37 = vpop.permute.xlu0 %1968 }
 0x309   : > { %2021 = vst.msk [vmem:[%s8230_s26 + $0xee0] sm:$0xff] %vm2000_vm0, %v1969_v37 }
 0x30a   : > { %v1967_v46 = vpop.permute.xlu1 %1966  ;;  %2256 = vrot.lane.b32.xlu0 %v8661_v20, %s7967_s20 }
 0x30b   : > { %2020 = vst.msk [vmem:[%s8230_s26 + $0xe28] sm:$0xff] %vm2000_vm0, %v1967_v46 }
 0x30c   : > { %2254 = vrot.lane.b32.xlu1 %v8656_v19, %s7967_s20  ;;  %v1973_v0 = vpop.permute.xlu0 %1972 }
 0x30d   : > { %2023 = vst.msk [vmem:[%s8230_s26 + $0x1050] sm:$0xff] %vm2000_vm0, %v1973_v0 }
 0x30e   : > { %v1971_v44 = vpop.permute.xlu1 %1970  ;;  %2260 = vrot.lane.b32.xlu0 %v8690_v24, %s7967_s20 }
 0x30f   : > { %2022 = vst.msk [vmem:[%s8230_s26 + $0xf98] sm:$0xff] %vm2000_vm0, %v1971_v44 }
 0x310   : > { %2258 = vrot.lane.b32.xlu1 %v8685_v23, %s7967_s20  ;;  %v2026_v37 = vpop.permute.xlu0 %2025 }
 0x311   : > { %2098 = vst.msk [vmem:[%s8230_s26 + $0x80] sm:$0xff] %vm2097_vm1, %v2026_v37 }
 0x312   : > { %v1975_v46 = vpop.permute.xlu1 %1974  ;;  %2100 = vst.msk [vmem:[%s8230_s26 + $0x88] sm:$0xff] %vm2099_vm2, %v2026_v37  ;;  %2264 = vrot.lane.b32.xlu0 %v8719_v29, %s7967_s20 }
 0x313   : > { %2024 = vst.msk [vmem:[%s8230_s26 + $0x1108] sm:$0xff] %vm2000_vm0, %v1975_v46  ;;  %vm3191_vm0 = vcmask 1048432  }
 0x314   : > { %2262 = vrot.lane.b32.xlu1 %v8714_v27, %s7967_s20  ;;  %v2030_v0 = vpop.permute.xlu0 %2029 }
 0x315   : > { %2103 = vst.msk [vmem:[%s8230_s26 + $0x1f0] sm:$0xff] %vm2097_vm1, %v2030_v0 }
 0x316   : > { %v2028_v44 = vpop.permute.xlu1 %2027  ;;  %2104 = vst.msk [vmem:[%s8230_s26 + $0x1f8] sm:$0xff] %vm2099_vm2, %v2030_v0  ;;  %2268 = vrot.lane.b32.xlu0 %v8746_v35, %s7967_s20 }
 0x317   : > { %2101 = vst.msk [vmem:[%s8230_s26 + $0x138] sm:$0xff] %vm2097_vm1, %v2028_v44 }
 0x318   : > { %2102 = vst.msk [vmem:[%s8230_s26 + $0x140] sm:$0xff] %vm2099_vm2, %v2028_v44  ;;  %2266 = vrot.lane.b32.xlu1 %v8741_v33, %s7967_s20  ;;  %v2034_v37 = vpop.permute.xlu0 %2033 }
 0x319   : > { %2107 = vst.msk [vmem:[%s8230_s26 + $0x360] sm:$0xff] %vm2097_vm1, %v2034_v37 }
 0x31a   : > { %v2032_v46 = vpop.permute.xlu1 %2031  ;;  %2108 = vst.msk [vmem:[%s8230_s26 + $0x368] sm:$0xff] %vm2099_vm2, %v2034_v37  ;;  %2272 = vrot.lane.b32.xlu0 %v8775_v1, %s7967_s20 }
 0x31b   : > { %2105 = vst.msk [vmem:[%s8230_s26 + $0x2a8] sm:$0xff] %vm2097_vm1, %v2032_v46 }
 0x31c   : > { %2106 = vst.msk [vmem:[%s8230_s26 + $0x2b0] sm:$0xff] %vm2099_vm2, %v2032_v46  ;;  %2270 = vrot.lane.b32.xlu1 %v8770_v63, %s7967_s20  ;;  %v2038_v0 = vpop.permute.xlu0 %2037 }
 0x31d   : > { %2111 = vst.msk [vmem:[%s8230_s26 + $0x4d0] sm:$0xff] %vm2097_vm1, %v2038_v0 }
 0x31e   : > { %v2036_v44 = vpop.permute.xlu1 %2035  ;;  %2112 = vst.msk [vmem:[%s8230_s26 + $0x4d8] sm:$0xff] %vm2099_vm2, %v2038_v0  ;;  %2276 = vrot.lane.b32.xlu0 %v8804_v15, %s7967_s20 }
 0x31f   : > { %2109 = vst.msk [vmem:[%s8230_s26 + $0x418] sm:$0xff] %vm2097_vm1, %v2036_v44 }
 0x320   : > { %2110 = vst.msk [vmem:[%s8230_s26 + $0x420] sm:$0xff] %vm2099_vm2, %v2036_v44  ;;  %2274 = vrot.lane.b32.xlu1 %v8799_v11, %s7967_s20  ;;  %v2042_v37 = vpop.permute.xlu0 %2041 }
 0x321   : > { %2115 = vst.msk [vmem:[%s8230_s26 + $0x640] sm:$0xff] %vm2097_vm1, %v2042_v37 }
 0x322   : > { %v2040_v46 = vpop.permute.xlu1 %2039  ;;  %2116 = vst.msk [vmem:[%s8230_s26 + $0x648] sm:$0xff] %vm2099_vm2, %v2042_v37  ;;  %2280 = vrot.lane.b32.xlu0 %v8831_v22, %s7967_s20 }
 0x323   : > { %2113 = vst.msk [vmem:[%s8230_s26 + $0x588] sm:$0xff] %vm2097_vm1, %v2040_v46 }
 0x324   : > { %2114 = vst.msk [vmem:[%s8230_s26 + $0x590] sm:$0xff] %vm2099_vm2, %v2040_v46  ;;  %2278 = vrot.lane.b32.xlu1 %v8826_v18, %s7967_s20  ;;  %v2046_v0 = vpop.permute.xlu0 %2045 }
 0x325   : > { %2119 = vst.msk [vmem:[%s8230_s26 + $0x7b0] sm:$0xff] %vm2097_vm1, %v2046_v0 }
 0x326   : > { %v2044_v44 = vpop.permute.xlu1 %2043  ;;  %2120 = vst.msk [vmem:[%s8230_s26 + $0x7b8] sm:$0xff] %vm2099_vm2, %v2046_v0  ;;  %2284 = vrot.lane.b32.xlu0 %v8860_v60, %s7967_s20 }
 0x327   : > { %2117 = vst.msk [vmem:[%s8230_s26 + $0x6f8] sm:$0xff] %vm2097_vm1, %v2044_v44 }
 0x328   : > { %2118 = vst.msk [vmem:[%s8230_s26 + $0x700] sm:$0xff] %vm2099_vm2, %v2044_v44  ;;  %2282 = vrot.lane.b32.xlu1 %v8855_v31, %s7967_s20  ;;  %v2050_v37 = vpop.permute.xlu0 %2049 }
 0x329   : > { %2123 = vst.msk [vmem:[%s8230_s26 + $0x920] sm:$0xff] %vm2097_vm1, %v2050_v37 }
 0x32a   : > { %v2048_v46 = vpop.permute.xlu1 %2047  ;;  %2124 = vst.msk [vmem:[%s8230_s26 + $0x928] sm:$0xff] %vm2099_vm2, %v2050_v37  ;;  %2288 = vrot.lane.b32.xlu0 %v8889_v3, %s7967_s20 }
 0x32b   : > { %2121 = vst.msk [vmem:[%s8230_s26 + $0x868] sm:$0xff] %vm2097_vm1, %v2048_v46 }
 0x32c   : > { %2122 = vst.msk [vmem:[%s8230_s26 + $0x870] sm:$0xff] %vm2099_vm2, %v2048_v46  ;;  %2286 = vrot.lane.b32.xlu1 %v8884_v41, %s7967_s20  ;;  %v2054_v0 = vpop.permute.xlu0 %2053 }
 0x32d   : > { %2127 = vst.msk [vmem:[%s8230_s26 + $0xa90] sm:$0xff] %vm2097_vm1, %v2054_v0 }
 0x32e   : > { %v2052_v44 = vpop.permute.xlu1 %2051  ;;  %2128 = vst.msk [vmem:[%s8230_s26 + $0xa98] sm:$0xff] %vm2099_vm2, %v2054_v0  ;;  %2366 = vrot.lane.b32.xlu0 %v8578_v9, %s7968_s23 }
 0x32f   : > { %2125 = vst.msk [vmem:[%s8230_s26 + $0x9d8] sm:$0xff] %vm2097_vm1, %v2052_v44 }
 0x330   : > { %2126 = vst.msk [vmem:[%s8230_s26 + $0x9e0] sm:$0xff] %vm2099_vm2, %v2052_v44  ;;  %2290 = vrot.lane.b32.xlu1 %v8911_v47, %s7967_s20  ;;  %v2058_v37 = vpop.permute.xlu0 %2057  ;;  %s7982_s20 = smov 104  }
 0x331   : > { %2131 = vst.msk [vmem:[%s8230_s26 + $0xc00] sm:$0xff] %vm2097_vm1, %v2058_v37 }
 0x332   : > { %v2056_v46 = vpop.permute.xlu1 %2055  ;;  %2132 = vst.msk [vmem:[%s8230_s26 + $0xc08] sm:$0xff] %vm2099_vm2, %v2058_v37  ;;  %2370 = vrot.lane.b32.xlu0 %v8600_v12, %s7968_s23 }
 0x333   : > { %2129 = vst.msk [vmem:[%s8230_s26 + $0xb48] sm:$0xff] %vm2097_vm1, %v2056_v46 }
 0x334   : > { %2130 = vst.msk [vmem:[%s8230_s26 + $0xb50] sm:$0xff] %vm2099_vm2, %v2056_v46  ;;  %2368 = vrot.lane.b32.xlu1 %v8605_v13, %s7968_s23  ;;  %v2062_v0 = vpop.permute.xlu0 %2061 }
 0x335   : > { %2135 = vst.msk [vmem:[%s8230_s26 + $0xd70] sm:$0xff] %vm2097_vm1, %v2062_v0 }
 0x336   : > { %v2060_v44 = vpop.permute.xlu1 %2059  ;;  %2136 = vst.msk [vmem:[%s8230_s26 + $0xd78] sm:$0xff] %vm2099_vm2, %v2062_v0  ;;  %2374 = vrot.lane.b32.xlu0 %v8634_v17, %s7968_s23 }
 0x337   : > { %2133 = vst.msk [vmem:[%s8230_s26 + $0xcb8] sm:$0xff] %vm2097_vm1, %v2060_v44 }
 0x338   : > { %2134 = vst.msk [vmem:[%s8230_s26 + $0xcc0] sm:$0xff] %vm2099_vm2, %v2060_v44  ;;  %2372 = vrot.lane.b32.xlu1 %v8629_v16, %s7968_s23  ;;  %v2066_v37 = vpop.permute.xlu0 %2065 }
 0x339   : > { %2139 = vst.msk [vmem:[%s8230_s26 + $0xee0] sm:$0xff] %vm2097_vm1, %v2066_v37 }
 0x33a   : > { %v2064_v46 = vpop.permute.xlu1 %2063  ;;  %2140 = vst.msk [vmem:[%s8230_s26 + $0xee8] sm:$0xff] %vm2099_vm2, %v2066_v37  ;;  %2378 = vrot.lane.b32.xlu0 %v8661_v20, %s7968_s23 }
 0x33b   : > { %2137 = vst.msk [vmem:[%s8230_s26 + $0xe28] sm:$0xff] %vm2097_vm1, %v2064_v46 }
 0x33c   : > { %2138 = vst.msk [vmem:[%s8230_s26 + $0xe30] sm:$0xff] %vm2099_vm2, %v2064_v46  ;;  %2376 = vrot.lane.b32.xlu1 %v8656_v19, %s7968_s23  ;;  %v2070_v0 = vpop.permute.xlu0 %2069 }
 0x33d   : > { %2143 = vst.msk [vmem:[%s8230_s26 + $0x1050] sm:$0xff] %vm2097_vm1, %v2070_v0 }
 0x33e   : > { %v2068_v44 = vpop.permute.xlu1 %2067  ;;  %2144 = vst.msk [vmem:[%s8230_s26 + $0x1058] sm:$0xff] %vm2099_vm2, %v2070_v0  ;;  %2382 = vrot.lane.b32.xlu0 %v8690_v24, %s7968_s23 }
 0x33f   : > { %2141 = vst.msk [vmem:[%s8230_s26 + $0xf98] sm:$0xff] %vm2097_vm1, %v2068_v44 }
 0x340   : > { %2142 = vst.msk [vmem:[%s8230_s26 + $0xfa0] sm:$0xff] %vm2099_vm2, %v2068_v44  ;;  %2380 = vrot.lane.b32.xlu1 %v8685_v23, %s7968_s23  ;;  %v2148_v37 = vpop.permute.xlu0 %2147 }
 0x341   : > { %2220 = vst.msk [vmem:[%s8230_s26 + $0x88] sm:$0xff] %vm2219_vm3, %v2148_v37 }
 0x342   : > { %v2072_v46 = vpop.permute.xlu1 %2071  ;;  %2386 = vrot.lane.b32.xlu0 %v8719_v29, %s7968_s23 }
 0x343   : > { %2145 = vst.msk [vmem:[%s8230_s26 + $0x1108] sm:$0xff] %vm2097_vm1, %v2072_v46  ;;  %vm3193_vm1 = vcmask 293888  }
 0x344   : > { %2146 = vst.msk [vmem:[%s8230_s26 + $0x1110] sm:$0xff] %vm2099_vm2, %v2072_v46  ;;  %2384 = vrot.lane.b32.xlu1 %v8714_v27, %s7968_s23  ;;  %v2152_v0 = vpop.permute.xlu0 %2151  ;;  %vm3313_vm2 = vcmask 736544  }
 0x345   : > { %2222 = vst.msk [vmem:[%s8230_s26 + $0x1f8] sm:$0xff] %vm2219_vm3, %v2152_v0 }
 0x346   : > { %v2150_v44 = vpop.permute.xlu1 %2149  ;;  %2390 = vrot.lane.b32.xlu0 %v8746_v35, %s7968_s23 }
 0x347   : > { %2221 = vst.msk [vmem:[%s8230_s26 + $0x140] sm:$0xff] %vm2219_vm3, %v2150_v44 }
 0x348   : > { %2388 = vrot.lane.b32.xlu1 %v8741_v33, %s7968_s23  ;;  %v2156_v37 = vpop.permute.xlu0 %2155 }
 0x349   : > { %2224 = vst.msk [vmem:[%s8230_s26 + $0x368] sm:$0xff] %vm2219_vm3, %v2156_v37 }
 0x34a   : > { %v2154_v46 = vpop.permute.xlu1 %2153  ;;  %2394 = vrot.lane.b32.xlu0 %v8775_v1, %s7968_s23 }
 0x34b   : > { %2223 = vst.msk [vmem:[%s8230_s26 + $0x2b0] sm:$0xff] %vm2219_vm3, %v2154_v46 }
 0x34c   : > { %2392 = vrot.lane.b32.xlu1 %v8770_v63, %s7968_s23  ;;  %v2160_v0 = vpop.permute.xlu0 %2159 }
 0x34d   : > { %2226 = vst.msk [vmem:[%s8230_s26 + $0x4d8] sm:$0xff] %vm2219_vm3, %v2160_v0 }
 0x34e   : > { %v2158_v44 = vpop.permute.xlu1 %2157  ;;  %2398 = vrot.lane.b32.xlu0 %v8804_v15, %s7968_s23 }
 0x34f   : > { %2225 = vst.msk [vmem:[%s8230_s26 + $0x420] sm:$0xff] %vm2219_vm3, %v2158_v44 }
 0x350   : > { %2396 = vrot.lane.b32.xlu1 %v8799_v11, %s7968_s23  ;;  %v2164_v37 = vpop.permute.xlu0 %2163 }
 0x351   : > { %2228 = vst.msk [vmem:[%s8230_s26 + $0x648] sm:$0xff] %vm2219_vm3, %v2164_v37 }
 0x352   : > { %v2162_v46 = vpop.permute.xlu1 %2161  ;;  %2402 = vrot.lane.b32.xlu0 %v8831_v22, %s7968_s23 }
 0x353   : > { %2227 = vst.msk [vmem:[%s8230_s26 + $0x590] sm:$0xff] %vm2219_vm3, %v2162_v46 }
 0x354   : > { %2400 = vrot.lane.b32.xlu1 %v8826_v18, %s7968_s23  ;;  %v2168_v0 = vpop.permute.xlu0 %2167 }
 0x355   : > { %2230 = vst.msk [vmem:[%s8230_s26 + $0x7b8] sm:$0xff] %vm2219_vm3, %v2168_v0 }
 0x356   : > { %v2166_v44 = vpop.permute.xlu1 %2165  ;;  %2406 = vrot.lane.b32.xlu0 %v8860_v60, %s7968_s23 }
 0x357   : > { %2229 = vst.msk [vmem:[%s8230_s26 + $0x700] sm:$0xff] %vm2219_vm3, %v2166_v44 }
 0x358   : > { %2404 = vrot.lane.b32.xlu1 %v8855_v31, %s7968_s23  ;;  %v2172_v37 = vpop.permute.xlu0 %2171 }
 0x359   : > { %2232 = vst.msk [vmem:[%s8230_s26 + $0x928] sm:$0xff] %vm2219_vm3, %v2172_v37 }
 0x35a   : > { %v2170_v46 = vpop.permute.xlu1 %2169  ;;  %2410 = vrot.lane.b32.xlu0 %v8889_v3, %s7968_s23 }
 0x35b   : > { %2231 = vst.msk [vmem:[%s8230_s26 + $0x870] sm:$0xff] %vm2219_vm3, %v2170_v46 }
 0x35c   : > { %2408 = vrot.lane.b32.xlu1 %v8884_v41, %s7968_s23  ;;  %v2176_v0 = vpop.permute.xlu0 %2175 }
 0x35d   : > { %2234 = vst.msk [vmem:[%s8230_s26 + $0xa98] sm:$0xff] %vm2219_vm3, %v2176_v0 }
 0x35e   : > { %v2174_v44 = vpop.permute.xlu1 %2173  ;;  %2463 = vrot.lane.b32.xlu0 %v8578_v9, %s7969_s24 }
 0x35f   : > { %2233 = vst.msk [vmem:[%s8230_s26 + $0x9e0] sm:$0xff] %vm2219_vm3, %v2174_v44 }
 0x360   : > { %2412 = vrot.lane.b32.xlu1 %v8911_v47, %s7968_s23  ;;  %v2180_v37 = vpop.permute.xlu0 %2179  ;;  %s7983_s23 = smov 30  }
 0x361   : > { %2236 = vst.msk [vmem:[%s8230_s26 + $0xc08] sm:$0xff] %vm2219_vm3, %v2180_v37 }
 0x362   : > { %v2178_v46 = vpop.permute.xlu1 %2177  ;;  %2467 = vrot.lane.b32.xlu0 %v8600_v12, %s7969_s24 }
 0x363   : > { %2235 = vst.msk [vmem:[%s8230_s26 + $0xb50] sm:$0xff] %vm2219_vm3, %v2178_v46  ;;  %v7921_v46 = vld [vmem:[%s8230_s26] sm:$0xff] }
 0x364   : > { %2465 = vrot.lane.b32.xlu1 %v8605_v13, %s7969_s24  ;;  %v2184_v0 = vpop.permute.xlu0 %2183 }
 0x365   : > { %2238 = vst.msk [vmem:[%s8230_s26 + $0xd78] sm:$0xff] %vm2219_vm3, %v2184_v0 }
 0x366   : > { %v2182_v44 = vpop.permute.xlu1 %2181  ;;  %2471 = vrot.lane.b32.xlu0 %v8634_v17, %s7969_s24 }
 0x367   : > { %2237 = vst.msk [vmem:[%s8230_s26 + $0xcc0] sm:$0xff] %vm2219_vm3, %v2182_v44  ;;  %v7922_v44 = vld [vmem:[%s8230_s26 + $0xb8] sm:$0xff] }
 0x368   : > { %2469 = vrot.lane.b32.xlu1 %v8629_v16, %s7969_s24  ;;  %v2188_v13 = vpop.permute.xlu0 %2187 }
 0x369   : > { %2240 = vst.msk [vmem:[%s8230_s26 + $0xee8] sm:$0xff] %vm2219_vm3, %v2188_v13  ;;  %v7924_v13 = vld [vmem:[%s8230_s26 + $0x2e0] sm:$0xff] }
 0x36a   : > { %v2186_v9 = vpop.permute.xlu1 %2185  ;;  %2475 = vrot.lane.b32.xlu0 %v8661_v20, %s7969_s24 }
 0x36b   : > { %2239 = vst.msk [vmem:[%s8230_s26 + $0xe30] sm:$0xff] %vm2219_vm3, %v2186_v9 }
 0x36c   : > { %2473 = vrot.lane.b32.xlu1 %v8656_v19, %s7969_s24  ;;  %v2192_v16 = vpop.permute.xlu0 %2191 }
 0x36d   : > { %2242 = vst.msk [vmem:[%s8230_s26 + $0x1058] sm:$0xff] %vm2219_vm3, %v2192_v16 }
 0x36e   : > { %v2190_v12 = vpop.permute.xlu1 %2189  ;;  %2479 = vrot.lane.b32.xlu0 %v8690_v24, %s7969_s24 }
 0x36f   : > { %2241 = vst.msk [vmem:[%s8230_s26 + $0xfa0] sm:$0xff] %vm2219_vm3, %v2190_v12 }
 0x370   : > { %2477 = vrot.lane.b32.xlu1 %v8685_v23, %s7969_s24  ;;  %v2245_v19 = vpop.permute.xlu0 %2244 }
 0x371   : > { %2317 = vst.msk [vmem:[%s8230_s26 + $0x88] sm:$0xff] %vm2316_vm5, %v2245_v19 }
 0x372   : > { %v2194_v17 = vpop.permute.xlu1 %2193  ;;  %2319 = vst.msk [vmem:[%s8230_s26 + $0x90] sm:$0xff] %vm2318_vm6, %v2245_v19  ;;  %2483 = vrot.lane.b32.xlu0 %v8719_v29, %s7969_s24  ;;  %v7926_v19 = vld [vmem:[%s8230_s26 + $0x450] sm:$0xff] }
 0x373   : > { %2243 = vst.msk [vmem:[%s8230_s26 + $0x1110] sm:$0xff] %vm2219_vm3, %v2194_v17  ;;  %vm3410_vm3 = vcmask 1048272  }
 0x374   : > { %2481 = vrot.lane.b32.xlu1 %v8714_v27, %s7969_s24  ;;  %v2249_v23 = vpop.permute.xlu0 %2248 }
 0x375   : > { %2322 = vst.msk [vmem:[%s8230_s26 + $0x1f8] sm:$0xff] %vm2316_vm5, %v2249_v23 }
 0x376   : > { %v2247_v20 = vpop.permute.xlu1 %2246  ;;  %2323 = vst.msk [vmem:[%s8230_s26 + $0x200] sm:$0xff] %vm2318_vm6, %v2249_v23  ;;  %2487 = vrot.lane.b32.xlu0 %v8746_v35, %s7969_s24 }
 0x377   : > { %2320 = vst.msk [vmem:[%s8230_s26 + $0x140] sm:$0xff] %vm2316_vm5, %v2247_v20 }
 0x378   : > { %2321 = vst.msk [vmem:[%s8230_s26 + $0x148] sm:$0xff] %vm2318_vm6, %v2247_v20  ;;  %2485 = vrot.lane.b32.xlu1 %v8741_v33, %s7969_s24  ;;  %v2253_v27 = vpop.permute.xlu0 %2252 }
 0x379   : > { %2326 = vst.msk [vmem:[%s8230_s26 + $0x368] sm:$0xff] %vm2316_vm5, %v2253_v27 }
 0x37a   : > { %v2251_v24 = vpop.permute.xlu1 %2250  ;;  %2327 = vst.msk [vmem:[%s8230_s26 + $0x370] sm:$0xff] %vm2318_vm6, %v2253_v27  ;;  %2491 = vrot.lane.b32.xlu0 %v8775_v1, %s7969_s24  ;;  %v7928_v27 = vld [vmem:[%s8230_s26 + $0x5c0] sm:$0xff] }
 0x37b   : > { %2324 = vst.msk [vmem:[%s8230_s26 + $0x2b0] sm:$0xff] %vm2316_vm5, %v2251_v24 }
 0x37c   : > { %2325 = vst.msk [vmem:[%s8230_s26 + $0x2b8] sm:$0xff] %vm2318_vm6, %v2251_v24  ;;  %2489 = vrot.lane.b32.xlu1 %v8770_v63, %s7969_s24  ;;  %v2257_v33 = vpop.permute.xlu0 %2256 }
 0x37d   : > { %2330 = vst.msk [vmem:[%s8230_s26 + $0x4d8] sm:$0xff] %vm2316_vm5, %v2257_v33 }
 0x37e   : > { %v2255_v29 = vpop.permute.xlu1 %2254  ;;  %2331 = vst.msk [vmem:[%s8230_s26 + $0x4e0] sm:$0xff] %vm2318_vm6, %v2257_v33  ;;  %2495 = vrot.lane.b32.xlu0 %v8804_v15, %s7969_s24 }
 0x37f   : > { %2328 = vst.msk [vmem:[%s8230_s26 + $0x420] sm:$0xff] %vm2316_vm5, %v2255_v29 }
 0x380   : > { %2329 = vst.msk [vmem:[%s8230_s26 + $0x428] sm:$0xff] %vm2318_vm6, %v2255_v29  ;;  %2493 = vrot.lane.b32.xlu1 %v8799_v11, %s7969_s24  ;;  %v2261_v63 = vpop.permute.xlu0 %2260 }
 0x381   : > { %2334 = vst.msk [vmem:[%s8230_s26 + $0x648] sm:$0xff] %vm2316_vm5, %v2261_v63 }
 0x382   : > { %v2259_v35 = vpop.permute.xlu1 %2258  ;;  %2335 = vst.msk [vmem:[%s8230_s26 + $0x650] sm:$0xff] %vm2318_vm6, %v2261_v63  ;;  %2499 = vrot.lane.b32.xlu0 %v8831_v22, %s7969_s24  ;;  %v786_v22 = vsel %vm687_vm7, %v8235_v28, %v8878_v45  ;;  %v787_v28 = vsel %vm687_vm7, %v8550_v56, %v8540_v51  ;;  %v789_v51 = vsel %vm687_vm7, %v8261_v30, %v8923_v8  ;;  %v7925_v30 = vld [vmem:[%s8230_s26 + $0x228] sm:$0xff]  ;;  %v7930_v63 = vld [vmem:[%s8230_s26 + $0x730] sm:$0xff] }
 0x383   : > { %2332 = vst.msk [vmem:[%s8230_s26 + $0x590] sm:$0xff] %vm2316_vm5, %v2259_v35  ;;  %v10341_v37 = vsel %vm444_vm4, %v7921_v46, %v786_v22  ;;  %v790_v56 = vsel %vm687_vm7, %v8560_v62, %v8542_v52  ;;  %v10401_v8 = vsel %vm444_vm4, %v7925_v30, %v789_v51  ;;  %v791_v52 = vsel %vm687_vm7, %v8287_v32, %v8929_v49  ;;  %v7927_v32 = vld [vmem:[%s8230_s26 + $0x398] sm:$0xff]  ;;  %v7934_v46 = vld [vmem:[%s8230_s26 + $0xa10] sm:$0xff] }
 0x384   : > { %2333 = vst.msk [vmem:[%s8230_s26 + $0x598] sm:$0xff] %vm2318_vm6, %v2259_v35  ;;  %2497 = vrot.lane.b32.xlu1 %v8826_v18, %s7969_s24  ;;  %v2265_v11 = vpop.permute.xlu0 %2264  ;;  %v10396_v12 = vsel %vm444_vm4, %v7924_v13, %v790_v56  ;;  %v792_v62 = vsel %vm687_vm7, %v8564_v2, %v8544_v53  ;;  %v10431_v49 = vsel %vm444_vm4, %v7927_v32, %v791_v52  ;;  %v15465_v51 = vld [vmem:[#allocation9_spill] sm:$0xff]  ;;  %v7938_v13 = vld [vmem:[%s8230_s26 + $0xcf0] sm:$0xff]  ;;  %v15469_v32 = vld [vmem:[#allocation10_spill] sm:$0xff] }
 0x385   : > { %2338 = vst.msk [vmem:[%s8230_s26 + $0x7b8] sm:$0xff] %vm2316_vm5, %v2265_v11  ;;  %v10426_v20 = vsel %vm444_vm4, %v7926_v19, %v792_v62  ;;  %v793_v53 = vsel %vm687_vm7, %v8314_v34, %v8939_v50  ;;  %v794_v2 = vsel %vm687_vm7, %v8570_v6, %v8546_v54  ;;  %v7929_v34 = vld [vmem:[%s8230_s26 + $0x508] sm:$0xff]  ;;  %v795_v54 = vsel %vm687_vm7, %v8340_v36, %v8945_v43  ;;  %v7931_v43 = vld [vmem:[%s8230_s26 + $0x678] sm:$0xff]  ;;  %v15466_v62 = vld [vmem:[#allocation12_spill] sm:$0xff] }
 0x386   : > { %v2263_v1 = vpop.permute.xlu1 %2262  ;;  %2339 = vst.msk [vmem:[%s8230_s26 + $0x7c0] sm:$0xff] %vm2318_vm6, %v2265_v11  ;;  %2503 = vrot.lane.b32.xlu0 %v8860_v60, %s7969_s24  ;;  %v10456_v29 = vsel %vm444_vm4, %v7928_v27, %v794_v2  ;;  %v10461_v50 = vsel %vm444_vm4, %v7929_v34, %v793_v53  ;;  %v796_v6 = vsel %vm687_vm7, %v8592_v10, %v8548_v55  ;;  %v7939_v30 = vld [vmem:[%s8230_s26 + $0xc38] sm:$0xff]  ;;  %v15468_v19 = vld [vmem:[#allocation7_spill] sm:$0xff] }
 0x387   : > { %2336 = vst.msk [vmem:[%s8230_s26 + $0x700] sm:$0xff] %vm2316_vm5, %v2263_v1  ;;  %v10486_v36 = vsel %vm444_vm4, %v7930_v63, %v796_v6  ;;  %v797_v55 = vsel %vm687_vm7, %v8366_v38, %v8955_v5  ;;  %v798_v10 = vsel %vm687_vm7, %v8623_v14, %v8552_v57  ;;  %v7933_v5 = vld [vmem:[%s8230_s26 + $0x7e8] sm:$0xff]  ;;  %v799_v57 = vsel %vm687_vm7, %v8392_v40, %v8961_v48  ;;  %v7935_v48 = vld [vmem:[%s8230_s26 + $0x958] sm:$0xff]  ;;  %v15472_v63 = vld [vmem:[#allocation8_spill] sm:$0xff] }
 0x388   : > { %2337 = vst.msk [vmem:[%s8230_s26 + $0x708] sm:$0xff] %vm2318_vm6, %v2263_v1  ;;  %2501 = vrot.lane.b32.xlu1 %v8855_v31, %s7969_s24  ;;  %v2269_v18 = vpop.permute.xlu0 %2268  ;;  %v10491_v1 = vsel %vm444_vm4, %v7931_v43, %v795_v54  ;;  %v10519_v22 = vsel %vm444_vm4, %v7933_v5, %v797_v55  ;;  %v800_v14 = vsel %vm687_vm7, %v8675_v21, %v8556_v59  ;;  %v7941_v34 = vld [vmem:[%s8230_s26 + $0xda8] sm:$0xff]  ;;  %v15470_v6 = vld [vmem:[#allocation13_spill] sm:$0xff] }
 0x389   : > { %2342 = vst.msk [vmem:[%s8230_s26 + $0x928] sm:$0xff] %vm2316_vm5, %v2269_v18  ;;  %v10540_v40 = vsel %vm444_vm4, %v7934_v46, %v800_v14  ;;  %v801_v59 = vsel %vm687_vm7, %v8417_v42, %v8971_v39  ;;  %v802_v21 = vsel %vm687_vm7, %v8708_v25, %v8558_v61  ;;  %v7937_v39 = vld [vmem:[%s8230_s26 + $0xac8] sm:$0xff]  ;;  %v15463_v61 = vld [vmem:[#allocation2_spill] sm:$0xff]  ;;  %v806_v53 = vsel %vm687_vm7, %v15469_v32, %v15468_v19  ;;  %v7943_v5 = vld [vmem:[%s8230_s26 + $0xf18] sm:$0xff] }
 0x38a   : > { %v2267_v15 = vpop.permute.xlu1 %2266  ;;  %2343 = vst.msk [vmem:[%s8230_s26 + $0x930] sm:$0xff] %vm2318_vm6, %v2269_v18  ;;  %2507 = vrot.lane.b32.xlu0 %v8889_v3, %s7969_s24  ;;  %v788_v3 = vsel %vm687_vm7, %v8554_v58, %v8913_v26  ;;  %v10366_v58 = vsel %vm444_vm4, %v7922_v44, %v787_v28  ;;  %v7923_v26 = vld [vmem:[%s8230_s26 + $0x170] sm:$0xff]  ;;  %v7932_v18 = vld [vmem:[%s8230_s26 + $0x8a0] sm:$0xff]  ;;  %v10571_v44 = vsel %vm444_vm4, %v7937_v39, %v801_v59  ;;  %v15473_v43 = vld [vmem:[#allocation11_spill] sm:$0xff] }
 0x38b   : > { %2340 = vst.msk [vmem:[%s8230_s26 + $0x870] sm:$0xff] %vm2316_vm5, %v2267_v15  ;;  %v10514_v38 = vsel %vm444_vm4, %v7932_v18, %v798_v10  ;;  %v803_v25 = vsel %vm687_vm7, %v15463_v61, %v8977_v4  ;;  %v808_v55 = vsel %vm687_vm7, %v15473_v43, %v15472_v63  ;;  %v15474_v14 = vld [vmem:[#allocation14_spill] sm:$0xff]  ;;  %v7944_v59 = vld [vmem:[%s8230_s26 + $0x1088] sm:$0xff] }
 0x38c   : > { %2341 = vst.msk [vmem:[%s8230_s26 + $0x878] sm:$0xff] %vm2318_vm6, %v2267_v15  ;;  %2505 = vrot.lane.b32.xlu1 %v8884_v41, %s7969_s24  ;;  %v2273_v60 = vpop.permute.xlu0 %2272  ;;  %v10597_v52 = vsel %vm444_vm4, %v7939_v30, %v803_v25 }
 0x38d   : > { %2346 = vst.msk [vmem:[%s8230_s26 + $0xa98] sm:$0xff] %vm2316_vm5, %v2273_v60 }
 0x38e   : > { %v2271_v31 = vpop.permute.xlu1 %2270  ;;  %2347 = vst.msk [vmem:[%s8230_s26 + $0xaa0] sm:$0xff] %vm2318_vm6, %v2273_v60  ;;  %2584 = vrot.lane.b32.xlu0 %v10341_v37, %s7970_s25 }
 0x38f   : > { %2344 = vst.msk [vmem:[%s8230_s26 + $0x9e0] sm:$0xff] %vm2316_vm5, %v2271_v31 }
 0x390   : > { %2345 = vst.msk [vmem:[%s8230_s26 + $0x9e8] sm:$0xff] %vm2318_vm6, %v2271_v31  ;;  %2509 = vrot.lane.b32.xlu1 %v8911_v47, %s7969_s24  ;;  %v2277_v41 = vpop.permute.xlu0 %2276  ;;  %v10371_v47 = vsel %vm444_vm4, %v7923_v26, %v788_v3  ;;  %v10545_v3 = vsel %vm444_vm4, %v7935_v48, %v799_v57  ;;  %v15464_v26 = vld [vmem:[#allocation6_spill] sm:$0xff]  ;;  %s7824_s24 = smul.u32 48, %s15504_s22  ;;  %s7990_s22 = smov 24  }
 0x391   : > { %2350 = vst.msk [vmem:[%s8230_s26 + $0xc08] sm:$0xff] %vm2316_vm5, %v2277_v41  ;;  %v804_v56 = vsel %vm687_vm7, %v15465_v51, %v15464_v26 }
 0x392   : > { %v2275_v45 = vpop.permute.xlu1 %2274  ;;  %2351 = vst.msk [vmem:[%s8230_s26 + $0xc10] sm:$0xff] %vm2318_vm6, %v2277_v41  ;;  %2588 = vrot.lane.b32.xlu0 %v10371_v47, %s7970_s25  ;;  %v7936_v41 = vld [vmem:[%s8230_s26 + $0xb80] sm:$0xff]  ;;  %v10592_v4 = vsel %vm444_vm4, %v7938_v13, %v804_v56 }
 0x393   : > { %2348 = vst.msk [vmem:[%s8230_s26 + $0xb50] sm:$0xff] %vm2316_vm5, %v2275_v45  ;;  %v10566_v42 = vsel %vm444_vm4, %v7936_v41, %v802_v21 }
 0x394   : > { %2349 = vst.msk [vmem:[%s8230_s26 + $0xb58] sm:$0xff] %vm2318_vm6, %v2275_v45  ;;  %2586 = vrot.lane.b32.xlu1 %v10366_v58, %s7970_s25  ;;  %v2281_v9 = vpop.permute.xlu0 %2280 }
 0x395   : > { %2354 = vst.msk [vmem:[%s8230_s26 + $0xd78] sm:$0xff] %vm2316_vm5, %v2281_v9 }
 0x396   : > { %v2279_v0 = vpop.permute.xlu1 %2278  ;;  %2355 = vst.msk [vmem:[%s8230_s26 + $0xd80] sm:$0xff] %vm2318_vm6, %v2281_v9  ;;  %2592 = vrot.lane.b32.xlu0 %v10396_v12, %s7970_s25 }
 0x397   : > { %2352 = vst.msk [vmem:[%s8230_s26 + $0xcc0] sm:$0xff] %vm2316_vm5, %v2279_v0 }
 0x398   : > { %2353 = vst.msk [vmem:[%s8230_s26 + $0xcc8] sm:$0xff] %vm2318_vm6, %v2279_v0  ;;  %2590 = vrot.lane.b32.xlu1 %v10401_v8, %s7970_s25  ;;  %v2285_v17 = vpop.permute.xlu0 %2284 }
 0x399   : > { %2358 = vst.msk [vmem:[%s8230_s26 + $0xee8] sm:$0xff] %vm2316_vm5, %v2285_v17 }
 0x39a   : > { %v2283_v16 = vpop.permute.xlu1 %2282  ;;  %2359 = vst.msk [vmem:[%s8230_s26 + $0xef0] sm:$0xff] %vm2318_vm6, %v2285_v17  ;;  %2596 = vrot.lane.b32.xlu0 %v10426_v20, %s7970_s25 }
 0x39b   : > { %2356 = vst.msk [vmem:[%s8230_s26 + $0xe30] sm:$0xff] %vm2316_vm5, %v2283_v16 }
 0x39c   : > { %2357 = vst.msk [vmem:[%s8230_s26 + $0xe38] sm:$0xff] %vm2318_vm6, %v2283_v16  ;;  %2594 = vrot.lane.b32.xlu1 %v10431_v49, %s7970_s25  ;;  %v2289_v24 = vpop.permute.xlu0 %2288  ;;  %v15467_v16 = vld [vmem:[#allocation3_spill] sm:$0xff] }
 0x39d   : > { %2362 = vst.msk [vmem:[%s8230_s26 + $0x1058] sm:$0xff] %vm2316_vm5, %v2289_v24  ;;  %v805_v17 = vsel %vm687_vm7, %v15467_v16, %v15466_v62 }
 0x39e   : > { %v2287_v23 = vpop.permute.xlu1 %2286  ;;  %2363 = vst.msk [vmem:[%s8230_s26 + $0x1060] sm:$0xff] %vm2318_vm6, %v2289_v24  ;;  %2600 = vrot.lane.b32.xlu0 %v10456_v29, %s7970_s25  ;;  %v7940_v24 = vld [vmem:[%s8230_s26 + $0xe60] sm:$0xff]  ;;  %v10623_v54 = vsel %vm444_vm4, %v7941_v34, %v805_v17 }
 0x39f   : > { %2360 = vst.msk [vmem:[%s8230_s26 + $0xfa0] sm:$0xff] %vm2316_vm5, %v2287_v23  ;;  %v10618_v27 = vsel %vm444_vm4, %v7940_v24, %v806_v53 }
 0x3a0   : > { %2361 = vst.msk [vmem:[%s8230_s26 + $0xfa8] sm:$0xff] %vm2318_vm6, %v2287_v23  ;;  %2598 = vrot.lane.b32.xlu1 %v10461_v50, %s7970_s25  ;;  %v2367_v35 = vpop.permute.xlu0 %2366 }
 0x3a1   : > { %2439 = vst.msk [vmem:[%s8230_s26 + $0x90] sm:$0xff] %vm2438_vm8, %v2367_v35 }
 0x3a2   : > { %v2291_v33 = vpop.permute.xlu1 %2290  ;;  %2604 = vrot.lane.b32.xlu0 %v10486_v36, %s7970_s25 }
 0x3a3   : > { %2364 = vst.msk [vmem:[%s8230_s26 + $0x1110] sm:$0xff] %vm2316_vm5, %v2291_v33  ;;  %vm3412_vm5 = vcmask 130048  }
 0x3a4   : > { %2365 = vst.msk [vmem:[%s8230_s26 + $0x1118] sm:$0xff] %vm2318_vm6, %v2291_v33  ;;  %2602 = vrot.lane.b32.xlu1 %v10491_v1, %s7970_s25  ;;  %v2371_v15 = vpop.permute.xlu0 %2370  ;;  %v15471_v33 = vld [vmem:[#allocation4_spill] sm:$0xff]  ;;  %vm3532_vm6 = vcmask 572544  }
 0x3a5   : > { %2441 = vst.msk [vmem:[%s8230_s26 + $0x200] sm:$0xff] %vm2438_vm8, %v2371_v15  ;;  %v807_v35 = vsel %vm687_vm7, %v15471_v33, %v15470_v6  ;;  %v7942_v15 = vld [vmem:[%s8230_s26 + $0xfd0] sm:$0xff] }
 0x3a6   : > { %v2369_v11 = vpop.permute.xlu1 %2368  ;;  %2608 = vrot.lane.b32.xlu0 %v10514_v38, %s7970_s25  ;;  %v10644_v18 = vsel %vm444_vm4, %v7942_v15, %v808_v55  ;;  %v10649_v57 = vsel %vm444_vm4, %v7943_v5, %v807_v35 }
 0x3a7   : > { %2440 = vst.msk [vmem:[%s8230_s26 + $0x148] sm:$0xff] %vm2438_vm8, %v2369_v11 }
 0x3a8   : > { %2606 = vrot.lane.b32.xlu1 %v10519_v22, %s7970_s25  ;;  %v2375_v60 = vpop.permute.xlu0 %2374 }
 0x3a9   : > { %2443 = vst.msk [vmem:[%s8230_s26 + $0x370] sm:$0xff] %vm2438_vm8, %v2375_v60 }
 0x3aa   : > { %v2373_v31 = vpop.permute.xlu1 %2372  ;;  %2612 = vrot.lane.b32.xlu0 %v10540_v40, %s7970_s25 }
 0x3ab   : > { %2442 = vst.msk [vmem:[%s8230_s26 + $0x2b8] sm:$0xff] %vm2438_vm8, %v2373_v31  ;;  %v15475_v31 = vld [vmem:[#allocation5_spill] sm:$0xff] }
 0x3ac   : > { %2610 = vrot.lane.b32.xlu1 %v10545_v3, %s7970_s25  ;;  %v2379_v45 = vpop.permute.xlu0 %2378  ;;  %v809_v60 = vsel %vm687_vm7, %v15475_v31, %v15474_v14  ;;  %vm3629_vm7 = vcmask 1015344  }
 0x3ad   : > { %2445 = vst.msk [vmem:[%s8230_s26 + $0x4e0] sm:$0xff] %vm2438_vm8, %v2379_v45  ;;  %v10666_v21 = vsel %vm444_vm4, %v7944_v59, %v809_v60  ;;  %vm2535_vm4 = vcmask 1031744  }
 0x3ae   : > { %v2377_v28 = vpop.permute.xlu1 %2376  ;;  %2616 = vrot.lane.b32.xlu0 %v10566_v42, %s7970_s25 }
 0x3af   : > { %2444 = vst.msk [vmem:[%s8230_s26 + $0x428] sm:$0xff] %vm2438_vm8, %v2377_v28 }
 0x3b0   : > { %2614 = vrot.lane.b32.xlu1 %v10571_v44, %s7970_s25  ;;  %v2383_v9 = vpop.permute.xlu0 %2382 }
 0x3b1   : > { %2447 = vst.msk [vmem:[%s8230_s26 + $0x650] sm:$0xff] %vm2438_vm8, %v2383_v9 }
 0x3b2   : > { %v2381_v0 = vpop.permute.xlu1 %2380  ;;  %2620 = vrot.lane.b32.xlu0 %v10592_v4, %s7970_s25 }
 0x3b3   : > { %2446 = vst.msk [vmem:[%s8230_s26 + $0x598] sm:$0xff] %vm2438_vm8, %v2381_v0 }
 0x3b4   : > { %2618 = vrot.lane.b32.xlu1 %v10597_v52, %s7970_s25  ;;  %v2387_v23 = vpop.permute.xlu0 %2386 }
 0x3b5   : > { %2449 = vst.msk [vmem:[%s8230_s26 + $0x7c0] sm:$0xff] %vm2438_vm8, %v2387_v23 }
 0x3b6   : > { %v2385_v2 = vpop.permute.xlu1 %2384  ;;  %2624 = vrot.lane.b32.xlu0 %v10618_v27, %s7970_s25 }
 0x3b7   : > { %2448 = vst.msk [vmem:[%s8230_s26 + $0x708] sm:$0xff] %vm2438_vm8, %v2385_v2 }
 0x3b8   : > { %2622 = vrot.lane.b32.xlu1 %v10623_v54, %s7970_s25  ;;  %v2391_v11 = vpop.permute.xlu0 %2390 }
 0x3b9   : > { %2451 = vst.msk [vmem:[%s8230_s26 + $0x930] sm:$0xff] %vm2438_vm8, %v2391_v11 }
 0x3ba   : > { %v2389_v10 = vpop.permute.xlu1 %2388  ;;  %2628 = vrot.lane.b32.xlu0 %v10644_v18, %s7970_s25 }
 0x3bb   : > { %2450 = vst.msk [vmem:[%s8230_s26 + $0x878] sm:$0xff] %vm2438_vm8, %v2389_v10 }
 0x3bc   : > { %2626 = vrot.lane.b32.xlu1 %v10649_v57, %s7970_s25  ;;  %v2395_v48 = vpop.permute.xlu0 %2394 }
 0x3bd   : > { %2453 = vst.msk [vmem:[%s8230_s26 + $0xaa0] sm:$0xff] %vm2438_vm8, %v2395_v48 }
 0x3be   : > { %v2393_v46 = vpop.permute.xlu1 %2392  ;;  %2706 = vrot.lane.b32.xlu0 %v10341_v37, %s7971_s27 }
 0x3bf   : > { %2452 = vst.msk [vmem:[%s8230_s26 + $0x9e8] sm:$0xff] %vm2438_vm8, %v2393_v46 }
 0x3c0   : > { %2630 = vrot.lane.b32.xlu1 %v10666_v21, %s7970_s25  ;;  %v2399_v45 = vpop.permute.xlu0 %2398  ;;  %s7993_s25 = smov 59  }
 0x3c1   : > { %2455 = vst.msk [vmem:[%s8230_s26 + $0xc10] sm:$0xff] %vm2438_vm8, %v2399_v45 }
 0x3c2   : > { %v2397_v28 = vpop.permute.xlu1 %2396  ;;  %2710 = vrot.lane.b32.xlu0 %v10371_v47, %s7971_s27 }
 0x3c3   : > { %2454 = vst.msk [vmem:[%s8230_s26 + $0xb58] sm:$0xff] %vm2438_vm8, %v2397_v28 }
 0x3c4   : > { %2708 = vrot.lane.b32.xlu1 %v10366_v58, %s7971_s27  ;;  %v2403_v41 = vpop.permute.xlu0 %2402 }
 0x3c5   : > { %2457 = vst.msk [vmem:[%s8230_s26 + $0xd80] sm:$0xff] %vm2438_vm8, %v2403_v41 }
 0x3c6   : > { %v2401_v7 = vpop.permute.xlu1 %2400  ;;  %2714 = vrot.lane.b32.xlu0 %v10396_v12, %s7971_s27 }
 0x3c7   : > { %2456 = vst.msk [vmem:[%s8230_s26 + $0xcc8] sm:$0xff] %vm2438_vm8, %v2401_v7 }
 0x3c8   : > { %2712 = vrot.lane.b32.xlu1 %v10401_v8, %s7971_s27  ;;  %v2407_v61 = vpop.permute.xlu0 %2406 }
 0x3c9   : > { %2459 = vst.msk [vmem:[%s8230_s26 + $0xef0] sm:$0xff] %vm2438_vm8, %v2407_v61 }
 0x3ca   : > { %v2405_v39 = vpop.permute.xlu1 %2404  ;;  %2718 = vrot.lane.b32.xlu0 %v10426_v20, %s7971_s27 }
 0x3cb   : > { %2458 = vst.msk [vmem:[%s8230_s26 + $0xe38] sm:$0xff] %vm2438_vm8, %v2405_v39 }
 0x3cc   : > { %2716 = vrot.lane.b32.xlu1 %v10431_v49, %s7971_s27  ;;  %v2411_v26 = vpop.permute.xlu0 %2410 }
 0x3cd   : > { %2461 = vst.msk [vmem:[%s8230_s26 + $0x1060] sm:$0xff] %vm2438_vm8, %v2411_v26 }
 0x3ce   : > { %v2409_v25 = vpop.permute.xlu1 %2408  ;;  %2722 = vrot.lane.b32.xlu0 %v10456_v29, %s7971_s27 }
 0x3cf   : > { %2460 = vst.msk [vmem:[%s8230_s26 + $0xfa8] sm:$0xff] %vm2438_vm8, %v2409_v25 }
 0x3d0   : > { %2720 = vrot.lane.b32.xlu1 %v10461_v50, %s7971_s27  ;;  %v2464_v56 = vpop.permute.xlu0 %2463 }
 0x3d1   : > { %2536 = vst.msk [vmem:[%s8230_s26 + $0x90] sm:$0xff] %vm2535_vm4, %v2464_v56 }
 0x3d2   : > { %v2413_v51 = vpop.permute.xlu1 %2412  ;;  %2726 = vrot.lane.b32.xlu0 %v10486_v36, %s7971_s27 }
 0x3d3   : > { %2462 = vst.msk [vmem:[%s8230_s26 + $0x1118] sm:$0xff] %vm2438_vm8, %v2413_v51  ;;  %vm3726_vm8 = vcmask 1048544  }
 0x3d4   : > { %2724 = vrot.lane.b32.xlu1 %v10491_v1, %s7971_s27  ;;  %v2468_v9 = vpop.permute.xlu0 %2467 }
 0x3d5   : > { %2538 = vst.msk [vmem:[%s8230_s26 + $0x200] sm:$0xff] %vm2535_vm4, %v2468_v9 }
 0x3d6   : > { %v2466_v0 = vpop.permute.xlu1 %2465  ;;  %2730 = vrot.lane.b32.xlu0 %v10514_v38, %s7971_s27 }
 0x3d7   : > { %2537 = vst.msk [vmem:[%s8230_s26 + $0x148] sm:$0xff] %vm2535_vm4, %v2466_v0 }
 0x3d8   : > { %2728 = vrot.lane.b32.xlu1 %v10519_v22, %s7971_s27  ;;  %v2472_v30 = vpop.permute.xlu0 %2471 }
 0x3d9   : > { %2540 = vst.msk [vmem:[%s8230_s26 + $0x370] sm:$0xff] %vm2535_vm4, %v2472_v30 }
 0x3da   : > { %v2470_v13 = vpop.permute.xlu1 %2469  ;;  %2734 = vrot.lane.b32.xlu0 %v10540_v40, %s7971_s27 }
 0x3db   : > { %2539 = vst.msk [vmem:[%s8230_s26 + $0x2b8] sm:$0xff] %vm2535_vm4, %v2470_v13 }
 0x3dc   : > { %2732 = vrot.lane.b32.xlu1 %v10545_v3, %s7971_s27  ;;  %v2476_v16 = vpop.permute.xlu0 %2475 }
 0x3dd   : > { %2542 = vst.msk [vmem:[%s8230_s26 + $0x4e0] sm:$0xff] %vm2535_vm4, %v2476_v16 }
 0x3de   : > { %v2474_v62 = vpop.permute.xlu1 %2473  ;;  %2738 = vrot.lane.b32.xlu0 %v10566_v42, %s7971_s27 }
 0x3df   : > { %2541 = vst.msk [vmem:[%s8230_s26 + $0x428] sm:$0xff] %vm2535_vm4, %v2474_v62 }
 0x3e0   : > { %2736 = vrot.lane.b32.xlu1 %v10571_v44, %s7971_s27  ;;  %v2480_v19 = vpop.permute.xlu0 %2479 }
 0x3e1   : > { %2544 = vst.msk [vmem:[%s8230_s26 + $0x650] sm:$0xff] %vm2535_vm4, %v2480_v19 }
 0x3e2   : > { %v2478_v17 = vpop.permute.xlu1 %2477  ;;  %2742 = vrot.lane.b32.xlu0 %v10592_v4, %s7971_s27 }
 0x3e3   : > { %2543 = vst.msk [vmem:[%s8230_s26 + $0x598] sm:$0xff] %vm2535_vm4, %v2478_v17 }
 0x3e4   : > { %2740 = vrot.lane.b32.xlu1 %v10597_v52, %s7971_s27  ;;  %v2484_v53 = vpop.permute.xlu0 %2483 }
 0x3e5   : > { %2546 = vst.msk [vmem:[%s8230_s26 + $0x7c0] sm:$0xff] %vm2535_vm4, %v2484_v53 }
 0x3e6   : > { %v2482_v32 = vpop.permute.xlu1 %2481  ;;  %2746 = vrot.lane.b32.xlu0 %v10618_v27, %s7971_s27 }
 0x3e7   : > { %2545 = vst.msk [vmem:[%s8230_s26 + $0x708] sm:$0xff] %vm2535_vm4, %v2482_v32 }
 0x3e8   : > { %2744 = vrot.lane.b32.xlu1 %v10623_v54, %s7971_s27  ;;  %v2488_v23 = vpop.permute.xlu0 %2487 }
 0x3e9   : > { %2548 = vst.msk [vmem:[%s8230_s26 + $0x930] sm:$0xff] %vm2535_vm4, %v2488_v23 }
 0x3ea   : > { %v2486_v2 = vpop.permute.xlu1 %2485  ;;  %2750 = vrot.lane.b32.xlu0 %v10644_v18, %s7971_s27 }
 0x3eb   : > { %2547 = vst.msk [vmem:[%s8230_s26 + $0x878] sm:$0xff] %vm2535_vm4, %v2486_v2 }
 0x3ec   : > { %2748 = vrot.lane.b32.xlu1 %v10649_v57, %s7971_s27  ;;  %v2492_v34 = vpop.permute.xlu0 %2491 }
 0x3ed   : > { %2550 = vst.msk [vmem:[%s8230_s26 + $0xaa0] sm:$0xff] %vm2535_vm4, %v2492_v34 }
 0x3ee   : > { %v2490_v24 = vpop.permute.xlu1 %2489  ;;  %2803 = vrot.lane.b32.xlu0 %v10341_v37, %s7972_s28 }
 0x3ef   : > { %2549 = vst.msk [vmem:[%s8230_s26 + $0x9e8] sm:$0xff] %vm2535_vm4, %v2490_v24 }
 0x3f0   : > { %2752 = vrot.lane.b32.xlu1 %v10666_v21, %s7971_s27  ;;  %v2496_v33 = vpop.permute.xlu0 %2495  ;;  %s7994_s27 = smov 97  }
 0x3f1   : > { %2552 = vst.msk [vmem:[%s8230_s26 + $0xc10] sm:$0xff] %vm2535_vm4, %v2496_v33 }
 0x3f2   : > { %v2494_v6 = vpop.permute.xlu1 %2493  ;;  %2807 = vrot.lane.b32.xlu0 %v10371_v47, %s7972_s28 }
 0x3f3   : > { %2551 = vst.msk [vmem:[%s8230_s26 + $0xb58] sm:$0xff] %vm2535_vm4, %v2494_v6 }
 0x3f4   : > { %2805 = vrot.lane.b32.xlu1 %v10366_v58, %s7972_s28  ;;  %v2500_v63 = vpop.permute.xlu0 %2499 }
 0x3f5   : > { %2554 = vst.msk [vmem:[%s8230_s26 + $0xd80] sm:$0xff] %vm2535_vm4, %v2500_v63 }
 0x3f6   : > { %v2498_v35 = vpop.permute.xlu1 %2497  ;;  %2811 = vrot.lane.b32.xlu0 %v10396_v12, %s7972_s28 }
 0x3f7   : > { %2553 = vst.msk [vmem:[%s8230_s26 + $0xcc8] sm:$0xff] %vm2535_vm4, %v2498_v35 }
 0x3f8   : > { %2809 = vrot.lane.b32.xlu1 %v10401_v8, %s7972_s28  ;;  %v2504_v55 = vpop.permute.xlu0 %2503 }
 0x3f9   : > { %2556 = vst.msk [vmem:[%s8230_s26 + $0xef0] sm:$0xff] %vm2535_vm4, %v2504_v55 }
 0x3fa   : > { %v2502_v43 = vpop.permute.xlu1 %2501  ;;  %2815 = vrot.lane.b32.xlu0 %v10426_v20, %s7972_s28 }
 0x3fb   : > { %2555 = vst.msk [vmem:[%s8230_s26 + $0xe38] sm:$0xff] %vm2535_vm4, %v2502_v43 }
 0x3fc   : > { %2813 = vrot.lane.b32.xlu1 %v10431_v49, %s7972_s28  ;;  %v2508_v11 = vpop.permute.xlu0 %2507 }
 0x3fd   : > { %2558 = vst.msk [vmem:[%s8230_s26 + $0x1060] sm:$0xff] %vm2535_vm4, %v2508_v11 }
 0x3fe   : > { %v2506_v10 = vpop.permute.xlu1 %2505  ;;  %2819 = vrot.lane.b32.xlu0 %v10456_v29, %s7972_s28 }
 0x3ff   : > { %2557 = vst.msk [vmem:[%s8230_s26 + $0xfa8] sm:$0xff] %vm2535_vm4, %v2506_v10 }
 0x400   : > { %2817 = vrot.lane.b32.xlu1 %v10461_v50, %s7972_s28  ;;  %v2585_v5 = vpop.permute.xlu0 %2584 }
 0x401   : > { %2657 = vst.msk [vmem:[%s8230_s26 + $0x30] sm:$0xff] %vm2656_vm9, %v2585_v5 }
 0x402   : > { %v2510_v15 = vpop.permute.xlu1 %2509  ;;  %2659 = vst.msk [vmem:[%s8230_s26 + $0x38] sm:$0xff] %vm2658_vm10, %v2585_v5  ;;  %2823 = vrot.lane.b32.xlu0 %v10486_v36, %s7972_s28 }
 0x403   : > { %2559 = vst.msk [vmem:[%s8230_s26 + $0x1118] sm:$0xff] %vm2535_vm4, %v2510_v15  ;;  %vm3728_vm4 = vcmask 408576  }
 0x404   : > { %2821 = vrot.lane.b32.xlu1 %v10491_v1, %s7972_s28  ;;  %v2589_v31 = vpop.permute.xlu0 %2588 }
 0x405   : > { %2662 = vst.msk [vmem:[%s8230_s26 + $0x1a0] sm:$0xff] %vm2656_vm9, %v2589_v31 }
 0x406   : > { %v2587_v14 = vpop.permute.xlu1 %2586  ;;  %2663 = vst.msk [vmem:[%s8230_s26 + $0x1a8] sm:$0xff] %vm2658_vm10, %v2589_v31  ;;  %2827 = vrot.lane.b32.xlu0 %v10514_v38, %s7972_s28 }
 0x407   : > { %2660 = vst.msk [vmem:[%s8230_s26 + $0xe8] sm:$0xff] %vm2656_vm9, %v2587_v14 }
 0x408   : > { %2661 = vst.msk [vmem:[%s8230_s26 + $0xf0] sm:$0xff] %vm2658_vm10, %v2587_v14  ;;  %2825 = vrot.lane.b32.xlu1 %v10519_v22, %s7972_s28  ;;  %v2593_v46 = vpop.permute.xlu0 %2592 }
 0x409   : > { %2666 = vst.msk [vmem:[%s8230_s26 + $0x310] sm:$0xff] %vm2656_vm9, %v2593_v46 }
 0x40a   : > { %v2591_v60 = vpop.permute.xlu1 %2590  ;;  %2667 = vst.msk [vmem:[%s8230_s26 + $0x318] sm:$0xff] %vm2658_vm10, %v2593_v46  ;;  %2831 = vrot.lane.b32.xlu0 %v10540_v40, %s7972_s28 }
 0x40b   : > { %2664 = vst.msk [vmem:[%s8230_s26 + $0x258] sm:$0xff] %vm2656_vm9, %v2591_v60 }
 0x40c   : > { %2665 = vst.msk [vmem:[%s8230_s26 + $0x260] sm:$0xff] %vm2658_vm10, %v2591_v60  ;;  %2829 = vrot.lane.b32.xlu1 %v10545_v3, %s7972_s28  ;;  %v2597_v59 = vpop.permute.xlu0 %2596 }
 0x40d   : > { %2670 = vst.msk [vmem:[%s8230_s26 + $0x480] sm:$0xff] %vm2656_vm9, %v2597_v59 }
 0x40e   : > { %v2595_v48 = vpop.permute.xlu1 %2594  ;;  %2671 = vst.msk [vmem:[%s8230_s26 + $0x488] sm:$0xff] %vm2658_vm10, %v2597_v59  ;;  %2835 = vrot.lane.b32.xlu0 %v10566_v42, %s7972_s28 }
 0x40f   : > { %2668 = vst.msk [vmem:[%s8230_s26 + $0x3c8] sm:$0xff] %vm2656_vm9, %v2595_v48 }
 0x410   : > { %2669 = vst.msk [vmem:[%s8230_s26 + $0x3d0] sm:$0xff] %vm2658_vm10, %v2595_v48  ;;  %2833 = vrot.lane.b32.xlu1 %v10571_v44, %s7972_s28  ;;  %v2601_v45 = vpop.permute.xlu0 %2600 }
 0x411   : > { %2674 = vst.msk [vmem:[%s8230_s26 + $0x5f0] sm:$0xff] %vm2656_vm9, %v2601_v45 }
 0x412   : > { %v2599_v28 = vpop.permute.xlu1 %2598  ;;  %2675 = vst.msk [vmem:[%s8230_s26 + $0x5f8] sm:$0xff] %vm2658_vm10, %v2601_v45  ;;  %2839 = vrot.lane.b32.xlu0 %v10592_v4, %s7972_s28 }
 0x413   : > { %2672 = vst.msk [vmem:[%s8230_s26 + $0x538] sm:$0xff] %vm2656_vm9, %v2599_v28 }
 0x414   : > { %2673 = vst.msk [vmem:[%s8230_s26 + $0x540] sm:$0xff] %vm2658_vm10, %v2599_v28  ;;  %2837 = vrot.lane.b32.xlu1 %v10597_v52, %s7972_s28  ;;  %v2605_v41 = vpop.permute.xlu0 %2604 }
 0x415   : > { %2678 = vst.msk [vmem:[%s8230_s26 + $0x760] sm:$0xff] %vm2656_vm9, %v2605_v41 }
 0x416   : > { %v2603_v7 = vpop.permute.xlu1 %2602  ;;  %2679 = vst.msk [vmem:[%s8230_s26 + $0x768] sm:$0xff] %vm2658_vm10, %v2605_v41  ;;  %2843 = vrot.lane.b32.xlu0 %v10618_v27, %s7972_s28 }
 0x417   : > { %2676 = vst.msk [vmem:[%s8230_s26 + $0x6a8] sm:$0xff] %vm2656_vm9, %v2603_v7 }
 0x418   : > { %2677 = vst.msk [vmem:[%s8230_s26 + $0x6b0] sm:$0xff] %vm2658_vm10, %v2603_v7  ;;  %2841 = vrot.lane.b32.xlu1 %v10623_v54, %s7972_s28  ;;  %v2609_v61 = vpop.permute.xlu0 %2608 }
 0x419   : > { %2682 = vst.msk [vmem:[%s8230_s26 + $0x8d0] sm:$0xff] %vm2656_vm9, %v2609_v61 }
 0x41a   : > { %v2607_v39 = vpop.permute.xlu1 %2606  ;;  %2683 = vst.msk [vmem:[%s8230_s26 + $0x8d8] sm:$0xff] %vm2658_vm10, %v2609_v61  ;;  %2847 = vrot.lane.b32.xlu0 %v10644_v18, %s7972_s28 }
 0x41b   : > { %2680 = vst.msk [vmem:[%s8230_s26 + $0x818] sm:$0xff] %vm2656_vm9, %v2607_v39 }
 0x41c   : > { %2681 = vst.msk [vmem:[%s8230_s26 + $0x820] sm:$0xff] %vm2658_vm10, %v2607_v39  ;;  %2845 = vrot.lane.b32.xlu1 %v10649_v57, %s7972_s28  ;;  %v2613_v26 = vpop.permute.xlu0 %2612 }
 0x41d   : > { %2686 = vst.msk [vmem:[%s8230_s26 + $0xa40] sm:$0xff] %vm2656_vm9, %v2613_v26 }
 0x41e   : > { %v2611_v25 = vpop.permute.xlu1 %2610  ;;  %2687 = vst.msk [vmem:[%s8230_s26 + $0xa48] sm:$0xff] %vm2658_vm10, %v2613_v26  ;;  %2925 = vrot.lane.b32.xlu0 %v10341_v37, %s7973_s29 }
 0x41f   : > { %2684 = vst.msk [vmem:[%s8230_s26 + $0x988] sm:$0xff] %vm2656_vm9, %v2611_v25 }
 0x420   : > { %2685 = vst.msk [vmem:[%s8230_s26 + $0x990] sm:$0xff] %vm2658_vm10, %v2611_v25  ;;  %2849 = vrot.lane.b32.xlu1 %v10666_v21, %s7972_s28  ;;  %v2617_v56 = vpop.permute.xlu0 %2616  ;;  %s408_s28 = scalar_lea.vmem %s15424_s0, %s7824_s24  ;;  %s7992_s24 = smov 21  }
 0x421   : > { %2690 = vst.msk [vmem:[%s8230_s26 + $0xbb0] sm:$0xff] %vm2656_vm9, %v2617_v56 }
 0x422   : > { %v2615_v51 = vpop.permute.xlu1 %2614  ;;  %2691 = vst.msk [vmem:[%s8230_s26 + $0xbb8] sm:$0xff] %vm2658_vm10, %v2617_v56  ;;  %2929 = vrot.lane.b32.xlu0 %v10371_v47, %s7973_s29 }
 0x423   : > { %2688 = vst.msk [vmem:[%s8230_s26 + $0xaf8] sm:$0xff] %vm2656_vm9, %v2615_v51 }
 0x424   : > { %2689 = vst.msk [vmem:[%s8230_s26 + $0xb00] sm:$0xff] %vm2658_vm10, %v2615_v51  ;;  %2927 = vrot.lane.b32.xlu1 %v10366_v58, %s7973_s29  ;;  %v2621_v9 = vpop.permute.xlu0 %2620 }
 0x425   : > { %2694 = vst.msk [vmem:[%s8230_s26 + $0xd20] sm:$0xff] %vm2656_vm9, %v2621_v9 }
 0x426   : > { %v2619_v0 = vpop.permute.xlu1 %2618  ;;  %2695 = vst.msk [vmem:[%s8230_s26 + $0xd28] sm:$0xff] %vm2658_vm10, %v2621_v9  ;;  %2933 = vrot.lane.b32.xlu0 %v10396_v12, %s7973_s29 }
 0x427   : > { %2692 = vst.msk [vmem:[%s8230_s26 + $0xc68] sm:$0xff] %vm2656_vm9, %v2619_v0 }
 0x428   : > { %2693 = vst.msk [vmem:[%s8230_s26 + $0xc70] sm:$0xff] %vm2658_vm10, %v2619_v0  ;;  %2931 = vrot.lane.b32.xlu1 %v10401_v8, %s7973_s29  ;;  %v2625_v30 = vpop.permute.xlu0 %2624 }
 0x429   : > { %2698 = vst.msk [vmem:[%s8230_s26 + $0xe90] sm:$0xff] %vm2656_vm9, %v2625_v30 }
 0x42a   : > { %v2623_v13 = vpop.permute.xlu1 %2622  ;;  %2699 = vst.msk [vmem:[%s8230_s26 + $0xe98] sm:$0xff] %vm2658_vm10, %v2625_v30  ;;  %2937 = vrot.lane.b32.xlu0 %v10426_v20, %s7973_s29 }
 0x42b   : > { %2696 = vst.msk [vmem:[%s8230_s26 + $0xdd8] sm:$0xff] %vm2656_vm9, %v2623_v13 }
 0x42c   : > { %2697 = vst.msk [vmem:[%s8230_s26 + $0xde0] sm:$0xff] %vm2658_vm10, %v2623_v13  ;;  %2935 = vrot.lane.b32.xlu1 %v10431_v49, %s7973_s29  ;;  %v2629_v16 = vpop.permute.xlu0 %2628 }
 0x42d   : > { %2702 = vst.msk [vmem:[%s8230_s26 + $0x1000] sm:$0xff] %vm2656_vm9, %v2629_v16 }
 0x42e   : > { %v2627_v62 = vpop.permute.xlu1 %2626  ;;  %2703 = vst.msk [vmem:[%s8230_s26 + $0x1008] sm:$0xff] %vm2658_vm10, %v2629_v16  ;;  %2941 = vrot.lane.b32.xlu0 %v10456_v29, %s7973_s29 }
 0x42f   : > { %2700 = vst.msk [vmem:[%s8230_s26 + $0xf48] sm:$0xff] %vm2656_vm9, %v2627_v62 }
 0x430   : > { %2701 = vst.msk [vmem:[%s8230_s26 + $0xf50] sm:$0xff] %vm2658_vm10, %v2627_v62  ;;  %2939 = vrot.lane.b32.xlu1 %v10461_v50, %s7973_s29  ;;  %v2707_v19 = vpop.permute.xlu0 %2706 }
 0x431   : > { %2779 = vst.msk [vmem:[%s8230_s26 + $0x38] sm:$0xff] %vm2778_vm11, %v2707_v19 }
 0x432   : > { %v2631_v17 = vpop.permute.xlu1 %2630  ;;  %2945 = vrot.lane.b32.xlu0 %v10486_v36, %s7973_s29 }
 0x433   : > { %2704 = vst.msk [vmem:[%s8230_s26 + $0x10b8] sm:$0xff] %vm2656_vm9, %v2631_v17  ;;  %vm3848_vm9 = vcmask 851344  }
 0x434   : > { %2705 = vst.msk [vmem:[%s8230_s26 + $0x10c0] sm:$0xff] %vm2658_vm10, %v2631_v17  ;;  %2943 = vrot.lane.b32.xlu1 %v10491_v1, %s7973_s29  ;;  %v2711_v53 = vpop.permute.xlu0 %2710 }
 0x435   : > { %2781 = vst.msk [vmem:[%s8230_s26 + $0x1a8] sm:$0xff] %vm2778_vm11, %v2711_v53 }
 0x436   : > { %v2709_v32 = vpop.permute.xlu1 %2708  ;;  %2949 = vrot.lane.b32.xlu0 %v10514_v38, %s7973_s29 }
 0x437   : > { %2780 = vst.msk [vmem:[%s8230_s26 + $0xf0] sm:$0xff] %vm2778_vm11, %v2709_v32 }
 0x438   : > { %2947 = vrot.lane.b32.xlu1 %v10519_v22, %s7973_s29  ;;  %v2715_v23 = vpop.permute.xlu0 %2714 }
 0x439   : > { %2783 = vst.msk [vmem:[%s8230_s26 + $0x318] sm:$0xff] %vm2778_vm11, %v2715_v23 }
 0x43a   : > { %v2713_v2 = vpop.permute.xlu1 %2712  ;;  %2953 = vrot.lane.b32.xlu0 %v10540_v40, %s7973_s29 }
 0x43b   : > { %2782 = vst.msk [vmem:[%s8230_s26 + $0x260] sm:$0xff] %vm2778_vm11, %v2713_v2 }
 0x43c   : > { %2951 = vrot.lane.b32.xlu1 %v10545_v3, %s7973_s29  ;;  %v2719_v34 = vpop.permute.xlu0 %2718 }
 0x43d   : > { %2785 = vst.msk [vmem:[%s8230_s26 + $0x488] sm:$0xff] %vm2778_vm11, %v2719_v34 }
 0x43e   : > { %v2717_v24 = vpop.permute.xlu1 %2716  ;;  %2957 = vrot.lane.b32.xlu0 %v10566_v42, %s7973_s29 }
 0x43f   : > { %2784 = vst.msk [vmem:[%s8230_s26 + $0x3d0] sm:$0xff] %vm2778_vm11, %v2717_v24 }
 0x440   : > { %2955 = vrot.lane.b32.xlu1 %v10571_v44, %s7973_s29  ;;  %v2723_v33 = vpop.permute.xlu0 %2722 }
 0x441   : > { %2787 = vst.msk [vmem:[%s8230_s26 + $0x5f8] sm:$0xff] %vm2778_vm11, %v2723_v33 }
 0x442   : > { %v2721_v6 = vpop.permute.xlu1 %2720  ;;  %2961 = vrot.lane.b32.xlu0 %v10592_v4, %s7973_s29 }
 0x443   : > { %2786 = vst.msk [vmem:[%s8230_s26 + $0x540] sm:$0xff] %vm2778_vm11, %v2721_v6 }
 0x444   : > { %2959 = vrot.lane.b32.xlu1 %v10597_v52, %s7973_s29  ;;  %v2727_v63 = vpop.permute.xlu0 %2726 }
 0x445   : > { %2789 = vst.msk [vmem:[%s8230_s26 + $0x768] sm:$0xff] %vm2778_vm11, %v2727_v63 }
 0x446   : > { %v2725_v35 = vpop.permute.xlu1 %2724  ;;  %2965 = vrot.lane.b32.xlu0 %v10618_v27, %s7973_s29 }
 0x447   : > { %2788 = vst.msk [vmem:[%s8230_s26 + $0x6b0] sm:$0xff] %vm2778_vm11, %v2725_v35 }
 0x448   : > { %2963 = vrot.lane.b32.xlu1 %v10623_v54, %s7973_s29  ;;  %v2731_v55 = vpop.permute.xlu0 %2730 }
 0x449   : > { %2791 = vst.msk [vmem:[%s8230_s26 + $0x8d8] sm:$0xff] %vm2778_vm11, %v2731_v55 }
 0x44a   : > { %v2729_v43 = vpop.permute.xlu1 %2728  ;;  %2969 = vrot.lane.b32.xlu0 %v10644_v18, %s7973_s29 }
 0x44b   : > { %2790 = vst.msk [vmem:[%s8230_s26 + $0x820] sm:$0xff] %vm2778_vm11, %v2729_v43 }
 0x44c   : > { %2967 = vrot.lane.b32.xlu1 %v10649_v57, %s7973_s29  ;;  %v2735_v11 = vpop.permute.xlu0 %2734 }
 0x44d   : > { %2793 = vst.msk [vmem:[%s8230_s26 + $0xa48] sm:$0xff] %vm2778_vm11, %v2735_v11 }
 0x44e   : > { %v2733_v10 = vpop.permute.xlu1 %2732  ;;  %3022 = vrot.lane.b32.xlu0 %v10341_v37, %s7974_s30 }
 0x44f   : > { %2792 = vst.msk [vmem:[%s8230_s26 + $0x990] sm:$0xff] %vm2778_vm11, %v2733_v10 }
 0x450   : > { %2971 = vrot.lane.b32.xlu1 %v10666_v21, %s7973_s29  ;;  %v2739_v5 = vpop.permute.xlu0 %2738  ;;  %s7991_s29 = smov 78  }
 0x451   : > { %2795 = vst.msk [vmem:[%s8230_s26 + $0xbb8] sm:$0xff] %vm2778_vm11, %v2739_v5 }
 0x452   : > { %v2737_v15 = vpop.permute.xlu1 %2736  ;;  %3026 = vrot.lane.b32.xlu0 %v10371_v47, %s7974_s30 }
 0x453   : > { %2794 = vst.msk [vmem:[%s8230_s26 + $0xb00] sm:$0xff] %vm2778_vm11, %v2737_v15 }
 0x454   : > { %3024 = vrot.lane.b32.xlu1 %v10366_v58, %s7974_s30  ;;  %v2743_v31 = vpop.permute.xlu0 %2742 }
 0x455   : > { %2797 = vst.msk [vmem:[%s8230_s26 + $0xd28] sm:$0xff] %vm2778_vm11, %v2743_v31 }
 0x456   : > { %v2741_v14 = vpop.permute.xlu1 %2740  ;;  %3030 = vrot.lane.b32.xlu0 %v10396_v12, %s7974_s30 }
 0x457   : > { %2796 = vst.msk [vmem:[%s8230_s26 + $0xc70] sm:$0xff] %vm2778_vm11, %v2741_v14 }
 0x458   : > { %3028 = vrot.lane.b32.xlu1 %v10401_v8, %s7974_s30  ;;  %v2747_v46 = vpop.permute.xlu0 %2746 }
 0x459   : > { %2799 = vst.msk [vmem:[%s8230_s26 + $0xe98] sm:$0xff] %vm2778_vm11, %v2747_v46 }
 0x45a   : > { %v2745_v60 = vpop.permute.xlu1 %2744  ;;  %3034 = vrot.lane.b32.xlu0 %v10426_v20, %s7974_s30 }
 0x45b   : > { %2798 = vst.msk [vmem:[%s8230_s26 + $0xde0] sm:$0xff] %vm2778_vm11, %v2745_v60 }
 0x45c   : > { %3032 = vrot.lane.b32.xlu1 %v10431_v49, %s7974_s30  ;;  %v2751_v59 = vpop.permute.xlu0 %2750 }
 0x45d   : > { %2801 = vst.msk [vmem:[%s8230_s26 + $0x1008] sm:$0xff] %vm2778_vm11, %v2751_v59 }
 0x45e   : > { %v2749_v48 = vpop.permute.xlu1 %2748  ;;  %3038 = vrot.lane.b32.xlu0 %v10456_v29, %s7974_s30 }
 0x45f   : > { %2800 = vst.msk [vmem:[%s8230_s26 + $0xf50] sm:$0xff] %vm2778_vm11, %v2749_v48 }
 0x460   : > { %3036 = vrot.lane.b32.xlu1 %v10461_v50, %s7974_s30  ;;  %v2804_v45 = vpop.permute.xlu0 %2803 }
 0x461   : > { %2876 = vst.msk [vmem:[%s8230_s26 + $0x38] sm:$0xff] %vm2875_vm12, %v2804_v45 }
 0x462   : > { %v2753_v28 = vpop.permute.xlu1 %2752  ;;  %2878 = vst.msk [vmem:[%s8230_s26 + $0x40] sm:$0xff] %vm2877_vm13, %v2804_v45  ;;  %3042 = vrot.lane.b32.xlu0 %v10486_v36, %s7974_s30 }
 0x463   : > { %2802 = vst.msk [vmem:[%s8230_s26 + $0x10c0] sm:$0xff] %vm2778_vm11, %v2753_v28  ;;  %vm5105_vm11 = vcmask 1042432  }
 0x464   : > { %3040 = vrot.lane.b32.xlu1 %v10491_v1, %s7974_s30  ;;  %v2808_v41 = vpop.permute.xlu0 %2807 }
 0x465   : > { %2881 = vst.msk [vmem:[%s8230_s26 + $0x1a8] sm:$0xff] %vm2875_vm12, %v2808_v41 }
 0x466   : > { %v2806_v7 = vpop.permute.xlu1 %2805  ;;  %2882 = vst.msk [vmem:[%s8230_s26 + $0x1b0] sm:$0xff] %vm2877_vm13, %v2808_v41  ;;  %3046 = vrot.lane.b32.xlu0 %v10514_v38, %s7974_s30 }
 0x467   : > { %2879 = vst.msk [vmem:[%s8230_s26 + $0xf0] sm:$0xff] %vm2875_vm12, %v2806_v7 }
 0x468   : > { %2880 = vst.msk [vmem:[%s8230_s26 + $0xf8] sm:$0xff] %vm2877_vm13, %v2806_v7  ;;  %3044 = vrot.lane.b32.xlu1 %v10519_v22, %s7974_s30  ;;  %v2812_v61 = vpop.permute.xlu0 %2811 }
 0x469   : > { %2885 = vst.msk [vmem:[%s8230_s26 + $0x318] sm:$0xff] %vm2875_vm12, %v2812_v61 }
 0x46a   : > { %v2810_v39 = vpop.permute.xlu1 %2809  ;;  %2886 = vst.msk [vmem:[%s8230_s26 + $0x320] sm:$0xff] %vm2877_vm13, %v2812_v61  ;;  %3050 = vrot.lane.b32.xlu0 %v10540_v40, %s7974_s30 }
 0x46b   : > { %2883 = vst.msk [vmem:[%s8230_s26 + $0x260] sm:$0xff] %vm2875_vm12, %v2810_v39 }
 0x46c   : > { %2884 = vst.msk [vmem:[%s8230_s26 + $0x268] sm:$0xff] %vm2877_vm13, %v2810_v39  ;;  %3048 = vrot.lane.b32.xlu1 %v10545_v3, %s7974_s30  ;;  %v2816_v26 = vpop.permute.xlu0 %2815 }
 0x46d   : > { %2889 = vst.msk [vmem:[%s8230_s26 + $0x488] sm:$0xff] %vm2875_vm12, %v2816_v26 }
 0x46e   : > { %v2814_v25 = vpop.permute.xlu1 %2813  ;;  %2890 = vst.msk [vmem:[%s8230_s26 + $0x490] sm:$0xff] %vm2877_vm13, %v2816_v26  ;;  %3054 = vrot.lane.b32.xlu0 %v10566_v42, %s7974_s30 }
 0x46f   : > { %2887 = vst.msk [vmem:[%s8230_s26 + $0x3d0] sm:$0xff] %vm2875_vm12, %v2814_v25 }
 0x470   : > { %2888 = vst.msk [vmem:[%s8230_s26 + $0x3d8] sm:$0xff] %vm2877_vm13, %v2814_v25  ;;  %3052 = vrot.lane.b32.xlu1 %v10571_v44, %s7974_s30  ;;  %v2820_v56 = vpop.permute.xlu0 %2819 }
 0x471   : > { %2893 = vst.msk [vmem:[%s8230_s26 + $0x5f8] sm:$0xff] %vm2875_vm12, %v2820_v56 }
 0x472   : > { %v2818_v51 = vpop.permute.xlu1 %2817  ;;  %2894 = vst.msk [vmem:[%s8230_s26 + $0x600] sm:$0xff] %vm2877_vm13, %v2820_v56  ;;  %3058 = vrot.lane.b32.xlu0 %v10592_v4, %s7974_s30 }
 0x473   : > { %2891 = vst.msk [vmem:[%s8230_s26 + $0x540] sm:$0xff] %vm2875_vm12, %v2818_v51 }
 0x474   : > { %2892 = vst.msk [vmem:[%s8230_s26 + $0x548] sm:$0xff] %vm2877_vm13, %v2818_v51  ;;  %3056 = vrot.lane.b32.xlu1 %v10597_v52, %s7974_s30  ;;  %v2824_v9 = vpop.permute.xlu0 %2823 }
 0x475   : > { %2897 = vst.msk [vmem:[%s8230_s26 + $0x768] sm:$0xff] %vm2875_vm12, %v2824_v9 }
 0x476   : > { %v2822_v0 = vpop.permute.xlu1 %2821  ;;  %2898 = vst.msk [vmem:[%s8230_s26 + $0x770] sm:$0xff] %vm2877_vm13, %v2824_v9  ;;  %3062 = vrot.lane.b32.xlu0 %v10618_v27, %s7974_s30 }
 0x477   : > { %2895 = vst.msk [vmem:[%s8230_s26 + $0x6b0] sm:$0xff] %vm2875_vm12, %v2822_v0 }
 0x478   : > { %2896 = vst.msk [vmem:[%s8230_s26 + $0x6b8] sm:$0xff] %vm2877_vm13, %v2822_v0  ;;  %3060 = vrot.lane.b32.xlu1 %v10623_v54, %s7974_s30  ;;  %v2828_v30 = vpop.permute.xlu0 %2827 }
 0x479   : > { %2901 = vst.msk [vmem:[%s8230_s26 + $0x8d8] sm:$0xff] %vm2875_vm12, %v2828_v30 }
 0x47a   : > { %v2826_v13 = vpop.permute.xlu1 %2825  ;;  %2902 = vst.msk [vmem:[%s8230_s26 + $0x8e0] sm:$0xff] %vm2877_vm13, %v2828_v30  ;;  %3066 = vrot.lane.b32.xlu0 %v10644_v18, %s7974_s30 }
 0x47b   : > { %2899 = vst.msk [vmem:[%s8230_s26 + $0x820] sm:$0xff] %vm2875_vm12, %v2826_v13 }
 0x47c   : > { %2900 = vst.msk [vmem:[%s8230_s26 + $0x828] sm:$0xff] %vm2877_vm13, %v2826_v13  ;;  %3064 = vrot.lane.b32.xlu1 %v10649_v57, %s7974_s30  ;;  %v2832_v16 = vpop.permute.xlu0 %2831 }
 0x47d   : > { %2905 = vst.msk [vmem:[%s8230_s26 + $0xa48] sm:$0xff] %vm2875_vm12, %v2832_v16 }
 0x47e   : > { %v2830_v62 = vpop.permute.xlu1 %2829  ;;  %2906 = vst.msk [vmem:[%s8230_s26 + $0xa50] sm:$0xff] %vm2877_vm13, %v2832_v16  ;;  %3119 = vrot.lane.b32.xlu0 %v10341_v37, %s7975_s13 }
 0x47f   : > { %2903 = vst.msk [vmem:[%s8230_s26 + $0x990] sm:$0xff] %vm2875_vm12, %v2830_v62 }
 0x480   : > { %2904 = vst.msk [vmem:[%s8230_s26 + $0x998] sm:$0xff] %vm2877_vm13, %v2830_v62  ;;  %3068 = vrot.lane.b32.xlu1 %v10666_v21, %s7974_s30  ;;  %v2836_v19 = vpop.permute.xlu0 %2835  ;;  %s7998_s30 = smov 121  }
 0x481   : > { %2909 = vst.msk [vmem:[%s8230_s26 + $0xbb8] sm:$0xff] %vm2875_vm12, %v2836_v19 }
 0x482   : > { %v2834_v17 = vpop.permute.xlu1 %2833  ;;  %2910 = vst.msk [vmem:[%s8230_s26 + $0xbc0] sm:$0xff] %vm2877_vm13, %v2836_v19  ;;  %3123 = vrot.lane.b32.xlu0 %v10371_v47, %s7975_s13 }
 0x483   : > { %2907 = vst.msk [vmem:[%s8230_s26 + $0xb00] sm:$0xff] %vm2875_vm12, %v2834_v17 }
 0x484   : > { %2908 = vst.msk [vmem:[%s8230_s26 + $0xb08] sm:$0xff] %vm2877_vm13, %v2834_v17  ;;  %3121 = vrot.lane.b32.xlu1 %v10366_v58, %s7975_s13  ;;  %v2840_v53 = vpop.permute.xlu0 %2839 }
 0x485   : > { %2913 = vst.msk [vmem:[%s8230_s26 + $0xd28] sm:$0xff] %vm2875_vm12, %v2840_v53 }
 0x486   : > { %v2838_v32 = vpop.permute.xlu1 %2837  ;;  %2914 = vst.msk [vmem:[%s8230_s26 + $0xd30] sm:$0xff] %vm2877_vm13, %v2840_v53  ;;  %3127 = vrot.lane.b32.xlu0 %v10396_v12, %s7975_s13 }
 0x487   : > { %2911 = vst.msk [vmem:[%s8230_s26 + $0xc70] sm:$0xff] %vm2875_vm12, %v2838_v32 }
 0x488   : > { %2912 = vst.msk [vmem:[%s8230_s26 + $0xc78] sm:$0xff] %vm2877_vm13, %v2838_v32  ;;  %3125 = vrot.lane.b32.xlu1 %v10401_v8, %s7975_s13  ;;  %v2844_v23 = vpop.permute.xlu0 %2843 }
 0x489   : > { %2917 = vst.msk [vmem:[%s8230_s26 + $0xe98] sm:$0xff] %vm2875_vm12, %v2844_v23 }
 0x48a   : > { %v2842_v2 = vpop.permute.xlu1 %2841  ;;  %2918 = vst.msk [vmem:[%s8230_s26 + $0xea0] sm:$0xff] %vm2877_vm13, %v2844_v23  ;;  %3131 = vrot.lane.b32.xlu0 %v10426_v20, %s7975_s13 }
 0x48b   : > { %2915 = vst.msk [vmem:[%s8230_s26 + $0xde0] sm:$0xff] %vm2875_vm12, %v2842_v2 }
 0x48c   : > { %2916 = vst.msk [vmem:[%s8230_s26 + $0xde8] sm:$0xff] %vm2877_vm13, %v2842_v2  ;;  %3129 = vrot.lane.b32.xlu1 %v10431_v49, %s7975_s13  ;;  %v2848_v34 = vpop.permute.xlu0 %2847 }
 0x48d   : > { %2921 = vst.msk [vmem:[%s8230_s26 + $0x1008] sm:$0xff] %vm2875_vm12, %v2848_v34 }
 0x48e   : > { %v2846_v24 = vpop.permute.xlu1 %2845  ;;  %2922 = vst.msk [vmem:[%s8230_s26 + $0x1010] sm:$0xff] %vm2877_vm13, %v2848_v34  ;;  %3135 = vrot.lane.b32.xlu0 %v10456_v29, %s7975_s13 }
 0x48f   : > { %2919 = vst.msk [vmem:[%s8230_s26 + $0xf50] sm:$0xff] %vm2875_vm12, %v2846_v24 }
 0x490   : > { %2920 = vst.msk [vmem:[%s8230_s26 + $0xf58] sm:$0xff] %vm2877_vm13, %v2846_v24  ;;  %3133 = vrot.lane.b32.xlu1 %v10461_v50, %s7975_s13  ;;  %v2926_v33 = vpop.permute.xlu0 %2925 }
 0x491   : > { %2998 = vst.msk [vmem:[%s8230_s26 + $0x40] sm:$0xff] %vm2997_vm14, %v2926_v33 }
 0x492   : > { %v2850_v6 = vpop.permute.xlu1 %2849  ;;  %3139 = vrot.lane.b32.xlu0 %v10486_v36, %s7975_s13 }
 0x493   : > { %2923 = vst.msk [vmem:[%s8230_s26 + $0x10c0] sm:$0xff] %vm2875_vm12, %v2850_v6  ;;  %vm3947_vm12 = vcmask 244736  }
 0x494   : > { %2924 = vst.msk [vmem:[%s8230_s26 + $0x10c8] sm:$0xff] %vm2877_vm13, %v2850_v6  ;;  %3137 = vrot.lane.b32.xlu1 %v10491_v1, %s7975_s13  ;;  %v2930_v63 = vpop.permute.xlu0 %2929  ;;  %vm4067_vm13 = vcmask 687344  }
 0x495   : > { %3000 = vst.msk [vmem:[%s8230_s26 + $0x1b0] sm:$0xff] %vm2997_vm14, %v2930_v63 }
 0x496   : > { %v2928_v35 = vpop.permute.xlu1 %2927  ;;  %3143 = vrot.lane.b32.xlu0 %v10514_v38, %s7975_s13 }
 0x497   : > { %2999 = vst.msk [vmem:[%s8230_s26 + $0xf8] sm:$0xff] %vm2997_vm14, %v2928_v35 }
 0x498   : > { %3141 = vrot.lane.b32.xlu1 %v10519_v22, %s7975_s13  ;;  %v2934_v55 = vpop.permute.xlu0 %2933 }
 0x499   : > { %3002 = vst.msk [vmem:[%s8230_s26 + $0x320] sm:$0xff] %vm2997_vm14, %v2934_v55 }
 0x49a   : > { %v2932_v43 = vpop.permute.xlu1 %2931  ;;  %3147 = vrot.lane.b32.xlu0 %v10540_v40, %s7975_s13 }
 0x49b   : > { %3001 = vst.msk [vmem:[%s8230_s26 + $0x268] sm:$0xff] %vm2997_vm14, %v2932_v43 }
 0x49c   : > { %3145 = vrot.lane.b32.xlu1 %v10545_v3, %s7975_s13  ;;  %v2938_v11 = vpop.permute.xlu0 %2937 }
 0x49d   : > { %3004 = vst.msk [vmem:[%s8230_s26 + $0x490] sm:$0xff] %vm2997_vm14, %v2938_v11 }
 0x49e   : > { %v2936_v10 = vpop.permute.xlu1 %2935  ;;  %3151 = vrot.lane.b32.xlu0 %v10566_v42, %s7975_s13 }
 0x49f   : > { %3003 = vst.msk [vmem:[%s8230_s26 + $0x3d8] sm:$0xff] %vm2997_vm14, %v2936_v10 }
 0x4a0   : > { %3149 = vrot.lane.b32.xlu1 %v10571_v44, %s7975_s13  ;;  %v2942_v5 = vpop.permute.xlu0 %2941 }
 0x4a1   : > { %3006 = vst.msk [vmem:[%s8230_s26 + $0x600] sm:$0xff] %vm2997_vm14, %v2942_v5 }
 0x4a2   : > { %v2940_v15 = vpop.permute.xlu1 %2939  ;;  %3155 = vrot.lane.b32.xlu0 %v10592_v4, %s7975_s13 }
 0x4a3   : > { %3005 = vst.msk [vmem:[%s8230_s26 + $0x548] sm:$0xff] %vm2997_vm14, %v2940_v15 }
 0x4a4   : > { %3153 = vrot.lane.b32.xlu1 %v10597_v52, %s7975_s13  ;;  %v2946_v31 = vpop.permute.xlu0 %2945 }
 0x4a5   : > { %3008 = vst.msk [vmem:[%s8230_s26 + $0x770] sm:$0xff] %vm2997_vm14, %v2946_v31 }
 0x4a6   : > { %v2944_v14 = vpop.permute.xlu1 %2943  ;;  %3159 = vrot.lane.b32.xlu0 %v10618_v27, %s7975_s13 }
 0x4a7   : > { %3007 = vst.msk [vmem:[%s8230_s26 + $0x6b8] sm:$0xff] %vm2997_vm14, %v2944_v14 }
 0x4a8   : > { %3157 = vrot.lane.b32.xlu1 %v10623_v54, %s7975_s13  ;;  %v2950_v46 = vpop.permute.xlu0 %2949 }
 0x4a9   : > { %3010 = vst.msk [vmem:[%s8230_s26 + $0x8e0] sm:$0xff] %vm2997_vm14, %v2950_v46 }
 0x4aa   : > { %v2948_v60 = vpop.permute.xlu1 %2947  ;;  %3163 = vrot.lane.b32.xlu0 %v10644_v18, %s7975_s13 }
 0x4ab   : > { %3009 = vst.msk [vmem:[%s8230_s26 + $0x828] sm:$0xff] %vm2997_vm14, %v2948_v60 }
 0x4ac   : > { %3161 = vrot.lane.b32.xlu1 %v10649_v57, %s7975_s13  ;;  %v2954_v59 = vpop.permute.xlu0 %2953 }
 0x4ad   : > { %3012 = vst.msk [vmem:[%s8230_s26 + $0xa50] sm:$0xff] %vm2997_vm14, %v2954_v59 }
 0x4ae   : > { %v2952_v48 = vpop.permute.xlu1 %2951  ;;  %3241 = vrot.lane.b32.xlu0 %v10341_v37, %s7976_s14 }
 0x4af   : > { %3011 = vst.msk [vmem:[%s8230_s26 + $0x998] sm:$0xff] %vm2997_vm14, %v2952_v48 }
 0x4b0   : > { %3165 = vrot.lane.b32.xlu1 %v10666_v21, %s7975_s13  ;;  %v2958_v45 = vpop.permute.xlu0 %2957  ;;  %s7999_s13 = smov 31  }
 0x4b1   : > { %3014 = vst.msk [vmem:[%s8230_s26 + $0xbc0] sm:$0xff] %vm2997_vm14, %v2958_v45 }
 0x4b2   : > { %v2956_v28 = vpop.permute.xlu1 %2955  ;;  %3245 = vrot.lane.b32.xlu0 %v10371_v47, %s7976_s14 }
 0x4b3   : > { %3013 = vst.msk [vmem:[%s8230_s26 + $0xb08] sm:$0xff] %vm2997_vm14, %v2956_v28 }
 0x4b4   : > { %3243 = vrot.lane.b32.xlu1 %v10366_v58, %s7976_s14  ;;  %v2962_v41 = vpop.permute.xlu0 %2961 }
 0x4b5   : > { %3016 = vst.msk [vmem:[%s8230_s26 + $0xd30] sm:$0xff] %vm2997_vm14, %v2962_v41 }
 0x4b6   : > { %v2960_v7 = vpop.permute.xlu1 %2959  ;;  %3249 = vrot.lane.b32.xlu0 %v10396_v12, %s7976_s14 }
 0x4b7   : > { %3015 = vst.msk [vmem:[%s8230_s26 + $0xc78] sm:$0xff] %vm2997_vm14, %v2960_v7 }
 0x4b8   : > { %3247 = vrot.lane.b32.xlu1 %v10401_v8, %s7976_s14  ;;  %v2966_v61 = vpop.permute.xlu0 %2965 }
 0x4b9   : > { %3018 = vst.msk [vmem:[%s8230_s26 + $0xea0] sm:$0xff] %vm2997_vm14, %v2966_v61 }
 0x4ba   : > { %v2964_v39 = vpop.permute.xlu1 %2963  ;;  %3253 = vrot.lane.b32.xlu0 %v10426_v20, %s7976_s14 }
 0x4bb   : > { %3017 = vst.msk [vmem:[%s8230_s26 + $0xde8] sm:$0xff] %vm2997_vm14, %v2964_v39 }
 0x4bc   : > { %3251 = vrot.lane.b32.xlu1 %v10431_v49, %s7976_s14  ;;  %v2970_v26 = vpop.permute.xlu0 %2969 }
 0x4bd   : > { %3020 = vst.msk [vmem:[%s8230_s26 + $0x1010] sm:$0xff] %vm2997_vm14, %v2970_v26 }
 0x4be   : > { %v2968_v25 = vpop.permute.xlu1 %2967  ;;  %3257 = vrot.lane.b32.xlu0 %v10456_v29, %s7976_s14 }
 0x4bf   : > { %3019 = vst.msk [vmem:[%s8230_s26 + $0xf58] sm:$0xff] %vm2997_vm14, %v2968_v25 }
 0x4c0   : > { %3255 = vrot.lane.b32.xlu1 %v10461_v50, %s7976_s14  ;;  %v3023_v56 = vpop.permute.xlu0 %3022 }
 0x4c1   : > { %3095 = vst.msk [vmem:[%s8230_s26 + $0x40] sm:$0xff] %vm3094_vm15, %v3023_v56 }
 0x4c2   : > { %v2972_v51 = vpop.permute.xlu1 %2971  ;;  %3261 = vrot.lane.b32.xlu0 %v10486_v36, %s7976_s14 }
 0x4c3   : > { %3021 = vst.msk [vmem:[%s8230_s26 + $0x10c8] sm:$0xff] %vm2997_vm14, %v2972_v51  ;;  %vm4164_vm14 = vcmask 1048224  }
 0x4c4   : > { %3259 = vrot.lane.b32.xlu1 %v10491_v1, %s7976_s14  ;;  %v3027_v9 = vpop.permute.xlu0 %3026 }
 0x4c5   : > { %3097 = vst.msk [vmem:[%s8230_s26 + $0x1b0] sm:$0xff] %vm3094_vm15, %v3027_v9 }
 0x4c6   : > { %v3025_v0 = vpop.permute.xlu1 %3024  ;;  %3265 = vrot.lane.b32.xlu0 %v10514_v38, %s7976_s14 }
 0x4c7   : > { %3096 = vst.msk [vmem:[%s8230_s26 + $0xf8] sm:$0xff] %vm3094_vm15, %v3025_v0 }
 0x4c8   : > { %3263 = vrot.lane.b32.xlu1 %v10519_v22, %s7976_s14  ;;  %v3031_v30 = vpop.permute.xlu0 %3030 }
 0x4c9   : > { %3099 = vst.msk [vmem:[%s8230_s26 + $0x320] sm:$0xff] %vm3094_vm15, %v3031_v30 }
 0x4ca   : > { %v3029_v13 = vpop.permute.xlu1 %3028  ;;  %3269 = vrot.lane.b32.xlu0 %v10540_v40, %s7976_s14 }
 0x4cb   : > { %3098 = vst.msk [vmem:[%s8230_s26 + $0x268] sm:$0xff] %vm3094_vm15, %v3029_v13 }
 0x4cc   : > { %3267 = vrot.lane.b32.xlu1 %v10545_v3, %s7976_s14  ;;  %v3035_v16 = vpop.permute.xlu0 %3034 }
 0x4cd   : > { %3101 = vst.msk [vmem:[%s8230_s26 + $0x490] sm:$0xff] %vm3094_vm15, %v3035_v16 }
 0x4ce   : > { %v3033_v62 = vpop.permute.xlu1 %3032  ;;  %3273 = vrot.lane.b32.xlu0 %v10566_v42, %s7976_s14 }
 0x4cf   : > { %3100 = vst.msk [vmem:[%s8230_s26 + $0x3d8] sm:$0xff] %vm3094_vm15, %v3033_v62 }
 0x4d0   : > { %3271 = vrot.lane.b32.xlu1 %v10571_v44, %s7976_s14  ;;  %v3039_v19 = vpop.permute.xlu0 %3038 }
 0x4d1   : > { %3103 = vst.msk [vmem:[%s8230_s26 + $0x600] sm:$0xff] %vm3094_vm15, %v3039_v19 }
 0x4d2   : > { %v3037_v17 = vpop.permute.xlu1 %3036  ;;  %3277 = vrot.lane.b32.xlu0 %v10592_v4, %s7976_s14 }
 0x4d3   : > { %3102 = vst.msk [vmem:[%s8230_s26 + $0x548] sm:$0xff] %vm3094_vm15, %v3037_v17 }
 0x4d4   : > { %3275 = vrot.lane.b32.xlu1 %v10597_v52, %s7976_s14  ;;  %v3043_v53 = vpop.permute.xlu0 %3042 }
 0x4d5   : > { %3105 = vst.msk [vmem:[%s8230_s26 + $0x770] sm:$0xff] %vm3094_vm15, %v3043_v53 }
 0x4d6   : > { %v3041_v32 = vpop.permute.xlu1 %3040  ;;  %3281 = vrot.lane.b32.xlu0 %v10618_v27, %s7976_s14 }
 0x4d7   : > { %3104 = vst.msk [vmem:[%s8230_s26 + $0x6b8] sm:$0xff] %vm3094_vm15, %v3041_v32 }
 0x4d8   : > { %3279 = vrot.lane.b32.xlu1 %v10623_v54, %s7976_s14  ;;  %v3047_v23 = vpop.permute.xlu0 %3046 }
 0x4d9   : > { %3107 = vst.msk [vmem:[%s8230_s26 + $0x8e0] sm:$0xff] %vm3094_vm15, %v3047_v23 }
 0x4da   : > { %v3045_v2 = vpop.permute.xlu1 %3044  ;;  %3285 = vrot.lane.b32.xlu0 %v10644_v18, %s7976_s14 }
 0x4db   : > { %3106 = vst.msk [vmem:[%s8230_s26 + $0x828] sm:$0xff] %vm3094_vm15, %v3045_v2 }
 0x4dc   : > { %3283 = vrot.lane.b32.xlu1 %v10649_v57, %s7976_s14  ;;  %v3051_v34 = vpop.permute.xlu0 %3050 }
 0x4dd   : > { %3109 = vst.msk [vmem:[%s8230_s26 + $0xa50] sm:$0xff] %vm3094_vm15, %v3051_v34 }
 0x4de   : > { %v3049_v24 = vpop.permute.xlu1 %3048  ;;  %3338 = vrot.lane.b32.xlu0 %v10341_v37, %s7977_s15 }
 0x4df   : > { %3108 = vst.msk [vmem:[%s8230_s26 + $0x998] sm:$0xff] %vm3094_vm15, %v3049_v24 }
 0x4e0   : > { %3287 = vrot.lane.b32.xlu1 %v10666_v21, %s7976_s14  ;;  %v3055_v33 = vpop.permute.xlu0 %3054  ;;  %s7984_s14 = smov 84  }
 0x4e1   : > { %3111 = vst.msk [vmem:[%s8230_s26 + $0xbc0] sm:$0xff] %vm3094_vm15, %v3055_v33 }
 0x4e2   : > { %v3053_v6 = vpop.permute.xlu1 %3052  ;;  %3342 = vrot.lane.b32.xlu0 %v10371_v47, %s7977_s15 }
 0x4e3   : > { %3110 = vst.msk [vmem:[%s8230_s26 + $0xb08] sm:$0xff] %vm3094_vm15, %v3053_v6 }
 0x4e4   : > { %3340 = vrot.lane.b32.xlu1 %v10366_v58, %s7977_s15  ;;  %v3059_v63 = vpop.permute.xlu0 %3058 }
 0x4e5   : > { %3113 = vst.msk [vmem:[%s8230_s26 + $0xd30] sm:$0xff] %vm3094_vm15, %v3059_v63 }
 0x4e6   : > { %v3057_v35 = vpop.permute.xlu1 %3056  ;;  %3346 = vrot.lane.b32.xlu0 %v10396_v12, %s7977_s15 }
 0x4e7   : > { %3112 = vst.msk [vmem:[%s8230_s26 + $0xc78] sm:$0xff] %vm3094_vm15, %v3057_v35 }
 0x4e8   : > { %3344 = vrot.lane.b32.xlu1 %v10401_v8, %s7977_s15  ;;  %v3063_v55 = vpop.permute.xlu0 %3062 }
 0x4e9   : > { %3115 = vst.msk [vmem:[%s8230_s26 + $0xea0] sm:$0xff] %vm3094_vm15, %v3063_v55 }
 0x4ea   : > { %v3061_v43 = vpop.permute.xlu1 %3060  ;;  %3350 = vrot.lane.b32.xlu0 %v10426_v20, %s7977_s15 }
 0x4eb   : > { %3114 = vst.msk [vmem:[%s8230_s26 + $0xde8] sm:$0xff] %vm3094_vm15, %v3061_v43 }
 0x4ec   : > { %3348 = vrot.lane.b32.xlu1 %v10431_v49, %s7977_s15  ;;  %v3067_v11 = vpop.permute.xlu0 %3066 }
 0x4ed   : > { %3117 = vst.msk [vmem:[%s8230_s26 + $0x1010] sm:$0xff] %vm3094_vm15, %v3067_v11 }
 0x4ee   : > { %v3065_v10 = vpop.permute.xlu1 %3064  ;;  %3354 = vrot.lane.b32.xlu0 %v10456_v29, %s7977_s15 }
 0x4ef   : > { %3116 = vst.msk [vmem:[%s8230_s26 + $0xf58] sm:$0xff] %vm3094_vm15, %v3065_v10 }
 0x4f0   : > { %3352 = vrot.lane.b32.xlu1 %v10461_v50, %s7977_s15  ;;  %v3120_v5 = vpop.permute.xlu0 %3119 }
 0x4f1   : > { %3192 = vst.msk [vmem:[%s8230_s26 + $0x40] sm:$0xff] %vm3191_vm0, %v3120_v5 }
 0x4f2   : > { %v3069_v15 = vpop.permute.xlu1 %3068  ;;  %3194 = vst.msk [vmem:[%s8230_s26 + $0x48] sm:$0xff] %vm3193_vm1, %v3120_v5  ;;  %3358 = vrot.lane.b32.xlu0 %v10486_v36, %s7977_s15 }
 0x4f3   : > { %3118 = vst.msk [vmem:[%s8230_s26 + $0x10c8] sm:$0xff] %vm3094_vm15, %v3069_v15  ;;  %vm4166_vm15 = vcmask 80896  }
 0x4f4   : > { %3356 = vrot.lane.b32.xlu1 %v10491_v1, %s7977_s15  ;;  %v3124_v31 = vpop.permute.xlu0 %3123 }
 0x4f5   : > { %3197 = vst.msk [vmem:[%s8230_s26 + $0x1b0] sm:$0xff] %vm3191_vm0, %v3124_v31 }
 0x4f6   : > { %v3122_v14 = vpop.permute.xlu1 %3121  ;;  %3198 = vst.msk [vmem:[%s8230_s26 + $0x1b8] sm:$0xff] %vm3193_vm1, %v3124_v31  ;;  %3362 = vrot.lane.b32.xlu0 %v10514_v38, %s7977_s15 }
 0x4f7   : > { %3195 = vst.msk [vmem:[%s8230_s26 + $0xf8] sm:$0xff] %vm3191_vm0, %v3122_v14 }
 0x4f8   : > { %3196 = vst.msk [vmem:[%s8230_s26 + $0x100] sm:$0xff] %vm3193_vm1, %v3122_v14  ;;  %3360 = vrot.lane.b32.xlu1 %v10519_v22, %s7977_s15  ;;  %v3128_v46 = vpop.permute.xlu0 %3127 }
 0x4f9   : > { %3201 = vst.msk [vmem:[%s8230_s26 + $0x320] sm:$0xff] %vm3191_vm0, %v3128_v46 }
 0x4fa   : > { %v3126_v60 = vpop.permute.xlu1 %3125  ;;  %3202 = vst.msk [vmem:[%s8230_s26 + $0x328] sm:$0xff] %vm3193_vm1, %v3128_v46  ;;  %3366 = vrot.lane.b32.xlu0 %v10540_v40, %s7977_s15 }
 0x4fb   : > { %3199 = vst.msk [vmem:[%s8230_s26 + $0x268] sm:$0xff] %vm3191_vm0, %v3126_v60 }
 0x4fc   : > { %3200 = vst.msk [vmem:[%s8230_s26 + $0x270] sm:$0xff] %vm3193_vm1, %v3126_v60  ;;  %3364 = vrot.lane.b32.xlu1 %v10545_v3, %s7977_s15  ;;  %v3132_v59 = vpop.permute.xlu0 %3131 }
 0x4fd   : > { %3205 = vst.msk [vmem:[%s8230_s26 + $0x490] sm:$0xff] %vm3191_vm0, %v3132_v59 }
 0x4fe   : > { %v3130_v48 = vpop.permute.xlu1 %3129  ;;  %3206 = vst.msk [vmem:[%s8230_s26 + $0x498] sm:$0xff] %vm3193_vm1, %v3132_v59  ;;  %3370 = vrot.lane.b32.xlu0 %v10566_v42, %s7977_s15 }
 0x4ff   : > { %3203 = vst.msk [vmem:[%s8230_s26 + $0x3d8] sm:$0xff] %vm3191_vm0, %v3130_v48 }
 0x500   : > { %3204 = vst.msk [vmem:[%s8230_s26 + $0x3e0] sm:$0xff] %vm3193_vm1, %v3130_v48  ;;  %3368 = vrot.lane.b32.xlu1 %v10571_v44, %s7977_s15  ;;  %v3136_v45 = vpop.permute.xlu0 %3135 }
 0x501   : > { %3209 = vst.msk [vmem:[%s8230_s26 + $0x600] sm:$0xff] %vm3191_vm0, %v3136_v45 }
 0x502   : > { %v3134_v28 = vpop.permute.xlu1 %3133  ;;  %3210 = vst.msk [vmem:[%s8230_s26 + $0x608] sm:$0xff] %vm3193_vm1, %v3136_v45  ;;  %3374 = vrot.lane.b32.xlu0 %v10592_v4, %s7977_s15 }
 0x503   : > { %3207 = vst.msk [vmem:[%s8230_s26 + $0x548] sm:$0xff] %vm3191_vm0, %v3134_v28 }
 0x504   : > { %3208 = vst.msk [vmem:[%s8230_s26 + $0x550] sm:$0xff] %vm3193_vm1, %v3134_v28  ;;  %3372 = vrot.lane.b32.xlu1 %v10597_v52, %s7977_s15  ;;  %v3140_v41 = vpop.permute.xlu0 %3139 }
 0x505   : > { %3213 = vst.msk [vmem:[%s8230_s26 + $0x770] sm:$0xff] %vm3191_vm0, %v3140_v41 }
 0x506   : > { %v3138_v7 = vpop.permute.xlu1 %3137  ;;  %3214 = vst.msk [vmem:[%s8230_s26 + $0x778] sm:$0xff] %vm3193_vm1, %v3140_v41  ;;  %3378 = vrot.lane.b32.xlu0 %v10618_v27, %s7977_s15 }
 0x507   : > { %3211 = vst.msk [vmem:[%s8230_s26 + $0x6b8] sm:$0xff] %vm3191_vm0, %v3138_v7 }
 0x508   : > { %3212 = vst.msk [vmem:[%s8230_s26 + $0x6c0] sm:$0xff] %vm3193_vm1, %v3138_v7  ;;  %3376 = vrot.lane.b32.xlu1 %v10623_v54, %s7977_s15  ;;  %v3144_v61 = vpop.permute.xlu0 %3143 }
 0x509   : > { %3217 = vst.msk [vmem:[%s8230_s26 + $0x8e0] sm:$0xff] %vm3191_vm0, %v3144_v61 }
 0x50a   : > { %v3142_v39 = vpop.permute.xlu1 %3141  ;;  %3218 = vst.msk [vmem:[%s8230_s26 + $0x8e8] sm:$0xff] %vm3193_vm1, %v3144_v61  ;;  %3382 = vrot.lane.b32.xlu0 %v10644_v18, %s7977_s15 }
 0x50b   : > { %3215 = vst.msk [vmem:[%s8230_s26 + $0x828] sm:$0xff] %vm3191_vm0, %v3142_v39 }
 0x50c   : > { %3216 = vst.msk [vmem:[%s8230_s26 + $0x830] sm:$0xff] %vm3193_vm1, %v3142_v39  ;;  %3380 = vrot.lane.b32.xlu1 %v10649_v57, %s7977_s15  ;;  %v3148_v26 = vpop.permute.xlu0 %3147 }
 0x50d   : > { %3221 = vst.msk [vmem:[%s8230_s26 + $0xa50] sm:$0xff] %vm3191_vm0, %v3148_v26 }
 0x50e   : > { %v3146_v25 = vpop.permute.xlu1 %3145  ;;  %3222 = vst.msk [vmem:[%s8230_s26 + $0xa58] sm:$0xff] %vm3193_vm1, %v3148_v26  ;;  %3460 = vrot.lane.b32.xlu0 %v10341_v37, %s7978_s16 }
 0x50f   : > { %3219 = vst.msk [vmem:[%s8230_s26 + $0x998] sm:$0xff] %vm3191_vm0, %v3146_v25 }
 0x510   : > { %3220 = vst.msk [vmem:[%s8230_s26 + $0x9a0] sm:$0xff] %vm3193_vm1, %v3146_v25  ;;  %3384 = vrot.lane.b32.xlu1 %v10666_v21, %s7977_s15  ;;  %v3152_v56 = vpop.permute.xlu0 %3151  ;;  %s7985_s15 = smov 10  }
 0x511   : > { %3225 = vst.msk [vmem:[%s8230_s26 + $0xbc0] sm:$0xff] %vm3191_vm0, %v3152_v56 }
 0x512   : > { %v3150_v51 = vpop.permute.xlu1 %3149  ;;  %3226 = vst.msk [vmem:[%s8230_s26 + $0xbc8] sm:$0xff] %vm3193_vm1, %v3152_v56  ;;  %3464 = vrot.lane.b32.xlu0 %v10371_v47, %s7978_s16 }
 0x513   : > { %3223 = vst.msk [vmem:[%s8230_s26 + $0xb08] sm:$0xff] %vm3191_vm0, %v3150_v51 }
 0x514   : > { %3224 = vst.msk [vmem:[%s8230_s26 + $0xb10] sm:$0xff] %vm3193_vm1, %v3150_v51  ;;  %3462 = vrot.lane.b32.xlu1 %v10366_v58, %s7978_s16  ;;  %v3156_v9 = vpop.permute.xlu0 %3155 }
 0x515   : > { %3229 = vst.msk [vmem:[%s8230_s26 + $0xd30] sm:$0xff] %vm3191_vm0, %v3156_v9 }
 0x516   : > { %v3154_v0 = vpop.permute.xlu1 %3153  ;;  %3230 = vst.msk [vmem:[%s8230_s26 + $0xd38] sm:$0xff] %vm3193_vm1, %v3156_v9  ;;  %3468 = vrot.lane.b32.xlu0 %v10396_v12, %s7978_s16 }
 0x517   : > { %3227 = vst.msk [vmem:[%s8230_s26 + $0xc78] sm:$0xff] %vm3191_vm0, %v3154_v0 }
 0x518   : > { %3228 = vst.msk [vmem:[%s8230_s26 + $0xc80] sm:$0xff] %vm3193_vm1, %v3154_v0  ;;  %3466 = vrot.lane.b32.xlu1 %v10401_v8, %s7978_s16  ;;  %v3160_v30 = vpop.permute.xlu0 %3159 }
 0x519   : > { %3233 = vst.msk [vmem:[%s8230_s26 + $0xea0] sm:$0xff] %vm3191_vm0, %v3160_v30 }
 0x51a   : > { %v3158_v13 = vpop.permute.xlu1 %3157  ;;  %3234 = vst.msk [vmem:[%s8230_s26 + $0xea8] sm:$0xff] %vm3193_vm1, %v3160_v30  ;;  %3472 = vrot.lane.b32.xlu0 %v10426_v20, %s7978_s16 }
 0x51b   : > { %3231 = vst.msk [vmem:[%s8230_s26 + $0xde8] sm:$0xff] %vm3191_vm0, %v3158_v13 }
 0x51c   : > { %3232 = vst.msk [vmem:[%s8230_s26 + $0xdf0] sm:$0xff] %vm3193_vm1, %v3158_v13  ;;  %3470 = vrot.lane.b32.xlu1 %v10431_v49, %s7978_s16  ;;  %v3164_v16 = vpop.permute.xlu0 %3163 }
 0x51d   : > { %3237 = vst.msk [vmem:[%s8230_s26 + $0x1010] sm:$0xff] %vm3191_vm0, %v3164_v16 }
 0x51e   : > { %v3162_v62 = vpop.permute.xlu1 %3161  ;;  %3238 = vst.msk [vmem:[%s8230_s26 + $0x1018] sm:$0xff] %vm3193_vm1, %v3164_v16  ;;  %3476 = vrot.lane.b32.xlu0 %v10456_v29, %s7978_s16 }
 0x51f   : > { %3235 = vst.msk [vmem:[%s8230_s26 + $0xf58] sm:$0xff] %vm3191_vm0, %v3162_v62 }
 0x520   : > { %3236 = vst.msk [vmem:[%s8230_s26 + $0xf60] sm:$0xff] %vm3193_vm1, %v3162_v62  ;;  %3474 = vrot.lane.b32.xlu1 %v10461_v50, %s7978_s16  ;;  %v3242_v19 = vpop.permute.xlu0 %3241 }
 0x521   : > { %3314 = vst.msk [vmem:[%s8230_s26 + $0x48] sm:$0xff] %vm3313_vm2, %v3242_v19 }
 0x522   : > { %v3166_v17 = vpop.permute.xlu1 %3165  ;;  %3480 = vrot.lane.b32.xlu0 %v10486_v36, %s7978_s16 }
 0x523   : > { %3239 = vst.msk [vmem:[%s8230_s26 + $0x10c8] sm:$0xff] %vm3191_vm0, %v3166_v17  ;;  %vm4286_vm0 = vcmask 523344  }
 0x524   : > { %3240 = vst.msk [vmem:[%s8230_s26 + $0x10d0] sm:$0xff] %vm3193_vm1, %v3166_v17  ;;  %3478 = vrot.lane.b32.xlu1 %v10491_v1, %s7978_s16  ;;  %v3246_v53 = vpop.permute.xlu0 %3245  ;;  %vm4383_vm1 = vcmask 966144  }
 0x525   : > { %3316 = vst.msk [vmem:[%s8230_s26 + $0x1b8] sm:$0xff] %vm3313_vm2, %v3246_v53 }
 0x526   : > { %v3244_v32 = vpop.permute.xlu1 %3243  ;;  %3484 = vrot.lane.b32.xlu0 %v10514_v38, %s7978_s16 }
 0x527   : > { %3315 = vst.msk [vmem:[%s8230_s26 + $0x100] sm:$0xff] %vm3313_vm2, %v3244_v32 }
 0x528   : > { %3482 = vrot.lane.b32.xlu1 %v10519_v22, %s7978_s16  ;;  %v3250_v23 = vpop.permute.xlu0 %3249 }
 0x529   : > { %3318 = vst.msk [vmem:[%s8230_s26 + $0x328] sm:$0xff] %vm3313_vm2, %v3250_v23 }
 0x52a   : > { %v3248_v2 = vpop.permute.xlu1 %3247  ;;  %3488 = vrot.lane.b32.xlu0 %v10540_v40, %s7978_s16 }
 0x52b   : > { %3317 = vst.msk [vmem:[%s8230_s26 + $0x270] sm:$0xff] %vm3313_vm2, %v3248_v2 }
 0x52c   : > { %3486 = vrot.lane.b32.xlu1 %v10545_v3, %s7978_s16  ;;  %v3254_v34 = vpop.permute.xlu0 %3253 }
 0x52d   : > { %3320 = vst.msk [vmem:[%s8230_s26 + $0x498] sm:$0xff] %vm3313_vm2, %v3254_v34 }
 0x52e   : > { %v3252_v24 = vpop.permute.xlu1 %3251  ;;  %3492 = vrot.lane.b32.xlu0 %v10566_v42, %s7978_s16 }
 0x52f   : > { %3319 = vst.msk [vmem:[%s8230_s26 + $0x3e0] sm:$0xff] %vm3313_vm2, %v3252_v24 }
 0x530   : > { %3490 = vrot.lane.b32.xlu1 %v10571_v44, %s7978_s16  ;;  %v3258_v33 = vpop.permute.xlu0 %3257 }
 0x531   : > { %3322 = vst.msk [vmem:[%s8230_s26 + $0x608] sm:$0xff] %vm3313_vm2, %v3258_v33 }
 0x532   : > { %v3256_v6 = vpop.permute.xlu1 %3255  ;;  %3496 = vrot.lane.b32.xlu0 %v10592_v4, %s7978_s16 }
 0x533   : > { %3321 = vst.msk [vmem:[%s8230_s26 + $0x550] sm:$0xff] %vm3313_vm2, %v3256_v6 }
 0x534   : > { %3494 = vrot.lane.b32.xlu1 %v10597_v52, %s7978_s16  ;;  %v3262_v63 = vpop.permute.xlu0 %3261 }
 0x535   : > { %3324 = vst.msk [vmem:[%s8230_s26 + $0x778] sm:$0xff] %vm3313_vm2, %v3262_v63 }
 0x536   : > { %v3260_v35 = vpop.permute.xlu1 %3259  ;;  %3500 = vrot.lane.b32.xlu0 %v10618_v27, %s7978_s16 }
 0x537   : > { %3323 = vst.msk [vmem:[%s8230_s26 + $0x6c0] sm:$0xff] %vm3313_vm2, %v3260_v35 }
 0x538   : > { %3498 = vrot.lane.b32.xlu1 %v10623_v54, %s7978_s16  ;;  %v3266_v55 = vpop.permute.xlu0 %3265 }
 0x539   : > { %3326 = vst.msk [vmem:[%s8230_s26 + $0x8e8] sm:$0xff] %vm3313_vm2, %v3266_v55 }
 0x53a   : > { %v3264_v43 = vpop.permute.xlu1 %3263  ;;  %3504 = vrot.lane.b32.xlu0 %v10644_v18, %s7978_s16 }
 0x53b   : > { %3325 = vst.msk [vmem:[%s8230_s26 + $0x830] sm:$0xff] %vm3313_vm2, %v3264_v43 }
 0x53c   : > { %3502 = vrot.lane.b32.xlu1 %v10649_v57, %s7978_s16  ;;  %v3270_v11 = vpop.permute.xlu0 %3269 }
 0x53d   : > { %3328 = vst.msk [vmem:[%s8230_s26 + $0xa58] sm:$0xff] %vm3313_vm2, %v3270_v11 }
 0x53e   : > { %v3268_v10 = vpop.permute.xlu1 %3267  ;;  %3557 = vrot.lane.b32.xlu0 %v10341_v37, %s7979_s17 }
 0x53f   : > { %3327 = vst.msk [vmem:[%s8230_s26 + $0x9a0] sm:$0xff] %vm3313_vm2, %v3268_v10 }
 0x540   : > { %3506 = vrot.lane.b32.xlu1 %v10666_v21, %s7978_s16  ;;  %v3274_v5 = vpop.permute.xlu0 %3273  ;;  %s7986_s16 = smov 64  }
 0x541   : > { %3330 = vst.msk [vmem:[%s8230_s26 + $0xbc8] sm:$0xff] %vm3313_vm2, %v3274_v5 }
 0x542   : > { %v3272_v15 = vpop.permute.xlu1 %3271  ;;  %3561 = vrot.lane.b32.xlu0 %v10371_v47, %s7979_s17 }
 0x543   : > { %3329 = vst.msk [vmem:[%s8230_s26 + $0xb10] sm:$0xff] %vm3313_vm2, %v3272_v15 }
 0x544   : > { %3559 = vrot.lane.b32.xlu1 %v10366_v58, %s7979_s17  ;;  %v3278_v31 = vpop.permute.xlu0 %3277 }
 0x545   : > { %3332 = vst.msk [vmem:[%s8230_s26 + $0xd38] sm:$0xff] %vm3313_vm2, %v3278_v31 }
 0x546   : > { %v3276_v14 = vpop.permute.xlu1 %3275  ;;  %3565 = vrot.lane.b32.xlu0 %v10396_v12, %s7979_s17 }
 0x547   : > { %3331 = vst.msk [vmem:[%s8230_s26 + $0xc80] sm:$0xff] %vm3313_vm2, %v3276_v14 }
 0x548   : > { %3563 = vrot.lane.b32.xlu1 %v10401_v8, %s7979_s17  ;;  %v3282_v46 = vpop.permute.xlu0 %3281 }
 0x549   : > { %3334 = vst.msk [vmem:[%s8230_s26 + $0xea8] sm:$0xff] %vm3313_vm2, %v3282_v46 }
 0x54a   : > { %v3280_v60 = vpop.permute.xlu1 %3279  ;;  %3569 = vrot.lane.b32.xlu0 %v10426_v20, %s7979_s17 }
 0x54b   : > { %3333 = vst.msk [vmem:[%s8230_s26 + $0xdf0] sm:$0xff] %vm3313_vm2, %v3280_v60 }
 0x54c   : > { %3567 = vrot.lane.b32.xlu1 %v10431_v49, %s7979_s17  ;;  %v3286_v59 = vpop.permute.xlu0 %3285 }
 0x54d   : > { %3336 = vst.msk [vmem:[%s8230_s26 + $0x1018] sm:$0xff] %vm3313_vm2, %v3286_v59 }
 0x54e   : > { %v3284_v48 = vpop.permute.xlu1 %3283  ;;  %3573 = vrot.lane.b32.xlu0 %v10456_v29, %s7979_s17 }
 0x54f   : > { %3335 = vst.msk [vmem:[%s8230_s26 + $0xf60] sm:$0xff] %vm3313_vm2, %v3284_v48 }
 0x550   : > { %3571 = vrot.lane.b32.xlu1 %v10461_v50, %s7979_s17  ;;  %v3339_v45 = vpop.permute.xlu0 %3338 }
 0x551   : > { %3411 = vst.msk [vmem:[%s8230_s26 + $0x48] sm:$0xff] %vm3410_vm3, %v3339_v45 }
 0x552   : > { %v3288_v28 = vpop.permute.xlu1 %3287  ;;  %3413 = vst.msk [vmem:[%s8230_s26 + $0x50] sm:$0xff] %vm3412_vm5, %v3339_v45  ;;  %3577 = vrot.lane.b32.xlu0 %v10486_v36, %s7979_s17 }
 0x553   : > { %3337 = vst.msk [vmem:[%s8230_s26 + $0x10d0] sm:$0xff] %vm3313_vm2, %v3288_v28  ;;  %vm4480_vm2 = vcmask 1048496  }
 0x554   : > { %3575 = vrot.lane.b32.xlu1 %v10491_v1, %s7979_s17  ;;  %v3343_v41 = vpop.permute.xlu0 %3342 }
 0x555   : > { %3416 = vst.msk [vmem:[%s8230_s26 + $0x1b8] sm:$0xff] %vm3410_vm3, %v3343_v41 }
 0x556   : > { %v3341_v7 = vpop.permute.xlu1 %3340  ;;  %3417 = vst.msk [vmem:[%s8230_s26 + $0x1c0] sm:$0xff] %vm3412_vm5, %v3343_v41  ;;  %3581 = vrot.lane.b32.xlu0 %v10514_v38, %s7979_s17 }
 0x557   : > { %3414 = vst.msk [vmem:[%s8230_s26 + $0x100] sm:$0xff] %vm3410_vm3, %v3341_v7 }
 0x558   : > { %3415 = vst.msk [vmem:[%s8230_s26 + $0x108] sm:$0xff] %vm3412_vm5, %v3341_v7  ;;  %3579 = vrot.lane.b32.xlu1 %v10519_v22, %s7979_s17  ;;  %v3347_v61 = vpop.permute.xlu0 %3346 }
 0x559   : > { %3420 = vst.msk [vmem:[%s8230_s26 + $0x328] sm:$0xff] %vm3410_vm3, %v3347_v61 }
 0x55a   : > { %v3345_v39 = vpop.permute.xlu1 %3344  ;;  %3421 = vst.msk [vmem:[%s8230_s26 + $0x330] sm:$0xff] %vm3412_vm5, %v3347_v61  ;;  %3585 = vrot.lane.b32.xlu0 %v10540_v40, %s7979_s17 }
 0x55b   : > { %3418 = vst.msk [vmem:[%s8230_s26 + $0x270] sm:$0xff] %vm3410_vm3, %v3345_v39 }
 0x55c   : > { %3419 = vst.msk [vmem:[%s8230_s26 + $0x278] sm:$0xff] %vm3412_vm5, %v3345_v39  ;;  %3583 = vrot.lane.b32.xlu1 %v10545_v3, %s7979_s17  ;;  %v3351_v26 = vpop.permute.xlu0 %3350 }
 0x55d   : > { %3424 = vst.msk [vmem:[%s8230_s26 + $0x498] sm:$0xff] %vm3410_vm3, %v3351_v26 }
 0x55e   : > { %v3349_v25 = vpop.permute.xlu1 %3348  ;;  %3425 = vst.msk [vmem:[%s8230_s26 + $0x4a0] sm:$0xff] %vm3412_vm5, %v3351_v26  ;;  %3589 = vrot.lane.b32.xlu0 %v10566_v42, %s7979_s17 }
 0x55f   : > { %3422 = vst.msk [vmem:[%s8230_s26 + $0x3e0] sm:$0xff] %vm3410_vm3, %v3349_v25 }
 0x560   : > { %3423 = vst.msk [vmem:[%s8230_s26 + $0x3e8] sm:$0xff] %vm3412_vm5, %v3349_v25  ;;  %3587 = vrot.lane.b32.xlu1 %v10571_v44, %s7979_s17  ;;  %v3355_v56 = vpop.permute.xlu0 %3354 }
 0x561   : > { %3428 = vst.msk [vmem:[%s8230_s26 + $0x608] sm:$0xff] %vm3410_vm3, %v3355_v56 }
 0x562   : > { %v3353_v51 = vpop.permute.xlu1 %3352  ;;  %3429 = vst.msk [vmem:[%s8230_s26 + $0x610] sm:$0xff] %vm3412_vm5, %v3355_v56  ;;  %3593 = vrot.lane.b32.xlu0 %v10592_v4, %s7979_s17 }
 0x563   : > { %3426 = vst.msk [vmem:[%s8230_s26 + $0x550] sm:$0xff] %vm3410_vm3, %v3353_v51 }
 0x564   : > { %3427 = vst.msk [vmem:[%s8230_s26 + $0x558] sm:$0xff] %vm3412_vm5, %v3353_v51  ;;  %3591 = vrot.lane.b32.xlu1 %v10597_v52, %s7979_s17  ;;  %v3359_v9 = vpop.permute.xlu0 %3358 }
 0x565   : > { %3432 = vst.msk [vmem:[%s8230_s26 + $0x778] sm:$0xff] %vm3410_vm3, %v3359_v9 }
 0x566   : > { %v3357_v0 = vpop.permute.xlu1 %3356  ;;  %3433 = vst.msk [vmem:[%s8230_s26 + $0x780] sm:$0xff] %vm3412_vm5, %v3359_v9  ;;  %3597 = vrot.lane.b32.xlu0 %v10618_v27, %s7979_s17 }
 0x567   : > { %3430 = vst.msk [vmem:[%s8230_s26 + $0x6c0] sm:$0xff] %vm3410_vm3, %v3357_v0 }
 0x568   : > { %3431 = vst.msk [vmem:[%s8230_s26 + $0x6c8] sm:$0xff] %vm3412_vm5, %v3357_v0  ;;  %3595 = vrot.lane.b32.xlu1 %v10623_v54, %s7979_s17  ;;  %v3363_v30 = vpop.permute.xlu0 %3362 }
 0x569   : > { %3436 = vst.msk [vmem:[%s8230_s26 + $0x8e8] sm:$0xff] %vm3410_vm3, %v3363_v30 }
 0x56a   : > { %v3361_v13 = vpop.permute.xlu1 %3360  ;;  %3437 = vst.msk [vmem:[%s8230_s26 + $0x8f0] sm:$0xff] %vm3412_vm5, %v3363_v30  ;;  %3601 = vrot.lane.b32.xlu0 %v10644_v18, %s7979_s17 }
 0x56b   : > { %3434 = vst.msk [vmem:[%s8230_s26 + $0x830] sm:$0xff] %vm3410_vm3, %v3361_v13 }
 0x56c   : > { %3435 = vst.msk [vmem:[%s8230_s26 + $0x838] sm:$0xff] %vm3412_vm5, %v3361_v13  ;;  %3599 = vrot.lane.b32.xlu1 %v10649_v57, %s7979_s17  ;;  %v3367_v16 = vpop.permute.xlu0 %3366 }
 0x56d   : > { %3440 = vst.msk [vmem:[%s8230_s26 + $0xa58] sm:$0xff] %vm3410_vm3, %v3367_v16 }
 0x56e   : > { %v3365_v62 = vpop.permute.xlu1 %3364  ;;  %3441 = vst.msk [vmem:[%s8230_s26 + $0xa60] sm:$0xff] %vm3412_vm5, %v3367_v16  ;;  %3654 = vrot.lane.b32.xlu0 %v10341_v37, %s7980_s18 }
 0x56f   : > { %3438 = vst.msk [vmem:[%s8230_s26 + $0x9a0] sm:$0xff] %vm3410_vm3, %v3365_v62 }
 0x570   : > { %3439 = vst.msk [vmem:[%s8230_s26 + $0x9a8] sm:$0xff] %vm3412_vm5, %v3365_v62  ;;  %3603 = vrot.lane.b32.xlu1 %v10666_v21, %s7979_s17  ;;  %v3371_v19 = vpop.permute.xlu0 %3370  ;;  %s7987_s17 = smov 118  }
 0x571   : > { %3444 = vst.msk [vmem:[%s8230_s26 + $0xbc8] sm:$0xff] %vm3410_vm3, %v3371_v19 }
 0x572   : > { %v3369_v17 = vpop.permute.xlu1 %3368  ;;  %3445 = vst.msk [vmem:[%s8230_s26 + $0xbd0] sm:$0xff] %vm3412_vm5, %v3371_v19  ;;  %3658 = vrot.lane.b32.xlu0 %v10371_v47, %s7980_s18 }
 0x573   : > { %3442 = vst.msk [vmem:[%s8230_s26 + $0xb10] sm:$0xff] %vm3410_vm3, %v3369_v17 }
 0x574   : > { %3443 = vst.msk [vmem:[%s8230_s26 + $0xb18] sm:$0xff] %vm3412_vm5, %v3369_v17  ;;  %3656 = vrot.lane.b32.xlu1 %v10366_v58, %s7980_s18  ;;  %v3375_v53 = vpop.permute.xlu0 %3374 }
 0x575   : > { %3448 = vst.msk [vmem:[%s8230_s26 + $0xd38] sm:$0xff] %vm3410_vm3, %v3375_v53 }
 0x576   : > { %v3373_v32 = vpop.permute.xlu1 %3372  ;;  %3449 = vst.msk [vmem:[%s8230_s26 + $0xd40] sm:$0xff] %vm3412_vm5, %v3375_v53  ;;  %3662 = vrot.lane.b32.xlu0 %v10396_v12, %s7980_s18 }
 0x577   : > { %3446 = vst.msk [vmem:[%s8230_s26 + $0xc80] sm:$0xff] %vm3410_vm3, %v3373_v32 }
 0x578   : > { %3447 = vst.msk [vmem:[%s8230_s26 + $0xc88] sm:$0xff] %vm3412_vm5, %v3373_v32  ;;  %3660 = vrot.lane.b32.xlu1 %v10401_v8, %s7980_s18  ;;  %v3379_v23 = vpop.permute.xlu0 %3378 }
 0x579   : > { %3452 = vst.msk [vmem:[%s8230_s26 + $0xea8] sm:$0xff] %vm3410_vm3, %v3379_v23 }
 0x57a   : > { %v3377_v2 = vpop.permute.xlu1 %3376  ;;  %3453 = vst.msk [vmem:[%s8230_s26 + $0xeb0] sm:$0xff] %vm3412_vm5, %v3379_v23  ;;  %3666 = vrot.lane.b32.xlu0 %v10426_v20, %s7980_s18 }
 0x57b   : > { %3450 = vst.msk [vmem:[%s8230_s26 + $0xdf0] sm:$0xff] %vm3410_vm3, %v3377_v2 }
 0x57c   : > { %3451 = vst.msk [vmem:[%s8230_s26 + $0xdf8] sm:$0xff] %vm3412_vm5, %v3377_v2  ;;  %3664 = vrot.lane.b32.xlu1 %v10431_v49, %s7980_s18  ;;  %v3383_v34 = vpop.permute.xlu0 %3382 }
 0x57d   : > { %3456 = vst.msk [vmem:[%s8230_s26 + $0x1018] sm:$0xff] %vm3410_vm3, %v3383_v34 }
 0x57e   : > { %v3381_v24 = vpop.permute.xlu1 %3380  ;;  %3457 = vst.msk [vmem:[%s8230_s26 + $0x1020] sm:$0xff] %vm3412_vm5, %v3383_v34  ;;  %3670 = vrot.lane.b32.xlu0 %v10456_v29, %s7980_s18 }
 0x57f   : > { %3454 = vst.msk [vmem:[%s8230_s26 + $0xf60] sm:$0xff] %vm3410_vm3, %v3381_v24 }
 0x580   : > { %3455 = vst.msk [vmem:[%s8230_s26 + $0xf68] sm:$0xff] %vm3412_vm5, %v3381_v24  ;;  %3668 = vrot.lane.b32.xlu1 %v10461_v50, %s7980_s18  ;;  %v3461_v33 = vpop.permute.xlu0 %3460 }
 0x581   : > { %3533 = vst.msk [vmem:[%s8230_s26 + $0x50] sm:$0xff] %vm3532_vm6, %v3461_v33 }
 0x582   : > { %v3385_v6 = vpop.permute.xlu1 %3384  ;;  %3674 = vrot.lane.b32.xlu0 %v10486_v36, %s7980_s18 }
 0x583   : > { %3458 = vst.msk [vmem:[%s8230_s26 + $0x10d0] sm:$0xff] %vm3410_vm3, %v3385_v6  ;;  %vm4482_vm3 = vcmask 359424  }
 0x584   : > { %3459 = vst.msk [vmem:[%s8230_s26 + $0x10d8] sm:$0xff] %vm3412_vm5, %v3385_v6  ;;  %3672 = vrot.lane.b32.xlu1 %v10491_v1, %s7980_s18  ;;  %v3465_v63 = vpop.permute.xlu0 %3464  ;;  %vm4602_vm5 = vcmask 802144  }
 0x585   : > { %3535 = vst.msk [vmem:[%s8230_s26 + $0x1c0] sm:$0xff] %vm3532_vm6, %v3465_v63 }
 0x586   : > { %v3463_v35 = vpop.permute.xlu1 %3462  ;;  %3678 = vrot.lane.b32.xlu0 %v10514_v38, %s7980_s18 }
 0x587   : > { %3534 = vst.msk [vmem:[%s8230_s26 + $0x108] sm:$0xff] %vm3532_vm6, %v3463_v35 }
 0x588   : > { %3676 = vrot.lane.b32.xlu1 %v10519_v22, %s7980_s18  ;;  %v3469_v55 = vpop.permute.xlu0 %3468 }
 0x589   : > { %3537 = vst.msk [vmem:[%s8230_s26 + $0x330] sm:$0xff] %vm3532_vm6, %v3469_v55 }
 0x58a   : > { %v3467_v43 = vpop.permute.xlu1 %3466  ;;  %3682 = vrot.lane.b32.xlu0 %v10540_v40, %s7980_s18 }
 0x58b   : > { %3536 = vst.msk [vmem:[%s8230_s26 + $0x278] sm:$0xff] %vm3532_vm6, %v3467_v43 }
 0x58c   : > { %3680 = vrot.lane.b32.xlu1 %v10545_v3, %s7980_s18  ;;  %v3473_v11 = vpop.permute.xlu0 %3472 }
 0x58d   : > { %3539 = vst.msk [vmem:[%s8230_s26 + $0x4a0] sm:$0xff] %vm3532_vm6, %v3473_v11 }
 0x58e   : > { %v3471_v10 = vpop.permute.xlu1 %3470  ;;  %3686 = vrot.lane.b32.xlu0 %v10566_v42, %s7980_s18 }
 0x58f   : > { %3538 = vst.msk [vmem:[%s8230_s26 + $0x3e8] sm:$0xff] %vm3532_vm6, %v3471_v10 }
 0x590   : > { %3684 = vrot.lane.b32.xlu1 %v10571_v44, %s7980_s18  ;;  %v3477_v5 = vpop.permute.xlu0 %3476 }
 0x591   : > { %3541 = vst.msk [vmem:[%s8230_s26 + $0x610] sm:$0xff] %vm3532_vm6, %v3477_v5 }
 0x592   : > { %v3475_v15 = vpop.permute.xlu1 %3474  ;;  %3690 = vrot.lane.b32.xlu0 %v10592_v4, %s7980_s18 }
 0x593   : > { %3540 = vst.msk [vmem:[%s8230_s26 + $0x558] sm:$0xff] %vm3532_vm6, %v3475_v15 }
 0x594   : > { %3688 = vrot.lane.b32.xlu1 %v10597_v52, %s7980_s18  ;;  %v3481_v31 = vpop.permute.xlu0 %3480 }
 0x595   : > { %3543 = vst.msk [vmem:[%s8230_s26 + $0x780] sm:$0xff] %vm3532_vm6, %v3481_v31 }
 0x596   : > { %v3479_v14 = vpop.permute.xlu1 %3478  ;;  %3694 = vrot.lane.b32.xlu0 %v10618_v27, %s7980_s18 }
 0x597   : > { %3542 = vst.msk [vmem:[%s8230_s26 + $0x6c8] sm:$0xff] %vm3532_vm6, %v3479_v14 }
 0x598   : > { %3692 = vrot.lane.b32.xlu1 %v10623_v54, %s7980_s18  ;;  %v3485_v46 = vpop.permute.xlu0 %3484 }
 0x599   : > { %3545 = vst.msk [vmem:[%s8230_s26 + $0x8f0] sm:$0xff] %vm3532_vm6, %v3485_v46 }
 0x59a   : > { %v3483_v60 = vpop.permute.xlu1 %3482  ;;  %3698 = vrot.lane.b32.xlu0 %v10644_v18, %s7980_s18 }
 0x59b   : > { %3544 = vst.msk [vmem:[%s8230_s26 + $0x838] sm:$0xff] %vm3532_vm6, %v3483_v60 }
 0x59c   : > { %3696 = vrot.lane.b32.xlu1 %v10649_v57, %s7980_s18  ;;  %v3489_v59 = vpop.permute.xlu0 %3488 }
 0x59d   : > { %3547 = vst.msk [vmem:[%s8230_s26 + $0xa60] sm:$0xff] %vm3532_vm6, %v3489_v59 }
 0x59e   : > { %v3487_v48 = vpop.permute.xlu1 %3486  ;;  %3776 = vrot.lane.b32.xlu0 %v10341_v37, %s7981_s19 }
 0x59f   : > { %3546 = vst.msk [vmem:[%s8230_s26 + $0x9a8] sm:$0xff] %vm3532_vm6, %v3487_v48 }
 0x5a0   : > { %3700 = vrot.lane.b32.xlu1 %v10666_v21, %s7980_s18  ;;  %v3493_v45 = vpop.permute.xlu0 %3492  ;;  %s7988_s18 = smov 44  }
 0x5a1   : > { %3549 = vst.msk [vmem:[%s8230_s26 + $0xbd0] sm:$0xff] %vm3532_vm6, %v3493_v45 }
 0x5a2   : > { %v3491_v28 = vpop.permute.xlu1 %3490  ;;  %3780 = vrot.lane.b32.xlu0 %v10371_v47, %s7981_s19 }
 0x5a3   : > { %3548 = vst.msk [vmem:[%s8230_s26 + $0xb18] sm:$0xff] %vm3532_vm6, %v3491_v28 }
 0x5a4   : > { %3778 = vrot.lane.b32.xlu1 %v10366_v58, %s7981_s19  ;;  %v3497_v41 = vpop.permute.xlu0 %3496 }
 0x5a5   : > { %3551 = vst.msk [vmem:[%s8230_s26 + $0xd40] sm:$0xff] %vm3532_vm6, %v3497_v41 }
 0x5a6   : > { %v3495_v7 = vpop.permute.xlu1 %3494  ;;  %3784 = vrot.lane.b32.xlu0 %v10396_v12, %s7981_s19 }
 0x5a7   : > { %3550 = vst.msk [vmem:[%s8230_s26 + $0xc88] sm:$0xff] %vm3532_vm6, %v3495_v7 }
 0x5a8   : > { %3782 = vrot.lane.b32.xlu1 %v10401_v8, %s7981_s19  ;;  %v3501_v61 = vpop.permute.xlu0 %3500 }
 0x5a9   : > { %3553 = vst.msk [vmem:[%s8230_s26 + $0xeb0] sm:$0xff] %vm3532_vm6, %v3501_v61 }
 0x5aa   : > { %v3499_v39 = vpop.permute.xlu1 %3498  ;;  %3788 = vrot.lane.b32.xlu0 %v10426_v20, %s7981_s19 }
 0x5ab   : > { %3552 = vst.msk [vmem:[%s8230_s26 + $0xdf8] sm:$0xff] %vm3532_vm6, %v3499_v39 }
 0x5ac   : > { %3786 = vrot.lane.b32.xlu1 %v10431_v49, %s7981_s19  ;;  %v3505_v26 = vpop.permute.xlu0 %3504 }
 0x5ad   : > { %3555 = vst.msk [vmem:[%s8230_s26 + $0x1020] sm:$0xff] %vm3532_vm6, %v3505_v26 }
 0x5ae   : > { %v3503_v25 = vpop.permute.xlu1 %3502  ;;  %3792 = vrot.lane.b32.xlu0 %v10456_v29, %s7981_s19 }
 0x5af   : > { %3554 = vst.msk [vmem:[%s8230_s26 + $0xf68] sm:$0xff] %vm3532_vm6, %v3503_v25 }
 0x5b0   : > { %3790 = vrot.lane.b32.xlu1 %v10461_v50, %s7981_s19  ;;  %v3558_v56 = vpop.permute.xlu0 %3557 }
 0x5b1   : > { %3630 = vst.msk [vmem:[%s8230_s26 + $0x50] sm:$0xff] %vm3629_vm7, %v3558_v56 }
 0x5b2   : > { %v3507_v51 = vpop.permute.xlu1 %3506  ;;  %3796 = vrot.lane.b32.xlu0 %v10486_v36, %s7981_s19 }
 0x5b3   : > { %3556 = vst.msk [vmem:[%s8230_s26 + $0x10d8] sm:$0xff] %vm3532_vm6, %v3507_v51  ;;  %vm5209_vm6 = vcmask 1043456  }
 0x5b4   : > { %3794 = vrot.lane.b32.xlu1 %v10491_v1, %s7981_s19  ;;  %v3562_v9 = vpop.permute.xlu0 %3561 }
 0x5b5   : > { %3632 = vst.msk [vmem:[%s8230_s26 + $0x1c0] sm:$0xff] %vm3629_vm7, %v3562_v9 }
 0x5b6   : > { %v3560_v0 = vpop.permute.xlu1 %3559  ;;  %3800 = vrot.lane.b32.xlu0 %v10514_v38, %s7981_s19 }
 0x5b7   : > { %3631 = vst.msk [vmem:[%s8230_s26 + $0x108] sm:$0xff] %vm3629_vm7, %v3560_v0 }
 0x5b8   : > { %3798 = vrot.lane.b32.xlu1 %v10519_v22, %s7981_s19  ;;  %v3566_v30 = vpop.permute.xlu0 %3565 }
 0x5b9   : > { %3634 = vst.msk [vmem:[%s8230_s26 + $0x330] sm:$0xff] %vm3629_vm7, %v3566_v30 }
 0x5ba   : > { %v3564_v13 = vpop.permute.xlu1 %3563  ;;  %3804 = vrot.lane.b32.xlu0 %v10540_v40, %s7981_s19 }
 0x5bb   : > { %3633 = vst.msk [vmem:[%s8230_s26 + $0x278] sm:$0xff] %vm3629_vm7, %v3564_v13 }
 0x5bc   : > { %3802 = vrot.lane.b32.xlu1 %v10545_v3, %s7981_s19  ;;  %v3570_v16 = vpop.permute.xlu0 %3569 }
 0x5bd   : > { %3636 = vst.msk [vmem:[%s8230_s26 + $0x4a0] sm:$0xff] %vm3629_vm7, %v3570_v16 }
 0x5be   : > { %v3568_v62 = vpop.permute.xlu1 %3567  ;;  %3808 = vrot.lane.b32.xlu0 %v10566_v42, %s7981_s19 }
 0x5bf   : > { %3635 = vst.msk [vmem:[%s8230_s26 + $0x3e8] sm:$0xff] %vm3629_vm7, %v3568_v62 }
 0x5c0   : > { %3806 = vrot.lane.b32.xlu1 %v10571_v44, %s7981_s19  ;;  %v3574_v19 = vpop.permute.xlu0 %3573 }
 0x5c1   : > { %3638 = vst.msk [vmem:[%s8230_s26 + $0x610] sm:$0xff] %vm3629_vm7, %v3574_v19 }
 0x5c2   : > { %v3572_v17 = vpop.permute.xlu1 %3571  ;;  %3812 = vrot.lane.b32.xlu0 %v10592_v4, %s7981_s19 }
 0x5c3   : > { %3637 = vst.msk [vmem:[%s8230_s26 + $0x558] sm:$0xff] %vm3629_vm7, %v3572_v17 }
 0x5c4   : > { %3810 = vrot.lane.b32.xlu1 %v10597_v52, %s7981_s19  ;;  %v3578_v53 = vpop.permute.xlu0 %3577 }
 0x5c5   : > { %3640 = vst.msk [vmem:[%s8230_s26 + $0x780] sm:$0xff] %vm3629_vm7, %v3578_v53 }
 0x5c6   : > { %v3576_v32 = vpop.permute.xlu1 %3575  ;;  %3816 = vrot.lane.b32.xlu0 %v10618_v27, %s7981_s19 }
 0x5c7   : > { %3639 = vst.msk [vmem:[%s8230_s26 + $0x6c8] sm:$0xff] %vm3629_vm7, %v3576_v32 }
 0x5c8   : > { %3814 = vrot.lane.b32.xlu1 %v10623_v54, %s7981_s19  ;;  %v3582_v23 = vpop.permute.xlu0 %3581 }
 0x5c9   : > { %3642 = vst.msk [vmem:[%s8230_s26 + $0x8f0] sm:$0xff] %vm3629_vm7, %v3582_v23  ;;  %v5069_v23 = vld [vmem:[%s408_s28 + $0x18] sm:$0xff] }
 0x5ca   : > { %v3580_v2 = vpop.permute.xlu1 %3579  ;;  %3820 = vrot.lane.b32.xlu0 %v10644_v18, %s7981_s19 }
 0x5cb   : > { %3641 = vst.msk [vmem:[%s8230_s26 + $0x838] sm:$0xff] %vm3629_vm7, %v3580_v2  ;;  %v5067_v2 = vld [vmem:[%s408_s28 + $0x8] sm:$0xff] }
 0x5cc   : > { %3818 = vrot.lane.b32.xlu1 %v10649_v57, %s7981_s19  ;;  %v3586_v34 = vpop.permute.xlu0 %3585 }
 0x5cd   : > { %3644 = vst.msk [vmem:[%s8230_s26 + $0xa60] sm:$0xff] %vm3629_vm7, %v3586_v34 }
 0x5ce   : > { %v3584_v24 = vpop.permute.xlu1 %3583  ;;  %3873 = vrot.lane.b32.xlu0 %v10341_v37, %s7982_s20 }
 0x5cf   : > { %3643 = vst.msk [vmem:[%s8230_s26 + $0x9a8] sm:$0xff] %vm3629_vm7, %v3584_v24 }
 0x5d0   : > { %3822 = vrot.lane.b32.xlu1 %v10666_v21, %s7981_s19  ;;  %v3590_v33 = vpop.permute.xlu0 %3589  ;;  %s8005_s19 = smov 3  }
 0x5d1   : > { %3646 = vst.msk [vmem:[%s8230_s26 + $0xbd0] sm:$0xff] %vm3629_vm7, %v3590_v33  ;;  %v5066_v33 = vld [vmem:[%s408_s28] sm:$0xff] }
 0x5d2   : > { %v3588_v6 = vpop.permute.xlu1 %3587  ;;  %3877 = vrot.lane.b32.xlu0 %v10371_v47, %s7982_s20 }
 0x5d3   : > { %3645 = vst.msk [vmem:[%s8230_s26 + $0xb18] sm:$0xff] %vm3629_vm7, %v3588_v6  ;;  %v5073_v6 = vpack.c.bf16 %v5069_v23, %v5067_v2 }
 0x5d4   : > { %3875 = vrot.lane.b32.xlu1 %v10366_v58, %s7982_s20  ;;  %v3594_v63 = vpop.permute.xlu0 %3593 }
 0x5d5   : > { %3648 = vst.msk [vmem:[%s8230_s26 + $0xd40] sm:$0xff] %vm3629_vm7, %v3594_v63  ;;  %5112 = vmatprep.subr.bf16.mxu0 %v5073_v6 }
 0x5d6   : > { %v3592_v35 = vpop.permute.xlu1 %3591  ;;  %3881 = vrot.lane.b32.xlu0 %v10396_v12, %s7982_s20 }
 0x5d7   : > { %3647 = vst.msk [vmem:[%s8230_s26 + $0xc88] sm:$0xff] %vm3629_vm7, %v3592_v35  ;;  %v5068_v35 = vld [vmem:[%s408_s28 + $0x10] sm:$0xff] }
 0x5d8   : > { %3879 = vrot.lane.b32.xlu1 %v10401_v8, %s7982_s20  ;;  %v3598_v55 = vpop.permute.xlu0 %3597  ;;  %v5072_v63 = vpack.c.bf16 %v5068_v35, %v5066_v33 }
 0x5d9   : > { %3650 = vst.msk [vmem:[%s8230_s26 + $0xeb0] sm:$0xff] %vm3629_vm7, %v3598_v55  ;;  %v5070_v55 = vld [vmem:[%s408_s28 + $0x20] sm:$0x3f] }
 0x5da   : > { %v3596_v43 = vpop.permute.xlu1 %3595  ;;  %3885 = vrot.lane.b32.xlu0 %v10426_v20, %s7982_s20  ;;  %5113 = vmatpush1.bf16.msra.mxu0 %v5072_v63 }
 0x5db   : > { %3649 = vst.msk [vmem:[%s8230_s26 + $0xdf8] sm:$0xff] %vm3629_vm7, %v3596_v43  ;;  %v5071_v43 = vld [vmem:[%s408_s28 + $0x28] sm:$0x3f]  ;;  %s7989_s28 = smov 98  }
 0x5dc   : > { %3883 = vrot.lane.b32.xlu1 %v10431_v49, %s7982_s20  ;;  %v3602_v11 = vpop.permute.xlu0 %3601 }
 0x5dd   : > { %3652 = vst.msk [vmem:[%s8230_s26 + $0x1020] sm:$0xff] %vm3629_vm7, %v3602_v11 }
 0x5de   : > { %v3600_v10 = vpop.permute.xlu1 %3599  ;;  %3889 = vrot.lane.b32.xlu0 %v10456_v29, %s7982_s20 }
 0x5df   : > { %3651 = vst.msk [vmem:[%s8230_s26 + $0xf68] sm:$0xff] %vm3629_vm7, %v3600_v10 }
 0x5e0   : > { %3887 = vrot.lane.b32.xlu1 %v10461_v50, %s7982_s20  ;;  %v3655_v5 = vpop.permute.xlu0 %3654 }
 0x5e1   : > { %3727 = vst.msk [vmem:[%s8230_s26 + $0x50] sm:$0xff] %vm3726_vm8, %v3655_v5 }
 0x5e2   : > { %v3604_v15 = vpop.permute.xlu1 %3603  ;;  %3729 = vst.msk [vmem:[%s8230_s26 + $0x58] sm:$0xff] %vm3728_vm4, %v3655_v5  ;;  %3893 = vrot.lane.b32.xlu0 %v10486_v36, %s7982_s20  ;;  %v5074_v5 = vpack.c.bf16 %v5070_v55, %v5070_v55 }
 0x5e3   : > { %3653 = vst.msk [vmem:[%s8230_s26 + $0x10d8] sm:$0xff] %vm3629_vm7, %v3604_v15  ;;  %v5075_v15 = vpack.c.bf16 %v5071_v43, %v5071_v43  ;;  %vm4701_vm7 = vcmask 195584  }
 0x5e4   : > { %3891 = vrot.lane.b32.xlu1 %v10491_v1, %s7982_s20  ;;  %v3659_v31 = vpop.permute.xlu0 %3658 }
 0x5e5   : > { %3732 = vst.msk [vmem:[%s8230_s26 + $0x1c0] sm:$0xff] %vm3726_vm8, %v3659_v31  ;;  %7762 = vmatprep.subr.msk.bf16.mxu0 %vm5105_vm11, %v5075_v15 }
 0x5e6   : > { %v3657_v14 = vpop.permute.xlu1 %3656  ;;  %3733 = vst.msk [vmem:[%s8230_s26 + $0x1c8] sm:$0xff] %vm3728_vm4, %v3659_v31  ;;  %3897 = vrot.lane.b32.xlu0 %v10514_v38, %s7982_s20 }
 0x5e7   : > { %3730 = vst.msk [vmem:[%s8230_s26 + $0x108] sm:$0xff] %vm3726_vm8, %v3657_v14 }
 0x5e8   : > { %3731 = vst.msk [vmem:[%s8230_s26 + $0x110] sm:$0xff] %vm3728_vm4, %v3657_v14  ;;  %3895 = vrot.lane.b32.xlu1 %v10519_v22, %s7982_s20  ;;  %v3663_v46 = vpop.permute.xlu0 %3662  ;;  %v5107_v14 = vsel %vm5105_vm11, %v5074_v5, 0  ;;  %vm4920_vm11 = vcmask 31744  }
 0x5e9   : > { %3736 = vst.msk [vmem:[%s8230_s26 + $0x330] sm:$0xff] %vm3726_vm8, %v3663_v46  ;;  %5115 = vmatpush1.bf16.msra.mxu0 %v5107_v14 }
 0x5ea   : > { %v3661_v60 = vpop.permute.xlu1 %3660  ;;  %3737 = vst.msk [vmem:[%s8230_s26 + $0x338] sm:$0xff] %vm3728_vm4, %v3663_v46  ;;  %3901 = vrot.lane.b32.xlu0 %v10540_v40, %s7982_s20  ;;  %v7896_v46 = vld [vmem:[%s15425_s1] sm:$0xff]  }
 0x5eb   : > { %3734 = vst.msk [vmem:[%s8230_s26 + $0x278] sm:$0xff] %vm3726_vm8, %v3661_v60 }
 0x5ec   : > { %3735 = vst.msk [vmem:[%s8230_s26 + $0x280] sm:$0xff] %vm3728_vm4, %v3661_v60  ;;  %3899 = vrot.lane.b32.xlu1 %v10545_v3, %s7982_s20  ;;  %v3667_v59 = vpop.permute.xlu0 %3666  ;;  %7763 = vmatmul.mubr.msk.bf16.vlgmr.msra.gmra.mrb[0].mxu0 %vm2658_vm10, %v7896_v46 }
 0x5ed   : > { %3740 = vst.msk [vmem:[%s8230_s26 + $0x4a0] sm:$0xff] %vm3726_vm8, %v3667_v59 }
 0x5ee   : > { %v3665_v48 = vpop.permute.xlu1 %3664  ;;  %3741 = vst.msk [vmem:[%s8230_s26 + $0x4a8] sm:$0xff] %vm3728_vm4, %v3667_v59  ;;  %3905 = vrot.lane.b32.xlu0 %v10566_v42, %s7982_s20 }
 0x5ef   : > { %3738 = vst.msk [vmem:[%s8230_s26 + $0x3e8] sm:$0xff] %vm3726_vm8, %v3665_v48 }
 0x5f0   : > { %3739 = vst.msk [vmem:[%s8230_s26 + $0x3f0] sm:$0xff] %vm3728_vm4, %v3665_v48  ;;  %3903 = vrot.lane.b32.xlu1 %v10571_v44, %s7982_s20  ;;  %v3671_v45 = vpop.permute.xlu0 %3670 }
 0x5f1   : > { %3744 = vst.msk [vmem:[%s8230_s26 + $0x610] sm:$0xff] %vm3726_vm8, %v3671_v45 }
 0x5f2   : > { %v3669_v28 = vpop.permute.xlu1 %3668  ;;  %3745 = vst.msk [vmem:[%s8230_s26 + $0x618] sm:$0xff] %vm3728_vm4, %v3671_v45  ;;  %3909 = vrot.lane.b32.xlu0 %v10592_v4, %s7982_s20 }
 0x5f3   : > { %3742 = vst.msk [vmem:[%s8230_s26 + $0x558] sm:$0xff] %vm3726_vm8, %v3669_v28 }
 0x5f4   : > { %3743 = vst.msk [vmem:[%s8230_s26 + $0x560] sm:$0xff] %vm3728_vm4, %v3669_v28  ;;  %3907 = vrot.lane.b32.xlu1 %v10597_v52, %s7982_s20  ;;  %v3675_v41 = vpop.permute.xlu0 %3674  ;;  %v15476_v28 = vmov 0  }
 0x5f5   : > { %3748 = vst.msk [vmem:[%s8230_s26 + $0x780] sm:$0xff] %vm3726_vm8, %v3675_v41  ;;  %5154 = vmatprep.mubr.bf16.mxu0 %v15476_v28 }
 0x5f6   : > { %v3673_v7 = vpop.permute.xlu1 %3672  ;;  %3749 = vst.msk [vmem:[%s8230_s26 + $0x788] sm:$0xff] %vm3728_vm4, %v3675_v41  ;;  %3913 = vrot.lane.b32.xlu0 %v10618_v27, %s7982_s20  ;;  %v7897_v41 = vld [vmem:[%s15425_s1 + $0x8] ss:$0 sps:$4 sm:$0xff]  }
 0x5f7   : > { %3746 = vst.msk [vmem:[%s8230_s26 + $0x6c8] sm:$0xff] %vm3726_vm8, %v3673_v7  ;;  %7764 = vmatmul.mubr.msk.bf16.gmra.mrb[4].mxu0 %vm2658_vm10, %v7897_v41  ;;  %vm3945_vm10 = vcmask 1048384  }
 0x5f8   : > { %3747 = vst.msk [vmem:[%s8230_s26 + $0x6d0] sm:$0xff] %vm3728_vm4, %v3673_v7  ;;  %3911 = vrot.lane.b32.xlu1 %v10623_v54, %s7982_s20  ;;  %v3679_v61 = vpop.permute.xlu0 %3678  ;;  %5386 = vmatprep.mubr.bf16.mxu0 %v15476_v28 }
 0x5f9   : > { %3752 = vst.msk [vmem:[%s8230_s26 + $0x8f0] sm:$0xff] %vm3726_vm8, %v3679_v61 }
 0x5fa   : > { %v3677_v39 = vpop.permute.xlu1 %3676  ;;  %3753 = vst.msk [vmem:[%s8230_s26 + $0x8f8] sm:$0xff] %vm3728_vm4, %v3679_v61  ;;  %3917 = vrot.lane.b32.xlu0 %v10644_v18, %s7982_s20 }
 0x5fb   : > { %3750 = vst.msk [vmem:[%s8230_s26 + $0x838] sm:$0xff] %vm3726_vm8, %v3677_v39 }
 0x5fc   : > { %3751 = vst.msk [vmem:[%s8230_s26 + $0x840] sm:$0xff] %vm3728_vm4, %v3677_v39  ;;  %3915 = vrot.lane.b32.xlu1 %v10649_v57, %s7982_s20  ;;  %v3683_v26 = vpop.permute.xlu0 %3682 }
 0x5fd   : > { %3756 = vst.msk [vmem:[%s8230_s26 + $0xa60] sm:$0xff] %vm3726_vm8, %v3683_v26 }
 0x5fe   : > { %v3681_v25 = vpop.permute.xlu1 %3680  ;;  %3757 = vst.msk [vmem:[%s8230_s26 + $0xa68] sm:$0xff] %vm3728_vm4, %v3683_v26  ;;  %3995 = vrot.lane.b32.xlu0 %v10341_v37, %s7983_s23 }
 0x5ff   : > { %3754 = vst.msk [vmem:[%s8230_s26 + $0x9a8] sm:$0xff] %vm3726_vm8, %v3681_v25 }
 0x600   : > { %3755 = vst.msk [vmem:[%s8230_s26 + $0x9b0] sm:$0xff] %vm3728_vm4, %v3681_v25  ;;  %3919 = vrot.lane.b32.xlu1 %v10666_v21, %s7982_s20  ;;  %v3687_v56 = vpop.permute.xlu0 %3686  ;;  %s8006_s20 = smov 41  }
 0x601   : > { %3760 = vst.msk [vmem:[%s8230_s26 + $0xbd0] sm:$0xff] %vm3726_vm8, %v3687_v56 }
 0x602   : > { %v3685_v51 = vpop.permute.xlu1 %3684  ;;  %3761 = vst.msk [vmem:[%s8230_s26 + $0xbd8] sm:$0xff] %vm3728_vm4, %v3687_v56  ;;  %3999 = vrot.lane.b32.xlu0 %v10371_v47, %s7983_s23 }
 0x603   : > { %3758 = vst.msk [vmem:[%s8230_s26 + $0xb18] sm:$0xff] %vm3726_vm8, %v3685_v51 }
 0x604   : > { %3759 = vst.msk [vmem:[%s8230_s26 + $0xb20] sm:$0xff] %vm3728_vm4, %v3685_v51  ;;  %3997 = vrot.lane.b32.xlu1 %v10366_v58, %s7983_s23  ;;  %v3691_v9 = vpop.permute.xlu0 %3690 }
 0x605   : > { %3764 = vst.msk [vmem:[%s8230_s26 + $0xd40] sm:$0xff] %vm3726_vm8, %v3691_v9 }
 0x606   : > { %v3689_v0 = vpop.permute.xlu1 %3688  ;;  %3765 = vst.msk [vmem:[%s8230_s26 + $0xd48] sm:$0xff] %vm3728_vm4, %v3691_v9  ;;  %4003 = vrot.lane.b32.xlu0 %v10396_v12, %s7983_s23 }
 0x607   : > { %3762 = vst.msk [vmem:[%s8230_s26 + $0xc88] sm:$0xff] %vm3726_vm8, %v3689_v0 }
 0x608   : > { %3763 = vst.msk [vmem:[%s8230_s26 + $0xc90] sm:$0xff] %vm3728_vm4, %v3689_v0  ;;  %4001 = vrot.lane.b32.xlu1 %v10401_v8, %s7983_s23  ;;  %v3695_v30 = vpop.permute.xlu0 %3694 }
 0x609   : > { %3768 = vst.msk [vmem:[%s8230_s26 + $0xeb0] sm:$0xff] %vm3726_vm8, %v3695_v30 }
 0x60a   : > { %v3693_v13 = vpop.permute.xlu1 %3692  ;;  %3769 = vst.msk [vmem:[%s8230_s26 + $0xeb8] sm:$0xff] %vm3728_vm4, %v3695_v30  ;;  %4007 = vrot.lane.b32.xlu0 %v10426_v20, %s7983_s23 }
 0x60b   : > { %3766 = vst.msk [vmem:[%s8230_s26 + $0xdf8] sm:$0xff] %vm3726_vm8, %v3693_v13 }
 0x60c   : > { %3767 = vst.msk [vmem:[%s8230_s26 + $0xe00] sm:$0xff] %vm3728_vm4, %v3693_v13  ;;  %4005 = vrot.lane.b32.xlu1 %v10431_v49, %s7983_s23  ;;  %v3699_v16 = vpop.permute.xlu0 %3698 }
 0x60d   : > { %3772 = vst.msk [vmem:[%s8230_s26 + $0x1020] sm:$0xff] %vm3726_vm8, %v3699_v16 }
 0x60e   : > { %v3697_v62 = vpop.permute.xlu1 %3696  ;;  %3773 = vst.msk [vmem:[%s8230_s26 + $0x1028] sm:$0xff] %vm3728_vm4, %v3699_v16  ;;  %4011 = vrot.lane.b32.xlu0 %v10456_v29, %s7983_s23 }
 0x60f   : > { %3770 = vst.msk [vmem:[%s8230_s26 + $0xf68] sm:$0xff] %vm3726_vm8, %v3697_v62 }
 0x610   : > { %3771 = vst.msk [vmem:[%s8230_s26 + $0xf70] sm:$0xff] %vm3728_vm4, %v3697_v62  ;;  %4009 = vrot.lane.b32.xlu1 %v10461_v50, %s7983_s23  ;;  %v3777_v19 = vpop.permute.xlu0 %3776 }
 0x611   : > { %3849 = vst.msk [vmem:[%s8230_s26 + $0x58] sm:$0xff] %vm3848_vm9, %v3777_v19 }
 0x612   : > { %v3701_v17 = vpop.permute.xlu1 %3700  ;;  %4015 = vrot.lane.b32.xlu0 %v10486_v36, %s7983_s23 }
 0x613   : > { %3774 = vst.msk [vmem:[%s8230_s26 + $0x10d8] sm:$0xff] %vm3726_vm8, %v3701_v17  ;;  %vm4699_vm8 = vcmask 1048336  }
 0x614   : > { %3775 = vst.msk [vmem:[%s8230_s26 + $0x10e0] sm:$0xff] %vm3728_vm4, %v3701_v17  ;;  %4013 = vrot.lane.b32.xlu1 %v10491_v1, %s7983_s23  ;;  %v3781_v53 = vpop.permute.xlu0 %3780  ;;  %vm4821_vm4 = vcmask 638144  }
 0x615   : > { %3851 = vst.msk [vmem:[%s8230_s26 + $0x1c8] sm:$0xff] %vm3848_vm9, %v3781_v53 }
 0x616   : > { %v3779_v32 = vpop.permute.xlu1 %3778  ;;  %4019 = vrot.lane.b32.xlu0 %v10514_v38, %s7983_s23 }
 0x617   : > { %3850 = vst.msk [vmem:[%s8230_s26 + $0x110] sm:$0xff] %vm3848_vm9, %v3779_v32 }
 0x618   : > { %4017 = vrot.lane.b32.xlu1 %v10519_v22, %s7983_s23  ;;  %v3785_v34 = vpop.permute.xlu0 %3784 }
 0x619   : > { %3853 = vst.msk [vmem:[%s8230_s26 + $0x338] sm:$0xff] %vm3848_vm9, %v3785_v34 }
 0x61a   : > { %v3783_v24 = vpop.permute.xlu1 %3782  ;;  %4023 = vrot.lane.b32.xlu0 %v10540_v40, %s7983_s23 }
 0x61b   : > { %3852 = vst.msk [vmem:[%s8230_s26 + $0x280] sm:$0xff] %vm3848_vm9, %v3783_v24 }
 0x61c   : > { %4021 = vrot.lane.b32.xlu1 %v10545_v3, %s7983_s23  ;;  %v3789_v11 = vpop.permute.xlu0 %3788 }
 0x61d   : > { %3855 = vst.msk [vmem:[%s8230_s26 + $0x4a8] sm:$0xff] %vm3848_vm9, %v3789_v11 }
 0x61e   : > { %v3787_v10 = vpop.permute.xlu1 %3786  ;;  %4027 = vrot.lane.b32.xlu0 %v10566_v42, %s7983_s23 }
 0x61f   : > { %3854 = vst.msk [vmem:[%s8230_s26 + $0x3f0] sm:$0xff] %vm3848_vm9, %v3787_v10 }
 0x620   : > { %4025 = vrot.lane.b32.xlu1 %v10571_v44, %s7983_s23  ;;  %v3793_v60 = vpop.permute.xlu0 %3792 }
 0x621   : > { %3857 = vst.msk [vmem:[%s8230_s26 + $0x618] sm:$0xff] %vm3848_vm9, %v3793_v60 }
 0x622   : > { %v3791_v31 = vpop.permute.xlu1 %3790  ;;  %4031 = vrot.lane.b32.xlu0 %v10592_v4, %s7983_s23 }
 0x623   : > { %3856 = vst.msk [vmem:[%s8230_s26 + $0x560] sm:$0xff] %vm3848_vm9, %v3791_v31 }
 0x624   : > { %4029 = vrot.lane.b32.xlu1 %v10597_v52, %s7983_s23  ;;  %v3797_v59 = vpop.permute.xlu0 %3796 }
 0x625   : > { %3859 = vst.msk [vmem:[%s8230_s26 + $0x788] sm:$0xff] %vm3848_vm9, %v3797_v59 }
 0x626   : > { %v3795_v48 = vpop.permute.xlu1 %3794  ;;  %4035 = vrot.lane.b32.xlu0 %v10618_v27, %s7983_s23 }
 0x627   : > { %3858 = vst.msk [vmem:[%s8230_s26 + $0x6d0] sm:$0xff] %vm3848_vm9, %v3795_v48 }
 0x628   : > { %4033 = vrot.lane.b32.xlu1 %v10623_v54, %s7983_s23  ;;  %v3801_v7 = vpop.permute.xlu0 %3800 }
 0x629   : > { %3861 = vst.msk [vmem:[%s8230_s26 + $0x8f8] sm:$0xff] %vm3848_vm9, %v3801_v7 }
 0x62a   : > { %v3799_v45 = vpop.permute.xlu1 %3798  ;;  %4039 = vrot.lane.b32.xlu0 %v10644_v18, %s7983_s23 }
 0x62b   : > { %3860 = vst.msk [vmem:[%s8230_s26 + $0x840] sm:$0xff] %vm3848_vm9, %v3799_v45 }
 0x62c   : > { %4037 = vrot.lane.b32.xlu1 %v10649_v57, %s7983_s23  ;;  %v3805_v61 = vpop.permute.xlu0 %3804 }
 0x62d   : > { %3863 = vst.msk [vmem:[%s8230_s26 + $0xa68] sm:$0xff] %vm3848_vm9, %v3805_v61 }
 0x62e   : > { %v3803_v39 = vpop.permute.xlu1 %3802  ;;  %4092 = vrot.lane.b32.xlu0 %v10341_v37, %s7984_s14 }
 0x62f   : > { %3862 = vst.msk [vmem:[%s8230_s26 + $0x9b0] sm:$0xff] %vm3848_vm9, %v3803_v39 }
 0x630   : > { %4041 = vrot.lane.b32.xlu1 %v10666_v21, %s7983_s23  ;;  %v3809_v26 = vpop.permute.xlu0 %3808  ;;  %s8007_s23 = smov 79  }
 0x631   : > { %3865 = vst.msk [vmem:[%s8230_s26 + $0xbd8] sm:$0xff] %vm3848_vm9, %v3809_v26 }
 0x632   : > { %v3807_v25 = vpop.permute.xlu1 %3806  ;;  %4096 = vrot.lane.b32.xlu0 %v10371_v47, %s7984_s14 }
 0x633   : > { %3864 = vst.msk [vmem:[%s8230_s26 + $0xb20] sm:$0xff] %vm3848_vm9, %v3807_v25 }
 0x634   : > { %4094 = vrot.lane.b32.xlu1 %v10366_v58, %s7984_s14  ;;  %v3813_v56 = vpop.permute.xlu0 %3812 }
 0x635   : > { %3867 = vst.msk [vmem:[%s8230_s26 + $0xd48] sm:$0xff] %vm3848_vm9, %v3813_v56 }
 0x636   : > { %v3811_v51 = vpop.permute.xlu1 %3810  ;;  %4100 = vrot.lane.b32.xlu0 %v10396_v12, %s7984_s14 }
 0x637   : > { %3866 = vst.msk [vmem:[%s8230_s26 + $0xc90] sm:$0xff] %vm3848_vm9, %v3811_v51 }
 0x638   : > { %4098 = vrot.lane.b32.xlu1 %v10401_v8, %s7984_s14  ;;  %v3817_v9 = vpop.permute.xlu0 %3816 }
 0x639   : > { %3869 = vst.msk [vmem:[%s8230_s26 + $0xeb8] sm:$0xff] %vm3848_vm9, %v3817_v9 }
 0x63a   : > { %v3815_v0 = vpop.permute.xlu1 %3814  ;;  %4104 = vrot.lane.b32.xlu0 %v10426_v20, %s7984_s14 }
 0x63b   : > { %3868 = vst.msk [vmem:[%s8230_s26 + $0xe00] sm:$0xff] %vm3848_vm9, %v3815_v0 }
 0x63c   : > { %4102 = vrot.lane.b32.xlu1 %v10431_v49, %s7984_s14  ;;  %v3821_v30 = vpop.permute.xlu0 %3820 }
 0x63d   : > { %3871 = vst.msk [vmem:[%s8230_s26 + $0x1028] sm:$0xff] %vm3848_vm9, %v3821_v30 }
 0x63e   : > { %v3819_v13 = vpop.permute.xlu1 %3818  ;;  %4108 = vrot.lane.b32.xlu0 %v10456_v29, %s7984_s14 }
 0x63f   : > { %3870 = vst.msk [vmem:[%s8230_s26 + $0xf70] sm:$0xff] %vm3848_vm9, %v3819_v13 }
 0x640   : > { %4106 = vrot.lane.b32.xlu1 %v10461_v50, %s7984_s14  ;;  %v3874_v16 = vpop.permute.xlu0 %3873 }
 0x641   : > { %3946 = vst.msk [vmem:[%s8230_s26 + $0x58] sm:$0xff] %vm3945_vm10, %v3874_v16 }
 0x642   : > { %v3823_v62 = vpop.permute.xlu1 %3822  ;;  %3948 = vst.msk [vmem:[%s8230_s26 + $0x60] sm:$0xff] %vm3947_vm12, %v3874_v16  ;;  %4112 = vrot.lane.b32.xlu0 %v10486_v36, %s7984_s14 }
 0x643   : > { %3872 = vst.msk [vmem:[%s8230_s26 + $0x10e0] sm:$0xff] %vm3848_vm9, %v3823_v62  ;;  %vm4918_vm9 = vcmask 1048176  }
 0x644   : > { %4110 = vrot.lane.b32.xlu1 %v10491_v1, %s7984_s14  ;;  %v3878_v19 = vpop.permute.xlu0 %3877 }
 0x645   : > { %3951 = vst.msk [vmem:[%s8230_s26 + $0x1c8] sm:$0xff] %vm3945_vm10, %v3878_v19 }
 0x646   : > { %v3876_v17 = vpop.permute.xlu1 %3875  ;;  %3952 = vst.msk [vmem:[%s8230_s26 + $0x1d0] sm:$0xff] %vm3947_vm12, %v3878_v19  ;;  %4116 = vrot.lane.b32.xlu0 %v10514_v38, %s7984_s14 }
 0x647   : > { %3949 = vst.msk [vmem:[%s8230_s26 + $0x110] sm:$0xff] %vm3945_vm10, %v3876_v17 }
 0x648   : > { %3950 = vst.msk [vmem:[%s8230_s26 + $0x118] sm:$0xff] %vm3947_vm12, %v3876_v17  ;;  %4114 = vrot.lane.b32.xlu1 %v10519_v22, %s7984_s14  ;;  %v3882_v53 = vpop.permute.xlu0 %3881 }
 0x649   : > { %3955 = vst.msk [vmem:[%s8230_s26 + $0x338] sm:$0xff] %vm3945_vm10, %v3882_v53 }
 0x64a   : > { %v3880_v32 = vpop.permute.xlu1 %3879  ;;  %3956 = vst.msk [vmem:[%s8230_s26 + $0x340] sm:$0xff] %vm3947_vm12, %v3882_v53  ;;  %4120 = vrot.lane.b32.xlu0 %v10540_v40, %s7984_s14 }
 0x64b   : > { %3953 = vst.msk [vmem:[%s8230_s26 + $0x280] sm:$0xff] %vm3945_vm10, %v3880_v32 }
 0x64c   : > { %3954 = vst.msk [vmem:[%s8230_s26 + $0x288] sm:$0xff] %vm3947_vm12, %v3880_v32  ;;  %4118 = vrot.lane.b32.xlu1 %v10545_v3, %s7984_s14  ;;  %v3886_v23 = vpop.permute.xlu0 %3885 }
 0x64d   : > { %3959 = vst.msk [vmem:[%s8230_s26 + $0x4a8] sm:$0xff] %vm3945_vm10, %v3886_v23 }
 0x64e   : > { %v3884_v2 = vpop.permute.xlu1 %3883  ;;  %3960 = vst.msk [vmem:[%s8230_s26 + $0x4b0] sm:$0xff] %vm3947_vm12, %v3886_v23  ;;  %4124 = vrot.lane.b32.xlu0 %v10566_v42, %s7984_s14 }
 0x64f   : > { %3957 = vst.msk [vmem:[%s8230_s26 + $0x3f0] sm:$0xff] %vm3945_vm10, %v3884_v2 }
 0x650   : > { %3958 = vst.msk [vmem:[%s8230_s26 + $0x3f8] sm:$0xff] %vm3947_vm12, %v3884_v2  ;;  %4122 = vrot.lane.b32.xlu1 %v10571_v44, %s7984_s14  ;;  %v3890_v34 = vpop.permute.xlu0 %3889 }
 0x651   : > { %3963 = vst.msk [vmem:[%s8230_s26 + $0x618] sm:$0xff] %vm3945_vm10, %v3890_v34 }
 0x652   : > { %v3888_v24 = vpop.permute.xlu1 %3887  ;;  %3964 = vst.msk [vmem:[%s8230_s26 + $0x620] sm:$0xff] %vm3947_vm12, %v3890_v34  ;;  %4128 = vrot.lane.b32.xlu0 %v10592_v4, %s7984_s14 }
 0x653   : > { %3961 = vst.msk [vmem:[%s8230_s26 + $0x560] sm:$0xff] %vm3945_vm10, %v3888_v24 }
 0x654   : > { %3962 = vst.msk [vmem:[%s8230_s26 + $0x568] sm:$0xff] %vm3947_vm12, %v3888_v24  ;;  %4126 = vrot.lane.b32.xlu1 %v10597_v52, %s7984_s14  ;;  %v3894_v33 = vpop.permute.xlu0 %3893 }
 0x655   : > { %3967 = vst.msk [vmem:[%s8230_s26 + $0x788] sm:$0xff] %vm3945_vm10, %v3894_v33 }
 0x656   : > { %v3892_v6 = vpop.permute.xlu1 %3891  ;;  %3968 = vst.msk [vmem:[%s8230_s26 + $0x790] sm:$0xff] %vm3947_vm12, %v3894_v33  ;;  %4132 = vrot.lane.b32.xlu0 %v10618_v27, %s7984_s14 }
 0x657   : > { %3965 = vst.msk [vmem:[%s8230_s26 + $0x6d0] sm:$0xff] %vm3945_vm10, %v3892_v6 }
 0x658   : > { %3966 = vst.msk [vmem:[%s8230_s26 + $0x6d8] sm:$0xff] %vm3947_vm12, %v3892_v6  ;;  %4130 = vrot.lane.b32.xlu1 %v10623_v54, %s7984_s14  ;;  %v3898_v63 = vpop.permute.xlu0 %3897 }
 0x659   : > { %3971 = vst.msk [vmem:[%s8230_s26 + $0x8f8] sm:$0xff] %vm3945_vm10, %v3898_v63 }
 0x65a   : > { %v3896_v35 = vpop.permute.xlu1 %3895  ;;  %3972 = vst.msk [vmem:[%s8230_s26 + $0x900] sm:$0xff] %vm3947_vm12, %v3898_v63  ;;  %4136 = vrot.lane.b32.xlu0 %v10644_v18, %s7984_s14 }
 0x65b   : > { %3969 = vst.msk [vmem:[%s8230_s26 + $0x840] sm:$0xff] %vm3945_vm10, %v3896_v35 }
 0x65c   : > { %3970 = vst.msk [vmem:[%s8230_s26 + $0x848] sm:$0xff] %vm3947_vm12, %v3896_v35  ;;  %4134 = vrot.lane.b32.xlu1 %v10649_v57, %s7984_s14  ;;  %v3902_v55 = vpop.permute.xlu0 %3901 }
 0x65d   : > { %3975 = vst.msk [vmem:[%s8230_s26 + $0xa68] sm:$0xff] %vm3945_vm10, %v3902_v55 }
 0x65e   : > { %v3900_v43 = vpop.permute.xlu1 %3899  ;;  %3976 = vst.msk [vmem:[%s8230_s26 + $0xa70] sm:$0xff] %vm3947_vm12, %v3902_v55  ;;  %4214 = vrot.lane.b32.xlu0 %v10341_v37, %s7985_s15 }
 0x65f   : > { %3973 = vst.msk [vmem:[%s8230_s26 + $0x9b0] sm:$0xff] %vm3945_vm10, %v3900_v43 }
 0x660   : > { %3974 = vst.msk [vmem:[%s8230_s26 + $0x9b8] sm:$0xff] %vm3947_vm12, %v3900_v43  ;;  %4138 = vrot.lane.b32.xlu1 %v10666_v21, %s7984_s14  ;;  %v3906_v11 = vpop.permute.xlu0 %3905  ;;  %s8000_s14 = smov 69  }
 0x661   : > { %3979 = vst.msk [vmem:[%s8230_s26 + $0xbd8] sm:$0xff] %vm3945_vm10, %v3906_v11 }
 0x662   : > { %v3904_v10 = vpop.permute.xlu1 %3903  ;;  %3980 = vst.msk [vmem:[%s8230_s26 + $0xbe0] sm:$0xff] %vm3947_vm12, %v3906_v11  ;;  %4218 = vrot.lane.b32.xlu0 %v10371_v47, %s7985_s15 }
 0x663   : > { %3977 = vst.msk [vmem:[%s8230_s26 + $0xb20] sm:$0xff] %vm3945_vm10, %v3904_v10 }
 0x664   : > { %3978 = vst.msk [vmem:[%s8230_s26 + $0xb28] sm:$0xff] %vm3947_vm12, %v3904_v10  ;;  %4216 = vrot.lane.b32.xlu1 %v10366_v58, %s7985_s15  ;;  %v3910_v5 = vpop.permute.xlu0 %3909 }
 0x665   : > { %3983 = vst.msk [vmem:[%s8230_s26 + $0xd48] sm:$0xff] %vm3945_vm10, %v3910_v5 }
 0x666   : > { %v3908_v15 = vpop.permute.xlu1 %3907  ;;  %3984 = vst.msk [vmem:[%s8230_s26 + $0xd50] sm:$0xff] %vm3947_vm12, %v3910_v5  ;;  %4222 = vrot.lane.b32.xlu0 %v10396_v12, %s7985_s15 }
 0x667   : > { %3981 = vst.msk [vmem:[%s8230_s26 + $0xc90] sm:$0xff] %vm3945_vm10, %v3908_v15 }
 0x668   : > { %3982 = vst.msk [vmem:[%s8230_s26 + $0xc98] sm:$0xff] %vm3947_vm12, %v3908_v15  ;;  %4220 = vrot.lane.b32.xlu1 %v10401_v8, %s7985_s15  ;;  %v3914_v31 = vpop.permute.xlu0 %3913 }
 0x669   : > { %3987 = vst.msk [vmem:[%s8230_s26 + $0xeb8] sm:$0xff] %vm3945_vm10, %v3914_v31 }
 0x66a   : > { %v3912_v14 = vpop.permute.xlu1 %3911  ;;  %3988 = vst.msk [vmem:[%s8230_s26 + $0xec0] sm:$0xff] %vm3947_vm12, %v3914_v31  ;;  %4226 = vrot.lane.b32.xlu0 %v10426_v20, %s7985_s15 }
 0x66b   : > { %3985 = vst.msk [vmem:[%s8230_s26 + $0xe00] sm:$0xff] %vm3945_vm10, %v3912_v14 }
 0x66c   : > { %3986 = vst.msk [vmem:[%s8230_s26 + $0xe08] sm:$0xff] %vm3947_vm12, %v3912_v14  ;;  %4224 = vrot.lane.b32.xlu1 %v10431_v49, %s7985_s15  ;;  %v3918_v46 = vpop.permute.xlu0 %3917 }
 0x66d   : > { %3991 = vst.msk [vmem:[%s8230_s26 + $0x1028] sm:$0xff] %vm3945_vm10, %v3918_v46 }
 0x66e   : > { %v3916_v60 = vpop.permute.xlu1 %3915  ;;  %3992 = vst.msk [vmem:[%s8230_s26 + $0x1030] sm:$0xff] %vm3947_vm12, %v3918_v46  ;;  %4230 = vrot.lane.b32.xlu0 %v10456_v29, %s7985_s15 }
 0x66f   : > { %3989 = vst.msk [vmem:[%s8230_s26 + $0xf70] sm:$0xff] %vm3945_vm10, %v3916_v60 }
 0x670   : > { %3990 = vst.msk [vmem:[%s8230_s26 + $0xf78] sm:$0xff] %vm3947_vm12, %v3916_v60  ;;  %4228 = vrot.lane.b32.xlu1 %v10461_v50, %s7985_s15  ;;  %v3996_v59 = vpop.permute.xlu0 %3995 }
 0x671   : > { %4068 = vst.msk [vmem:[%s8230_s26 + $0x60] sm:$0xff] %vm4067_vm13, %v3996_v59 }
 0x672   : > { %v3920_v48 = vpop.permute.xlu1 %3919  ;;  %4234 = vrot.lane.b32.xlu0 %v10486_v36, %s7985_s15 }
 0x673   : > { %3993 = vst.msk [vmem:[%s8230_s26 + $0x10e0] sm:$0xff] %vm3945_vm10, %v3920_v48  ;;  %vm5341_vm10 = vcmask 261120  }
 0x674   : > { %3994 = vst.msk [vmem:[%s8230_s26 + $0x10e8] sm:$0xff] %vm3947_vm12, %v3920_v48  ;;  %4232 = vrot.lane.b32.xlu1 %v10491_v1, %s7985_s15  ;;  %v4000_v7 = vpop.permute.xlu0 %3999  ;;  %vm5526_vm12 = vcmask 523264  }
 0x675   : > { %4070 = vst.msk [vmem:[%s8230_s26 + $0x1d0] sm:$0xff] %vm4067_vm13, %v4000_v7 }
 0x676   : > { %v3998_v45 = vpop.permute.xlu1 %3997  ;;  %4238 = vrot.lane.b32.xlu0 %v10514_v38, %s7985_s15 }
 0x677   : > { %4069 = vst.msk [vmem:[%s8230_s26 + $0x118] sm:$0xff] %vm4067_vm13, %v3998_v45 }
 0x678   : > { %4236 = vrot.lane.b32.xlu1 %v10519_v22, %s7985_s15  ;;  %v4004_v39 = vpop.permute.xlu0 %4003 }
 0x679   : > { %4072 = vst.msk [vmem:[%s8230_s26 + $0x340] sm:$0xff] %vm4067_vm13, %v4004_v39 }
 0x67a   : > { %v4002_v41 = vpop.permute.xlu1 %4001  ;;  %4242 = vrot.lane.b32.xlu0 %v10540_v40, %s7985_s15 }
 0x67b   : > { %4071 = vst.msk [vmem:[%s8230_s26 + $0x288] sm:$0xff] %vm4067_vm13, %v4002_v41 }
 0x67c   : > { %4240 = vrot.lane.b32.xlu1 %v10545_v3, %s7985_s15  ;;  %v4008_v25 = vpop.permute.xlu0 %4007 }
 0x67d   : > { %4074 = vst.msk [vmem:[%s8230_s26 + $0x4b0] sm:$0xff] %vm4067_vm13, %v4008_v25 }
 0x67e   : > { %v4006_v61 = vpop.permute.xlu1 %4005  ;;  %4246 = vrot.lane.b32.xlu0 %v10566_v42, %s7985_s15 }
 0x67f   : > { %4073 = vst.msk [vmem:[%s8230_s26 + $0x3f8] sm:$0xff] %vm4067_vm13, %v4006_v61 }
 0x680   : > { %4244 = vrot.lane.b32.xlu1 %v10571_v44, %s7985_s15  ;;  %v4012_v51 = vpop.permute.xlu0 %4011 }
 0x681   : > { %4076 = vst.msk [vmem:[%s8230_s26 + $0x620] sm:$0xff] %vm4067_vm13, %v4012_v51 }
 0x682   : > { %v4010_v26 = vpop.permute.xlu1 %4009  ;;  %4250 = vrot.lane.b32.xlu0 %v10592_v4, %s7985_s15 }
 0x683   : > { %4075 = vst.msk [vmem:[%s8230_s26 + $0x568] sm:$0xff] %vm4067_vm13, %v4010_v26 }
 0x684   : > { %4248 = vrot.lane.b32.xlu1 %v10597_v52, %s7985_s15  ;;  %v4016_v0 = vpop.permute.xlu0 %4015 }
 0x685   : > { %4078 = vst.msk [vmem:[%s8230_s26 + $0x790] sm:$0xff] %vm4067_vm13, %v4016_v0 }
 0x686   : > { %v4014_v56 = vpop.permute.xlu1 %4013  ;;  %4254 = vrot.lane.b32.xlu0 %v10618_v27, %s7985_s15 }
 0x687   : > { %4077 = vst.msk [vmem:[%s8230_s26 + $0x6d8] sm:$0xff] %vm4067_vm13, %v4014_v56 }
 0x688   : > { %4252 = vrot.lane.b32.xlu1 %v10623_v54, %s7985_s15  ;;  %v4020_v13 = vpop.permute.xlu0 %4019 }
 0x689   : > { %4080 = vst.msk [vmem:[%s8230_s26 + $0x900] sm:$0xff] %vm4067_vm13, %v4020_v13 }
 0x68a   : > { %v4018_v9 = vpop.permute.xlu1 %4017  ;;  %4258 = vrot.lane.b32.xlu0 %v10644_v18, %s7985_s15 }
 0x68b   : > { %4079 = vst.msk [vmem:[%s8230_s26 + $0x848] sm:$0xff] %vm4067_vm13, %v4018_v9 }
 0x68c   : > { %4256 = vrot.lane.b32.xlu1 %v10649_v57, %s7985_s15  ;;  %v4024_v62 = vpop.permute.xlu0 %4023 }
 0x68d   : > { %4082 = vst.msk [vmem:[%s8230_s26 + $0xa70] sm:$0xff] %vm4067_vm13, %v4024_v62 }
 0x68e   : > { %v4022_v30 = vpop.permute.xlu1 %4021  ;;  %4311 = vrot.lane.b32.xlu0 %v10341_v37, %s7986_s16 }
 0x68f   : > { %4081 = vst.msk [vmem:[%s8230_s26 + $0x9b8] sm:$0xff] %vm4067_vm13, %v4022_v30 }
 0x690   : > { %4260 = vrot.lane.b32.xlu1 %v10666_v21, %s7985_s15  ;;  %v4028_v17 = vpop.permute.xlu0 %4027  ;;  %s8001_s15 = smov 107  }
 0x691   : > { %4084 = vst.msk [vmem:[%s8230_s26 + $0xbe0] sm:$0xff] %vm4067_vm13, %v4028_v17 }
 0x692   : > { %v4026_v16 = vpop.permute.xlu1 %4025  ;;  %4315 = vrot.lane.b32.xlu0 %v10371_v47, %s7986_s16 }
 0x693   : > { %4083 = vst.msk [vmem:[%s8230_s26 + $0xb28] sm:$0xff] %vm4067_vm13, %v4026_v16 }
 0x694   : > { %4313 = vrot.lane.b32.xlu1 %v10366_v58, %s7986_s16  ;;  %v4032_v32 = vpop.permute.xlu0 %4031 }
 0x695   : > { %4086 = vst.msk [vmem:[%s8230_s26 + $0xd50] sm:$0xff] %vm4067_vm13, %v4032_v32 }
 0x696   : > { %v4030_v19 = vpop.permute.xlu1 %4029  ;;  %4319 = vrot.lane.b32.xlu0 %v10396_v12, %s7986_s16 }
 0x697   : > { %4085 = vst.msk [vmem:[%s8230_s26 + $0xc98] sm:$0xff] %vm4067_vm13, %v4030_v19 }
 0x698   : > { %4317 = vrot.lane.b32.xlu1 %v10401_v8, %s7986_s16  ;;  %v4036_v2 = vpop.permute.xlu0 %4035 }
 0x699   : > { %4088 = vst.msk [vmem:[%s8230_s26 + $0xec0] sm:$0xff] %vm4067_vm13, %v4036_v2 }
 0x69a   : > { %v4034_v53 = vpop.permute.xlu1 %4033  ;;  %4323 = vrot.lane.b32.xlu0 %v10426_v20, %s7986_s16 }
 0x69b   : > { %4087 = vst.msk [vmem:[%s8230_s26 + $0xe08] sm:$0xff] %vm4067_vm13, %v4034_v53 }
 0x69c   : > { %4321 = vrot.lane.b32.xlu1 %v10431_v49, %s7986_s16  ;;  %v4040_v24 = vpop.permute.xlu0 %4039 }
 0x69d   : > { %4090 = vst.msk [vmem:[%s8230_s26 + $0x1030] sm:$0xff] %vm4067_vm13, %v4040_v24 }
 0x69e   : > { %v4038_v23 = vpop.permute.xlu1 %4037  ;;  %4327 = vrot.lane.b32.xlu0 %v10456_v29, %s7986_s16 }
 0x69f   : > { %4089 = vst.msk [vmem:[%s8230_s26 + $0xf78] sm:$0xff] %vm4067_vm13, %v4038_v23 }
 0x6a0   : > { %4325 = vrot.lane.b32.xlu1 %v10461_v50, %s7986_s16  ;;  %v4093_v6 = vpop.permute.xlu0 %4092 }
 0x6a1   : > { %4165 = vst.msk [vmem:[%s8230_s26 + $0x60] sm:$0xff] %vm4164_vm14, %v4093_v6 }
 0x6a2   : > { %v4042_v34 = vpop.permute.xlu1 %4041  ;;  %4167 = vst.msk [vmem:[%s8230_s26 + $0x68] sm:$0xff] %vm4166_vm15, %v4093_v6  ;;  %4331 = vrot.lane.b32.xlu0 %v10486_v36, %s7986_s16 }
 0x6a3   : > { %4091 = vst.msk [vmem:[%s8230_s26 + $0x10e8] sm:$0xff] %vm4067_vm13, %v4042_v34  ;;  %vm5835_vm13 = vcmask 654336  }
 0x6a4   : > { %4329 = vrot.lane.b32.xlu1 %v10491_v1, %s7986_s16  ;;  %v4097_v35 = vpop.permute.xlu0 %4096 }
 0x6a5   : > { %4170 = vst.msk [vmem:[%s8230_s26 + $0x1d0] sm:$0xff] %vm4164_vm14, %v4097_v35 }
 0x6a6   : > { %v4095_v33 = vpop.permute.xlu1 %4094  ;;  %4171 = vst.msk [vmem:[%s8230_s26 + $0x1d8] sm:$0xff] %vm4166_vm15, %v4097_v35  ;;  %4335 = vrot.lane.b32.xlu0 %v10514_v38, %s7986_s16 }
 0x6a7   : > { %4168 = vst.msk [vmem:[%s8230_s26 + $0x118] sm:$0xff] %vm4164_vm14, %v4095_v33 }
 0x6a8   : > { %4169 = vst.msk [vmem:[%s8230_s26 + $0x120] sm:$0xff] %vm4166_vm15, %v4095_v33  ;;  %4333 = vrot.lane.b32.xlu1 %v10519_v22, %s7986_s16  ;;  %v4101_v43 = vpop.permute.xlu0 %4100 }
 0x6a9   : > { %4174 = vst.msk [vmem:[%s8230_s26 + $0x340] sm:$0xff] %vm4164_vm14, %v4101_v43 }
 0x6aa   : > { %v4099_v63 = vpop.permute.xlu1 %4098  ;;  %4175 = vst.msk [vmem:[%s8230_s26 + $0x348] sm:$0xff] %vm4166_vm15, %v4101_v43  ;;  %4339 = vrot.lane.b32.xlu0 %v10540_v40, %s7986_s16 }
 0x6ab   : > { %4172 = vst.msk [vmem:[%s8230_s26 + $0x288] sm:$0xff] %vm4164_vm14, %v4099_v63 }
 0x6ac   : > { %4173 = vst.msk [vmem:[%s8230_s26 + $0x290] sm:$0xff] %vm4166_vm15, %v4099_v63  ;;  %4337 = vrot.lane.b32.xlu1 %v10545_v3, %s7986_s16  ;;  %v4105_v10 = vpop.permute.xlu0 %4104 }
 0x6ad   : > { %4178 = vst.msk [vmem:[%s8230_s26 + $0x4b0] sm:$0xff] %vm4164_vm14, %v4105_v10 }
 0x6ae   : > { %v4103_v55 = vpop.permute.xlu1 %4102  ;;  %4179 = vst.msk [vmem:[%s8230_s26 + $0x4b8] sm:$0xff] %vm4166_vm15, %v4105_v10  ;;  %4343 = vrot.lane.b32.xlu0 %v10566_v42, %s7986_s16 }
 0x6af   : > { %4176 = vst.msk [vmem:[%s8230_s26 + $0x3f8] sm:$0xff] %vm4164_vm14, %v4103_v55 }
 0x6b0   : > { %4177 = vst.msk [vmem:[%s8230_s26 + $0x400] sm:$0xff] %vm4166_vm15, %v4103_v55  ;;  %4341 = vrot.lane.b32.xlu1 %v10571_v44, %s7986_s16  ;;  %v4109_v15 = vpop.permute.xlu0 %4108  ;;  %v5017_v55 = vld [vmem:[%s15426_s2] sm:$0xff] }
 0x6b1   : > { %4182 = vst.msk [vmem:[%s8230_s26 + $0x620] sm:$0xff] %vm4164_vm14, %v4109_v15 }
 0x6b2   : > { %v4107_v11 = vpop.permute.xlu1 %4106  ;;  %4183 = vst.msk [vmem:[%s8230_s26 + $0x628] sm:$0xff] %vm4166_vm15, %v4109_v15  ;;  %4347 = vrot.lane.b32.xlu0 %v10592_v4, %s7986_s16 }
 0x6b3   : > { %4180 = vst.msk [vmem:[%s8230_s26 + $0x568] sm:$0xff] %vm4164_vm14, %v4107_v11 }
 0x6b4   : > { %4181 = vst.msk [vmem:[%s8230_s26 + $0x570] sm:$0xff] %vm4166_vm15, %v4107_v11  ;;  %4345 = vrot.lane.b32.xlu1 %v10597_v52, %s7986_s16  ;;  %v4113_v14 = vpop.permute.xlu0 %4112 }
 0x6b5   : > { %4186 = vst.msk [vmem:[%s8230_s26 + $0x790] sm:$0xff] %vm4164_vm14, %v4113_v14 }
 0x6b6   : > { %v4111_v5 = vpop.permute.xlu1 %4110  ;;  %4187 = vst.msk [vmem:[%s8230_s26 + $0x798] sm:$0xff] %vm4166_vm15, %v4113_v14  ;;  %4351 = vrot.lane.b32.xlu0 %v10618_v27, %s7986_s16 }
 0x6b7   : > { %4184 = vst.msk [vmem:[%s8230_s26 + $0x6d8] sm:$0xff] %vm4164_vm14, %v4111_v5 }
 0x6b8   : > { %4185 = vst.msk [vmem:[%s8230_s26 + $0x6e0] sm:$0xff] %vm4166_vm15, %v4111_v5  ;;  %4349 = vrot.lane.b32.xlu1 %v10623_v54, %s7986_s16  ;;  %v4117_v60 = vpop.permute.xlu0 %4116 }
 0x6b9   : > { %4190 = vst.msk [vmem:[%s8230_s26 + $0x900] sm:$0xff] %vm4164_vm14, %v4117_v60 }
 0x6ba   : > { %v4115_v31 = vpop.permute.xlu1 %4114  ;;  %4191 = vst.msk [vmem:[%s8230_s26 + $0x908] sm:$0xff] %vm4166_vm15, %v4117_v60  ;;  %4355 = vrot.lane.b32.xlu0 %v10644_v18, %s7986_s16 }
 0x6bb   : > { %4188 = vst.msk [vmem:[%s8230_s26 + $0x848] sm:$0xff] %vm4164_vm14, %v4115_v31 }
 0x6bc   : > { %4189 = vst.msk [vmem:[%s8230_s26 + $0x850] sm:$0xff] %vm4166_vm15, %v4115_v31  ;;  %4353 = vrot.lane.b32.xlu1 %v10649_v57, %s7986_s16  ;;  %v4121_v48 = vpop.permute.xlu0 %4120  ;;  %v5018_v31 = vld [vmem:[%s15426_s2 + $0x8] sm:$0xff] }
 0x6bd   : > { %4194 = vst.msk [vmem:[%s8230_s26 + $0xa70] sm:$0xff] %vm4164_vm14, %v4121_v48 }
 0x6be   : > { %v4119_v46 = vpop.permute.xlu1 %4118  ;;  %4195 = vst.msk [vmem:[%s8230_s26 + $0xa78] sm:$0xff] %vm4166_vm15, %v4121_v48  ;;  %4408 = vrot.lane.b32.xlu0 %v10341_v37, %s7987_s17 }
 0x6bf   : > { %4192 = vst.msk [vmem:[%s8230_s26 + $0x9b8] sm:$0xff] %vm4164_vm14, %v4119_v46  ;;  %v12674_v43 = vpop.f32.mrb[0].mxu0 }
 0x6c0   : > { %4193 = vst.msk [vmem:[%s8230_s26 + $0x9c0] sm:$0xff] %vm4166_vm15, %v4119_v46  ;;  %4357 = vrot.lane.b32.xlu1 %v10666_v21, %s7986_s16  ;;  %v4125_v45 = vpop.permute.xlu0 %4124  ;;  %v12679_v10 = vpop.f32.mrb[1].mxu0  ;;  %s8002_s16 = smov 17  }
 0x6c1   : > { %4198 = vst.msk [vmem:[%s8230_s26 + $0xbe0] sm:$0xff] %vm4164_vm14, %v4125_v45  ;;  %v12685_v5 = vpop.f32.mrb[2].mxu0 }
 0x6c2   : > { %v4123_v59 = vpop.permute.xlu1 %4122  ;;  %4199 = vst.msk [vmem:[%s8230_s26 + $0xbe8] sm:$0xff] %vm4166_vm15, %v4125_v45  ;;  %4412 = vrot.lane.b32.xlu0 %v10371_v47, %s7987_s17  ;;  %v12689_v14 = vpop.f32.mrb[3].mxu0 }
 0x6c3   : > { %4196 = vst.msk [vmem:[%s8230_s26 + $0xb28] sm:$0xff] %vm4164_vm14, %v4123_v59 }
 0x6c4   : > { %4197 = vst.msk [vmem:[%s8230_s26 + $0xb30] sm:$0xff] %vm4166_vm15, %v4123_v59  ;;  %4410 = vrot.lane.b32.xlu1 %v10366_v58, %s7987_s17  ;;  %v4129_v41 = vpop.permute.xlu0 %4128  ;;  %v5019_v59 = vld [vmem:[%s15426_s2 + $0x10] sm:$0xff] }
 0x6c5   : > { %4202 = vst.msk [vmem:[%s8230_s26 + $0xd50] sm:$0xff] %vm4164_vm14, %v4129_v41 }
 0x6c6   : > { %v4127_v7 = vpop.permute.xlu1 %4126  ;;  %4203 = vst.msk [vmem:[%s8230_s26 + $0xd58] sm:$0xff] %vm4166_vm15, %v4129_v41  ;;  %4416 = vrot.lane.b32.xlu0 %v10396_v12, %s7987_s17 }
 0x6c7   : > { %4200 = vst.msk [vmem:[%s8230_s26 + $0xc98] sm:$0xff] %vm4164_vm14, %v4127_v7 }
 0x6c8   : > { %4201 = vst.msk [vmem:[%s8230_s26 + $0xca0] sm:$0xff] %vm4166_vm15, %v4127_v7  ;;  %4414 = vrot.lane.b32.xlu1 %v10401_v8, %s7987_s17  ;;  %v4133_v61 = vpop.permute.xlu0 %4132 }
 0x6c9   : > { %4206 = vst.msk [vmem:[%s8230_s26 + $0xec0] sm:$0xff] %vm4164_vm14, %v4133_v61 }
 0x6ca   : > { %v4131_v39 = vpop.permute.xlu1 %4130  ;;  %4207 = vst.msk [vmem:[%s8230_s26 + $0xec8] sm:$0xff] %vm4166_vm15, %v4133_v61  ;;  %4420 = vrot.lane.b32.xlu0 %v10426_v20, %s7987_s17  ;;  %v12700_v48 = vpop.f32.mrb[4].mxu0 }
 0x6cb   : > { %4204 = vst.msk [vmem:[%s8230_s26 + $0xe08] sm:$0xff] %vm4164_vm14, %v4131_v39  ;;  %v12705_v45 = vpop.f32.mrb[5].mxu0 }
 0x6cc   : > { %4205 = vst.msk [vmem:[%s8230_s26 + $0xe10] sm:$0xff] %vm4166_vm15, %v4131_v39  ;;  %4418 = vrot.lane.b32.xlu1 %v10431_v49, %s7987_s17  ;;  %v4137_v26 = vpop.permute.xlu0 %4136  ;;  %v5160_v39 = vpop.f32.mrb[6].mxu0 }
 0x6cd   : > { %4210 = vst.msk [vmem:[%s8230_s26 + $0x1030] sm:$0xff] %vm4164_vm14, %v4137_v26  ;;  %v5161_v61 = vpop.f32.mrb[7].mxu0 }
 0x6ce   : > { %v4135_v25 = vpop.permute.xlu1 %4134  ;;  %4211 = vst.msk [vmem:[%s8230_s26 + $0x1038] sm:$0xff] %vm4166_vm15, %v4137_v26  ;;  %4424 = vrot.lane.b32.xlu0 %v10456_v29, %s7987_s17 }
 0x6cf   : > { %4208 = vst.msk [vmem:[%s8230_s26 + $0xf78] sm:$0xff] %vm4164_vm14, %v4135_v25 }
 0x6d0   : > { %4209 = vst.msk [vmem:[%s8230_s26 + $0xf80] sm:$0xff] %vm4166_vm15, %v4135_v25  ;;  %4422 = vrot.lane.b32.xlu1 %v10461_v50, %s7987_s17  ;;  %v4215_v56 = vpop.permute.xlu0 %4214 }
 0x6d1   : > { %4287 = vst.msk [vmem:[%s8230_s26 + $0x68] sm:$0xff] %vm4286_vm0, %v4215_v56 }
 0x6d2   : > { %v4139_v51 = vpop.permute.xlu1 %4138  ;;  %4428 = vrot.lane.b32.xlu0 %v10486_v36, %s7987_s17 }
 0x6d3   : > { %4212 = vst.msk [vmem:[%s8230_s26 + $0x10e8] sm:$0xff] %vm4164_vm14, %v4139_v51  ;;  %vm6169_vm14 = vcmask 302248  }
 0x6d4   : > { %4213 = vst.msk [vmem:[%s8230_s26 + $0x10f0] sm:$0xff] %vm4166_vm15, %v4139_v51  ;;  %4426 = vrot.lane.b32.xlu1 %v10491_v1, %s7987_s17  ;;  %v4219_v9 = vpop.permute.xlu0 %4218  ;;  %vm6266_vm15 = vcmask 745048  }
 0x6d5   : > { %4289 = vst.msk [vmem:[%s8230_s26 + $0x1d8] sm:$0xff] %vm4286_vm0, %v4219_v9 }
 0x6d6   : > { %v4217_v0 = vpop.permute.xlu1 %4216  ;;  %4432 = vrot.lane.b32.xlu0 %v10514_v38, %s7987_s17 }
 0x6d7   : > { %4288 = vst.msk [vmem:[%s8230_s26 + $0x120] sm:$0xff] %vm4286_vm0, %v4217_v0 }
 0x6d8   : > { %4430 = vrot.lane.b32.xlu1 %v10519_v22, %s7987_s17  ;;  %v4223_v30 = vpop.permute.xlu0 %4222 }
 0x6d9   : > { %4291 = vst.msk [vmem:[%s8230_s26 + $0x348] sm:$0xff] %vm4286_vm0, %v4223_v30 }
 0x6da   : > { %v4221_v13 = vpop.permute.xlu1 %4220  ;;  %4436 = vrot.lane.b32.xlu0 %v10540_v40, %s7987_s17 }
 0x6db   : > { %4290 = vst.msk [vmem:[%s8230_s26 + $0x290] sm:$0xff] %vm4286_vm0, %v4221_v13 }
 0x6dc   : > { %4434 = vrot.lane.b32.xlu1 %v10545_v3, %s7987_s17  ;;  %v4227_v16 = vpop.permute.xlu0 %4226 }
 0x6dd   : > { %4293 = vst.msk [vmem:[%s8230_s26 + $0x4b8] sm:$0xff] %vm4286_vm0, %v4227_v16 }
 0x6de   : > { %v4225_v62 = vpop.permute.xlu1 %4224  ;;  %4440 = vrot.lane.b32.xlu0 %v10566_v42, %s7987_s17 }
 0x6df   : > { %4292 = vst.msk [vmem:[%s8230_s26 + $0x400] sm:$0xff] %vm4286_vm0, %v4225_v62 }
 0x6e0   : > { %4438 = vrot.lane.b32.xlu1 %v10571_v44, %s7987_s17  ;;  %v4231_v19 = vpop.permute.xlu0 %4230 }
 0x6e1   : > { %4295 = vst.msk [vmem:[%s8230_s26 + $0x628] sm:$0xff] %vm4286_vm0, %v4231_v19 }
 0x6e2   : > { %v4229_v17 = vpop.permute.xlu1 %4228  ;;  %4444 = vrot.lane.b32.xlu0 %v10592_v4, %s7987_s17 }
 0x6e3   : > { %4294 = vst.msk [vmem:[%s8230_s26 + $0x570] sm:$0xff] %vm4286_vm0, %v4229_v17 }
 0x6e4   : > { %4442 = vrot.lane.b32.xlu1 %v10597_v52, %s7987_s17  ;;  %v4235_v53 = vpop.permute.xlu0 %4234 }
 0x6e5   : > { %4297 = vst.msk [vmem:[%s8230_s26 + $0x798] sm:$0xff] %vm4286_vm0, %v4235_v53 }
 0x6e6   : > { %v4233_v32 = vpop.permute.xlu1 %4232  ;;  %4448 = vrot.lane.b32.xlu0 %v10618_v27, %s7987_s17 }
 0x6e7   : > { %4296 = vst.msk [vmem:[%s8230_s26 + $0x6e0] sm:$0xff] %vm4286_vm0, %v4233_v32 }
 0x6e8   : > { %4446 = vrot.lane.b32.xlu1 %v10623_v54, %s7987_s17  ;;  %v4239_v23 = vpop.permute.xlu0 %4238 }
 0x6e9   : > { %4299 = vst.msk [vmem:[%s8230_s26 + $0x908] sm:$0xff] %vm4286_vm0, %v4239_v23 }
 0x6ea   : > { %v4237_v2 = vpop.permute.xlu1 %4236  ;;  %4452 = vrot.lane.b32.xlu0 %v10644_v18, %s7987_s17 }
 0x6eb   : > { %4298 = vst.msk [vmem:[%s8230_s26 + $0x850] sm:$0xff] %vm4286_vm0, %v4237_v2 }
 0x6ec   : > { %4450 = vrot.lane.b32.xlu1 %v10649_v57, %s7987_s17  ;;  %v4243_v34 = vpop.permute.xlu0 %4242 }
 0x6ed   : > { %4301 = vst.msk [vmem:[%s8230_s26 + $0xa78] sm:$0xff] %vm4286_vm0, %v4243_v34 }
 0x6ee   : > { %v4241_v24 = vpop.permute.xlu1 %4240  ;;  %4530 = vrot.lane.b32.xlu0 %v10341_v37, %s7988_s18 }
 0x6ef   : > { %4300 = vst.msk [vmem:[%s8230_s26 + $0x9c0] sm:$0xff] %vm4286_vm0, %v4241_v24 }
 0x6f0   : > { %4454 = vrot.lane.b32.xlu1 %v10666_v21, %s7987_s17  ;;  %v4247_v33 = vpop.permute.xlu0 %4246  ;;  %s8003_s17 = smov 55  }
 0x6f1   : > { %4303 = vst.msk [vmem:[%s8230_s26 + $0xbe8] sm:$0xff] %vm4286_vm0, %v4247_v33 }
 0x6f2   : > { %v4245_v6 = vpop.permute.xlu1 %4244  ;;  %4534 = vrot.lane.b32.xlu0 %v10371_v47, %s7988_s18 }
 0x6f3   : > { %4302 = vst.msk [vmem:[%s8230_s26 + $0xb30] sm:$0xff] %vm4286_vm0, %v4245_v6 }
 0x6f4   : > { %4532 = vrot.lane.b32.xlu1 %v10366_v58, %s7988_s18  ;;  %v4251_v63 = vpop.permute.xlu0 %4250 }
 0x6f5   : > { %4305 = vst.msk [vmem:[%s8230_s26 + $0xd58] sm:$0xff] %vm4286_vm0, %v4251_v63 }
 0x6f6   : > { %v4249_v35 = vpop.permute.xlu1 %4248  ;;  %4538 = vrot.lane.b32.xlu0 %v10396_v12, %s7988_s18 }
 0x6f7   : > { %4304 = vst.msk [vmem:[%s8230_s26 + $0xca0] sm:$0xff] %vm4286_vm0, %v4249_v35 }
 0x6f8   : > { %4536 = vrot.lane.b32.xlu1 %v10401_v8, %s7988_s18  ;;  %v4255_v15 = vpop.permute.xlu0 %4254 }
 0x6f9   : > { %4307 = vst.msk [vmem:[%s8230_s26 + $0xec8] sm:$0xff] %vm4286_vm0, %v4255_v15 }
 0x6fa   : > { %v4253_v11 = vpop.permute.xlu1 %4252  ;;  %5078 = vperm.xlu0 %7894, %v5017_v55  }
 0x6fb   : > { %4306 = vst.msk [vmem:[%s8230_s26 + $0xe10] sm:$0xff] %vm4286_vm0, %v4253_v11 }
 0x6fc   : > { %4540 = vrot.lane.b32.xlu1 %v10431_v49, %s7988_s18  ;;  %v4259_v46 = vpop.permute.xlu0 %4258 }
 0x6fd   : > { %4309 = vst.msk [vmem:[%s8230_s26 + $0x1038] sm:$0xff] %vm4286_vm0, %v4259_v46 }
 0x6fe   : > { %v4257_v60 = vpop.permute.xlu1 %4256  ;;  %4542 = vrot.lane.b32.xlu0 %v10426_v20, %s7988_s18 }
 0x6ff   : > { %4308 = vst.msk [vmem:[%s8230_s26 + $0xf80] sm:$0xff] %vm4286_vm0, %v4257_v60 }
 0x700   : > { %5083 = vperm.xlu1 %7895, %v5018_v31   ;;  %v4312_v41 = vpop.permute.xlu0 %4311 }
 0x701   : > { %4384 = vst.msk [vmem:[%s8230_s26 + $0x68] sm:$0xff] %vm4383_vm1, %v4312_v41 }
 0x702   : > { %v4261_v7 = vpop.permute.xlu1 %4260  ;;  %4546 = vrot.lane.b32.xlu0 %v10456_v29, %s7988_s18 }
 0x703   : > { %4310 = vst.msk [vmem:[%s8230_s26 + $0x10f0] sm:$0xff] %vm4286_vm0, %v4261_v7  ;;  %vm6363_vm0 = vcmask 138248  }
 0x704   : > { %5088 = vperm.xlu1 %7895, %v5019_v59   ;;  %v4316_v26 = vpop.permute.xlu0 %4315 }
 0x705   : > { %4386 = vst.msk [vmem:[%s8230_s26 + $0x1d8] sm:$0xff] %vm4383_vm1, %v4316_v26 }
 0x706   : > { %v4314_v25 = vpop.permute.xlu1 %4313  ;;  %4550 = vrot.lane.b32.xlu0 %v10486_v36, %s7988_s18 }
 0x707   : > { %4385 = vst.msk [vmem:[%s8230_s26 + $0x120] sm:$0xff] %vm4383_vm1, %v4314_v25 }
 0x708   : > { %4544 = vrot.lane.b32.xlu1 %v10461_v50, %s7988_s18  ;;  %v4320_v56 = vpop.permute.xlu0 %4319 }
 0x709   : > { %4388 = vst.msk [vmem:[%s8230_s26 + $0x348] sm:$0xff] %vm4383_vm1, %v4320_v56 }
 0x70a   : > { %v4318_v51 = vpop.permute.xlu1 %4317  ;;  %4554 = vrot.lane.b32.xlu0 %v10514_v38, %s7988_s18 }
 0x70b   : > { %4387 = vst.msk [vmem:[%s8230_s26 + $0x290] sm:$0xff] %vm4383_vm1, %v4318_v51 }
 0x70c   : > { %4548 = vrot.lane.b32.xlu1 %v10491_v1, %s7988_s18  ;;  %v4324_v9 = vpop.permute.xlu0 %4323 }
 0x70d   : > { %4390 = vst.msk [vmem:[%s8230_s26 + $0x4b8] sm:$0xff] %vm4383_vm1, %v4324_v9 }
 0x70e   : > { %v4322_v0 = vpop.permute.xlu1 %4321  ;;  %4558 = vrot.lane.b32.xlu0 %v10540_v40, %s7988_s18 }
 0x70f   : > { %4389 = vst.msk [vmem:[%s8230_s26 + $0x400] sm:$0xff] %vm4383_vm1, %v4322_v0 }
 0x710   : > { %4552 = vrot.lane.b32.xlu1 %v10519_v22, %s7988_s18  ;;  %v4328_v30 = vpop.permute.xlu0 %4327 }
 0x711   : > { %4392 = vst.msk [vmem:[%s8230_s26 + $0x628] sm:$0xff] %vm4383_vm1, %v4328_v30 }
 0x712   : > { %v4326_v13 = vpop.permute.xlu1 %4325  ;;  %4562 = vrot.lane.b32.xlu0 %v10566_v42, %s7988_s18 }
 0x713   : > { %4391 = vst.msk [vmem:[%s8230_s26 + $0x570] sm:$0xff] %vm4383_vm1, %v4326_v13 }
 0x714   : > { %4556 = vrot.lane.b32.xlu1 %v10545_v3, %s7988_s18  ;;  %v4332_v16 = vpop.permute.xlu0 %4331 }
 0x715   : > { %4394 = vst.msk [vmem:[%s8230_s26 + $0x798] sm:$0xff] %vm4383_vm1, %v4332_v16 }
 0x716   : > { %v4330_v62 = vpop.permute.xlu1 %4329  ;;  %4566 = vrot.lane.b32.xlu0 %v10592_v4, %s7988_s18 }
 0x717   : > { %4393 = vst.msk [vmem:[%s8230_s26 + $0x6e0] sm:$0xff] %vm4383_vm1, %v4330_v62 }
 0x718   : > { %4560 = vrot.lane.b32.xlu1 %v10571_v44, %s7988_s18  ;;  %v4336_v19 = vpop.permute.xlu0 %4335 }
 0x719   : > { %4396 = vst.msk [vmem:[%s8230_s26 + $0x908] sm:$0xff] %vm4383_vm1, %v4336_v19 }
 0x71a   : > { %v4334_v17 = vpop.permute.xlu1 %4333  ;;  %4570 = vrot.lane.b32.xlu0 %v10618_v27, %s7988_s18 }
 0x71b   : > { %4395 = vst.msk [vmem:[%s8230_s26 + $0x850] sm:$0xff] %vm4383_vm1, %v4334_v17 }
 0x71c   : > { %4564 = vrot.lane.b32.xlu1 %v10597_v52, %s7988_s18  ;;  %v4340_v53 = vpop.permute.xlu0 %4339 }
 0x71d   : > { %4398 = vst.msk [vmem:[%s8230_s26 + $0xa78] sm:$0xff] %vm4383_vm1, %v4340_v53 }
 0x71e   : > { %v4338_v32 = vpop.permute.xlu1 %4337  ;;  %4574 = vrot.lane.b32.xlu0 %v10644_v18, %s7988_s18 }
 0x71f   : > { %4397 = vst.msk [vmem:[%s8230_s26 + $0x9c0] sm:$0xff] %vm4383_vm1, %v4338_v32 }
 0x720   : > { %4568 = vrot.lane.b32.xlu1 %v10623_v54, %s7988_s18  ;;  %v4344_v23 = vpop.permute.xlu0 %4343 }
 0x721   : > { %4400 = vst.msk [vmem:[%s8230_s26 + $0xbe8] sm:$0xff] %vm4383_vm1, %v4344_v23 }
 0x722   : > { %v4342_v2 = vpop.permute.xlu1 %4341  ;;  %4627 = vrot.lane.b32.xlu0 %v10341_v37, %s7989_s28 }
 0x723   : > { %4399 = vst.msk [vmem:[%s8230_s26 + $0xb30] sm:$0xff] %vm4383_vm1, %v4342_v2 }
 0x724   : > { %4572 = vrot.lane.b32.xlu1 %v10649_v57, %s7988_s18  ;;  %v4348_v34 = vpop.permute.xlu0 %4347 }
 0x725   : > { %4402 = vst.msk [vmem:[%s8230_s26 + $0xd58] sm:$0xff] %vm4383_vm1, %v4348_v34 }
 0x726   : > { %v4346_v24 = vpop.permute.xlu1 %4345  ;;  %4631 = vrot.lane.b32.xlu0 %v10371_v47, %s7989_s28 }
 0x727   : > { %4401 = vst.msk [vmem:[%s8230_s26 + $0xca0] sm:$0xff] %vm4383_vm1, %v4346_v24 }
 0x728   : > { %4576 = vrot.lane.b32.xlu1 %v10666_v21, %s7988_s18  ;;  %v4352_v33 = vpop.permute.xlu0 %4351  ;;  %s8004_s18 = smov 93  }
 0x729   : > { %4404 = vst.msk [vmem:[%s8230_s26 + $0xec8] sm:$0xff] %vm4383_vm1, %v4352_v33 }
 0x72a   : > { %v4350_v6 = vpop.permute.xlu1 %4349  ;;  %4635 = vrot.lane.b32.xlu0 %v10396_v12, %s7989_s28 }
 0x72b   : > { %4403 = vst.msk [vmem:[%s8230_s26 + $0xe10] sm:$0xff] %vm4383_vm1, %v4350_v6 }
 0x72c   : > { %4629 = vrot.lane.b32.xlu1 %v10366_v58, %s7989_s28  ;;  %v4356_v63 = vpop.permute.xlu0 %4355 }
 0x72d   : > { %4406 = vst.msk [vmem:[%s8230_s26 + $0x1038] sm:$0xff] %vm4383_vm1, %v4356_v63 }
 0x72e   : > { %v4354_v35 = vpop.permute.xlu1 %4353  ;;  %4639 = vrot.lane.b32.xlu0 %v10426_v20, %s7989_s28 }
 0x72f   : > { %4405 = vst.msk [vmem:[%s8230_s26 + $0xf80] sm:$0xff] %vm4383_vm1, %v4354_v35 }
 0x730   : > { %4633 = vrot.lane.b32.xlu1 %v10401_v8, %s7989_s28  ;;  %v4409_v11 = vpop.permute.xlu0 %4408 }
 0x731   : > { %4481 = vst.msk [vmem:[%s8230_s26 + $0x68] sm:$0xff] %vm4480_vm2, %v4409_v11 }
 0x732   : > { %v4358_v55 = vpop.permute.xlu1 %4357  ;;  %4483 = vst.msk [vmem:[%s8230_s26 + $0x70] sm:$0xff] %vm4482_vm3, %v4409_v11  ;;  %4643 = vrot.lane.b32.xlu0 %v10456_v29, %s7989_s28 }
 0x733   : > { %4407 = vst.msk [vmem:[%s8230_s26 + $0x10f0] sm:$0xff] %vm4383_vm1, %v4358_v55  ;;  %vm6460_vm1 = vcmask 581048  }
 0x734   : > { %4637 = vrot.lane.b32.xlu1 %v10431_v49, %s7989_s28  ;;  %v4413_v31 = vpop.permute.xlu0 %4412 }
 0x735   : > { %4486 = vst.msk [vmem:[%s8230_s26 + $0x1d8] sm:$0xff] %vm4480_vm2, %v4413_v31 }
 0x736   : > { %v4411_v15 = vpop.permute.xlu1 %4410  ;;  %4487 = vst.msk [vmem:[%s8230_s26 + $0x1e0] sm:$0xff] %vm4482_vm3, %v4413_v31  ;;  %4647 = vrot.lane.b32.xlu0 %v10486_v36, %s7989_s28 }
 0x737   : > { %4484 = vst.msk [vmem:[%s8230_s26 + $0x120] sm:$0xff] %vm4480_vm2, %v4411_v15 }
 0x738   : > { %4485 = vst.msk [vmem:[%s8230_s26 + $0x128] sm:$0xff] %vm4482_vm3, %v4411_v15  ;;  %4641 = vrot.lane.b32.xlu1 %v10461_v50, %s7989_s28  ;;  %v4417_v46 = vpop.permute.xlu0 %4416 }
 0x739   : > { %4490 = vst.msk [vmem:[%s8230_s26 + $0x348] sm:$0xff] %vm4480_vm2, %v4417_v46 }
 0x73a   : > { %v4415_v60 = vpop.permute.xlu1 %4414  ;;  %4491 = vst.msk [vmem:[%s8230_s26 + $0x350] sm:$0xff] %vm4482_vm3, %v4417_v46  ;;  %4651 = vrot.lane.b32.xlu0 %v10514_v38, %s7989_s28 }
 0x73b   : > { %4488 = vst.msk [vmem:[%s8230_s26 + $0x290] sm:$0xff] %vm4480_vm2, %v4415_v60 }
 0x73c   : > { %4489 = vst.msk [vmem:[%s8230_s26 + $0x298] sm:$0xff] %vm4482_vm3, %v4415_v60  ;;  %4645 = vrot.lane.b32.xlu1 %v10491_v1, %s7989_s28  ;;  %v4421_v7 = vpop.permute.xlu0 %4420 }
 0x73d   : > { %4494 = vst.msk [vmem:[%s8230_s26 + $0x4b8] sm:$0xff] %vm4480_vm2, %v4421_v7 }
 0x73e   : > { %v4419_v59 = vpop.permute.xlu1 %4418  ;;  %4495 = vst.msk [vmem:[%s8230_s26 + $0x4c0] sm:$0xff] %vm4482_vm3, %v4421_v7  ;;  %4655 = vrot.lane.b32.xlu0 %v10540_v40, %s7989_s28 }
 0x73f   : > { %4492 = vst.msk [vmem:[%s8230_s26 + $0x400] sm:$0xff] %vm4480_vm2, %v4419_v59 }
 0x740   : > { %4493 = vst.msk [vmem:[%s8230_s26 + $0x408] sm:$0xff] %vm4482_vm3, %v4419_v59  ;;  %4649 = vrot.lane.b32.xlu1 %v10519_v22, %s7989_s28  ;;  %v4425_v39 = vpop.permute.xlu0 %4424 }
 0x741   : > { %4498 = vst.msk [vmem:[%s8230_s26 + $0x628] sm:$0xff] %vm4480_vm2, %v4425_v39 }
 0x742   : > { %v4423_v41 = vpop.permute.xlu1 %4422  ;;  %4499 = vst.msk [vmem:[%s8230_s26 + $0x630] sm:$0xff] %vm4482_vm3, %v4425_v39  ;;  %4659 = vrot.lane.b32.xlu0 %v10566_v42, %s7989_s28 }
 0x743   : > { %4496 = vst.msk [vmem:[%s8230_s26 + $0x570] sm:$0xff] %vm4480_vm2, %v4423_v41 }
 0x744   : > { %4497 = vst.msk [vmem:[%s8230_s26 + $0x578] sm:$0xff] %vm4482_vm3, %v4423_v41  ;;  %4653 = vrot.lane.b32.xlu1 %v10545_v3, %s7989_s28  ;;  %v4429_v25 = vpop.permute.xlu0 %4428 }
 0x745   : > { %4502 = vst.msk [vmem:[%s8230_s26 + $0x798] sm:$0xff] %vm4480_vm2, %v4429_v25 }
 0x746   : > { %v4427_v61 = vpop.permute.xlu1 %4426  ;;  %4503 = vst.msk [vmem:[%s8230_s26 + $0x7a0] sm:$0xff] %vm4482_vm3, %v4429_v25  ;;  %4663 = vrot.lane.b32.xlu0 %v10592_v4, %s7989_s28 }
 0x747   : > { %4500 = vst.msk [vmem:[%s8230_s26 + $0x6e0] sm:$0xff] %vm4480_vm2, %v4427_v61 }
 0x748   : > { %4501 = vst.msk [vmem:[%s8230_s26 + $0x6e8] sm:$0xff] %vm4482_vm3, %v4427_v61  ;;  %4657 = vrot.lane.b32.xlu1 %v10571_v44, %s7989_s28  ;;  %v4433_v51 = vpop.permute.xlu0 %4432 }
 0x749   : > { %4506 = vst.msk [vmem:[%s8230_s26 + $0x908] sm:$0xff] %vm4480_vm2, %v4433_v51 }
 0x74a   : > { %v4431_v26 = vpop.permute.xlu1 %4430  ;;  %4507 = vst.msk [vmem:[%s8230_s26 + $0x910] sm:$0xff] %vm4482_vm3, %v4433_v51  ;;  %4667 = vrot.lane.b32.xlu0 %v10618_v27, %s7989_s28 }
 0x74b   : > { %4504 = vst.msk [vmem:[%s8230_s26 + $0x850] sm:$0xff] %vm4480_vm2, %v4431_v26 }
 0x74c   : > { %4505 = vst.msk [vmem:[%s8230_s26 + $0x858] sm:$0xff] %vm4482_vm3, %v4431_v26  ;;  %4661 = vrot.lane.b32.xlu1 %v10597_v52, %s7989_s28  ;;  %v4437_v0 = vpop.permute.xlu0 %4436 }
 0x74d   : > { %4510 = vst.msk [vmem:[%s8230_s26 + $0xa78] sm:$0xff] %vm4480_vm2, %v4437_v0 }
 0x74e   : > { %v4435_v56 = vpop.permute.xlu1 %4434  ;;  %4511 = vst.msk [vmem:[%s8230_s26 + $0xa80] sm:$0xff] %vm4482_vm3, %v4437_v0  ;;  %4671 = vrot.lane.b32.xlu0 %v10644_v18, %s7989_s28  ;;  %v7898_v0 = vld [vmem:[%s15427_s3] sm:$0xff]  }
 0x74f   : > { %4508 = vst.msk [vmem:[%s8230_s26 + $0x9c0] sm:$0xff] %vm4480_vm2, %v4435_v56 }
 0x750   : > { %4509 = vst.msk [vmem:[%s8230_s26 + $0x9c8] sm:$0xff] %vm4482_vm3, %v4435_v56  ;;  %4665 = vrot.lane.b32.xlu1 %v10623_v54, %s7989_s28  ;;  %v4441_v13 = vpop.permute.xlu0 %4440 }
 0x751   : > { %4514 = vst.msk [vmem:[%s8230_s26 + $0xbe8] sm:$0xff] %vm4480_vm2, %v4441_v13 }
 0x752   : > { %v4439_v9 = vpop.permute.xlu1 %4438  ;;  %4515 = vst.msk [vmem:[%s8230_s26 + $0xbf0] sm:$0xff] %vm4482_vm3, %v4441_v13  ;;  %4749 = vrot.lane.b32.xlu0 %v10341_v37, %s7990_s22 }
 0x753   : > { %4512 = vst.msk [vmem:[%s8230_s26 + $0xb30] sm:$0xff] %vm4480_vm2, %v4439_v9 }
 0x754   : > { %4513 = vst.msk [vmem:[%s8230_s26 + $0xb38] sm:$0xff] %vm4482_vm3, %v4439_v9  ;;  %4669 = vrot.lane.b32.xlu1 %v10649_v57, %s7989_s28  ;;  %v4445_v62 = vpop.permute.xlu0 %4444 }
 0x755   : > { %4518 = vst.msk [vmem:[%s8230_s26 + $0xd58] sm:$0xff] %vm4480_vm2, %v4445_v62 }
 0x756   : > { %v4443_v30 = vpop.permute.xlu1 %4442  ;;  %4519 = vst.msk [vmem:[%s8230_s26 + $0xd60] sm:$0xff] %vm4482_vm3, %v4445_v62  ;;  %4753 = vrot.lane.b32.xlu0 %v10371_v47, %s7990_s22 }
 0x757   : > { %4516 = vst.msk [vmem:[%s8230_s26 + $0xca0] sm:$0xff] %vm4480_vm2, %v4443_v30 }
 0x758   : > { %4517 = vst.msk [vmem:[%s8230_s26 + $0xca8] sm:$0xff] %vm4482_vm3, %v4443_v30  ;;  %4673 = vrot.lane.b32.xlu1 %v10666_v21, %s7989_s28  ;;  %v4449_v17 = vpop.permute.xlu0 %4448  ;;  %s7995_s28 = smov 7  }
 0x759   : > { %4522 = vst.msk [vmem:[%s8230_s26 + $0xec8] sm:$0xff] %vm4480_vm2, %v4449_v17 }
 0x75a   : > { %v4447_v16 = vpop.permute.xlu1 %4446  ;;  %4523 = vst.msk [vmem:[%s8230_s26 + $0xed0] sm:$0xff] %vm4482_vm3, %v4449_v17  ;;  %4757 = vrot.lane.b32.xlu0 %v10396_v12, %s7990_s22 }
 0x75b   : > { %4520 = vst.msk [vmem:[%s8230_s26 + $0xe10] sm:$0xff] %vm4480_vm2, %v4447_v16 }
 0x75c   : > { %4521 = vst.msk [vmem:[%s8230_s26 + $0xe18] sm:$0xff] %vm4482_vm3, %v4447_v16  ;;  %4751 = vrot.lane.b32.xlu1 %v10366_v58, %s7990_s22  ;;  %v4453_v32 = vpop.permute.xlu0 %4452 }
 0x75d   : > { %4526 = vst.msk [vmem:[%s8230_s26 + $0x1038] sm:$0xff] %vm4480_vm2, %v4453_v32 }
 0x75e   : > { %v4451_v19 = vpop.permute.xlu1 %4450  ;;  %4527 = vst.msk [vmem:[%s8230_s26 + $0x1040] sm:$0xff] %vm4482_vm3, %v4453_v32  ;;  %4761 = vrot.lane.b32.xlu0 %v10426_v20, %s7990_s22 }
 0x75f   : > { %4524 = vst.msk [vmem:[%s8230_s26 + $0xf80] sm:$0xff] %vm4480_vm2, %v4451_v19 }
 0x760   : > { %4525 = vst.msk [vmem:[%s8230_s26 + $0xf88] sm:$0xff] %vm4482_vm3, %v4451_v19  ;;  %4755 = vrot.lane.b32.xlu1 %v10401_v8, %s7990_s22  ;;  %v4531_v2 = vpop.permute.xlu0 %4530  ;;  %v5024_v19 = vld [vmem:[%s15430_s6] sm:$0xff] }
 0x761   : > { %4603 = vst.msk [vmem:[%s8230_s26 + $0x70] sm:$0xff] %vm4602_vm5, %v4531_v2  ;;  %v5026_v2 = vld [vmem:[%s15430_s6 + $0x10] sm:$0xff] }
 0x762   : > { %v4455_v53 = vpop.permute.xlu1 %4454  ;;  %4765 = vrot.lane.b32.xlu0 %v10456_v29, %s7990_s22 }
 0x763   : > { %4528 = vst.msk [vmem:[%s8230_s26 + $0x10f0] sm:$0xff] %vm4480_vm2, %v4455_v53  ;;  %vm6557_vm2 = vcmask 1023848  }
 0x764   : > { %4529 = vst.msk [vmem:[%s8230_s26 + $0x10f8] sm:$0xff] %vm4482_vm3, %v4455_v53  ;;  %4759 = vrot.lane.b32.xlu1 %v10431_v49, %s7990_s22  ;;  %v4535_v24 = vpop.permute.xlu0 %4534  ;;  %vm6654_vm3 = vcmask 417048  }
 0x765   : > { %4605 = vst.msk [vmem:[%s8230_s26 + $0x1e0] sm:$0xff] %vm4602_vm5, %v4535_v24 }
 0x766   : > { %v4533_v23 = vpop.permute.xlu1 %4532  ;;  %4769 = vrot.lane.b32.xlu0 %v10486_v36, %s7990_s22 }
 0x767   : > { %4604 = vst.msk [vmem:[%s8230_s26 + $0x128] sm:$0xff] %vm4602_vm5, %v4533_v23 }
 0x768   : > { %4763 = vrot.lane.b32.xlu1 %v10461_v50, %s7990_s22  ;;  %v4539_v6 = vpop.permute.xlu0 %4538 }
 0x769   : > { %4607 = vst.msk [vmem:[%s8230_s26 + $0x350] sm:$0xff] %vm4602_vm5, %v4539_v6  ;;  %v5028_v6 = vld [vmem:[%s15430_s6 + $0x20] sm:$0xff] }
 0x76a   : > { %v4537_v34 = vpop.permute.xlu1 %4536  ;;  %4773 = vrot.lane.b32.xlu0 %v10514_v38, %s7990_s22 }
 0x76b   : > { %4606 = vst.msk [vmem:[%s8230_s26 + $0x298] sm:$0xff] %vm4602_vm5, %v4537_v34  ;;  %v5025_v34 = vld [vmem:[%s15430_s6 + $0x8] sm:$0xff] }
 0x76c   : > { %4767 = vrot.lane.b32.xlu1 %v10491_v1, %s7990_s22 }
 0x76e   : > { %v4541_v33 = vpop.permute.xlu1 %4540  ;;  %4777 = vrot.lane.b32.xlu0 %v10540_v40, %s7990_s22 }
 0x76f   : > { %4608 = vst.msk [vmem:[%s8230_s26 + $0x408] sm:$0xff] %vm4602_vm5, %v4541_v33 }
 0x770   : > { %4771 = vrot.lane.b32.xlu1 %v10519_v22, %s7990_s22 }
 0x772   : > { %4781 = vrot.lane.b32.xlu0 %v10566_v42, %s7990_s22 }
 0x774   : > { %4775 = vrot.lane.b32.xlu1 %v10545_v3, %s7990_s22 }
 0x776   : > { %4785 = vrot.lane.b32.xlu0 %v10592_v4, %s7990_s22 }
 0x778   : > { %4779 = vrot.lane.b32.xlu1 %v10571_v44, %s7990_s22 }
 0x779   : > { %v5079_v35 = vpop.permute.xlu0 %5078 }
 0x77a   : > { %4789 = vrot.lane.b32.xlu0 %v10618_v27, %s7990_s22  ;;  %v5149_v63 = vadd.f32 %v12679_v10, %v5079_v35  ;;  %v5147_v55 = vadd.f32 %v12674_v43, %v5079_v35 }
 0x77c   : > { %4783 = vrot.lane.b32.xlu1 %v10597_v52, %s7990_s22  ;;  %v5164_v46 = vmax.f32 %v5149_v63, 0.0  ;;  %v5163_v41 = vmax.f32 %v5147_v55, 0.0  ;;  %v5027_v63 = vld [vmem:[%s15430_s6 + $0x18] sm:$0xff]  ;;  %v5030_v55 = vld [vmem:[%s15430_s6 + $0x30] sm:$0xff] }
 0x77d   : > { %v4543_v15 = vpop.permute.xlu0 %4542 }
 0x77e   : > { %4609 = vst.msk [vmem:[%s8230_s26 + $0x4c0] sm:$0xff] %vm4602_vm5, %v4543_v15  ;;  %4793 = vrot.lane.b32.xlu0 %v10644_v18, %s7990_s22 }
 0x77f   : > { %v5084_v11 = vpop.permute.xlu1 %5083 }
 0x780   : > { %v5151_v31 = vadd.f32 %v12685_v5, %v5084_v11  ;;  %4787 = vrot.lane.b32.xlu1 %v10623_v54, %s7990_s22  ;;  %v5153_v60 = vadd.f32 %v12689_v14, %v5084_v11 }
 0x781   : > { %v4547_v43 = vpop.permute.xlu0 %4546 }
 0x782   : > { %v5166_v59 = vmax.f32 %v5153_v60, 0.0  ;;  %v5165_v10 = vmax.f32 %v5151_v31, 0.0  ;;  %4611 = vst.msk [vmem:[%s8230_s26 + $0x630] sm:$0xff] %vm4602_vm5, %v4547_v43  ;;  %4846 = vrot.lane.b32.xlu0 %v10341_v37, %s7991_s29  ;;  %v5029_v31 = vld [vmem:[%s15430_s6 + $0x28] sm:$0xff]  ;;  %v5032_v60 = vld [vmem:[%s15432_s8] sm:$0xff] }
 0x783   : > { %v5089_v7 = vpop.permute.xlu1 %5088 }
 0x784   : > { %v5157_v39 = vadd.f32 %v12700_v48, %v5089_v7  ;;  %v5159_v5 = vadd.f32 %v12705_v45, %v5089_v7  ;;  %4791 = vrot.lane.b32.xlu1 %v10649_v57, %s7990_s22  ;;  %v5170_v14 = vpack.c.bf16 %v5166_v59, %v5164_v46  ;;  %v5169_v61 = vpack.c.bf16 %v5165_v10, %v5163_v41  ;;  %v5031_v10 = vld [vmem:[%s15430_s6 + $0x38] sm:$0xff]  ;;  %v5034_v7 = vld [vmem:[%s15432_s8 + $0x10] sm:$0xff] }
 0x785   : > { %v4551_v48 = vpop.permute.xlu0 %4550 }
 0x786   : > { %v5167_v25 = vmax.f32 %v5157_v39, 0.0  ;;  %v5168_v26 = vmax.f32 %v5159_v5, 0.0  ;;  %5216 = vmatprep.subr.bf16.mxu1 %v5170_v14  ;;  %4613 = vst.msk [vmem:[%s8230_s26 + $0x7a0] sm:$0xff] %vm4602_vm5, %v4551_v48  ;;  %4850 = vrot.lane.b32.xlu0 %v10371_v47, %s7991_s29  ;;  %v5033_v39 = vld [vmem:[%s15432_s8 + $0x8] sm:$0xff]  ;;  %v5036_v5 = vld [vmem:[%s15432_s8 + $0x20] sm:$0xff] }
 0x787   : > { %v4545_v51 = vpop.permute.xlu1 %4544  ;;  %5217 = vmatpush1.bf16.msra.mxu1 %v5169_v61 }
 0x788   : > { %v5172_v45 = vpack.c.bf16 %v5168_v26, %v5168_v26  ;;  %4610 = vst.msk [vmem:[%s8230_s26 + $0x578] sm:$0xff] %vm4602_vm5, %v4545_v51  ;;  %4795 = vrot.lane.b32.xlu1 %v10666_v21, %s7990_s22  ;;  %v5171_v37 = vpack.c.bf16 %v5167_v25, %v5167_v25  ;;  %v5035_v25 = vld [vmem:[%s15432_s8 + $0x18] sm:$0xff]  ;;  %v5038_v26 = vld [vmem:[%s15432_s8 + $0x30] sm:$0xff]  ;;  %s7996_s22 = smov 45  }
 0x789   : > { %v4555_v13 = vpop.permute.xlu0 %4554 }
 0x78a   : > { %7767 = vmatprep.subr.msk.bf16.mxu1 %vm5209_vm6, %v5172_v45  ;;  %v5211_v56 = vsel %vm5209_vm6, %v5171_v37, 0  ;;  %4615 = vst.msk [vmem:[%s8230_s26 + $0x910] sm:$0xff] %vm4602_vm5, %v4555_v13  ;;  %4854 = vrot.lane.b32.xlu0 %v10396_v12, %s7991_s29  ;;  %v5037_v45 = vld [vmem:[%s15432_s8 + $0x28] sm:$0xff]  ;;  %v5040_v37 = vld [vmem:[%s15432_s8 + $0x40] sm:$0xff]  ;;  %vm6848_vm6 = vcmask 253048  }
 0x78b   : > { %v4549_v9 = vpop.permute.xlu1 %4548  ;;  %5219 = vmatpush1.bf16.msra.mxu1 %v5211_v56  ;;  %v5042_v13 = vld [vmem:[%s15434_s10] sm:$0xff] }
 0x78c   : > { %4612 = vst.msk [vmem:[%s8230_s26 + $0x6e8] sm:$0xff] %vm4602_vm5, %v4549_v9  ;;  %4848 = vrot.lane.b32.xlu1 %v10366_v58, %s7991_s29  ;;  %v7899_v58 = vld [vmem:[%s15427_s3 + $0x8] sm:$0xff]   ;;  %v5039_v9 = vld [vmem:[%s15432_s8 + $0x38] sm:$0xff] }
 0x78d   : > { %v4559_v30 = vpop.permute.xlu0 %4558 }
 0x78e   : > { %7768 = vmatmul.mubr.msk.bf16.vlgmr.msra.gmra.mrb[0].mxu1 %vm4701_vm7, %v7898_v0  ;;  %4617 = vst.msk [vmem:[%s8230_s26 + $0xa80] sm:$0xff] %vm4602_vm5, %v4559_v30  ;;  %4858 = vrot.lane.b32.xlu0 %v10426_v20, %s7991_s29 }
 0x78f   : > { %v4553_v47 = vpop.permute.xlu1 %4552  ;;  %5258 = vmatprep.mubr.bf16.mxu1 %v15476_v28 }
 0x790   : > { %4614 = vst.msk [vmem:[%s8230_s26 + $0x858] sm:$0xff] %vm4602_vm5, %v4553_v47  ;;  %4852 = vrot.lane.b32.xlu1 %v10401_v8, %s7991_s29 }
 0x791   : > { %v4563_v62 = vpop.permute.xlu0 %4562 }
 0x792   : > { %4619 = vst.msk [vmem:[%s8230_s26 + $0xbf0] sm:$0xff] %vm4602_vm5, %v4563_v62  ;;  %4862 = vrot.lane.b32.xlu0 %v10456_v29, %s7991_s29 }
 0x793   : > { %v4557_v12 = vpop.permute.xlu1 %4556 }
 0x794   : > { %4616 = vst.msk [vmem:[%s8230_s26 + $0x9c8] sm:$0xff] %vm4602_vm5, %v4557_v12  ;;  %4856 = vrot.lane.b32.xlu1 %v10431_v49, %s7991_s29  ;;  %v5044_v12 = vld [vmem:[%s15434_s10 + $0x10] sm:$0xff] }
 0x795   : > { %v4567_v20 = vpop.permute.xlu0 %4566 }
 0x796   : > { %7769 = vmatmul.mubr.msk.bf16.gmra.mrb[4].mxu1 %vm4701_vm7, %v7899_v58  ;;  %4621 = vst.msk [vmem:[%s8230_s26 + $0xd60] sm:$0xff] %vm4602_vm5, %v4567_v20  ;;  %4866 = vrot.lane.b32.xlu0 %v10486_v36, %s7991_s29  ;;  %v5041_v58 = vld [vmem:[%s15432_s8 + $0x48] sm:$0xff] }
 0x797   : > { %v4561_v8 = vpop.permute.xlu1 %4560  ;;  %5574 = vmatprep.mubr.bf16.mxu1 %v15476_v28  ;;  %v5043_v20 = vld [vmem:[%s15434_s10 + $0x8] sm:$0xff] }
 0x798   : > { %4618 = vst.msk [vmem:[%s8230_s26 + $0xb38] sm:$0xff] %vm4602_vm5, %v4561_v8  ;;  %4860 = vrot.lane.b32.xlu1 %v10461_v50, %s7991_s29 }
 0x799   : > { %v4571_v29 = vpop.permute.xlu0 %4570 }
 0x79a   : > { %4623 = vst.msk [vmem:[%s8230_s26 + $0xed0] sm:$0xff] %vm4602_vm5, %v4571_v29  ;;  %4870 = vrot.lane.b32.xlu0 %v10514_v38, %s7991_s29 }
 0x79b   : > { %v4565_v49 = vpop.permute.xlu1 %4564 }
 0x79c   : > { %4620 = vst.msk [vmem:[%s8230_s26 + $0xca8] sm:$0xff] %vm4602_vm5, %v4565_v49  ;;  %4864 = vrot.lane.b32.xlu1 %v10491_v1, %s7991_s29  ;;  %v5046_v49 = vld [vmem:[%s15434_s10 + $0x20] sm:$0xff] }
 0x79d   : > { %v4575_v50 = vpop.permute.xlu0 %4574 }
 0x79e   : > { %4625 = vst.msk [vmem:[%s8230_s26 + $0x1040] sm:$0xff] %vm4602_vm5, %v4575_v50  ;;  %4874 = vrot.lane.b32.xlu0 %v10540_v40, %s7991_s29  ;;  %v5045_v50 = vld [vmem:[%s15434_s10 + $0x18] sm:$0xff] }
 0x79f   : > { %v4569_v16 = vpop.permute.xlu1 %4568 }
 0x7a0   : > { %4622 = vst.msk [vmem:[%s8230_s26 + $0xe18] sm:$0xff] %vm4602_vm5, %v4569_v16  ;;  %4868 = vrot.lane.b32.xlu1 %v10519_v22, %s7991_s29 }
 0x7a1   : > { %v4628_v1 = vpop.permute.xlu0 %4627 }
 0x7a2   : > { %4700 = vst.msk [vmem:[%s8230_s26 + $0x70] sm:$0xff] %vm4699_vm8, %v4628_v1  ;;  %4878 = vrot.lane.b32.xlu0 %v10566_v42, %s7991_s29 }
 0x7a3   : > { %v4573_v36 = vpop.permute.xlu1 %4572  ;;  %4702 = vst.msk [vmem:[%s8230_s26 + $0x78] sm:$0xff] %vm4701_vm7, %v4628_v1 }
 0x7a4   : > { %4624 = vst.msk [vmem:[%s8230_s26 + $0xf88] sm:$0xff] %vm4602_vm5, %v4573_v36  ;;  %4872 = vrot.lane.b32.xlu1 %v10545_v3, %s7991_s29  ;;  %v5048_v36 = vld [vmem:[%s15434_s10 + $0x30] sm:$0xff] }
 0x7a5   : > { %v4632_v22 = vpop.permute.xlu0 %4631 }
 0x7a6   : > { %4705 = vst.msk [vmem:[%s8230_s26 + $0x1e0] sm:$0xff] %vm4699_vm8, %v4632_v22  ;;  %4882 = vrot.lane.b32.xlu0 %v10592_v4, %s7991_s29  ;;  %v5020_v4 = vld [vmem:[%s15428_s4] sm:$0xff] }
 0x7a7   : > { %v4577_v38 = vpop.permute.xlu1 %4576  ;;  %4706 = vst.msk [vmem:[%s8230_s26 + $0x1e8] sm:$0xff] %vm4701_vm7, %v4632_v22  ;;  %v5047_v22 = vld [vmem:[%s15434_s10 + $0x28] sm:$0xff] }
 0x7a8   : > { %4626 = vst.msk [vmem:[%s8230_s26 + $0x10f8] sm:$0xff] %vm4602_vm5, %v4577_v38  ;;  %4876 = vrot.lane.b32.xlu1 %v10571_v44, %s7991_s29  ;;  %vm6751_vm5 = vcmask 859848  }
 0x7a9   : > { %v4636_v3 = vpop.permute.xlu0 %4635 }
 0x7aa   : > { %4709 = vst.msk [vmem:[%s8230_s26 + $0x350] sm:$0xff] %vm4699_vm8, %v4636_v3  ;;  %4886 = vrot.lane.b32.xlu0 %v10618_v27, %s7991_s29 }
 0x7ab   : > { %v4630_v40 = vpop.permute.xlu1 %4629  ;;  %4710 = vst.msk [vmem:[%s8230_s26 + $0x358] sm:$0xff] %vm4701_vm7, %v4636_v3 }
 0x7ac   : > { %4703 = vst.msk [vmem:[%s8230_s26 + $0x128] sm:$0xff] %vm4699_vm8, %v4630_v40  ;;  %4880 = vrot.lane.b32.xlu1 %v10597_v52, %s7991_s29 }
 0x7ad   : > { %4704 = vst.msk [vmem:[%s8230_s26 + $0x130] sm:$0xff] %vm4701_vm7, %v4630_v40  ;;  %v4640_v44 = vpop.permute.xlu0 %4639  ;;  %v5050_v40 = vld [vmem:[%s15434_s10 + $0x40] sm:$0xff] }
 0x7ae   : > { %4713 = vst.msk [vmem:[%s8230_s26 + $0x4c0] sm:$0xff] %vm4699_vm8, %v4640_v44  ;;  %4890 = vrot.lane.b32.xlu0 %v10644_v18, %s7991_s29 }
 0x7af   : > { %v4634_v42 = vpop.permute.xlu1 %4633  ;;  %4714 = vst.msk [vmem:[%s8230_s26 + $0x4c8] sm:$0xff] %vm4701_vm7, %v4640_v44  ;;  %v5049_v44 = vld [vmem:[%s15434_s10 + $0x38] sm:$0xff] }
 0x7b0   : > { %4707 = vst.msk [vmem:[%s8230_s26 + $0x298] sm:$0xff] %vm4699_vm8, %v4634_v42  ;;  %4884 = vrot.lane.b32.xlu1 %v10623_v54, %s7991_s29  ;;  %v5022_v54 = vld [vmem:[%s15428_s4 + $0x10] sm:$0xff] }
 0x7b1   : > { %4708 = vst.msk [vmem:[%s8230_s26 + $0x2a0] sm:$0xff] %vm4701_vm7, %v4634_v42  ;;  %v4644_v27 = vpop.permute.xlu0 %4643 }
 0x7b2   : > { %4717 = vst.msk [vmem:[%s8230_s26 + $0x630] sm:$0xff] %vm4699_vm8, %v4644_v27  ;;  %5175 = vperm.xlu0 %7894, %v5020_v4   ;;  %v5052_v4 = vld [vmem:[%s15434_s10 + $0x50] sm:$0xff] }
 0x7b3   : > { %v4638_v52 = vpop.permute.xlu1 %4637  ;;  %4718 = vst.msk [vmem:[%s8230_s26 + $0x638] sm:$0xff] %vm4701_vm7, %v4644_v27 }
 0x7b4   : > { %4711 = vst.msk [vmem:[%s8230_s26 + $0x408] sm:$0xff] %vm4699_vm8, %v4638_v52  ;;  %4888 = vrot.lane.b32.xlu1 %v10649_v57, %s7991_s29  ;;  %v5021_v57 = vld [vmem:[%s15428_s4 + $0x8] sm:$0xff] }
 0x7b5   : > { %4712 = vst.msk [vmem:[%s8230_s26 + $0x410] sm:$0xff] %vm4701_vm7, %v4638_v52  ;;  %v4648_v17 = vpop.permute.xlu0 %4647 }
 0x7b6   : > { %4721 = vst.msk [vmem:[%s8230_s26 + $0x7a0] sm:$0xff] %vm4699_vm8, %v4648_v17  ;;  %5185 = vperm.xlu0 %7894, %v5022_v54   ;;  %v5051_v54 = vld [vmem:[%s15434_s10 + $0x48] sm:$0xff] }
 0x7b7   : > { %v4642_v18 = vpop.permute.xlu1 %4641  ;;  %4722 = vst.msk [vmem:[%s8230_s26 + $0x7a8] sm:$0xff] %vm4701_vm7, %v4648_v17 }
 0x7b8   : > { %4715 = vst.msk [vmem:[%s8230_s26 + $0x578] sm:$0xff] %vm4699_vm8, %v4642_v18  ;;  %4892 = vrot.lane.b32.xlu1 %v10666_v21, %s7991_s29  ;;  %v5023_v21 = vld [vmem:[%s15428_s4 + $0x18] sm:$0xff]  ;;  %s7997_s29 = smov 83  }
 0x7b9   : > { %4716 = vst.msk [vmem:[%s8230_s26 + $0x580] sm:$0xff] %vm4701_vm7, %v4642_v18  ;;  %v4652_v53 = vpop.permute.xlu0 %4651  ;;  %v5054_v18 = vld [vmem:[%s15434_s10 + $0x60] sm:$0xff] }
 0x7ba   : > { %4725 = vst.msk [vmem:[%s8230_s26 + $0x910] sm:$0xff] %vm4699_vm8, %v4652_v53  ;;  %5283 = vperm.xlu0 %7894, %v5024_v19   ;;  %v5053_v19 = vld [vmem:[%s15434_s10 + $0x58] sm:$0xff] }
 0x7bb   : > { %v4646_v32 = vpop.permute.xlu1 %4645  ;;  %4726 = vst.msk [vmem:[%s8230_s26 + $0x918] sm:$0xff] %vm4701_vm7, %v4652_v53 }
 0x7bc   : > { %4719 = vst.msk [vmem:[%s8230_s26 + $0x6e8] sm:$0xff] %vm4699_vm8, %v4646_v32  ;;  %5180 = vperm.xlu1 %7895, %v5021_v57  }
 0x7bd   : > { %4720 = vst.msk [vmem:[%s8230_s26 + $0x6f0] sm:$0xff] %vm4701_vm7, %v4646_v32  ;;  %v4656_v24 = vpop.permute.xlu0 %4655  ;;  %v5056_v32 = vld [vmem:[%s15434_s10 + $0x70] sm:$0xff] }
 0x7be   : > { %4729 = vst.msk [vmem:[%s8230_s26 + $0xa80] sm:$0xff] %vm4699_vm8, %v4656_v24  ;;  %5293 = vperm.xlu0 %7894, %v5026_v2   ;;  %v5055_v2 = vld [vmem:[%s15434_s10 + $0x68] sm:$0xff] }
 0x7bf   : > { %v4650_v23 = vpop.permute.xlu1 %4649  ;;  %4730 = vst.msk [vmem:[%s8230_s26 + $0xa88] sm:$0xff] %vm4701_vm7, %v4656_v24 }
 0x7c0   : > { %4723 = vst.msk [vmem:[%s8230_s26 + $0x858] sm:$0xff] %vm4699_vm8, %v4650_v23  ;;  %5190 = vperm.xlu1 %7895, %v5023_v21  }
 0x7c1   : > { %4724 = vst.msk [vmem:[%s8230_s26 + $0x860] sm:$0xff] %vm4701_vm7, %v4650_v23  ;;  %v4660_v35 = vpop.permute.xlu0 %4659  ;;  %v5058_v23 = vld [vmem:[%s15434_s10 + $0x80] sm:$0xff] }
 0x7c2   : > { %4733 = vst.msk [vmem:[%s8230_s26 + $0xbf0] sm:$0xff] %vm4699_vm8, %v4660_v35  ;;  %5303 = vperm.xlu0 %7894, %v5028_v6   ;;  %v5057_v6 = vld [vmem:[%s15434_s10 + $0x78] sm:$0xff] }
 0x7c3   : > { %v4654_v33 = vpop.permute.xlu1 %4653  ;;  %4734 = vst.msk [vmem:[%s8230_s26 + $0xbf8] sm:$0xff] %vm4701_vm7, %v4660_v35 }
 0x7c4   : > { %4727 = vst.msk [vmem:[%s8230_s26 + $0x9c8] sm:$0xff] %vm4699_vm8, %v4654_v33  ;;  %5288 = vperm.xlu1 %7895, %v5025_v34  }
 0x7c5   : > { %4728 = vst.msk [vmem:[%s8230_s26 + $0x9d0] sm:$0xff] %vm4701_vm7, %v4654_v33  ;;  %v4664_v15 = vpop.permute.xlu0 %4663  ;;  %v5060_v33 = vld [vmem:[%s15434_s10 + $0x90] sm:$0xff] }
 0x7c6   : > { %4737 = vst.msk [vmem:[%s8230_s26 + $0xd60] sm:$0xff] %vm4699_vm8, %v4664_v15  ;;  %5313 = vperm.xlu0 %7894, %v5030_v55   ;;  %v5059_v55 = vld [vmem:[%s15434_s10 + $0x88] sm:$0xff] }
 0x7c7   : > { %v4658_v11 = vpop.permute.xlu1 %4657  ;;  %4738 = vst.msk [vmem:[%s8230_s26 + $0xd68] sm:$0xff] %vm4701_vm7, %v4664_v15 }
 0x7c8   : > { %4731 = vst.msk [vmem:[%s8230_s26 + $0xb38] sm:$0xff] %vm4699_vm8, %v4658_v11  ;;  %5298 = vperm.xlu1 %7895, %v5027_v63  }
 0x7c9   : > { %4732 = vst.msk [vmem:[%s8230_s26 + $0xb40] sm:$0xff] %vm4701_vm7, %v4658_v11  ;;  %v4668_v59 = vpop.permute.xlu0 %4667  ;;  %v5062_v11 = vld [vmem:[%s15434_s10 + $0xa0] sm:$0xff] }
 0x7ca   : > { %4741 = vst.msk [vmem:[%s8230_s26 + $0xed0] sm:$0xff] %vm4699_vm8, %v4668_v59  ;;  %5453 = vperm.xlu0 %7894, %v5032_v60   ;;  %v5061_v60 = vld [vmem:[%s15434_s10 + $0x98] sm:$0xff] }
 0x7cb   : > { %v4662_v46 = vpop.permute.xlu1 %4661  ;;  %4742 = vst.msk [vmem:[%s8230_s26 + $0xed8] sm:$0xff] %vm4701_vm7, %v4668_v59 }
 0x7cc   : > { %4735 = vst.msk [vmem:[%s8230_s26 + $0xca8] sm:$0xff] %vm4699_vm8, %v4662_v46  ;;  %5308 = vperm.xlu1 %7895, %v5029_v31  }
 0x7cd   : > { %4736 = vst.msk [vmem:[%s8230_s26 + $0xcb0] sm:$0xff] %vm4701_vm7, %v4662_v46  ;;  %v4672_v41 = vpop.permute.xlu0 %4671  ;;  %v5064_v46 = vld [vmem:[%s15434_s10 + $0xb0] sm:$0xff] }
 0x7ce   : > { %4745 = vst.msk [vmem:[%s8230_s26 + $0x1040] sm:$0xff] %vm4699_vm8, %v4672_v41  ;;  %5463 = vperm.xlu0 %7894, %v5034_v7   ;;  %v5063_v7 = vld [vmem:[%s15434_s10 + $0xa8] sm:$0xff] }
 0x7cf   : > { %v4666_v43 = vpop.permute.xlu1 %4665  ;;  %4746 = vst.msk [vmem:[%s8230_s26 + $0x1048] sm:$0xff] %vm4701_vm7, %v4672_v41 }
 0x7d0   : > { %4739 = vst.msk [vmem:[%s8230_s26 + $0xe18] sm:$0xff] %vm4699_vm8, %v4666_v43  ;;  %5318 = vperm.xlu1 %7895, %v5031_v10  }
 0x7d1   : > { %4740 = vst.msk [vmem:[%s8230_s26 + $0xe20] sm:$0xff] %vm4701_vm7, %v4666_v43  ;;  %v4750_v61 = vpop.permute.xlu0 %4749 }
 0x7d2   : > { %4822 = vst.msk [vmem:[%s8230_s26 + $0x78] sm:$0xff] %vm4821_vm4, %v4750_v61  ;;  %5473 = vperm.xlu0 %7894, %v5036_v5  }
 0x7d3   : > { %v4670_v14 = vpop.permute.xlu1 %4669 }
 0x7d4   : > { %4743 = vst.msk [vmem:[%s8230_s26 + $0xf88] sm:$0xff] %vm4699_vm8, %v4670_v14  ;;  %5458 = vperm.xlu1 %7895, %v5033_v39   ;;  %v5065_v39 = vld [vmem:[%s15434_s10 + $0xb8] sm:$0xff] }
 0x7d5   : > { %4744 = vst.msk [vmem:[%s8230_s26 + $0xf90] sm:$0xff] %vm4701_vm7, %v4670_v14  ;;  %v4754_v48 = vpop.permute.xlu0 %4753 }
 0x7d6   : > { %4824 = vst.msk [vmem:[%s8230_s26 + $0x1e8] sm:$0xff] %vm4821_vm4, %v4754_v48  ;;  %5483 = vperm.xlu0 %7894, %v5038_v26  }
 0x7d7   : > { %v4674_v51 = vpop.permute.xlu1 %4673 }
 0x7d8   : > { %4747 = vst.msk [vmem:[%s8230_s26 + $0x10f8] sm:$0xff] %vm4699_vm8, %v4674_v51  ;;  %5468 = vperm.xlu1 %7895, %v5035_v25   ;;  %vm7066_vm8 = vcmask 1048536  }
 0x7d9   : > { %4748 = vst.msk [vmem:[%s8230_s26 + $0x1100] sm:$0xff] %vm4701_vm7, %v4674_v51  ;;  %v4758_v0 = vpop.permute.xlu0 %4757  ;;  %vm6969_vm7 = vcmask 695848  }
 0x7da   : > { %4826 = vst.msk [vmem:[%s8230_s26 + $0x358] sm:$0xff] %vm4821_vm4, %v4758_v0  ;;  %5493 = vperm.xlu0 %7894, %v5040_v37  }
 0x7db   : > { %v4752_v56 = vpop.permute.xlu1 %4751 }
 0x7dc   : > { %4823 = vst.msk [vmem:[%s8230_s26 + $0x130] sm:$0xff] %vm4821_vm4, %v4752_v56  ;;  %5478 = vperm.xlu1 %7895, %v5037_v45  }
 0x7dd   : > { %v4762_v30 = vpop.permute.xlu0 %4761 }
 0x7de   : > { %4828 = vst.msk [vmem:[%s8230_s26 + $0x4c8] sm:$0xff] %vm4821_vm4, %v4762_v30  ;;  %5657 = vperm.xlu0 %7894, %v5042_v13  }
 0x7df   : > { %v4756_v47 = vpop.permute.xlu1 %4755 }
 0x7e0   : > { %4825 = vst.msk [vmem:[%s8230_s26 + $0x2a0] sm:$0xff] %vm4821_vm4, %v4756_v47  ;;  %5488 = vperm.xlu1 %7895, %v5039_v9  }
 0x7e1   : > { %v4766_v8 = vpop.permute.xlu0 %4765 }
 0x7e2   : > { %4830 = vst.msk [vmem:[%s8230_s26 + $0x638] sm:$0xff] %vm4821_vm4, %v4766_v8  ;;  %5667 = vperm.xlu0 %7894, %v5044_v12  }
 0x7e3   : > { %v4760_v62 = vpop.permute.xlu1 %4759 }
 0x7e4   : > { %4827 = vst.msk [vmem:[%s8230_s26 + $0x410] sm:$0xff] %vm4821_vm4, %v4760_v62  ;;  %5498 = vperm.xlu1 %7895, %v5041_v58  }
 0x7e5   : > { %v4770_v16 = vpop.permute.xlu0 %4769 }
 0x7e6   : > { %4832 = vst.msk [vmem:[%s8230_s26 + $0x7a8] sm:$0xff] %vm4821_vm4, %v4770_v16  ;;  %5677 = vperm.xlu0 %7894, %v5046_v49  }
 0x7e7   : > { %v4764_v29 = vpop.permute.xlu1 %4763 }
 0x7e8   : > { %4829 = vst.msk [vmem:[%s8230_s26 + $0x580] sm:$0xff] %vm4821_vm4, %v4764_v29  ;;  %5662 = vperm.xlu1 %7895, %v5043_v20  }
 0x7e9   : > { %v4774_v38 = vpop.permute.xlu0 %4773 }
 0x7ea   : > { %4834 = vst.msk [vmem:[%s8230_s26 + $0x918] sm:$0xff] %vm4821_vm4, %v4774_v38  ;;  %5687 = vperm.xlu0 %7894, %v5048_v36  }
 0x7eb   : > { %v4768_v1 = vpop.permute.xlu1 %4767 }
 0x7ec   : > { %4831 = vst.msk [vmem:[%s8230_s26 + $0x6f0] sm:$0xff] %vm4821_vm4, %v4768_v1  ;;  %5672 = vperm.xlu1 %7895, %v5045_v50  }
 0x7ed   : > { %v4778_v42 = vpop.permute.xlu0 %4777 }
 0x7ee   : > { %4836 = vst.msk [vmem:[%s8230_s26 + $0xa88] sm:$0xff] %vm4821_vm4, %v4778_v42  ;;  %5697 = vperm.xlu0 %7894, %v5050_v40  }
 0x7ef   : > { %v4772_v3 = vpop.permute.xlu1 %4771 }
 0x7f0   : > { %4833 = vst.msk [vmem:[%s8230_s26 + $0x860] sm:$0xff] %vm4821_vm4, %v4772_v3  ;;  %5682 = vperm.xlu1 %7895, %v5047_v22  }
 0x7f1   : > { %v4782_v27 = vpop.permute.xlu0 %4781 }
 0x7f2   : > { %4838 = vst.msk [vmem:[%s8230_s26 + $0xbf8] sm:$0xff] %vm4821_vm4, %v4782_v27  ;;  %5707 = vperm.xlu0 %7894, %v5052_v4  }
 0x7f3   : > { %v4776_v52 = vpop.permute.xlu1 %4775 }
 0x7f4   : > { %4835 = vst.msk [vmem:[%s8230_s26 + $0x9d0] sm:$0xff] %vm4821_vm4, %v4776_v52  ;;  %5692 = vperm.xlu1 %7895, %v5049_v44  }
 0x7f5   : > { %v4786_v57 = vpop.permute.xlu0 %4785 }
 0x7f6   : > { %4840 = vst.msk [vmem:[%s8230_s26 + $0xd68] sm:$0xff] %vm4821_vm4, %v4786_v57  ;;  %5717 = vperm.xlu0 %7894, %v5054_v18  }
 0x7f7   : > { %v4780_v17 = vpop.permute.xlu1 %4779 }
 0x7f8   : > { %4837 = vst.msk [vmem:[%s8230_s26 + $0xb40] sm:$0xff] %vm4821_vm4, %v4780_v17  ;;  %5702 = vperm.xlu1 %7895, %v5051_v54  }
 0x7f9   : > { %v4790_v21 = vpop.permute.xlu0 %4789 }
 0x7fa   : > { %4842 = vst.msk [vmem:[%s8230_s26 + $0xed8] sm:$0xff] %vm4821_vm4, %v4790_v21  ;;  %5727 = vperm.xlu0 %7894, %v5056_v32  }
 0x7fb   : > { %v4784_v53 = vpop.permute.xlu1 %4783 }
 0x7fc   : > { %4839 = vst.msk [vmem:[%s8230_s26 + $0xcb0] sm:$0xff] %vm4821_vm4, %v4784_v53  ;;  %5712 = vperm.xlu1 %7895, %v5053_v19  }
 0x7fd   : > { %v4794_v34 = vpop.permute.xlu0 %4793 }
 0x7fe   : > { %4844 = vst.msk [vmem:[%s8230_s26 + $0x1048] sm:$0xff] %vm4821_vm4, %v4794_v34  ;;  %5737 = vperm.xlu0 %7894, %v5058_v23  }
 0x7ff   : > { %v4788_v24 = vpop.permute.xlu1 %4787 }
 0x800   : > { %4841 = vst.msk [vmem:[%s8230_s26 + $0xe20] sm:$0xff] %vm4821_vm4, %v4788_v24  ;;  %5722 = vperm.xlu1 %7895, %v5055_v2  }
 0x801   : > { %v4847_v63 = vpop.permute.xlu0 %4846 }
 0x802   : > { %4919 = vst.msk [vmem:[%s8230_s26 + $0x78] sm:$0xff] %vm4918_vm9, %v4847_v63  ;;  %5747 = vperm.xlu0 %7894, %v5060_v33  }
 0x803   : > { %v4792_v35 = vpop.permute.xlu1 %4791  ;;  %4921 = vst.msk [vmem:[%s8230_s26 + $0x80] sm:$0xff] %vm4920_vm11, %v4847_v63  ;;  %v7900_v63 = vld [vmem:[%s15429_s5] sm:$0xff]  }
 0x804   : > { %4843 = vst.msk [vmem:[%s8230_s26 + $0xf90] sm:$0xff] %vm4821_vm4, %v4792_v35  ;;  %5732 = vperm.xlu1 %7895, %v5057_v6  }
 0x805   : > { %v4851_v31 = vpop.permute.xlu0 %4850 }
 0x806   : > { %4924 = vst.msk [vmem:[%s8230_s26 + $0x1e8] sm:$0xff] %vm4918_vm9, %v4851_v31  ;;  %5757 = vperm.xlu0 %7894, %v5062_v11   ;;  %v7902_v11 = vld [vmem:[%s15429_s5 + $0x10] sm:$0xff]  }
 0x807   : > { %v4796_v15 = vpop.permute.xlu1 %4795  ;;  %4925 = vst.msk [vmem:[%s8230_s26 + $0x1f0] sm:$0xff] %vm4920_vm11, %v4851_v31 }
 0x808   : > { %4845 = vst.msk [vmem:[%s8230_s26 + $0x1100] sm:$0xff] %vm4821_vm4, %v4796_v15  ;;  %5742 = vperm.xlu1 %7895, %v5059_v55   ;;  %v7901_v55 = vld [vmem:[%s15429_s5 + $0x8] sm:$0xff]   ;;  %v7903_v15 = vld [vmem:[%s15429_s5 + $0x18] sm:$0xff]   ;;  %vm7068_vm4 = vcmask 89088  }
 0x809   : > { %v4855_v10 = vpop.permute.xlu0 %4854 }
 0x80a   : > { %4928 = vst.msk [vmem:[%s8230_s26 + $0x358] sm:$0xff] %vm4918_vm9, %v4855_v10  ;;  %5767 = vperm.xlu0 %7894, %v5064_v46  }
 0x80b   : > { %v4849_v59 = vpop.permute.xlu1 %4848  ;;  %4929 = vst.msk [vmem:[%s8230_s26 + $0x360] sm:$0xff] %vm4920_vm11, %v4855_v10 }
 0x80c   : > { %4922 = vst.msk [vmem:[%s8230_s26 + $0x130] sm:$0xff] %vm4918_vm9, %v4849_v59  ;;  %5752 = vperm.xlu1 %7895, %v5061_v60  }
 0x80d   : > { %4923 = vst.msk [vmem:[%s8230_s26 + $0x138] sm:$0xff] %vm4920_vm11, %v4849_v59  ;;  %v4859_v41 = vpop.permute.xlu0 %4858 }
 0x80e   : > { %4932 = vst.msk [vmem:[%s8230_s26 + $0x4c8] sm:$0xff] %vm4918_vm9, %v4859_v41 }
 0x80f   : > { %v4853_v43 = vpop.permute.xlu1 %4852  ;;  %4933 = vst.msk [vmem:[%s8230_s26 + $0x4d0] sm:$0xff] %vm4920_vm11, %v4859_v41 }
 0x810   : > { %4926 = vst.msk [vmem:[%s8230_s26 + $0x2a0] sm:$0xff] %vm4918_vm9, %v4853_v43  ;;  %5762 = vperm.xlu1 %7895, %v5063_v7  }
 0x811   : > { %4927 = vst.msk [vmem:[%s8230_s26 + $0x2a8] sm:$0xff] %vm4920_vm11, %v4853_v43  ;;  %v4863_v14 = vpop.permute.xlu0 %4862 }
 0x812   : > { %4936 = vst.msk [vmem:[%s8230_s26 + $0x638] sm:$0xff] %vm4918_vm9, %v4863_v14 }
 0x813   : > { %v4857_v5 = vpop.permute.xlu1 %4856  ;;  %4937 = vst.msk [vmem:[%s8230_s26 + $0x640] sm:$0xff] %vm4920_vm11, %v4863_v14 }
 0x814   : > { %4930 = vst.msk [vmem:[%s8230_s26 + $0x410] sm:$0xff] %vm4918_vm9, %v4857_v5  ;;  %5772 = vperm.xlu1 %7895, %v5065_v39  }
 0x815   : > { %4931 = vst.msk [vmem:[%s8230_s26 + $0x418] sm:$0xff] %vm4920_vm11, %v4857_v5  ;;  %v4867_v25 = vpop.permute.xlu0 %4866 }
 0x816   : > { %4940 = vst.msk [vmem:[%s8230_s26 + $0x7a8] sm:$0xff] %vm4918_vm9, %v4867_v25 }
 0x817   : > { %v4861_v61 = vpop.permute.xlu1 %4860  ;;  %4941 = vst.msk [vmem:[%s8230_s26 + $0x7b0] sm:$0xff] %vm4920_vm11, %v4867_v25 }
 0x818   : > { %4934 = vst.msk [vmem:[%s8230_s26 + $0x580] sm:$0xff] %vm4918_vm9, %v4861_v61 }
 0x819   : > { %4935 = vst.msk [vmem:[%s8230_s26 + $0x588] sm:$0xff] %vm4920_vm11, %v4861_v61  ;;  %v4871_v51 = vpop.permute.xlu0 %4870 }
 0x81a   : > { %4944 = vst.msk [vmem:[%s8230_s26 + $0x918] sm:$0xff] %vm4918_vm9, %v4871_v51 }
 0x81b   : > { %v4865_v26 = vpop.permute.xlu1 %4864  ;;  %4945 = vst.msk [vmem:[%s8230_s26 + $0x920] sm:$0xff] %vm4920_vm11, %v4871_v51 }
 0x81c   : > { %4938 = vst.msk [vmem:[%s8230_s26 + $0x6f0] sm:$0xff] %vm4918_vm9, %v4865_v26 }
 0x81d   : > { %4939 = vst.msk [vmem:[%s8230_s26 + $0x6f8] sm:$0xff] %vm4920_vm11, %v4865_v26  ;;  %v4875_v45 = vpop.permute.xlu0 %4874 }
 0x81e   : > { %4948 = vst.msk [vmem:[%s8230_s26 + $0xa88] sm:$0xff] %vm4918_vm9, %v4875_v45 }
 0x81f   : > { %v4869_v48 = vpop.permute.xlu1 %4868  ;;  %4949 = vst.msk [vmem:[%s8230_s26 + $0xa90] sm:$0xff] %vm4920_vm11, %v4875_v45 }
 0x820   : > { %4942 = vst.msk [vmem:[%s8230_s26 + $0x860] sm:$0xff] %vm4918_vm9, %v4869_v48 }
 0x821   : > { %4943 = vst.msk [vmem:[%s8230_s26 + $0x868] sm:$0xff] %vm4920_vm11, %v4869_v48  ;;  %v4879_v56 = vpop.permute.xlu0 %4878 }
 0x822   : > { %4952 = vst.msk [vmem:[%s8230_s26 + $0xbf8] sm:$0xff] %vm4918_vm9, %v4879_v56 }
 0x823   : > { %v4873_v37 = vpop.permute.xlu1 %4872  ;;  %4953 = vst.msk [vmem:[%s8230_s26 + $0xc00] sm:$0xff] %vm4920_vm11, %v4879_v56 }
 0x824   : > { %4946 = vst.msk [vmem:[%s8230_s26 + $0x9d0] sm:$0xff] %vm4918_vm9, %v4873_v37 }
 0x825   : > { %4947 = vst.msk [vmem:[%s8230_s26 + $0x9d8] sm:$0xff] %vm4920_vm11, %v4873_v37  ;;  %v4883_v9 = vpop.permute.xlu0 %4882 }
 0x826   : > { %4956 = vst.msk [vmem:[%s8230_s26 + $0xd68] sm:$0xff] %vm4918_vm9, %v4883_v9 }
 0x827   : > { %v4877_v0 = vpop.permute.xlu1 %4876  ;;  %4957 = vst.msk [vmem:[%s8230_s26 + $0xd70] sm:$0xff] %vm4920_vm11, %v4883_v9 }
 0x828   : > { %4950 = vst.msk [vmem:[%s8230_s26 + $0xb40] sm:$0xff] %vm4918_vm9, %v4877_v0 }
 0x829   : > { %4951 = vst.msk [vmem:[%s8230_s26 + $0xb48] sm:$0xff] %vm4920_vm11, %v4877_v0  ;;  %v4887_v47 = vpop.permute.xlu0 %4886 }
 0x82a   : > { %4960 = vst.msk [vmem:[%s8230_s26 + $0xed8] sm:$0xff] %vm4918_vm9, %v4887_v47 }
 0x82b   : > { %v4881_v13 = vpop.permute.xlu1 %4880  ;;  %4961 = vst.msk [vmem:[%s8230_s26 + $0xee0] sm:$0xff] %vm4920_vm11, %v4887_v47 }
 0x82c   : > { %4954 = vst.msk [vmem:[%s8230_s26 + $0xcb0] sm:$0xff] %vm4918_vm9, %v4881_v13 }
 0x82d   : > { %4955 = vst.msk [vmem:[%s8230_s26 + $0xcb8] sm:$0xff] %vm4920_vm11, %v4881_v13  ;;  %v4891_v58 = vpop.permute.xlu0 %4890 }
 0x82e   : > { %4964 = vst.msk [vmem:[%s8230_s26 + $0x1048] sm:$0xff] %vm4918_vm9, %v4891_v58 }
 0x82f   : > { %v4885_v30 = vpop.permute.xlu1 %4884  ;;  %4965 = vst.msk [vmem:[%s8230_s26 + $0x1050] sm:$0xff] %vm4920_vm11, %v4891_v58 }
 0x830   : > { %4958 = vst.msk [vmem:[%s8230_s26 + $0xe20] sm:$0xff] %vm4918_vm9, %v4885_v30 }
 0x831   : > { %4959 = vst.msk [vmem:[%s8230_s26 + $0xe28] sm:$0xff] %vm4920_vm11, %v4885_v30  ;;  %v5176_v20 = vpop.permute.xlu0 %5175 }
 0x833   : > { %v4889_v12 = vpop.permute.xlu1 %4888 }
 0x834   : > { %4962 = vst.msk [vmem:[%s8230_s26 + $0xf90] sm:$0xff] %vm4918_vm9, %v4889_v12 }
 0x835   : > { %4963 = vst.msk [vmem:[%s8230_s26 + $0xf98] sm:$0xff] %vm4920_vm11, %v4889_v12  ;;  %v5186_v27 = vpop.permute.xlu0 %5185 }
 0x837   : > { %v4893_v62 = vpop.permute.xlu1 %4892 }
 0x838   : > { %4966 = vst.msk [vmem:[%s8230_s26 + $0x1100] sm:$0xff] %vm4918_vm9, %v4893_v62  ;;  %vm7188_vm9 = vcmask 531848  }
 0x839   : > { %4967 = vst.msk [vmem:[%s8230_s26 + $0x1108] sm:$0xff] %vm4920_vm11, %v4893_v62  ;;  %v5284_v31 = vpop.permute.xlu0 %5283  ;;  %vm7285_vm11 = vcmask 974648  }
 0x83b   : > { %v5181_v16 = vpop.permute.xlu1 %5180 }
 0x83d   : > { %v5294_v48 = vpop.permute.xlu0 %5293 }
 0x83f   : > { %v5191_v57 = vpop.permute.xlu1 %5190 }
 0x843   : > { %v5289_v10 = vpop.permute.xlu1 %5288 }
 0x847   : > { %v5299_v9 = vpop.permute.xlu1 %5298 }
 0x861   : > { %v5250_v8 = vpop.f32.mrb[0].mxu1 }
 0x862   : > { %v5252_v49 = vpop.f32.mrb[1].mxu1  ;;  %v5251_v29 = vadd.f32 %v5250_v8, %v5176_v20 }
 0x863   : > { %v5253_v50 = vadd.f32 %v5252_v49, %v5176_v20  ;;  %v5254_v36 = vpop.f32.mrb[2].mxu1 }
 0x864   : > { %v5255_v1 = vadd.f32 %v5254_v36, %v5181_v16  ;;  %v5256_v38 = vpop.f32.mrb[3].mxu1  ;;  %v5269_v40 = vmax.f32 %v5251_v29, 0.0 }
 0x865   : > { %v5257_v22 = vadd.f32 %v5256_v38, %v5181_v16  ;;  %v5270_v42 = vmax.f32 %v5253_v50, 0.0  ;;  %v5304_v16 = vpop.permute.xlu0 %5303 }
 0x866   : > { %v5271_v3 = vmax.f32 %v5255_v1, 0.0 }
 0x867   : > { %v5272_v44 = vmax.f32 %v5257_v22, 0.0  ;;  %v5309_v22 = vpop.permute.xlu1 %5308 }
 0x868   : > { %v5277_v4 = vpack.c.bf16 %v5271_v3, %v5269_v40 }
 0x869   : > { %v5260_v52 = vpop.f32.mrb[4].mxu1  ;;  %v5278_v54 = vpack.c.bf16 %v5272_v44, %v5270_v42 }
 0x86a   : > { %v5262_v18 = vpop.f32.mrb[5].mxu1  ;;  %v5261_v17 = vadd.f32 %v5260_v52, %v5186_v27 }
 0x86b   : > { %v5263_v19 = vadd.f32 %v5262_v18, %v5186_v27  ;;  %v5264_v32 = vpop.f32.mrb[6].mxu1  ;;  %5354 = vmatprep.subr.bf16.mxu0 %v5278_v54 }
 0x86c   : > { %v5265_v53 = vadd.f32 %v5264_v32, %v5191_v57  ;;  %v5266_v21 = vpop.f32.mrb[7].mxu1  ;;  %5355 = vmatpush1.bf16.msra.mxu0 %v5277_v4  ;;  %v5273_v23 = vmax.f32 %v5261_v17, 0.0 }
 0x86d   : > { %v5267_v2 = vadd.f32 %v5266_v21, %v5191_v57  ;;  %v5274_v34 = vmax.f32 %v5263_v19, 0.0  ;;  %v5314_v57 = vpop.permute.xlu0 %5313 }
 0x86e   : > { %v5275_v24 = vmax.f32 %v5265_v53, 0.0 }
 0x86f   : > { %v5276_v6 = vmax.f32 %v5267_v2, 0.0  ;;  %v5319_v2 = vpop.permute.xlu1 %5318 }
 0x870   : > { %v5279_v33 = vpack.c.bf16 %v5275_v24, %v5273_v23 }
 0x871   : > { %v5280_v35 = vpack.c.bf16 %v5276_v6, %v5274_v34 }
 0x873   : > { %5356 = vmatprep.subr.bf16.mxu0 %v5280_v35 }
 0x874   : > { %5357 = vmatpush1.bf16.msra.mxu0 %v5279_v33 }
 0x877   : > { %7774 = vmatmul.mubr.msk.bf16.vlgmr.msra.gmra.mrb[8].mxu0 %vm5341_vm10, %v7900_v63 }
 0x878   : > { %5396 = vmatprep.mubr.bf16.mxu0 %v15476_v28 }
 0x87f   : > { %7775 = vmatmul.mubr.msk.bf16.gmra.mrb[12].mxu0 %vm5341_vm10, %v7901_v55 }
 0x880   : > { %5406 = vmatprep.mubr.bf16.mxu0 %v15476_v28 }
 0x887   : > { %7776 = vmatmul.mubr.msk.bf16.gmra.mrb[16].mxu0 %vm5341_vm10, %v7902_v11 }
 0x888   : > { %5416 = vmatprep.mubr.bf16.mxu0 %v15476_v28 }
 0x88f   : > { %7777 = vmatmul.mubr.msk.bf16.gmra.mrb[20].mxu0 %vm5341_vm10, %v7903_v15  ;;  %vm7382_vm10 = vcmask 367848  }
 0x890   : > { %5904 = vmatprep.mubr.bf16.mxu0 %v15476_v28 }
 0x94a   : > { %v5388_v60 = vpop.f32.mrb[8].mxu0 }
 0x94b   : > { %v5389_v46 = vadd.f32 %v5388_v60, %v5284_v31  ;;  %v5390_v59 = vpop.f32.mrb[9].mxu0  ;;  %v7904_v60 = vld [vmem:[%s15431_s7] sm:$0xff]  }
 0x94c   : > { %v5391_v7 = vadd.f32 %v5390_v59, %v5284_v31  ;;  %v5392_v43 = vpop.f32.mrb[10].mxu0  ;;  %v7906_v59 = vld [vmem:[%s15431_s7 + $0x10] sm:$0xff]  }
 0x94d   : > { %v5393_v41 = vadd.f32 %v5392_v43, %v5289_v10  ;;  %v5394_v39 = vpop.f32.mrb[11].mxu0  ;;  %v5427_v14 = vmax.f32 %v5389_v46, 0.0  ;;  %v7905_v46 = vld [vmem:[%s15431_s7 + $0x8] sm:$0xff]   ;;  %v5454_v43 = vpop.permute.xlu0 %5453 }
 0x94e   : > { %v5395_v5 = vadd.f32 %v5394_v39, %v5289_v10  ;;  %v5428_v25 = vmax.f32 %v5391_v7, 0.0  ;;  %v7907_v10 = vld [vmem:[%s15431_s7 + $0x18] sm:$0xff]   ;;  %v7908_v7 = vld [vmem:[%s15431_s7 + $0x20] sm:$0xff]  }
 0x94f   : > { %v5429_v61 = vmax.f32 %v5393_v41, 0.0 }
 0x950   : > { %v5430_v26 = vmax.f32 %v5395_v5, 0.0 }
 0x951   : > { %v5443_v51 = vpack.c.bf16 %v5429_v61, %v5427_v14  ;;  %v5459_v14 = vpop.permute.xlu1 %5458 }
 0x952   : > { %v5444_v45 = vpack.c.bf16 %v5430_v26, %v5428_v25  ;;  %v5398_v37 = vpop.f32.mrb[12].mxu0 }
 0x953   : > { %v5399_v56 = vadd.f32 %v5398_v37, %v5294_v48  ;;  %v5400_v0 = vpop.f32.mrb[13].mxu0 }
 0x954   : > { %v5401_v13 = vadd.f32 %v5400_v0, %v5294_v48  ;;  %v5402_v47 = vpop.f32.mrb[14].mxu0  ;;  %5542 = vmatprep.subr.bf16.mxu1 %v5444_v45 }
 0x955   : > { %v5403_v30 = vadd.f32 %v5402_v47, %v5299_v9  ;;  %v5404_v58 = vpop.f32.mrb[15].mxu0  ;;  %5543 = vmatpush1.bf16.msra.mxu1 %v5443_v51  ;;  %v5431_v62 = vmax.f32 %v5399_v56, 0.0 }
 0x956   : > { %v5405_v12 = vadd.f32 %v5404_v58, %v5299_v9  ;;  %v5432_v20 = vmax.f32 %v5401_v13, 0.0  ;;  %v5464_v13 = vpop.permute.xlu0 %5463 }
 0x957   : > { %v5433_v8 = vmax.f32 %v5403_v30, 0.0 }
 0x958   : > { %v5434_v49 = vmax.f32 %v5405_v12, 0.0 }
 0x959   : > { %v5445_v29 = vpack.c.bf16 %v5433_v8, %v5431_v62  ;;  %v5469_v62 = vpop.permute.xlu1 %5468 }
 0x95a   : > { %v5446_v50 = vpack.c.bf16 %v5434_v49, %v5432_v20  ;;  %v5408_v36 = vpop.f32.mrb[16].mxu0 }
 0x95b   : > { %v5409_v1 = vadd.f32 %v5408_v36, %v5304_v16  ;;  %v5410_v38 = vpop.f32.mrb[17].mxu0 }
 0x95c   : > { %v5411_v40 = vadd.f32 %v5410_v38, %v5304_v16  ;;  %v5412_v3 = vpop.f32.mrb[18].mxu0  ;;  %5544 = vmatprep.subr.bf16.mxu1 %v5446_v50 }
 0x95d   : > { %v5413_v42 = vadd.f32 %v5412_v3, %v5309_v22  ;;  %v5414_v44 = vpop.f32.mrb[19].mxu0  ;;  %5545 = vmatpush1.bf16.msra.mxu1 %v5445_v29  ;;  %v5435_v52 = vmax.f32 %v5409_v1, 0.0 }
 0x95e   : > { %v5415_v4 = vadd.f32 %v5414_v44, %v5309_v22  ;;  %v5436_v54 = vmax.f32 %v5411_v40, 0.0  ;;  %v5474_v40 = vpop.permute.xlu0 %5473 }
 0x95f   : > { %v5437_v27 = vmax.f32 %v5413_v42, 0.0 }
 0x960   : > { %v5438_v18 = vmax.f32 %v5415_v4, 0.0 }
 0x961   : > { %v5447_v17 = vpack.c.bf16 %v5437_v27, %v5435_v52  ;;  %v5479_v52 = vpop.permute.xlu1 %5478 }
 0x962   : > { %v5448_v19 = vpack.c.bf16 %v5438_v18, %v5436_v54  ;;  %v5418_v32 = vpop.f32.mrb[20].mxu0 }
 0x963   : > { %v5419_v53 = vadd.f32 %v5418_v32, %v5314_v57  ;;  %v5420_v21 = vpop.f32.mrb[21].mxu0 }
 0x964   : > { %v5421_v23 = vadd.f32 %v5420_v21, %v5314_v57  ;;  %v5422_v24 = vpop.f32.mrb[22].mxu0  ;;  %5546 = vmatprep.subr.bf16.mxu1 %v5448_v19 }
 0x965   : > { %v5423_v34 = vadd.f32 %v5422_v24, %v5319_v2  ;;  %v5424_v6 = vpop.f32.mrb[23].mxu0  ;;  %5547 = vmatpush1.bf16.msra.mxu1 %v5447_v17  ;;  %v5439_v35 = vmax.f32 %v5419_v53, 0.0 }
 0x966   : > { %v5425_v33 = vadd.f32 %v5424_v6, %v5319_v2  ;;  %v5440_v55 = vmax.f32 %v5421_v23, 0.0  ;;  %v5484_v23 = vpop.permute.xlu0 %5483 }
 0x967   : > { %v5441_v63 = vmax.f32 %v5423_v34, 0.0 }
 0x968   : > { %v5442_v11 = vmax.f32 %v5425_v33, 0.0 }
 0x969   : > { %v5449_v15 = vpack.c.bf16 %v5441_v63, %v5439_v35  ;;  %v5489_v35 = vpop.permute.xlu1 %5488 }
 0x96a   : > { %v5450_v31 = vpack.c.bf16 %v5442_v11, %v5440_v55 }
 0x96c   : > { %5548 = vmatprep.subr.bf16.mxu1 %v5450_v31 }
 0x96d   : > { %5549 = vmatpush1.bf16.msra.mxu1 %v5449_v15 }
 0x970   : > { %7783 = vmatmul.mubr.msk.bf16.vlgmr.msra.gmra.mrb[8].mxu1 %vm5526_vm12, %v7904_v60 }
 0x971   : > { %5584 = vmatprep.mubr.bf16.mxu1 %v15476_v28 }
 0x978   : > { %7784 = vmatmul.mubr.msk.bf16.gmra.mrb[12].mxu1 %vm5526_vm12, %v7905_v46 }
 0x979   : > { %5594 = vmatprep.mubr.bf16.mxu1 %v15476_v28 }
 0x980   : > { %7785 = vmatmul.mubr.msk.bf16.gmra.mrb[16].mxu1 %vm5526_vm12, %v7906_v59 }
 0x981   : > { %5604 = vmatprep.mubr.bf16.mxu1 %v15476_v28 }
 0x988   : > { %7786 = vmatmul.mubr.msk.bf16.gmra.mrb[20].mxu1 %vm5526_vm12, %v7907_v10 }
 0x989   : > { %5614 = vmatprep.mubr.bf16.mxu1 %v15476_v28 }
 0x990   : > { %7787 = vmatmul.mubr.msk.bf16.gmra.mrb[24].mxu1 %vm5526_vm12, %v7908_v7  ;;  %vm7479_vm12 = vcmask 810648  }
 0x991   : > { %5974 = vmatprep.mubr.bf16.mxu1 %v15476_v28 }
 0xa43   : > { %v5576_v41 = vpop.f32.mrb[8].mxu1 }
 0xa44   : > { %v5577_v39 = vadd.f32 %v5576_v41, %v5454_v43  ;;  %v5578_v5 = vpop.f32.mrb[9].mxu1 }
 0xa45   : > { %v5579_v61 = vadd.f32 %v5578_v5, %v5454_v43  ;;  %v5580_v25 = vpop.f32.mrb[10].mxu1  ;;  %v5494_v43 = vpop.permute.xlu0 %5493 }
 0xa46   : > { %v5581_v26 = vadd.f32 %v5580_v25, %v5459_v14  ;;  %v5582_v51 = vpop.f32.mrb[11].mxu1  ;;  %v5625_v45 = vmax.f32 %v5577_v39, 0.0 }
 0xa47   : > { %v5583_v48 = vadd.f32 %v5582_v51, %v5459_v14  ;;  %v5626_v56 = vmax.f32 %v5579_v61, 0.0  ;;  %v5499_v61 = vpop.permute.xlu1 %5498 }
 0xa48   : > { %v5627_v37 = vmax.f32 %v5581_v26, 0.0 }
 0xa49   : > { %v5628_v0 = vmax.f32 %v5583_v48, 0.0 }
 0xa4a   : > { %v5645_v9 = vpack.c.bf16 %v5627_v37, %v5625_v45 }
 0xa4b   : > { %v5646_v47 = vpack.c.bf16 %v5628_v0, %v5626_v56  ;;  %v5586_v30 = vpop.f32.mrb[12].mxu1 }
 0xa4c   : > { %v5587_v58 = vadd.f32 %v5586_v30, %v5464_v13  ;;  %v5588_v12 = vpop.f32.mrb[13].mxu1  ;;  %v7909_v30 = vld [vmem:[%s15433_s9] sm:$0xff]  }
 0xa4d   : > { %v5589_v8 = vadd.f32 %v5588_v12, %v5464_v13  ;;  %v5590_v20 = vpop.f32.mrb[14].mxu1  ;;  %5872 = vmatprep.subr.bf16.mxu0 %v5646_v47  ;;  %7814 = vmatprep.subr.bf16.mxu1 %v5646_v47  ;;  %v7911_v12 = vld [vmem:[%s15433_s9 + $0x8] sm:$0xff]  }
 0xa4e   : > { %v5591_v49 = vadd.f32 %v5590_v20, %v5469_v62  ;;  %v5592_v29 = vpop.f32.mrb[15].mxu1  ;;  %5873 = vmatpush1.bf16.msra.mxu0 %v5645_v9  ;;  %7819 = vmatpush1.bf16.msra.mxu1 %v5645_v9  ;;  %v5629_v50 = vmax.f32 %v5587_v58, 0.0  ;;  %v7910_v58 = vld [vmem:[%s15433_s9 + $0x38] sm:$0xff]   ;;  %v7914_v20 = vld [vmem:[%s15433_s9 + $0x48] sm:$0xff]  }
 0xa4f   : > { %v5593_v16 = vadd.f32 %v5592_v29, %v5469_v62  ;;  %v5630_v1 = vmax.f32 %v5589_v8, 0.0  ;;  %v7912_v62 = vld [vmem:[%s15433_s9 + $0x40] sm:$0xff]   ;;  %v7913_v8 = vld [vmem:[%s15433_s9 + $0x10] sm:$0xff]  }
 0xa50   : > { %v5631_v36 = vmax.f32 %v5591_v49, 0.0  ;;  %v7915_v49 = vld [vmem:[%s15433_s9 + $0x18] sm:$0xff]   ;;  %v7916_v29 = vld [vmem:[%s15433_s9 + $0x50] sm:$0xff]  }
 0xa51   : > { %v5632_v38 = vmax.f32 %v5593_v16, 0.0  ;;  %v7917_v16 = vld [vmem:[%s15433_s9 + $0x20] sm:$0xff]  }
 0xa52   : > { %v5647_v22 = vpack.c.bf16 %v5631_v36, %v5629_v50  ;;  %v7918_v50 = vld [vmem:[%s15433_s9 + $0x58] sm:$0xff]   ;;  %v7919_v36 = vld [vmem:[%s15433_s9 + $0x28] sm:$0xff]  }
 0xa53   : > { %v5648_v3 = vpack.c.bf16 %v5632_v38, %v5630_v1  ;;  %v5596_v42 = vpop.f32.mrb[16].mxu1  ;;  %v7920_v1 = vld [vmem:[%s15433_s9 + $0x30] sm:$0xff]   ;;  %v13567_v38 = vpop.permute.xlu0 %5657 }
 0xa54   : > { %v5597_v44 = vadd.f32 %v5596_v42, %v5474_v40  ;;  %v5598_v4 = vpop.f32.mrb[17].mxu1 }
 0xa55   : > { %v5599_v27 = vadd.f32 %v5598_v4, %v5474_v40  ;;  %v5600_v54 = vpop.f32.mrb[18].mxu1  ;;  %5874 = vmatprep.subr.bf16.mxu0 %v5648_v3  ;;  %7815 = vmatprep.subr.bf16.mxu1 %v5648_v3 }
 0xa56   : > { %v5601_v18 = vadd.f32 %v5600_v54, %v5479_v52  ;;  %v5602_v17 = vpop.f32.mrb[19].mxu1  ;;  %5875 = vmatpush1.bf16.msra.mxu0 %v5647_v22  ;;  %7820 = vmatpush1.bf16.msra.mxu1 %v5647_v22  ;;  %v5633_v19 = vmax.f32 %v5597_v44, 0.0  ;;  %v13569_v22 = vpop.permute.xlu1 %5662 }
 0xa57   : > { %v5603_v57 = vadd.f32 %v5602_v17, %v5479_v52  ;;  %v5634_v53 = vmax.f32 %v5599_v27, 0.0  ;;  %v13571_v40 = vpop.permute.xlu0 %5667 }
 0xa58   : > { %v5635_v32 = vmax.f32 %v5601_v18, 0.0 }
 0xa59   : > { %v5636_v21 = vmax.f32 %v5603_v57, 0.0 }
 0xa5a   : > { %v5649_v2 = vpack.c.bf16 %v5635_v32, %v5633_v19  ;;  %v13573_v3 = vpop.permute.xlu1 %5672 }
 0xa5b   : > { %v5650_v24 = vpack.c.bf16 %v5636_v21, %v5634_v53  ;;  %v5606_v34 = vpop.f32.mrb[20].mxu1  ;;  %v13595_v53 = vpop.permute.xlu0 %5677 }
 0xa5c   : > { %v5607_v6 = vadd.f32 %v5606_v34, %v5484_v23  ;;  %v5608_v33 = vpop.f32.mrb[21].mxu1 }
 0xa5d   : > { %v5609_v63 = vadd.f32 %v5608_v33, %v5484_v23  ;;  %v5610_v55 = vpop.f32.mrb[22].mxu1  ;;  %5876 = vmatprep.subr.bf16.mxu0 %v5650_v24  ;;  %7816 = vmatprep.subr.bf16.mxu1 %v5650_v24 }
 0xa5e   : > { %v5611_v11 = vadd.f32 %v5610_v55, %v5489_v35  ;;  %v5612_v15 = vpop.f32.mrb[23].mxu1  ;;  %5877 = vmatpush1.bf16.msra.mxu0 %v5649_v2  ;;  %7821 = vmatpush1.bf16.msra.mxu1 %v5649_v2  ;;  %v5637_v60 = vmax.f32 %v5607_v6, 0.0  ;;  %v13597_v21 = vpop.permute.xlu1 %5682 }
 0xa5f   : > { %v5613_v31 = vadd.f32 %v5612_v15, %v5489_v35  ;;  %v5638_v59 = vmax.f32 %v5609_v63, 0.0 }
 0xa60   : > { %v5639_v46 = vmax.f32 %v5611_v11, 0.0 }
 0xa61   : > { %v5640_v10 = vmax.f32 %v5613_v31, 0.0 }
 0xa62   : > { %v5651_v7 = vpack.c.bf16 %v5639_v46, %v5637_v60  ;;  %v13621_v60 = vpop.permute.xlu0 %5687  ;;  %v13623_v46 = vpop.permute.xlu1 %5692 }
 0xa63   : > { %v5652_v41 = vpack.c.bf16 %v5640_v10, %v5638_v59  ;;  %v5616_v39 = vpop.f32.mrb[24].mxu1 }
 0xa64   : > { %v5617_v5 = vadd.f32 %v5616_v39, %v5494_v43  ;;  %v5618_v14 = vpop.f32.mrb[25].mxu1 }
 0xa65   : > { %v5619_v25 = vadd.f32 %v5618_v14, %v5494_v43  ;;  %v5620_v26 = vpop.f32.mrb[26].mxu1  ;;  %5878 = vmatprep.subr.bf16.mxu0 %v5652_v41  ;;  %7817 = vmatprep.subr.bf16.mxu1 %v5652_v41 }
 0xa66   : > { %v5621_v51 = vadd.f32 %v5620_v26, %v5499_v61  ;;  %v5622_v48 = vpop.f32.mrb[27].mxu1  ;;  %5879 = vmatpush1.bf16.msra.mxu0 %v5651_v7  ;;  %7822 = vmatpush1.bf16.msra.mxu1 %v5651_v7  ;;  %v5641_v37 = vmax.f32 %v5617_v5, 0.0 }
 0xa67   : > { %v5623_v45 = vadd.f32 %v5622_v48, %v5499_v61  ;;  %v5642_v0 = vmax.f32 %v5619_v25, 0.0  ;;  %v13647_v48 = vpop.permute.xlu0 %5697 }
 0xa68   : > { %v5643_v56 = vmax.f32 %v5621_v51, 0.0 }
 0xa69   : > { %v5644_v9 = vmax.f32 %v5623_v45, 0.0  ;;  %v13649_v45 = vpop.permute.xlu1 %5702 }
 0xa6a   : > { %v5653_v13 = vpack.c.bf16 %v5643_v56, %v5641_v37 }
 0xa6b   : > { %v5654_v47 = vpack.c.bf16 %v5644_v9, %v5642_v0 }
 0xa6d   : > { %5880 = vmatprep.subr.bf16.mxu0 %v5654_v47  ;;  %7818 = vmatprep.subr.bf16.mxu1 %v5654_v47 }
 0xa6e   : > { %5881 = vmatpush1.bf16.msra.mxu0 %v5653_v13  ;;  %7823 = vmatpush1.bf16.msra.mxu1 %v5653_v13 }
 0xa71   : > { %7800 = vmatmul.mubr.msk.bf16.vlgmr.msra.gmra.mrb[24].mxu0 %vm5835_vm13, %v7909_v30  ;;  %7807 = vmatmul.mubr.msk.bf16.vlgmr.msra.gmra.mrb[28].mxu1 %vm5835_vm13, %v7910_v58 }
 0xa72   : > { %5914 = vmatprep.mubr.bf16.mxu0 %v15476_v28  ;;  %5984 = vmatprep.mubr.bf16.mxu1 %v15476_v28 }
 0xa79   : > { %7801 = vmatmul.mubr.msk.bf16.gmra.mrb[28].mxu0 %vm5835_vm13, %v7911_v12  ;;  %7808 = vmatmul.mubr.msk.bf16.gmra.mrb[32].mxu1 %vm5835_vm13, %v7912_v62 }
 0xa7a   : > { %5924 = vmatprep.mubr.bf16.mxu0 %v15476_v28  ;;  %5994 = vmatprep.mubr.bf16.mxu1 %v15476_v28 }
 0xa81   : > { %7802 = vmatmul.mubr.msk.bf16.gmra.mrb[32].mxu0 %vm5835_vm13, %v7913_v8  ;;  %7809 = vmatmul.mubr.msk.bf16.gmra.mrb[36].mxu1 %vm5835_vm13, %v7914_v20 }
 0xa82   : > { %5934 = vmatprep.mubr.bf16.mxu0 %v15476_v28  ;;  %6004 = vmatprep.mubr.bf16.mxu1 %v15476_v28 }
 0xa89   : > { %7803 = vmatmul.mubr.msk.bf16.gmra.mrb[36].mxu0 %vm5835_vm13, %v7915_v49  ;;  %7810 = vmatmul.mubr.msk.bf16.gmra.mrb[40].mxu1 %vm5835_vm13, %v7916_v29  ;;  %v13673_v49 = vpop.permute.xlu0 %5707  ;;  %v13675_v29 = vpop.permute.xlu1 %5712 }
 0xa8a   : > { %5944 = vmatprep.mubr.bf16.mxu0 %v15476_v28  ;;  %6014 = vmatprep.mubr.bf16.mxu1 %v15476_v28 }
 0xa91   : > { %7804 = vmatmul.mubr.msk.bf16.gmra.mrb[40].mxu0 %vm5835_vm13, %v7917_v16  ;;  %7811 = vmatmul.mubr.msk.bf16.gmra.mrb[44].mxu1 %vm5835_vm13, %v7918_v50 }
 0xa92   : > { %5954 = vmatprep.mubr.bf16.mxu0 %v15476_v28 }
 0xa99   : > { %7805 = vmatmul.mubr.msk.bf16.gmra.mrb[44].mxu0 %vm5835_vm13, %v7919_v36 }
 0xa9a   : > { %5964 = vmatprep.mubr.bf16.mxu0 %v15476_v28 }
 0xaa1   : > { %7806 = vmatmul.mubr.msk.bf16.gmra.mrb[48].mxu0 %vm5835_vm13, %v7920_v1  ;;  %vm7576_vm13 = vcmask 203848  }
 0xb44   : > { %v5906_v42 = vpop.f32.mrb[24].mxu0  ;;  %v13575_v44 = vpop.f32.mrb[28].mxu1 }
 0xb45   : > { %v5907_v4 = vadd.f32 %v5906_v42, %v13567_v38  ;;  %v13578_v28 = vpop.f32.mrb[25].mxu0  ;;  %v13580_v52 = vpop.f32.mrb[29].mxu1 }
 0xb46   : > { %v5910_v27 = vpop.f32.mrb[26].mxu0  ;;  %v13582_v54 = vpop.f32.mrb[30].mxu1 }
 0xb47   : > { %v13584_v18 = vmax.f32 %v5907_v4, 0.0  ;;  %v5911_v17 = vadd.f32 %v5910_v27, %v13569_v22  ;;  %v13587_v57 = vpop.f32.mrb[27].mxu0  ;;  %v13589_v19 = vpop.f32.mrb[31].mxu1 }
 0xb48   : > { %15477 = vst [vmem:[#allocation2_spill] sm:$0xff] %v13589_v19 }
 0xb49   : > { %v13591_v32 = vmax.f32 %v5911_v17, 0.0  ;;  %6097 = vrot.lane.b32.xlu0 %v13584_v18, %s7992_s24 }
 0xb4b   : > { %6099 = vrot.lane.b32.xlu1 %v13591_v32, %s7992_s24 }
 0xb4c   : > { %v5916_v2 = vpop.f32.mrb[28].mxu0  ;;  %v13601_v23 = vpop.f32.mrb[32].mxu1 }
 0xb4d   : > { %v5917_v24 = vadd.f32 %v5916_v2, %v13571_v40  ;;  %v13604_v34 = vpop.f32.mrb[29].mxu0  ;;  %v13606_v6 = vpop.f32.mrb[33].mxu1 }
 0xb4e   : > { %15478 = vst [vmem:[#allocation6_spill] sm:$0xff] %v13606_v6  ;;  %v5920_v33 = vpop.f32.mrb[30].mxu0  ;;  %v13608_v35 = vpop.f32.mrb[34].mxu1 }
 0xb4f   : > { %v13610_v63 = vmax.f32 %v5917_v24, 0.0  ;;  %v5921_v55 = vadd.f32 %v5920_v33, %v13573_v3  ;;  %v13613_v11 = vpop.f32.mrb[31].mxu0  ;;  %v13615_v15 = vpop.f32.mrb[35].mxu1 }
 0xb50   : > { %15479 = vst [vmem:[#allocation9_spill] sm:$0xff] %v13615_v15 }
 0xb51   : > { %v13617_v31 = vmax.f32 %v5921_v55, 0.0  ;;  %6101 = vrot.lane.b32.xlu0 %v13610_v63, %s7992_s24  ;;  %v13695_v55 = vpop.permute.xlu0 %5717 }
 0xb53   : > { %6103 = vrot.lane.b32.xlu1 %v13617_v31, %s7992_s24 }
 0xb54   : > { %v5926_v59 = vpop.f32.mrb[32].mxu0  ;;  %v13627_v10 = vpop.f32.mrb[36].mxu1 }
 0xb55   : > { %v5927_v7 = vadd.f32 %v5926_v59, %v13595_v53  ;;  %v13630_v43 = vpop.f32.mrb[33].mxu0  ;;  %v13632_v41 = vpop.f32.mrb[37].mxu1 }
 0xb56   : > { %15480 = vst [vmem:[#allocation12_spill] sm:$0xff] %v13632_v41  ;;  %v5930_v39 = vpop.f32.mrb[34].mxu0  ;;  %v13634_v5 = vpop.f32.mrb[38].mxu1 }
 0xb57   : > { %v13636_v14 = vmax.f32 %v5927_v7, 0.0  ;;  %v5931_v61 = vadd.f32 %v5930_v39, %v13597_v21  ;;  %v13639_v25 = vpop.f32.mrb[35].mxu0  ;;  %v13641_v26 = vpop.f32.mrb[39].mxu1 }
 0xb58   : > { %15481 = vst [vmem:[#allocation3_spill] sm:$0xff] %v13641_v26  ;;  %v13701_v7 = vpop.permute.xlu1 %5722 }
 0xb59   : > { %v13643_v51 = vmax.f32 %v5931_v61, 0.0  ;;  %6105 = vrot.lane.b32.xlu0 %v13636_v14, %s7992_s24 }
 0xb5b   : > { %6107 = vrot.lane.b32.xlu1 %v13643_v51, %s7992_s24 }
 0xb5c   : > { %v5936_v37 = vpop.f32.mrb[36].mxu0  ;;  %v13653_v56 = vpop.f32.mrb[40].mxu1 }
 0xb5d   : > { %v5937_v0 = vadd.f32 %v5936_v37, %v13621_v60  ;;  %v13656_v9 = vpop.f32.mrb[37].mxu0  ;;  %v13658_v13 = vpop.f32.mrb[41].mxu1 }
 0xb5e   : > { %15482 = vst [vmem:[#allocation7_spill] sm:$0xff] %v13658_v13  ;;  %v5940_v47 = vpop.f32.mrb[38].mxu0  ;;  %v13660_v30 = vpop.f32.mrb[42].mxu1 }
 0xb5f   : > { %v13662_v58 = vmax.f32 %v5937_v0, 0.0  ;;  %v5941_v12 = vadd.f32 %v5940_v47, %v13623_v46  ;;  %v13665_v62 = vpop.f32.mrb[39].mxu0  ;;  %v13667_v8 = vpop.f32.mrb[43].mxu1 }
 0xb60   : > { %15483 = vst [vmem:[#allocation10_spill] sm:$0xff] %v13667_v8  ;;  %v13708_v0 = vpop.permute.xlu0 %5727 }
 0xb61   : > { %v13669_v20 = vmax.f32 %v5941_v12, 0.0  ;;  %6109 = vrot.lane.b32.xlu0 %v13662_v58, %s7992_s24 }
 0xb63   : > { %6111 = vrot.lane.b32.xlu1 %v13669_v20, %s7992_s24 }
 0xb64   : > { %v5946_v16 = vpop.f32.mrb[40].mxu0  ;;  %v13679_v50 = vpop.f32.mrb[44].mxu1 }
 0xb65   : > { %v5947_v36 = vadd.f32 %v5946_v16, %v13647_v48  ;;  %v13682_v1 = vpop.f32.mrb[41].mxu0  ;;  %v13684_v42 = vpop.f32.mrb[45].mxu1 }
 0xb66   : > { %15484 = vst [vmem:[#allocation13_spill] sm:$0xff] %v13684_v42  ;;  %v5950_v4 = vpop.f32.mrb[42].mxu0  ;;  %v13686_v27 = vpop.f32.mrb[46].mxu1 }
 0xb67   : > { %v13688_v17 = vmax.f32 %v5947_v36, 0.0  ;;  %v5951_v2 = vadd.f32 %v5950_v4, %v13649_v45  ;;  %v13691_v24 = vpop.f32.mrb[43].mxu0  ;;  %v13693_v33 = vpop.f32.mrb[47].mxu1 }
 0xb68   : > { %15485 = vst [vmem:[#allocation4_spill] sm:$0xff] %v13693_v33  ;;  %v13715_v4 = vpop.permute.xlu1 %5732 }
 0xb69   : > { %v13697_v59 = vmax.f32 %v5951_v2, 0.0  ;;  %6113 = vrot.lane.b32.xlu0 %v13688_v17, %s7992_s24  ;;  %v5981_v15 = vadd.f32 %v13582_v54, %v13715_v4 }
 0xb6b   : > { %6115 = vrot.lane.b32.xlu1 %v13697_v59, %s7992_s24 }
 0xb6c   : > { %v5956_v39 = vpop.f32.mrb[44].mxu0 }
 0xb6d   : > { %v5957_v61 = vadd.f32 %v5956_v39, %v13673_v49  ;;  %v13706_v37 = vpop.f32.mrb[45].mxu0  ;;  %v13723_v39 = vpop.permute.xlu0 %5737 }
 0xb6e   : > { %v5960_v47 = vpop.f32.mrb[46].mxu0  ;;  %15486 = vst [vmem:[#allocation8_spill] sm:$0xff] %v13723_v39 }
 0xb6f   : > { %v13710_v12 = vmax.f32 %v5957_v61, 0.0  ;;  %v5961_v16 = vadd.f32 %v5960_v47, %v13675_v29  ;;  %v13713_v36 = vpop.f32.mrb[47].mxu0  ;;  %v13728_v47 = vpop.permute.xlu1 %5742 }
 0xb70   : > { %v5991_v54 = vadd.f32 %v13608_v35, %v13728_v47 }
 0xb71   : > { %v13717_v2 = vmax.f32 %v5961_v16, 0.0  ;;  %6117 = vrot.lane.b32.xlu0 %v13710_v12, %s7992_s24  ;;  %v5977_v16 = vadd.f32 %v13575_v44, %v13708_v0  ;;  %v5987_v44 = vadd.f32 %v13601_v23, %v13723_v39 }
 0xb72   : > { %v13767_v39 = vmax.f32 %v5991_v54, 0.0 }
 0xb73   : > { %6119 = vrot.lane.b32.xlu1 %v13717_v2, %s7992_s24  ;;  %v13745_v19 = vmax.f32 %v5977_v16, 0.0 }
 0xb74   : > { %v5966_v33 = vpop.f32.mrb[48].mxu0 }
 0xb75   : > { %v5967_v61 = vadd.f32 %v5966_v33, %v13695_v55  ;;  %v13726_v42 = vpop.f32.mrb[49].mxu0  ;;  %v13743_v33 = vpop.permute.xlu0 %5747 }
 0xb76   : > { %v5970_v8 = vpop.f32.mrb[50].mxu0  ;;  %15487 = vst [vmem:[#allocation11_spill] sm:$0xff] %v13743_v33  ;;  %v5997_v16 = vadd.f32 %v13627_v10, %v13743_v33 }
 0xb77   : > { %v13732_v13 = vmax.f32 %v5967_v61, 0.0  ;;  %v5971_v26 = vadd.f32 %v5970_v8, %v13701_v7  ;;  %v13735_v41 = vpop.f32.mrb[51].mxu0  ;;  %v13751_v8 = vpop.permute.xlu1 %5752  ;;  %v13753_v61 = vmax.f32 %v5981_v15, 0.0 }
 0xb78   : > { %15488 = vst [vmem:[#allocation14_spill] sm:$0xff] %v13751_v8  ;;  %v6001_v15 = vadd.f32 %v13634_v5, %v13751_v8 }
 0xb79   : > { %v13739_v6 = vmax.f32 %v5971_v26, 0.0  ;;  %6121 = vrot.lane.b32.xlu0 %v13732_v13, %s7992_s24  ;;  %v13759_v26 = vmax.f32 %v5987_v44, 0.0  ;;  %v13765_v23 = vpop.permute.xlu0 %5757  ;;  %v13775_v44 = vmax.f32 %v5997_v16, 0.0 }
 0xb7a   : > { %v6007_v10 = vadd.f32 %v13653_v56, %v13765_v23  ;;  %v13781_v33 = vmax.f32 %v6001_v15, 0.0 }
 0xb7b   : > { %6123 = vrot.lane.b32.xlu1 %v13739_v6, %s7992_s24  ;;  %v13773_v35 = vpop.permute.xlu1 %5762 }
 0xb7c   : > { %15489 = vst [vmem:[#allocation5_spill] sm:$0xff] %v13773_v35  ;;  %v6011_v54 = vadd.f32 %v13660_v30, %v13773_v35  ;;  %v13789_v8 = vmax.f32 %v6007_v10, 0.0 }
 0xb7d   : > { %6125 = vrot.lane.b32.xlu0 %v13745_v19, %s7992_s24  ;;  %v13787_v5 = vpop.permute.xlu0 %5767 }
 0xb7e   : > { %v6017_v16 = vadd.f32 %v13679_v50, %v13787_v5  ;;  %v13797_v15 = vmax.f32 %v6011_v54, 0.0 }
 0xb7f   : > { %6127 = vrot.lane.b32.xlu1 %v13753_v61, %s7992_s24  ;;  %v13795_v56 = vpop.permute.xlu1 %5772 }
 0xb80   : > { %v6021_v30 = vadd.f32 %v13686_v27, %v13795_v56  ;;  %v13803_v35 = vmax.f32 %v6017_v16, 0.0 }
 0xb81   : > { %6129 = vrot.lane.b32.xlu0 %v13759_v26, %s7992_s24 }
 0xb82   : > { %v13807_v10 = vmax.f32 %v6021_v30, 0.0 }
 0xb83   : > { %6131 = vrot.lane.b32.xlu1 %v13767_v39, %s7992_s24 }
 0xb85   : > { %6133 = vrot.lane.b32.xlu0 %v13775_v44, %s7992_s24 }
 0xb87   : > { %6135 = vrot.lane.b32.xlu1 %v13781_v33, %s7992_s24 }
 0xb89   : > { %6137 = vrot.lane.b32.xlu0 %v13789_v8, %s7992_s24 }
 0xb8b   : > { %6139 = vrot.lane.b32.xlu1 %v13797_v15, %s7992_s24 }
 0xb8d   : > { %6141 = vrot.lane.b32.xlu0 %v13803_v35, %s7992_s24 }
 0xb8f   : > { %6143 = vrot.lane.b32.xlu1 %v13807_v10, %s7992_s24 }
 0xb91   : > { %6194 = vrot.lane.b32.xlu0 %v13584_v18, %s7993_s25 }
 0xb93   : > { %6196 = vrot.lane.b32.xlu1 %v13591_v32, %s7993_s25 }
 0xb95   : > { %6198 = vrot.lane.b32.xlu0 %v13610_v63, %s7993_s25 }
 0xb97   : > { %6200 = vrot.lane.b32.xlu1 %v13617_v31, %s7993_s25 }
 0xb99   : > { %6202 = vrot.lane.b32.xlu0 %v13636_v14, %s7993_s25 }
 0xb9b   : > { %6204 = vrot.lane.b32.xlu1 %v13643_v51, %s7993_s25 }
 0xb9d   : > { %6206 = vrot.lane.b32.xlu0 %v13662_v58, %s7993_s25 }
 0xb9f   : > { %6208 = vrot.lane.b32.xlu1 %v13669_v20, %s7993_s25 }
 0xba1   : > { %6210 = vrot.lane.b32.xlu0 %v13688_v17, %s7993_s25 }
 0xba3   : > { %6212 = vrot.lane.b32.xlu1 %v13697_v59, %s7993_s25 }
 0xba5   : > { %6214 = vrot.lane.b32.xlu0 %v13710_v12, %s7993_s25 }
 0xba7   : > { %6216 = vrot.lane.b32.xlu1 %v13717_v2, %s7993_s25 }
 0xba9   : > { %6218 = vrot.lane.b32.xlu0 %v13732_v13, %s7993_s25 }
 0xbab   : > { %6220 = vrot.lane.b32.xlu1 %v13739_v6, %s7993_s25 }
 0xbad   : > { %6222 = vrot.lane.b32.xlu0 %v13745_v19, %s7993_s25 }
 0xbaf   : > { %6224 = vrot.lane.b32.xlu1 %v13753_v61, %s7993_s25 }
 0xbb1   : > { %6226 = vrot.lane.b32.xlu0 %v13759_v26, %s7993_s25 }
 0xbb3   : > { %6228 = vrot.lane.b32.xlu1 %v13767_v39, %s7993_s25 }
 0xbb5   : > { %6230 = vrot.lane.b32.xlu0 %v13775_v44, %s7993_s25 }
 0xbb7   : > { %6232 = vrot.lane.b32.xlu1 %v13781_v33, %s7993_s25 }
 0xbb9   : > { %6234 = vrot.lane.b32.xlu0 %v13789_v8, %s7993_s25 }
 0xbbb   : > { %6236 = vrot.lane.b32.xlu1 %v13797_v15, %s7993_s25  ;;  %v6098_v50 = vpop.permute.xlu0 %6097 }
 0xbbc   : > { %6170 = vst.msk [vmem:[%s8230_s26 + $0x40] sm:$0xff] %vm6169_vm14, %v6098_v50 }
 0xbbd   : > { %v6100_v27 = vpop.permute.xlu1 %6099  ;;  %6238 = vrot.lane.b32.xlu0 %v13803_v35, %s7993_s25 }
 0xbbe   : > { %6171 = vst.msk [vmem:[%s8230_s26 + $0xf8] sm:$0xff] %vm6169_vm14, %v6100_v27 }
 0xbbf   : > { %6240 = vrot.lane.b32.xlu1 %v13807_v10, %s7993_s25 }
 0xbc1   : > { %6291 = vrot.lane.b32.xlu0 %v13584_v18, %s7994_s27 }
 0xbc3   : > { %6293 = vrot.lane.b32.xlu1 %v13591_v32, %s7994_s27  ;;  %v6102_v54 = vpop.permute.xlu0 %6101 }
 0xbc4   : > { %6172 = vst.msk [vmem:[%s8230_s26 + $0x1b0] sm:$0xff] %vm6169_vm14, %v6102_v54 }
 0xbc5   : > { %v6104_v16 = vpop.permute.xlu1 %6103  ;;  %6295 = vrot.lane.b32.xlu0 %v13610_v63, %s7994_s27 }
 0xbc6   : > { %6173 = vst.msk [vmem:[%s8230_s26 + $0x268] sm:$0xff] %vm6169_vm14, %v6104_v16 }
 0xbc7   : > { %6297 = vrot.lane.b32.xlu1 %v13617_v31, %s7994_s27 }
 0xbc9   : > { %6299 = vrot.lane.b32.xlu0 %v13636_v14, %s7994_s27 }
 0xbcb   : > { %6301 = vrot.lane.b32.xlu1 %v13643_v51, %s7994_s27  ;;  %v6106_v30 = vpop.permute.xlu0 %6105 }
 0xbcc   : > { %6174 = vst.msk [vmem:[%s8230_s26 + $0x320] sm:$0xff] %vm6169_vm14, %v6106_v30 }
 0xbcd   : > { %v6108_v50 = vpop.permute.xlu1 %6107  ;;  %6303 = vrot.lane.b32.xlu0 %v13662_v58, %s7994_s27 }
 0xbce   : > { %6175 = vst.msk [vmem:[%s8230_s26 + $0x3d8] sm:$0xff] %vm6169_vm14, %v6108_v50 }
 0xbcf   : > { %6305 = vrot.lane.b32.xlu1 %v13669_v20, %s7994_s27 }
 0xbd1   : > { %6307 = vrot.lane.b32.xlu0 %v13688_v17, %s7994_s27 }
 0xbd3   : > { %6309 = vrot.lane.b32.xlu1 %v13697_v59, %s7994_s27  ;;  %v6110_v27 = vpop.permute.xlu0 %6109 }
 0xbd4   : > { %6176 = vst.msk [vmem:[%s8230_s26 + $0x490] sm:$0xff] %vm6169_vm14, %v6110_v27 }
 0xbd5   : > { %v6112_v54 = vpop.permute.xlu1 %6111  ;;  %6311 = vrot.lane.b32.xlu0 %v13710_v12, %s7994_s27 }
 0xbd6   : > { %6177 = vst.msk [vmem:[%s8230_s26 + $0x548] sm:$0xff] %vm6169_vm14, %v6112_v54 }
 0xbd7   : > { %6313 = vrot.lane.b32.xlu1 %v13717_v2, %s7994_s27 }
 0xbd9   : > { %6315 = vrot.lane.b32.xlu0 %v13732_v13, %s7994_s27 }
 0xbdb   : > { %6317 = vrot.lane.b32.xlu1 %v13739_v6, %s7994_s27  ;;  %v6114_v16 = vpop.permute.xlu0 %6113 }
 0xbdc   : > { %6178 = vst.msk [vmem:[%s8230_s26 + $0x600] sm:$0xff] %vm6169_vm14, %v6114_v16 }
 0xbdd   : > { %v6116_v30 = vpop.permute.xlu1 %6115  ;;  %6319 = vrot.lane.b32.xlu0 %v13745_v19, %s7994_s27 }
 0xbde   : > { %6179 = vst.msk [vmem:[%s8230_s26 + $0x6b8] sm:$0xff] %vm6169_vm14, %v6116_v30 }
 0xbdf   : > { %6321 = vrot.lane.b32.xlu1 %v13753_v61, %s7994_s27 }
 0xbe1   : > { %6323 = vrot.lane.b32.xlu0 %v13759_v26, %s7994_s27 }
 0xbe3   : > { %6325 = vrot.lane.b32.xlu1 %v13767_v39, %s7994_s27  ;;  %v6118_v50 = vpop.permute.xlu0 %6117 }
 0xbe4   : > { %6180 = vst.msk [vmem:[%s8230_s26 + $0x770] sm:$0xff] %vm6169_vm14, %v6118_v50 }
 0xbe5   : > { %v6120_v27 = vpop.permute.xlu1 %6119  ;;  %6327 = vrot.lane.b32.xlu0 %v13775_v44, %s7994_s27 }
 0xbe6   : > { %6181 = vst.msk [vmem:[%s8230_s26 + $0x828] sm:$0xff] %vm6169_vm14, %v6120_v27 }
 0xbe7   : > { %6329 = vrot.lane.b32.xlu1 %v13781_v33, %s7994_s27 }
 0xbe9   : > { %6331 = vrot.lane.b32.xlu0 %v13789_v8, %s7994_s27 }
 0xbeb   : > { %6333 = vrot.lane.b32.xlu1 %v13797_v15, %s7994_s27  ;;  %v6122_v54 = vpop.permute.xlu0 %6121 }
 0xbec   : > { %6182 = vst.msk [vmem:[%s8230_s26 + $0x8e0] sm:$0xff] %vm6169_vm14, %v6122_v54 }
 0xbed   : > { %v6124_v16 = vpop.permute.xlu1 %6123  ;;  %6335 = vrot.lane.b32.xlu0 %v13803_v35, %s7994_s27 }
 0xbee   : > { %6183 = vst.msk [vmem:[%s8230_s26 + $0x998] sm:$0xff] %vm6169_vm14, %v6124_v16 }
 0xbef   : > { %6337 = vrot.lane.b32.xlu1 %v13807_v10, %s7994_s27  ;;  %v6126_v30 = vpop.permute.xlu0 %6125 }
 0xbf0   : > { %6184 = vst.msk [vmem:[%s8230_s26 + $0xa50] sm:$0xff] %vm6169_vm14, %v6126_v30 }
 0xbf1   : > { %v6128_v50 = vpop.permute.xlu1 %6127  ;;  %6388 = vrot.lane.b32.xlu0 %v13584_v18, %s7995_s28 }
 0xbf2   : > { %6185 = vst.msk [vmem:[%s8230_s26 + $0xb08] sm:$0xff] %vm6169_vm14, %v6128_v50 }
 0xbf3   : > { %6390 = vrot.lane.b32.xlu1 %v13591_v32, %s7995_s28  ;;  %v6130_v27 = vpop.permute.xlu0 %6129 }
 0xbf4   : > { %6186 = vst.msk [vmem:[%s8230_s26 + $0xbc0] sm:$0xff] %vm6169_vm14, %v6130_v27 }
 0xbf5   : > { %v6132_v54 = vpop.permute.xlu1 %6131  ;;  %6392 = vrot.lane.b32.xlu0 %v13610_v63, %s7995_s28 }
 0xbf6   : > { %6187 = vst.msk [vmem:[%s8230_s26 + $0xc78] sm:$0xff] %vm6169_vm14, %v6132_v54 }
 0xbf7   : > { %6394 = vrot.lane.b32.xlu1 %v13617_v31, %s7995_s28  ;;  %v6134_v16 = vpop.permute.xlu0 %6133 }
 0xbf8   : > { %6188 = vst.msk [vmem:[%s8230_s26 + $0xd30] sm:$0xff] %vm6169_vm14, %v6134_v16 }
 0xbf9   : > { %v6136_v30 = vpop.permute.xlu1 %6135  ;;  %6396 = vrot.lane.b32.xlu0 %v13636_v14, %s7995_s28 }
 0xbfa   : > { %6189 = vst.msk [vmem:[%s8230_s26 + $0xde8] sm:$0xff] %vm6169_vm14, %v6136_v30 }
 0xbfb   : > { %6398 = vrot.lane.b32.xlu1 %v13643_v51, %s7995_s28  ;;  %v6138_v50 = vpop.permute.xlu0 %6137 }
 0xbfc   : > { %6190 = vst.msk [vmem:[%s8230_s26 + $0xea0] sm:$0xff] %vm6169_vm14, %v6138_v50 }
 0xbfd   : > { %v6140_v27 = vpop.permute.xlu1 %6139  ;;  %6400 = vrot.lane.b32.xlu0 %v13662_v58, %s7995_s28 }
 0xbfe   : > { %6191 = vst.msk [vmem:[%s8230_s26 + $0xf58] sm:$0xff] %vm6169_vm14, %v6140_v27 }
 0xbff   : > { %6402 = vrot.lane.b32.xlu1 %v13669_v20, %s7995_s28  ;;  %v6142_v54 = vpop.permute.xlu0 %6141 }
 0xc00   : > { %6192 = vst.msk [vmem:[%s8230_s26 + $0x1010] sm:$0xff] %vm6169_vm14, %v6142_v54 }
 0xc01   : > { %v6144_v16 = vpop.permute.xlu1 %6143  ;;  %6404 = vrot.lane.b32.xlu0 %v13688_v17, %s7995_s28 }
 0xc02   : > { %6193 = vst.msk [vmem:[%s8230_s26 + $0x10c8] sm:$0xff] %vm6169_vm14, %v6144_v16  ;;  %vm7673_vm14 = vcmask 646648  }
 0xc03   : > { %6406 = vrot.lane.b32.xlu1 %v13697_v59, %s7995_s28  ;;  %v6195_v30 = vpop.permute.xlu0 %6194 }
 0xc04   : > { %6267 = vst.msk [vmem:[%s8230_s26 + $0x40] sm:$0xff] %vm6266_vm15, %v6195_v30 }
 0xc05   : > { %v6197_v50 = vpop.permute.xlu1 %6196  ;;  %6408 = vrot.lane.b32.xlu0 %v13710_v12, %s7995_s28 }
 0xc06   : > { %6268 = vst.msk [vmem:[%s8230_s26 + $0xf8] sm:$0xff] %vm6266_vm15, %v6197_v50 }
 0xc07   : > { %6410 = vrot.lane.b32.xlu1 %v13717_v2, %s7995_s28  ;;  %v6199_v27 = vpop.permute.xlu0 %6198 }
 0xc08   : > { %6269 = vst.msk [vmem:[%s8230_s26 + $0x1b0] sm:$0xff] %vm6266_vm15, %v6199_v27 }
 0xc09   : > { %v6201_v54 = vpop.permute.xlu1 %6200  ;;  %6412 = vrot.lane.b32.xlu0 %v13732_v13, %s7995_s28 }
 0xc0a   : > { %6270 = vst.msk [vmem:[%s8230_s26 + $0x268] sm:$0xff] %vm6266_vm15, %v6201_v54 }
 0xc0b   : > { %6414 = vrot.lane.b32.xlu1 %v13739_v6, %s7995_s28  ;;  %v6203_v16 = vpop.permute.xlu0 %6202 }
 0xc0c   : > { %6271 = vst.msk [vmem:[%s8230_s26 + $0x320] sm:$0xff] %vm6266_vm15, %v6203_v16 }
 0xc0d   : > { %v6205_v30 = vpop.permute.xlu1 %6204  ;;  %6416 = vrot.lane.b32.xlu0 %v13745_v19, %s7995_s28 }
 0xc0e   : > { %6272 = vst.msk [vmem:[%s8230_s26 + $0x3d8] sm:$0xff] %vm6266_vm15, %v6205_v30 }
 0xc0f   : > { %6418 = vrot.lane.b32.xlu1 %v13753_v61, %s7995_s28  ;;  %v6207_v50 = vpop.permute.xlu0 %6206 }
 0xc10   : > { %6273 = vst.msk [vmem:[%s8230_s26 + $0x490] sm:$0xff] %vm6266_vm15, %v6207_v50 }
 0xc11   : > { %v6209_v27 = vpop.permute.xlu1 %6208  ;;  %6420 = vrot.lane.b32.xlu0 %v13759_v26, %s7995_s28 }
 0xc12   : > { %6274 = vst.msk [vmem:[%s8230_s26 + $0x548] sm:$0xff] %vm6266_vm15, %v6209_v27 }
 0xc13   : > { %6422 = vrot.lane.b32.xlu1 %v13767_v39, %s7995_s28  ;;  %v6211_v54 = vpop.permute.xlu0 %6210 }
 0xc14   : > { %6275 = vst.msk [vmem:[%s8230_s26 + $0x600] sm:$0xff] %vm6266_vm15, %v6211_v54 }
 0xc15   : > { %v6213_v16 = vpop.permute.xlu1 %6212  ;;  %6424 = vrot.lane.b32.xlu0 %v13775_v44, %s7995_s28 }
 0xc16   : > { %6276 = vst.msk [vmem:[%s8230_s26 + $0x6b8] sm:$0xff] %vm6266_vm15, %v6213_v16 }
 0xc17   : > { %6426 = vrot.lane.b32.xlu1 %v13781_v33, %s7995_s28  ;;  %v6215_v30 = vpop.permute.xlu0 %6214 }
 0xc18   : > { %6277 = vst.msk [vmem:[%s8230_s26 + $0x770] sm:$0xff] %vm6266_vm15, %v6215_v30 }
 0xc19   : > { %v6217_v50 = vpop.permute.xlu1 %6216  ;;  %6428 = vrot.lane.b32.xlu0 %v13789_v8, %s7995_s28 }
 0xc1a   : > { %6278 = vst.msk [vmem:[%s8230_s26 + $0x828] sm:$0xff] %vm6266_vm15, %v6217_v50 }
 0xc1b   : > { %6430 = vrot.lane.b32.xlu1 %v13797_v15, %s7995_s28  ;;  %v6219_v27 = vpop.permute.xlu0 %6218 }
 0xc1c   : > { %6279 = vst.msk [vmem:[%s8230_s26 + $0x8e0] sm:$0xff] %vm6266_vm15, %v6219_v27 }
 0xc1d   : > { %v6221_v54 = vpop.permute.xlu1 %6220  ;;  %6432 = vrot.lane.b32.xlu0 %v13803_v35, %s7995_s28 }
 0xc1e   : > { %6280 = vst.msk [vmem:[%s8230_s26 + $0x998] sm:$0xff] %vm6266_vm15, %v6221_v54 }
 0xc1f   : > { %6434 = vrot.lane.b32.xlu1 %v13807_v10, %s7995_s28  ;;  %v6223_v16 = vpop.permute.xlu0 %6222 }
 0xc20   : > { %6281 = vst.msk [vmem:[%s8230_s26 + $0xa50] sm:$0xff] %vm6266_vm15, %v6223_v16 }
 0xc21   : > { %v6225_v30 = vpop.permute.xlu1 %6224  ;;  %6485 = vrot.lane.b32.xlu0 %v13584_v18, %s7996_s22 }
 0xc22   : > { %6282 = vst.msk [vmem:[%s8230_s26 + $0xb08] sm:$0xff] %vm6266_vm15, %v6225_v30 }
 0xc23   : > { %6487 = vrot.lane.b32.xlu1 %v13591_v32, %s7996_s22  ;;  %v6227_v50 = vpop.permute.xlu0 %6226 }
 0xc24   : > { %6283 = vst.msk [vmem:[%s8230_s26 + $0xbc0] sm:$0xff] %vm6266_vm15, %v6227_v50 }
 0xc25   : > { %v6229_v27 = vpop.permute.xlu1 %6228  ;;  %6489 = vrot.lane.b32.xlu0 %v13610_v63, %s7996_s22 }
 0xc26   : > { %6284 = vst.msk [vmem:[%s8230_s26 + $0xc78] sm:$0xff] %vm6266_vm15, %v6229_v27 }
 0xc27   : > { %6491 = vrot.lane.b32.xlu1 %v13617_v31, %s7996_s22  ;;  %v6231_v54 = vpop.permute.xlu0 %6230 }
 0xc28   : > { %6285 = vst.msk [vmem:[%s8230_s26 + $0xd30] sm:$0xff] %vm6266_vm15, %v6231_v54 }
 0xc29   : > { %v6233_v16 = vpop.permute.xlu1 %6232  ;;  %6493 = vrot.lane.b32.xlu0 %v13636_v14, %s7996_s22 }
 0xc2a   : > { %6286 = vst.msk [vmem:[%s8230_s26 + $0xde8] sm:$0xff] %vm6266_vm15, %v6233_v16 }
 0xc2b   : > { %6495 = vrot.lane.b32.xlu1 %v13643_v51, %s7996_s22  ;;  %v6235_v30 = vpop.permute.xlu0 %6234 }
 0xc2c   : > { %6287 = vst.msk [vmem:[%s8230_s26 + $0xea0] sm:$0xff] %vm6266_vm15, %v6235_v30 }
 0xc2d   : > { %v6237_v50 = vpop.permute.xlu1 %6236  ;;  %6497 = vrot.lane.b32.xlu0 %v13662_v58, %s7996_s22 }
 0xc2e   : > { %6288 = vst.msk [vmem:[%s8230_s26 + $0xf58] sm:$0xff] %vm6266_vm15, %v6237_v50 }
 0xc2f   : > { %6499 = vrot.lane.b32.xlu1 %v13669_v20, %s7996_s22  ;;  %v6239_v27 = vpop.permute.xlu0 %6238 }
 0xc30   : > { %6289 = vst.msk [vmem:[%s8230_s26 + $0x1010] sm:$0xff] %vm6266_vm15, %v6239_v27 }
 0xc31   : > { %v6241_v54 = vpop.permute.xlu1 %6240  ;;  %6501 = vrot.lane.b32.xlu0 %v13688_v17, %s7996_s22 }
 0xc32   : > { %6290 = vst.msk [vmem:[%s8230_s26 + $0x10c8] sm:$0xff] %vm6266_vm15, %v6241_v54 }
 0xc33   : > { %6503 = vrot.lane.b32.xlu1 %v13697_v59, %s7996_s22  ;;  %v6292_v16 = vpop.permute.xlu0 %6291 }
 0xc34   : > { %6364 = vst.msk [vmem:[%s8230_s26 + $0x48] sm:$0xff] %vm6363_vm0, %v6292_v16 }
 0xc35   : > { %v6294_v30 = vpop.permute.xlu1 %6293  ;;  %6505 = vrot.lane.b32.xlu0 %v13710_v12, %s7996_s22 }
 0xc36   : > { %6365 = vst.msk [vmem:[%s8230_s26 + $0x100] sm:$0xff] %vm6363_vm0, %v6294_v30 }
 0xc37   : > { %6507 = vrot.lane.b32.xlu1 %v13717_v2, %s7996_s22  ;;  %v6296_v50 = vpop.permute.xlu0 %6295 }
 0xc38   : > { %6366 = vst.msk [vmem:[%s8230_s26 + $0x1b8] sm:$0xff] %vm6363_vm0, %v6296_v50 }
 0xc39   : > { %v6298_v27 = vpop.permute.xlu1 %6297  ;;  %6509 = vrot.lane.b32.xlu0 %v13732_v13, %s7996_s22 }
 0xc3a   : > { %6367 = vst.msk [vmem:[%s8230_s26 + $0x270] sm:$0xff] %vm6363_vm0, %v6298_v27 }
 0xc3b   : > { %6511 = vrot.lane.b32.xlu1 %v13739_v6, %s7996_s22  ;;  %v6300_v54 = vpop.permute.xlu0 %6299 }
 0xc3c   : > { %6368 = vst.msk [vmem:[%s8230_s26 + $0x328] sm:$0xff] %vm6363_vm0, %v6300_v54 }
 0xc3d   : > { %v6302_v16 = vpop.permute.xlu1 %6301  ;;  %6513 = vrot.lane.b32.xlu0 %v13745_v19, %s7996_s22 }
 0xc3e   : > { %6369 = vst.msk [vmem:[%s8230_s26 + $0x3e0] sm:$0xff] %vm6363_vm0, %v6302_v16 }
 0xc3f   : > { %6515 = vrot.lane.b32.xlu1 %v13753_v61, %s7996_s22  ;;  %v6304_v30 = vpop.permute.xlu0 %6303 }
 0xc40   : > { %6370 = vst.msk [vmem:[%s8230_s26 + $0x498] sm:$0xff] %vm6363_vm0, %v6304_v30 }
 0xc41   : > { %v6306_v50 = vpop.permute.xlu1 %6305  ;;  %6517 = vrot.lane.b32.xlu0 %v13759_v26, %s7996_s22 }
 0xc42   : > { %6371 = vst.msk [vmem:[%s8230_s26 + $0x550] sm:$0xff] %vm6363_vm0, %v6306_v50 }
 0xc43   : > { %6519 = vrot.lane.b32.xlu1 %v13767_v39, %s7996_s22  ;;  %v6308_v27 = vpop.permute.xlu0 %6307 }
 0xc44   : > { %6372 = vst.msk [vmem:[%s8230_s26 + $0x608] sm:$0xff] %vm6363_vm0, %v6308_v27 }
 0xc45   : > { %v6310_v54 = vpop.permute.xlu1 %6309  ;;  %6521 = vrot.lane.b32.xlu0 %v13775_v44, %s7996_s22 }
 0xc46   : > { %6373 = vst.msk [vmem:[%s8230_s26 + $0x6c0] sm:$0xff] %vm6363_vm0, %v6310_v54 }
 0xc47   : > { %6523 = vrot.lane.b32.xlu1 %v13781_v33, %s7996_s22  ;;  %v6312_v16 = vpop.permute.xlu0 %6311 }
 0xc48   : > { %6374 = vst.msk [vmem:[%s8230_s26 + $0x778] sm:$0xff] %vm6363_vm0, %v6312_v16 }
 0xc49   : > { %v6314_v30 = vpop.permute.xlu1 %6313  ;;  %6525 = vrot.lane.b32.xlu0 %v13789_v8, %s7996_s22 }
 0xc4a   : > { %6375 = vst.msk [vmem:[%s8230_s26 + $0x830] sm:$0xff] %vm6363_vm0, %v6314_v30 }
 0xc4b   : > { %6527 = vrot.lane.b32.xlu1 %v13797_v15, %s7996_s22  ;;  %v6316_v50 = vpop.permute.xlu0 %6315 }
 0xc4c   : > { %6376 = vst.msk [vmem:[%s8230_s26 + $0x8e8] sm:$0xff] %vm6363_vm0, %v6316_v50 }
 0xc4d   : > { %v6318_v27 = vpop.permute.xlu1 %6317  ;;  %6529 = vrot.lane.b32.xlu0 %v13803_v35, %s7996_s22 }
 0xc4e   : > { %6377 = vst.msk [vmem:[%s8230_s26 + $0x9a0] sm:$0xff] %vm6363_vm0, %v6318_v27 }
 0xc4f   : > { %6531 = vrot.lane.b32.xlu1 %v13807_v10, %s7996_s22  ;;  %v6320_v54 = vpop.permute.xlu0 %6319 }
 0xc50   : > { %6378 = vst.msk [vmem:[%s8230_s26 + $0xa58] sm:$0xff] %vm6363_vm0, %v6320_v54 }
 0xc51   : > { %v6322_v16 = vpop.permute.xlu1 %6321  ;;  %6582 = vrot.lane.b32.xlu0 %v13584_v18, %s7997_s29 }
 0xc52   : > { %6379 = vst.msk [vmem:[%s8230_s26 + $0xb10] sm:$0xff] %vm6363_vm0, %v6322_v16 }
 0xc53   : > { %6584 = vrot.lane.b32.xlu1 %v13591_v32, %s7997_s29  ;;  %v6324_v30 = vpop.permute.xlu0 %6323 }
 0xc54   : > { %6380 = vst.msk [vmem:[%s8230_s26 + $0xbc8] sm:$0xff] %vm6363_vm0, %v6324_v30 }
 0xc55   : > { %v6326_v50 = vpop.permute.xlu1 %6325  ;;  %6586 = vrot.lane.b32.xlu0 %v13610_v63, %s7997_s29 }
 0xc56   : > { %6381 = vst.msk [vmem:[%s8230_s26 + $0xc80] sm:$0xff] %vm6363_vm0, %v6326_v50 }
 0xc57   : > { %6588 = vrot.lane.b32.xlu1 %v13617_v31, %s7997_s29  ;;  %v6328_v27 = vpop.permute.xlu0 %6327 }
 0xc58   : > { %6382 = vst.msk [vmem:[%s8230_s26 + $0xd38] sm:$0xff] %vm6363_vm0, %v6328_v27 }
 0xc59   : > { %v6330_v54 = vpop.permute.xlu1 %6329  ;;  %6590 = vrot.lane.b32.xlu0 %v13636_v14, %s7997_s29 }
 0xc5a   : > { %6383 = vst.msk [vmem:[%s8230_s26 + $0xdf0] sm:$0xff] %vm6363_vm0, %v6330_v54 }
 0xc5b   : > { %6592 = vrot.lane.b32.xlu1 %v13643_v51, %s7997_s29  ;;  %v6332_v16 = vpop.permute.xlu0 %6331 }
 0xc5c   : > { %6384 = vst.msk [vmem:[%s8230_s26 + $0xea8] sm:$0xff] %vm6363_vm0, %v6332_v16 }
 0xc5d   : > { %v6334_v30 = vpop.permute.xlu1 %6333  ;;  %6594 = vrot.lane.b32.xlu0 %v13662_v58, %s7997_s29 }
 0xc5e   : > { %6385 = vst.msk [vmem:[%s8230_s26 + $0xf60] sm:$0xff] %vm6363_vm0, %v6334_v30 }
 0xc5f   : > { %6596 = vrot.lane.b32.xlu1 %v13669_v20, %s7997_s29  ;;  %v6336_v50 = vpop.permute.xlu0 %6335 }
 0xc60   : > { %6386 = vst.msk [vmem:[%s8230_s26 + $0x1018] sm:$0xff] %vm6363_vm0, %v6336_v50 }
 0xc61   : > { %v6338_v27 = vpop.permute.xlu1 %6337  ;;  %6598 = vrot.lane.b32.xlu0 %v13688_v17, %s7997_s29 }
 0xc62   : > { %6387 = vst.msk [vmem:[%s8230_s26 + $0x10d0] sm:$0xff] %vm6363_vm0, %v6338_v27 }
 0xc63   : > { %6600 = vrot.lane.b32.xlu1 %v13697_v59, %s7997_s29  ;;  %v6389_v54 = vpop.permute.xlu0 %6388 }
 0xc64   : > { %6461 = vst.msk [vmem:[%s8230_s26 + $0x48] sm:$0xff] %vm6460_vm1, %v6389_v54 }
 0xc65   : > { %v6391_v16 = vpop.permute.xlu1 %6390  ;;  %6602 = vrot.lane.b32.xlu0 %v13710_v12, %s7997_s29 }
 0xc66   : > { %6462 = vst.msk [vmem:[%s8230_s26 + $0x100] sm:$0xff] %vm6460_vm1, %v6391_v16 }
 0xc67   : > { %6604 = vrot.lane.b32.xlu1 %v13717_v2, %s7997_s29  ;;  %v6393_v30 = vpop.permute.xlu0 %6392 }
 0xc68   : > { %6463 = vst.msk [vmem:[%s8230_s26 + $0x1b8] sm:$0xff] %vm6460_vm1, %v6393_v30 }
 0xc69   : > { %v6395_v50 = vpop.permute.xlu1 %6394  ;;  %6606 = vrot.lane.b32.xlu0 %v13732_v13, %s7997_s29 }
 0xc6a   : > { %6464 = vst.msk [vmem:[%s8230_s26 + $0x270] sm:$0xff] %vm6460_vm1, %v6395_v50 }
 0xc6b   : > { %6608 = vrot.lane.b32.xlu1 %v13739_v6, %s7997_s29  ;;  %v6397_v27 = vpop.permute.xlu0 %6396 }
 0xc6c   : > { %6465 = vst.msk [vmem:[%s8230_s26 + $0x328] sm:$0xff] %vm6460_vm1, %v6397_v27 }
 0xc6d   : > { %v6399_v54 = vpop.permute.xlu1 %6398  ;;  %6610 = vrot.lane.b32.xlu0 %v13745_v19, %s7997_s29 }
 0xc6e   : > { %6466 = vst.msk [vmem:[%s8230_s26 + $0x3e0] sm:$0xff] %vm6460_vm1, %v6399_v54 }
 0xc6f   : > { %6612 = vrot.lane.b32.xlu1 %v13753_v61, %s7997_s29  ;;  %v6401_v16 = vpop.permute.xlu0 %6400 }
 0xc70   : > { %6467 = vst.msk [vmem:[%s8230_s26 + $0x498] sm:$0xff] %vm6460_vm1, %v6401_v16 }
 0xc71   : > { %v6403_v30 = vpop.permute.xlu1 %6402  ;;  %6614 = vrot.lane.b32.xlu0 %v13759_v26, %s7997_s29 }
 0xc72   : > { %6468 = vst.msk [vmem:[%s8230_s26 + $0x550] sm:$0xff] %vm6460_vm1, %v6403_v30 }
 0xc73   : > { %6616 = vrot.lane.b32.xlu1 %v13767_v39, %s7997_s29  ;;  %v6405_v50 = vpop.permute.xlu0 %6404 }
 0xc74   : > { %6469 = vst.msk [vmem:[%s8230_s26 + $0x608] sm:$0xff] %vm6460_vm1, %v6405_v50 }
 0xc75   : > { %v6407_v27 = vpop.permute.xlu1 %6406  ;;  %6618 = vrot.lane.b32.xlu0 %v13775_v44, %s7997_s29 }
 0xc76   : > { %6470 = vst.msk [vmem:[%s8230_s26 + $0x6c0] sm:$0xff] %vm6460_vm1, %v6407_v27 }
 0xc77   : > { %6620 = vrot.lane.b32.xlu1 %v13781_v33, %s7997_s29  ;;  %v6409_v54 = vpop.permute.xlu0 %6408 }
 0xc78   : > { %6471 = vst.msk [vmem:[%s8230_s26 + $0x778] sm:$0xff] %vm6460_vm1, %v6409_v54 }
 0xc79   : > { %v6411_v16 = vpop.permute.xlu1 %6410  ;;  %6622 = vrot.lane.b32.xlu0 %v13789_v8, %s7997_s29 }
 0xc7a   : > { %6472 = vst.msk [vmem:[%s8230_s26 + $0x830] sm:$0xff] %vm6460_vm1, %v6411_v16 }
 0xc7b   : > { %6624 = vrot.lane.b32.xlu1 %v13797_v15, %s7997_s29  ;;  %v6413_v30 = vpop.permute.xlu0 %6412 }
 0xc7c   : > { %6473 = vst.msk [vmem:[%s8230_s26 + $0x8e8] sm:$0xff] %vm6460_vm1, %v6413_v30 }
 0xc7d   : > { %v6415_v50 = vpop.permute.xlu1 %6414  ;;  %6626 = vrot.lane.b32.xlu0 %v13803_v35, %s7997_s29 }
 0xc7e   : > { %6474 = vst.msk [vmem:[%s8230_s26 + $0x9a0] sm:$0xff] %vm6460_vm1, %v6415_v50 }
 0xc7f   : > { %6628 = vrot.lane.b32.xlu1 %v13807_v10, %s7997_s29  ;;  %v6417_v27 = vpop.permute.xlu0 %6416 }
 0xc80   : > { %6475 = vst.msk [vmem:[%s8230_s26 + $0xa58] sm:$0xff] %vm6460_vm1, %v6417_v27 }
 0xc81   : > { %v6419_v54 = vpop.permute.xlu1 %6418  ;;  %6679 = vrot.lane.b32.xlu0 %v13584_v18, %s7998_s30 }
 0xc82   : > { %6476 = vst.msk [vmem:[%s8230_s26 + $0xb10] sm:$0xff] %vm6460_vm1, %v6419_v54 }
 0xc83   : > { %6681 = vrot.lane.b32.xlu1 %v13591_v32, %s7998_s30  ;;  %v6421_v16 = vpop.permute.xlu0 %6420 }
 0xc84   : > { %6477 = vst.msk [vmem:[%s8230_s26 + $0xbc8] sm:$0xff] %vm6460_vm1, %v6421_v16 }
 0xc85   : > { %v6423_v30 = vpop.permute.xlu1 %6422  ;;  %6683 = vrot.lane.b32.xlu0 %v13610_v63, %s7998_s30 }
 0xc86   : > { %6478 = vst.msk [vmem:[%s8230_s26 + $0xc80] sm:$0xff] %vm6460_vm1, %v6423_v30 }
 0xc87   : > { %6685 = vrot.lane.b32.xlu1 %v13617_v31, %s7998_s30  ;;  %v6425_v50 = vpop.permute.xlu0 %6424 }
 0xc88   : > { %6479 = vst.msk [vmem:[%s8230_s26 + $0xd38] sm:$0xff] %vm6460_vm1, %v6425_v50 }
 0xc89   : > { %v6427_v27 = vpop.permute.xlu1 %6426  ;;  %6687 = vrot.lane.b32.xlu0 %v13636_v14, %s7998_s30 }
 0xc8a   : > { %6480 = vst.msk [vmem:[%s8230_s26 + $0xdf0] sm:$0xff] %vm6460_vm1, %v6427_v27 }
 0xc8b   : > { %6689 = vrot.lane.b32.xlu1 %v13643_v51, %s7998_s30  ;;  %v6429_v54 = vpop.permute.xlu0 %6428 }
 0xc8c   : > { %6481 = vst.msk [vmem:[%s8230_s26 + $0xea8] sm:$0xff] %vm6460_vm1, %v6429_v54 }
 0xc8d   : > { %v6431_v16 = vpop.permute.xlu1 %6430  ;;  %6691 = vrot.lane.b32.xlu0 %v13662_v58, %s7998_s30 }
 0xc8e   : > { %6482 = vst.msk [vmem:[%s8230_s26 + $0xf60] sm:$0xff] %vm6460_vm1, %v6431_v16 }
 0xc8f   : > { %6693 = vrot.lane.b32.xlu1 %v13669_v20, %s7998_s30  ;;  %v6433_v30 = vpop.permute.xlu0 %6432 }
 0xc90   : > { %6483 = vst.msk [vmem:[%s8230_s26 + $0x1018] sm:$0xff] %vm6460_vm1, %v6433_v30 }
 0xc91   : > { %v6435_v50 = vpop.permute.xlu1 %6434  ;;  %6695 = vrot.lane.b32.xlu0 %v13688_v17, %s7998_s30 }
 0xc92   : > { %6484 = vst.msk [vmem:[%s8230_s26 + $0x10d0] sm:$0xff] %vm6460_vm1, %v6435_v50 }
 0xc93   : > { %6697 = vrot.lane.b32.xlu1 %v13697_v59, %s7998_s30  ;;  %v6486_v27 = vpop.permute.xlu0 %6485 }
 0xc94   : > { %6558 = vst.msk [vmem:[%s8230_s26 + $0x48] sm:$0xff] %vm6557_vm2, %v6486_v27 }
 0xc95   : > { %v6488_v54 = vpop.permute.xlu1 %6487  ;;  %6699 = vrot.lane.b32.xlu0 %v13710_v12, %s7998_s30 }
 0xc96   : > { %6559 = vst.msk [vmem:[%s8230_s26 + $0x100] sm:$0xff] %vm6557_vm2, %v6488_v54 }
 0xc97   : > { %6701 = vrot.lane.b32.xlu1 %v13717_v2, %s7998_s30  ;;  %v6490_v16 = vpop.permute.xlu0 %6489 }
 0xc98   : > { %6560 = vst.msk [vmem:[%s8230_s26 + $0x1b8] sm:$0xff] %vm6557_vm2, %v6490_v16 }
 0xc99   : > { %v6492_v30 = vpop.permute.xlu1 %6491  ;;  %6703 = vrot.lane.b32.xlu0 %v13732_v13, %s7998_s30 }
 0xc9a   : > { %6561 = vst.msk [vmem:[%s8230_s26 + $0x270] sm:$0xff] %vm6557_vm2, %v6492_v30 }
 0xc9b   : > { %6705 = vrot.lane.b32.xlu1 %v13739_v6, %s7998_s30  ;;  %v6494_v50 = vpop.permute.xlu0 %6493 }
 0xc9c   : > { %6562 = vst.msk [vmem:[%s8230_s26 + $0x328] sm:$0xff] %vm6557_vm2, %v6494_v50 }
 0xc9d   : > { %v6496_v27 = vpop.permute.xlu1 %6495  ;;  %6707 = vrot.lane.b32.xlu0 %v13745_v19, %s7998_s30 }
 0xc9e   : > { %6563 = vst.msk [vmem:[%s8230_s26 + $0x3e0] sm:$0xff] %vm6557_vm2, %v6496_v27 }
 0xc9f   : > { %6709 = vrot.lane.b32.xlu1 %v13753_v61, %s7998_s30  ;;  %v6498_v54 = vpop.permute.xlu0 %6497 }
 0xca0   : > { %6564 = vst.msk [vmem:[%s8230_s26 + $0x498] sm:$0xff] %vm6557_vm2, %v6498_v54 }
 0xca1   : > { %v6500_v16 = vpop.permute.xlu1 %6499  ;;  %6711 = vrot.lane.b32.xlu0 %v13759_v26, %s7998_s30 }
 0xca2   : > { %6565 = vst.msk [vmem:[%s8230_s26 + $0x550] sm:$0xff] %vm6557_vm2, %v6500_v16 }
 0xca3   : > { %6713 = vrot.lane.b32.xlu1 %v13767_v39, %s7998_s30  ;;  %v6502_v30 = vpop.permute.xlu0 %6501 }
 0xca4   : > { %6566 = vst.msk [vmem:[%s8230_s26 + $0x608] sm:$0xff] %vm6557_vm2, %v6502_v30 }
 0xca5   : > { %v6504_v50 = vpop.permute.xlu1 %6503  ;;  %6715 = vrot.lane.b32.xlu0 %v13775_v44, %s7998_s30 }
 0xca6   : > { %6567 = vst.msk [vmem:[%s8230_s26 + $0x6c0] sm:$0xff] %vm6557_vm2, %v6504_v50 }
 0xca7   : > { %6717 = vrot.lane.b32.xlu1 %v13781_v33, %s7998_s30  ;;  %v6506_v27 = vpop.permute.xlu0 %6505 }
 0xca8   : > { %6568 = vst.msk [vmem:[%s8230_s26 + $0x778] sm:$0xff] %vm6557_vm2, %v6506_v27 }
 0xca9   : > { %v6508_v54 = vpop.permute.xlu1 %6507  ;;  %6719 = vrot.lane.b32.xlu0 %v13789_v8, %s7998_s30 }
 0xcaa   : > { %6569 = vst.msk [vmem:[%s8230_s26 + $0x830] sm:$0xff] %vm6557_vm2, %v6508_v54 }
 0xcab   : > { %6721 = vrot.lane.b32.xlu1 %v13797_v15, %s7998_s30  ;;  %v6510_v16 = vpop.permute.xlu0 %6509 }
 0xcac   : > { %6570 = vst.msk [vmem:[%s8230_s26 + $0x8e8] sm:$0xff] %vm6557_vm2, %v6510_v16 }
 0xcad   : > { %v6512_v30 = vpop.permute.xlu1 %6511  ;;  %6723 = vrot.lane.b32.xlu0 %v13803_v35, %s7998_s30 }
 0xcae   : > { %6571 = vst.msk [vmem:[%s8230_s26 + $0x9a0] sm:$0xff] %vm6557_vm2, %v6512_v30 }
 0xcaf   : > { %6725 = vrot.lane.b32.xlu1 %v13807_v10, %s7998_s30  ;;  %v6514_v50 = vpop.permute.xlu0 %6513 }
 0xcb0   : > { %6572 = vst.msk [vmem:[%s8230_s26 + $0xa58] sm:$0xff] %vm6557_vm2, %v6514_v50 }
 0xcb1   : > { %v6516_v27 = vpop.permute.xlu1 %6515  ;;  %6776 = vrot.lane.b32.xlu0 %v13584_v18, %s7999_s13 }
 0xcb2   : > { %6573 = vst.msk [vmem:[%s8230_s26 + $0xb10] sm:$0xff] %vm6557_vm2, %v6516_v27 }
 0xcb3   : > { %6778 = vrot.lane.b32.xlu1 %v13591_v32, %s7999_s13  ;;  %v6518_v54 = vpop.permute.xlu0 %6517 }
 0xcb4   : > { %6574 = vst.msk [vmem:[%s8230_s26 + $0xbc8] sm:$0xff] %vm6557_vm2, %v6518_v54 }
 0xcb5   : > { %v6520_v16 = vpop.permute.xlu1 %6519  ;;  %6780 = vrot.lane.b32.xlu0 %v13610_v63, %s7999_s13 }
 0xcb6   : > { %6575 = vst.msk [vmem:[%s8230_s26 + $0xc80] sm:$0xff] %vm6557_vm2, %v6520_v16 }
 0xcb7   : > { %6782 = vrot.lane.b32.xlu1 %v13617_v31, %s7999_s13  ;;  %v6522_v18 = vpop.permute.xlu0 %6521 }
 0xcb8   : > { %6576 = vst.msk [vmem:[%s8230_s26 + $0xd38] sm:$0xff] %vm6557_vm2, %v6522_v18 }
 0xcb9   : > { %v6524_v30 = vpop.permute.xlu1 %6523  ;;  %6784 = vrot.lane.b32.xlu0 %v13636_v14, %s7999_s13 }
 0xcba   : > { %6577 = vst.msk [vmem:[%s8230_s26 + $0xdf0] sm:$0xff] %vm6557_vm2, %v6524_v30 }
 0xcbb   : > { %6786 = vrot.lane.b32.xlu1 %v13643_v51, %s7999_s13  ;;  %v6526_v32 = vpop.permute.xlu0 %6525 }
 0xcbc   : > { %6578 = vst.msk [vmem:[%s8230_s26 + $0xea8] sm:$0xff] %vm6557_vm2, %v6526_v32 }
 0xcbd   : > { %v6528_v63 = vpop.permute.xlu1 %6527  ;;  %6788 = vrot.lane.b32.xlu0 %v13662_v58, %s7999_s13 }
 0xcbe   : > { %6579 = vst.msk [vmem:[%s8230_s26 + $0xf60] sm:$0xff] %vm6557_vm2, %v6528_v63 }
 0xcbf   : > { %6790 = vrot.lane.b32.xlu1 %v13669_v20, %s7999_s13  ;;  %v6530_v31 = vpop.permute.xlu0 %6529 }
 0xcc0   : > { %6580 = vst.msk [vmem:[%s8230_s26 + $0x1018] sm:$0xff] %vm6557_vm2, %v6530_v31 }
 0xcc1   : > { %v6532_v14 = vpop.permute.xlu1 %6531  ;;  %6792 = vrot.lane.b32.xlu0 %v13688_v17, %s7999_s13 }
 0xcc2   : > { %6581 = vst.msk [vmem:[%s8230_s26 + $0x10d0] sm:$0xff] %vm6557_vm2, %v6532_v14 }
 0xcc3   : > { %6794 = vrot.lane.b32.xlu1 %v13697_v59, %s7999_s13  ;;  %v6583_v51 = vpop.permute.xlu0 %6582 }
 0xcc4   : > { %6655 = vst.msk [vmem:[%s8230_s26 + $0x50] sm:$0xff] %vm6654_vm3, %v6583_v51 }
 0xcc5   : > { %v6585_v58 = vpop.permute.xlu1 %6584  ;;  %6796 = vrot.lane.b32.xlu0 %v13710_v12, %s7999_s13 }
 0xcc6   : > { %6656 = vst.msk [vmem:[%s8230_s26 + $0x108] sm:$0xff] %vm6654_vm3, %v6585_v58 }
 0xcc7   : > { %6798 = vrot.lane.b32.xlu1 %v13717_v2, %s7999_s13  ;;  %v6587_v20 = vpop.permute.xlu0 %6586 }
 0xcc8   : > { %6657 = vst.msk [vmem:[%s8230_s26 + $0x1c0] sm:$0xff] %vm6654_vm3, %v6587_v20  ;;  %v15492_v20 = vld [vmem:[#allocation6_spill] sm:$0xff] }
 0xcc9   : > { %v6589_v17 = vpop.permute.xlu1 %6588  ;;  %6800 = vrot.lane.b32.xlu0 %v13732_v13, %s7999_s13 }
 0xcca   : > { %6658 = vst.msk [vmem:[%s8230_s26 + $0x278] sm:$0xff] %vm6654_vm3, %v6589_v17 }
 0xccb   : > { %6802 = vrot.lane.b32.xlu1 %v13739_v6, %s7999_s13  ;;  %v6591_v59 = vpop.permute.xlu0 %6590 }
 0xccc   : > { %6659 = vst.msk [vmem:[%s8230_s26 + $0x330] sm:$0xff] %vm6654_vm3, %v6591_v59 }
 0xccd   : > { %v6593_v12 = vpop.permute.xlu1 %6592  ;;  %6804 = vrot.lane.b32.xlu0 %v13745_v19, %s7999_s13 }
 0xcce   : > { %6660 = vst.msk [vmem:[%s8230_s26 + $0x3e8] sm:$0xff] %vm6654_vm3, %v6593_v12  ;;  %v15493_v12 = vld [vmem:[#allocation9_spill] sm:$0xff] }
 0xccf   : > { %6806 = vrot.lane.b32.xlu1 %v13753_v61, %s7999_s13  ;;  %v6595_v13 = vpop.permute.xlu0 %6594 }
 0xcd0   : > { %6661 = vst.msk [vmem:[%s8230_s26 + $0x4a0] sm:$0xff] %vm6654_vm3, %v6595_v13  ;;  %v5993_v13 = vadd.f32 %v15493_v12, %v13728_v47 }
 0xcd1   : > { %v6597_v2 = vpop.permute.xlu1 %6596  ;;  %6808 = vrot.lane.b32.xlu0 %v13759_v26, %s7999_s13 }
 0xcd2   : > { %6662 = vst.msk [vmem:[%s8230_s26 + $0x558] sm:$0xff] %vm6654_vm3, %v6597_v2  ;;  %v14531_v47 = vmax.f32 %v5993_v13, 0.0 }
 0xcd3   : > { %6810 = vrot.lane.b32.xlu1 %v13767_v39, %s7999_s13  ;;  %v6599_v19 = vpop.permute.xlu0 %6598  ;;  %v5909_v39 = vadd.f32 %v13578_v28, %v13567_v38  ;;  %v5919_v38 = vadd.f32 %v13604_v34, %v13571_v40  ;;  %v5929_v34 = vadd.f32 %v13630_v43, %v13595_v53  ;;  %v5939_v43 = vadd.f32 %v13656_v9, %v13621_v60 }
 0xcd4   : > { %6663 = vst.msk [vmem:[%s8230_s26 + $0x610] sm:$0xff] %vm6654_vm3, %v6599_v19  ;;  %v5949_v9 = vadd.f32 %v13682_v1, %v13647_v48  ;;  %v5959_v1 = vadd.f32 %v13706_v37, %v13673_v49  ;;  %v5969_v37 = vadd.f32 %v13726_v42, %v13695_v55  ;;  %v5979_v42 = vadd.f32 %v13580_v52, %v13708_v0  ;;  %v15491_v0 = vld [vmem:[#allocation8_spill] sm:$0xff] }
 0xcd5   : > { %v6601_v6 = vpop.permute.xlu1 %6600  ;;  %6812 = vrot.lane.b32.xlu0 %v13775_v44, %s7999_s13  ;;  %v14411_v40 = vmax.f32 %v5919_v38, 0.0  ;;  %v14427_v53 = vmax.f32 %v5929_v34, 0.0  ;;  %v14443_v60 = vmax.f32 %v5939_v43, 0.0  ;;  %v5989_v17 = vadd.f32 %v15492_v20, %v15491_v0 }
 0xcd6   : > { %6664 = vst.msk [vmem:[%s8230_s26 + $0x6c8] sm:$0xff] %vm6654_vm3, %v6601_v6  ;;  %v14459_v48 = vmax.f32 %v5949_v9, 0.0  ;;  %v14475_v49 = vmax.f32 %v5959_v1, 0.0  ;;  %v14493_v55 = vmax.f32 %v5969_v37, 0.0  ;;  %v14507_v52 = vmax.f32 %v5979_v42, 0.0  ;;  %v15494_v6 = vld [vmem:[#allocation11_spill] sm:$0xff] }
 0xcd7   : > { %6814 = vrot.lane.b32.xlu1 %v13781_v33, %s7999_s13  ;;  %v6603_v61 = vpop.permute.xlu0 %6602  ;;  %v5913_v33 = vadd.f32 %v13587_v57, %v13569_v22  ;;  %v5923_v57 = vadd.f32 %v13613_v11, %v13573_v3  ;;  %v5933_v11 = vadd.f32 %v13639_v25, %v13597_v21  ;;  %v5943_v25 = vadd.f32 %v13665_v62, %v13623_v46 }
 0xcd8   : > { %6665 = vst.msk [vmem:[%s8230_s26 + $0x780] sm:$0xff] %vm6654_vm3, %v6603_v61  ;;  %v5953_v62 = vadd.f32 %v13691_v24, %v13649_v45  ;;  %v5963_v24 = vadd.f32 %v13713_v36, %v13675_v29  ;;  %v5973_v36 = vadd.f32 %v13735_v41, %v13701_v7  ;;  %v15490_v41 = vld [vmem:[#allocation2_spill] sm:$0xff]  ;;  %v14523_v19 = vmax.f32 %v5989_v17, 0.0  ;;  %v15495_v61 = vld [vmem:[#allocation12_spill] sm:$0xff] }
 0xcd9   : > { %v6605_v26 = vpop.permute.xlu1 %6604  ;;  %6816 = vrot.lane.b32.xlu0 %v13789_v8, %s7999_s13  ;;  %v14395_v8 = vmax.f32 %v5909_v39, 0.0  ;;  %v14403_v22 = vmax.f32 %v5913_v33, 0.0  ;;  %v14419_v3 = vmax.f32 %v5923_v57, 0.0  ;;  %v14435_v21 = vmax.f32 %v5933_v11, 0.0  ;;  %v15497_v33 = vld [vmem:[#allocation3_spill] sm:$0xff]  ;;  %v15499_v11 = vld [vmem:[#allocation5_spill] sm:$0xff] }
 0xcda   : > { %6666 = vst.msk [vmem:[%s8230_s26 + $0x838] sm:$0xff] %vm6654_vm3, %v6605_v26  ;;  %v14451_v46 = vmax.f32 %v5943_v25, 0.0  ;;  %v14467_v45 = vmax.f32 %v5953_v62, 0.0  ;;  %v14483_v29 = vmax.f32 %v5963_v24, 0.0  ;;  %v5983_v7 = vadd.f32 %v15490_v41, %v13715_v4  ;;  %v15498_v57 = vld [vmem:[#allocation7_spill] sm:$0xff]  ;;  %v15501_v25 = vld [vmem:[#allocation13_spill] sm:$0xff] }
 0xcdb   : > { %6818 = vrot.lane.b32.xlu1 %v13797_v15, %s7999_s13  ;;  %v6607_v44 = vpop.permute.xlu0 %6606  ;;  %v14501_v51 = vmax.f32 %v5973_v36, 0.0  ;;  %v5999_v26 = vadd.f32 %v15495_v61, %v15494_v6  ;;  %v15502_v62 = vld [vmem:[#allocation4_spill] sm:$0xff] }
 0xcdc   : > { %6667 = vst.msk [vmem:[%s8230_s26 + $0x8f0] sm:$0xff] %vm6654_vm3, %v6607_v44  ;;  %v14515_v4 = vmax.f32 %v5983_v7, 0.0  ;;  %v15496_v44 = vld [vmem:[#allocation14_spill] sm:$0xff] }
 0xcdd   : > { %v6609_v50 = vpop.permute.xlu1 %6608  ;;  %6820 = vrot.lane.b32.xlu0 %v13803_v35, %s7999_s13 }
 0xcde   : > { %6668 = vst.msk [vmem:[%s8230_s26 + $0x9a8] sm:$0xff] %vm6654_vm3, %v6609_v50  ;;  %v6003_v50 = vadd.f32 %v15497_v33, %v15496_v44 }
 0xcdf   : > { %6822 = vrot.lane.b32.xlu1 %v13807_v10, %s7999_s13  ;;  %v6611_v28 = vpop.permute.xlu0 %6610 }
 0xce0   : > { %6669 = vst.msk [vmem:[%s8230_s26 + $0xa60] sm:$0xff] %vm6654_vm3, %v6611_v28  ;;  %v14539_v28 = vmax.f32 %v5999_v26, 0.0 }
 0xce1   : > { %v6613_v35 = vpop.permute.xlu1 %6612  ;;  %6897 = vrot.lane.b32.xlu0 %v14395_v8, %s8000_s14 }
 0xce2   : > { %6670 = vst.msk [vmem:[%s8230_s26 + $0xb18] sm:$0xff] %vm6654_vm3, %v6613_v35  ;;  %v6009_v35 = vadd.f32 %v15498_v57, %v13765_v23 }
 0xce3   : > { %6899 = vrot.lane.b32.xlu1 %v14403_v22, %s8000_s14  ;;  %v6615_v15 = vpop.permute.xlu0 %6614 }
 0xce4   : > { %6671 = vst.msk [vmem:[%s8230_s26 + $0xbd0] sm:$0xff] %vm6654_vm3, %v6615_v15  ;;  %v14547_v15 = vmax.f32 %v6003_v50, 0.0  ;;  %v14555_v23 = vmax.f32 %v6009_v35, 0.0 }
 0xce5   : > { %v6617_v10 = vpop.permute.xlu1 %6616  ;;  %6901 = vrot.lane.b32.xlu0 %v14411_v40, %s8000_s14 }
 0xce6   : > { %6672 = vst.msk [vmem:[%s8230_s26 + $0xc88] sm:$0xff] %vm6654_vm3, %v6617_v10  ;;  %v15500_v10 = vld [vmem:[#allocation10_spill] sm:$0xff] }
 0xce7   : > { %6903 = vrot.lane.b32.xlu1 %v14419_v3, %s8000_s14  ;;  %v6619_v27 = vpop.permute.xlu0 %6618  ;;  %v6013_v43 = vadd.f32 %v15500_v10, %v15499_v11 }
 0xce8   : > { %6673 = vst.msk [vmem:[%s8230_s26 + $0xd40] sm:$0xff] %vm6654_vm3, %v6619_v27 }
 0xce9   : > { %v6621_v54 = vpop.permute.xlu1 %6620  ;;  %6905 = vrot.lane.b32.xlu0 %v14427_v53, %s8000_s14 }
 0xcea   : > { %6674 = vst.msk [vmem:[%s8230_s26 + $0xdf8] sm:$0xff] %vm6654_vm3, %v6621_v54  ;;  %v6019_v54 = vadd.f32 %v15501_v25, %v13787_v5 }
 0xceb   : > { %6907 = vrot.lane.b32.xlu1 %v14435_v21, %s8000_s14  ;;  %v6623_v16 = vpop.permute.xlu0 %6622 }
 0xcec   : > { %6675 = vst.msk [vmem:[%s8230_s26 + $0xeb0] sm:$0xff] %vm6654_vm3, %v6623_v16  ;;  %v14563_v16 = vmax.f32 %v6013_v43, 0.0  ;;  %v14571_v5 = vmax.f32 %v6019_v54, 0.0 }
 0xced   : > { %v6625_v18 = vpop.permute.xlu1 %6624  ;;  %6909 = vrot.lane.b32.xlu0 %v14443_v60, %s8000_s14 }
 0xcee   : > { %6676 = vst.msk [vmem:[%s8230_s26 + $0xf68] sm:$0xff] %vm6654_vm3, %v6625_v18  ;;  %v6023_v18 = vadd.f32 %v15502_v62, %v13795_v56 }
 0xcef   : > { %6911 = vrot.lane.b32.xlu1 %v14451_v46, %s8000_s14  ;;  %v6627_v30 = vpop.permute.xlu0 %6626 }
 0xcf0   : > { %6677 = vst.msk [vmem:[%s8230_s26 + $0x1020] sm:$0xff] %vm6654_vm3, %v6627_v30  ;;  %v14577_v24 = vmax.f32 %v6023_v18, 0.0 }
 0xcf1   : > { %v6629_v32 = vpop.permute.xlu1 %6628  ;;  %6913 = vrot.lane.b32.xlu0 %v14459_v48, %s8000_s14 }
 0xcf2   : > { %6678 = vst.msk [vmem:[%s8230_s26 + $0x10d8] sm:$0xff] %vm6654_vm3, %v6629_v32 }
 0xcf3   : > { %6915 = vrot.lane.b32.xlu1 %v14467_v45, %s8000_s14  ;;  %v6680_v63 = vpop.permute.xlu0 %6679 }
 0xcf4   : > { %6752 = vst.msk [vmem:[%s8230_s26 + $0x50] sm:$0xff] %vm6751_vm5, %v6680_v63 }
 0xcf5   : > { %v6682_v31 = vpop.permute.xlu1 %6681  ;;  %6917 = vrot.lane.b32.xlu0 %v14475_v49, %s8000_s14 }
 0xcf6   : > { %6753 = vst.msk [vmem:[%s8230_s26 + $0x108] sm:$0xff] %vm6751_vm5, %v6682_v31 }
 0xcf7   : > { %6919 = vrot.lane.b32.xlu1 %v14483_v29, %s8000_s14  ;;  %v6684_v14 = vpop.permute.xlu0 %6683 }
 0xcf8   : > { %6754 = vst.msk [vmem:[%s8230_s26 + $0x1c0] sm:$0xff] %vm6751_vm5, %v6684_v14 }
 0xcf9   : > { %v6686_v58 = vpop.permute.xlu1 %6685  ;;  %6921 = vrot.lane.b32.xlu0 %v14493_v55, %s8000_s14 }
 0xcfa   : > { %6755 = vst.msk [vmem:[%s8230_s26 + $0x278] sm:$0xff] %vm6751_vm5, %v6686_v58 }
 0xcfb   : > { %6923 = vrot.lane.b32.xlu1 %v14501_v51, %s8000_s14  ;;  %v6688_v59 = vpop.permute.xlu0 %6687 }
 0xcfc   : > { %6756 = vst.msk [vmem:[%s8230_s26 + $0x330] sm:$0xff] %vm6751_vm5, %v6688_v59 }
 0xcfd   : > { %v6690_v2 = vpop.permute.xlu1 %6689  ;;  %6925 = vrot.lane.b32.xlu0 %v14507_v52, %s8000_s14 }
 0xcfe   : > { %6757 = vst.msk [vmem:[%s8230_s26 + $0x3e8] sm:$0xff] %vm6751_vm5, %v6690_v2 }
 0xcff   : > { %6927 = vrot.lane.b32.xlu1 %v14515_v4, %s8000_s14  ;;  %v6692_v39 = vpop.permute.xlu0 %6691 }
 0xd00   : > { %6758 = vst.msk [vmem:[%s8230_s26 + $0x4a0] sm:$0xff] %vm6751_vm5, %v6692_v39 }
 0xd01   : > { %v6694_v38 = vpop.permute.xlu1 %6693  ;;  %6929 = vrot.lane.b32.xlu0 %v14523_v19, %s8000_s14 }
 0xd02   : > { %6759 = vst.msk [vmem:[%s8230_s26 + $0x558] sm:$0xff] %vm6751_vm5, %v6694_v38 }
 0xd03   : > { %6931 = vrot.lane.b32.xlu1 %v14531_v47, %s8000_s14  ;;  %v6696_v34 = vpop.permute.xlu0 %6695 }
 0xd04   : > { %6760 = vst.msk [vmem:[%s8230_s26 + $0x610] sm:$0xff] %vm6751_vm5, %v6696_v34 }
 0xd05   : > { %v6698_v27 = vpop.permute.xlu1 %6697  ;;  %6933 = vrot.lane.b32.xlu0 %v14539_v28, %s8000_s14 }
 0xd06   : > { %6761 = vst.msk [vmem:[%s8230_s26 + $0x6c8] sm:$0xff] %vm6751_vm5, %v6698_v27 }
 0xd07   : > { %6935 = vrot.lane.b32.xlu1 %v14547_v15, %s8000_s14  ;;  %v6700_v9 = vpop.permute.xlu0 %6699 }
 0xd08   : > { %6762 = vst.msk [vmem:[%s8230_s26 + $0x780] sm:$0xff] %vm6751_vm5, %v6700_v9 }
 0xd09   : > { %v6702_v1 = vpop.permute.xlu1 %6701  ;;  %6937 = vrot.lane.b32.xlu0 %v14555_v23, %s8000_s14 }
 0xd0a   : > { %6763 = vst.msk [vmem:[%s8230_s26 + $0x838] sm:$0xff] %vm6751_vm5, %v6702_v1 }
 0xd0b   : > { %6939 = vrot.lane.b32.xlu1 %v14563_v16, %s8000_s14  ;;  %v6704_v30 = vpop.permute.xlu0 %6703 }
 0xd0c   : > { %6764 = vst.msk [vmem:[%s8230_s26 + $0x8f0] sm:$0xff] %vm6751_vm5, %v6704_v30 }
 0xd0d   : > { %v6706_v56 = vpop.permute.xlu1 %6705  ;;  %6941 = vrot.lane.b32.xlu0 %v14571_v5, %s8000_s14 }
 0xd0e   : > { %6765 = vst.msk [vmem:[%s8230_s26 + $0x9a8] sm:$0xff] %vm6751_vm5, %v6706_v56 }
 0xd0f   : > { %6943 = vrot.lane.b32.xlu1 %v14577_v24, %s8000_s14  ;;  %v6708_v32 = vpop.permute.xlu0 %6707 }
 0xd10   : > { %6766 = vst.msk [vmem:[%s8230_s26 + $0xa60] sm:$0xff] %vm6751_vm5, %v6708_v32 }
 0xd11   : > { %v6710_v37 = vpop.permute.xlu1 %6709  ;;  %6994 = vrot.lane.b32.xlu0 %v14395_v8, %s8001_s15 }
 0xd12   : > { %6767 = vst.msk [vmem:[%s8230_s26 + $0xb18] sm:$0xff] %vm6751_vm5, %v6710_v37 }
 0xd13   : > { %6996 = vrot.lane.b32.xlu1 %v14403_v22, %s8001_s15  ;;  %v6712_v63 = vpop.permute.xlu0 %6711 }
 0xd14   : > { %6768 = vst.msk [vmem:[%s8230_s26 + $0xbd0] sm:$0xff] %vm6751_vm5, %v6712_v63 }
 0xd15   : > { %v6714_v36 = vpop.permute.xlu1 %6713  ;;  %6998 = vrot.lane.b32.xlu0 %v14411_v40, %s8001_s15 }
 0xd16   : > { %6769 = vst.msk [vmem:[%s8230_s26 + $0xc88] sm:$0xff] %vm6751_vm5, %v6714_v36 }
 0xd17   : > { %7000 = vrot.lane.b32.xlu1 %v14419_v3, %s8001_s15  ;;  %v6716_v31 = vpop.permute.xlu0 %6715 }
 0xd18   : > { %6770 = vst.msk [vmem:[%s8230_s26 + $0xd40] sm:$0xff] %vm6751_vm5, %v6716_v31 }
 0xd19   : > { %v6718_v42 = vpop.permute.xlu1 %6717  ;;  %7002 = vrot.lane.b32.xlu0 %v14427_v53, %s8001_s15 }
 0xd1a   : > { %6771 = vst.msk [vmem:[%s8230_s26 + $0xdf8] sm:$0xff] %vm6751_vm5, %v6718_v42 }
 0xd1b   : > { %7004 = vrot.lane.b32.xlu1 %v14435_v21, %s8001_s15  ;;  %v6720_v14 = vpop.permute.xlu0 %6719 }
 0xd1c   : > { %6772 = vst.msk [vmem:[%s8230_s26 + $0xeb0] sm:$0xff] %vm6751_vm5, %v6720_v14 }
 0xd1d   : > { %v6722_v41 = vpop.permute.xlu1 %6721  ;;  %7006 = vrot.lane.b32.xlu0 %v14443_v60, %s8001_s15 }
 0xd1e   : > { %6773 = vst.msk [vmem:[%s8230_s26 + $0xf68] sm:$0xff] %vm6751_vm5, %v6722_v41 }
 0xd1f   : > { %7008 = vrot.lane.b32.xlu1 %v14451_v46, %s8001_s15  ;;  %v6724_v7 = vpop.permute.xlu0 %6723 }
 0xd20   : > { %6774 = vst.msk [vmem:[%s8230_s26 + $0x1020] sm:$0xff] %vm6751_vm5, %v6724_v7 }
 0xd21   : > { %v6726_v58 = vpop.permute.xlu1 %6725  ;;  %7010 = vrot.lane.b32.xlu0 %v14459_v48, %s8001_s15 }
 0xd22   : > { %6775 = vst.msk [vmem:[%s8230_s26 + $0x10d8] sm:$0xff] %vm6751_vm5, %v6726_v58 }
 0xd23   : > { %7012 = vrot.lane.b32.xlu1 %v14467_v45, %s8001_s15  ;;  %v6777_v0 = vpop.permute.xlu0 %6776 }
 0xd24   : > { %6849 = vst.msk [vmem:[%s8230_s26 + $0x58] sm:$0xff] %vm6848_vm6, %v6777_v0 }
 0xd25   : > { %v6779_v20 = vpop.permute.xlu1 %6778  ;;  %7014 = vrot.lane.b32.xlu0 %v14475_v49, %s8001_s15 }
 0xd26   : > { %6850 = vst.msk [vmem:[%s8230_s26 + $0x110] sm:$0xff] %vm6848_vm6, %v6779_v20 }
 0xd27   : > { %7016 = vrot.lane.b32.xlu1 %v14483_v29, %s8001_s15  ;;  %v6781_v17 = vpop.permute.xlu0 %6780 }
 0xd28   : > { %6851 = vst.msk [vmem:[%s8230_s26 + $0x1c8] sm:$0xff] %vm6848_vm6, %v6781_v17 }
 0xd29   : > { %v6783_v59 = vpop.permute.xlu1 %6782  ;;  %7018 = vrot.lane.b32.xlu0 %v14493_v55, %s8001_s15 }
 0xd2a   : > { %6852 = vst.msk [vmem:[%s8230_s26 + $0x280] sm:$0xff] %vm6848_vm6, %v6783_v59 }
 0xd2b   : > { %7020 = vrot.lane.b32.xlu1 %v14501_v51, %s8001_s15  ;;  %v6785_v12 = vpop.permute.xlu0 %6784 }
 0xd2c   : > { %6853 = vst.msk [vmem:[%s8230_s26 + $0x338] sm:$0xff] %vm6848_vm6, %v6785_v12 }
 0xd2d   : > { %v6787_v13 = vpop.permute.xlu1 %6786  ;;  %7022 = vrot.lane.b32.xlu0 %v14507_v52, %s8001_s15 }
 0xd2e   : > { %6854 = vst.msk [vmem:[%s8230_s26 + $0x3f0] sm:$0xff] %vm6848_vm6, %v6787_v13 }
 0xd2f   : > { %7024 = vrot.lane.b32.xlu1 %v14515_v4, %s8001_s15  ;;  %v6789_v2 = vpop.permute.xlu0 %6788 }
 0xd30   : > { %6855 = vst.msk [vmem:[%s8230_s26 + $0x4a8] sm:$0xff] %vm6848_vm6, %v6789_v2 }
 0xd31   : > { %v6791_v6 = vpop.permute.xlu1 %6790  ;;  %7026 = vrot.lane.b32.xlu0 %v14523_v19, %s8001_s15 }
 0xd32   : > { %6856 = vst.msk [vmem:[%s8230_s26 + $0x560] sm:$0xff] %vm6848_vm6, %v6791_v6 }
 0xd33   : > { %7028 = vrot.lane.b32.xlu1 %v14531_v47, %s8001_s15  ;;  %v6793_v61 = vpop.permute.xlu0 %6792 }
 0xd34   : > { %6857 = vst.msk [vmem:[%s8230_s26 + $0x618] sm:$0xff] %vm6848_vm6, %v6793_v61 }
 0xd35   : > { %v6795_v26 = vpop.permute.xlu1 %6794  ;;  %7030 = vrot.lane.b32.xlu0 %v14539_v28, %s8001_s15 }
 0xd36   : > { %6858 = vst.msk [vmem:[%s8230_s26 + $0x6d0] sm:$0xff] %vm6848_vm6, %v6795_v26 }
 0xd37   : > { %7032 = vrot.lane.b32.xlu1 %v14547_v15, %s8001_s15  ;;  %v6797_v39 = vpop.permute.xlu0 %6796 }
 0xd38   : > { %6859 = vst.msk [vmem:[%s8230_s26 + $0x788] sm:$0xff] %vm6848_vm6, %v6797_v39 }
 0xd39   : > { %v6799_v44 = vpop.permute.xlu1 %6798  ;;  %7034 = vrot.lane.b32.xlu0 %v14555_v23, %s8001_s15 }
 0xd3a   : > { %6860 = vst.msk [vmem:[%s8230_s26 + $0x840] sm:$0xff] %vm6848_vm6, %v6799_v44 }
 0xd3b   : > { %7036 = vrot.lane.b32.xlu1 %v14563_v16, %s8001_s15  ;;  %v6801_v33 = vpop.permute.xlu0 %6800 }
 0xd3c   : > { %6861 = vst.msk [vmem:[%s8230_s26 + $0x8f8] sm:$0xff] %vm6848_vm6, %v6801_v33 }
 0xd3d   : > { %v6803_v50 = vpop.permute.xlu1 %6802  ;;  %7038 = vrot.lane.b32.xlu0 %v14571_v5, %s8001_s15 }
 0xd3e   : > { %6862 = vst.msk [vmem:[%s8230_s26 + $0x9b0] sm:$0xff] %vm6848_vm6, %v6803_v50 }
 0xd3f   : > { %7040 = vrot.lane.b32.xlu1 %v14577_v24, %s8001_s15  ;;  %v6805_v38 = vpop.permute.xlu0 %6804 }
 0xd40   : > { %6863 = vst.msk [vmem:[%s8230_s26 + $0xa68] sm:$0xff] %vm6848_vm6, %v6805_v38 }
 0xd41   : > { %v6807_v57 = vpop.permute.xlu1 %6806  ;;  %7116 = vrot.lane.b32.xlu0 %v14395_v8, %s8002_s16 }
 0xd42   : > { %6864 = vst.msk [vmem:[%s8230_s26 + $0xb20] sm:$0xff] %vm6848_vm6, %v6807_v57 }
 0xd43   : > { %7118 = vrot.lane.b32.xlu1 %v14403_v22, %s8002_s16  ;;  %v6809_v35 = vpop.permute.xlu0 %6808 }
 0xd44   : > { %6865 = vst.msk [vmem:[%s8230_s26 + $0xbd8] sm:$0xff] %vm6848_vm6, %v6809_v35 }
 0xd45   : > { %v6811_v34 = vpop.permute.xlu1 %6810  ;;  %7120 = vrot.lane.b32.xlu0 %v14411_v40, %s8002_s16 }
 0xd46   : > { %6866 = vst.msk [vmem:[%s8230_s26 + $0xc90] sm:$0xff] %vm6848_vm6, %v6811_v34 }
 0xd47   : > { %7122 = vrot.lane.b32.xlu1 %v14419_v3, %s8002_s16  ;;  %v6813_v11 = vpop.permute.xlu0 %6812 }
 0xd48   : > { %6867 = vst.msk [vmem:[%s8230_s26 + $0xd48] sm:$0xff] %vm6848_vm6, %v6813_v11 }
 0xd49   : > { %v6815_v10 = vpop.permute.xlu1 %6814  ;;  %7124 = vrot.lane.b32.xlu0 %v14427_v53, %s8002_s16 }
 0xd4a   : > { %6868 = vst.msk [vmem:[%s8230_s26 + $0xe00] sm:$0xff] %vm6848_vm6, %v6815_v10 }
 0xd4b   : > { %7126 = vrot.lane.b32.xlu1 %v14435_v21, %s8002_s16  ;;  %v6817_v43 = vpop.permute.xlu0 %6816 }
 0xd4c   : > { %6869 = vst.msk [vmem:[%s8230_s26 + $0xeb8] sm:$0xff] %vm6848_vm6, %v6817_v43 }
 0xd4d   : > { %v6819_v27 = vpop.permute.xlu1 %6818  ;;  %7128 = vrot.lane.b32.xlu0 %v14443_v60, %s8002_s16 }
 0xd4e   : > { %6870 = vst.msk [vmem:[%s8230_s26 + $0xf70] sm:$0xff] %vm6848_vm6, %v6819_v27 }
 0xd4f   : > { %7130 = vrot.lane.b32.xlu1 %v14451_v46, %s8002_s16  ;;  %v6821_v25 = vpop.permute.xlu0 %6820 }
 0xd50   : > { %6871 = vst.msk [vmem:[%s8230_s26 + $0x1028] sm:$0xff] %vm6848_vm6, %v6821_v25 }
 0xd51   : > { %v6823_v54 = vpop.permute.xlu1 %6822  ;;  %7132 = vrot.lane.b32.xlu0 %v14459_v48, %s8002_s16 }
 0xd52   : > { %6872 = vst.msk [vmem:[%s8230_s26 + $0x10e0] sm:$0xff] %vm6848_vm6, %v6823_v54 }
 0xd53   : > { %7134 = vrot.lane.b32.xlu1 %v14467_v45, %s8002_s16  ;;  %v6898_v9 = vpop.permute.xlu0 %6897 }
 0xd54   : > { %6970 = vst.msk [vmem:[%s8230_s26 + $0x58] sm:$0xff] %vm6969_vm7, %v6898_v9 }
 0xd55   : > { %v6900_v62 = vpop.permute.xlu1 %6899  ;;  %7136 = vrot.lane.b32.xlu0 %v14475_v49, %s8002_s16 }
 0xd56   : > { %6971 = vst.msk [vmem:[%s8230_s26 + $0x110] sm:$0xff] %vm6969_vm7, %v6900_v62 }
 0xd57   : > { %7138 = vrot.lane.b32.xlu1 %v14483_v29, %s8002_s16  ;;  %v6902_v18 = vpop.permute.xlu0 %6901 }
 0xd58   : > { %6972 = vst.msk [vmem:[%s8230_s26 + $0x1c8] sm:$0xff] %vm6969_vm7, %v6902_v18 }
 0xd59   : > { %v6904_v1 = vpop.permute.xlu1 %6903  ;;  %7140 = vrot.lane.b32.xlu0 %v14493_v55, %s8002_s16 }
 0xd5a   : > { %6973 = vst.msk [vmem:[%s8230_s26 + $0x280] sm:$0xff] %vm6969_vm7, %v6904_v1 }
 0xd5b   : > { %7142 = vrot.lane.b32.xlu1 %v14501_v51, %s8002_s16  ;;  %v6906_v30 = vpop.permute.xlu0 %6905 }
 0xd5c   : > { %6974 = vst.msk [vmem:[%s8230_s26 + $0x338] sm:$0xff] %vm6969_vm7, %v6906_v30 }
 0xd5d   : > { %v6908_v56 = vpop.permute.xlu1 %6907  ;;  %7144 = vrot.lane.b32.xlu0 %v14507_v52, %s8002_s16 }
 0xd5e   : > { %6975 = vst.msk [vmem:[%s8230_s26 + $0x3f0] sm:$0xff] %vm6969_vm7, %v6908_v56 }
 0xd5f   : > { %7146 = vrot.lane.b32.xlu1 %v14515_v4, %s8002_s16  ;;  %v6910_v32 = vpop.permute.xlu0 %6909 }
 0xd60   : > { %6976 = vst.msk [vmem:[%s8230_s26 + $0x4a8] sm:$0xff] %vm6969_vm7, %v6910_v32 }
 0xd61   : > { %v6912_v37 = vpop.permute.xlu1 %6911  ;;  %7148 = vrot.lane.b32.xlu0 %v14523_v19, %s8002_s16 }
 0xd62   : > { %6977 = vst.msk [vmem:[%s8230_s26 + $0x560] sm:$0xff] %vm6969_vm7, %v6912_v37 }
 0xd63   : > { %7150 = vrot.lane.b32.xlu1 %v14531_v47, %s8002_s16  ;;  %v6914_v63 = vpop.permute.xlu0 %6913 }
 0xd64   : > { %6978 = vst.msk [vmem:[%s8230_s26 + $0x618] sm:$0xff] %vm6969_vm7, %v6914_v63 }
 0xd65   : > { %v6916_v36 = vpop.permute.xlu1 %6915  ;;  %7152 = vrot.lane.b32.xlu0 %v14539_v28, %s8002_s16 }
 0xd66   : > { %6979 = vst.msk [vmem:[%s8230_s26 + $0x6d0] sm:$0xff] %vm6969_vm7, %v6916_v36 }
 0xd67   : > { %7154 = vrot.lane.b32.xlu1 %v14547_v15, %s8002_s16  ;;  %v6918_v31 = vpop.permute.xlu0 %6917 }
 0xd68   : > { %6980 = vst.msk [vmem:[%s8230_s26 + $0x788] sm:$0xff] %vm6969_vm7, %v6918_v31 }
 0xd69   : > { %v6920_v42 = vpop.permute.xlu1 %6919  ;;  %7156 = vrot.lane.b32.xlu0 %v14555_v23, %s8002_s16 }
 0xd6a   : > { %6981 = vst.msk [vmem:[%s8230_s26 + $0x840] sm:$0xff] %vm6969_vm7, %v6920_v42 }
 0xd6b   : > { %7158 = vrot.lane.b32.xlu1 %v14563_v16, %s8002_s16  ;;  %v6922_v14 = vpop.permute.xlu0 %6921 }
 0xd6c   : > { %6982 = vst.msk [vmem:[%s8230_s26 + $0x8f8] sm:$0xff] %vm6969_vm7, %v6922_v14 }
 0xd6d   : > { %v6924_v41 = vpop.permute.xlu1 %6923  ;;  %7160 = vrot.lane.b32.xlu0 %v14571_v5, %s8002_s16 }
 0xd6e   : > { %6983 = vst.msk [vmem:[%s8230_s26 + $0x9b0] sm:$0xff] %vm6969_vm7, %v6924_v41 }
 0xd6f   : > { %7162 = vrot.lane.b32.xlu1 %v14577_v24, %s8002_s16  ;;  %v6926_v7 = vpop.permute.xlu0 %6925 }
 0xd70   : > { %6984 = vst.msk [vmem:[%s8230_s26 + $0xa68] sm:$0xff] %vm6969_vm7, %v6926_v7 }
 0xd71   : > { %v6928_v58 = vpop.permute.xlu1 %6927  ;;  %7213 = vrot.lane.b32.xlu0 %v14395_v8, %s8003_s17 }
 0xd72   : > { %6985 = vst.msk [vmem:[%s8230_s26 + $0xb20] sm:$0xff] %vm6969_vm7, %v6928_v58 }
 0xd73   : > { %7215 = vrot.lane.b32.xlu1 %v14403_v22, %s8003_s17  ;;  %v6930_v0 = vpop.permute.xlu0 %6929 }
 0xd74   : > { %6986 = vst.msk [vmem:[%s8230_s26 + $0xbd8] sm:$0xff] %vm6969_vm7, %v6930_v0 }
 0xd75   : > { %v6932_v20 = vpop.permute.xlu1 %6931  ;;  %7217 = vrot.lane.b32.xlu0 %v14411_v40, %s8003_s17 }
 0xd76   : > { %6987 = vst.msk [vmem:[%s8230_s26 + $0xc90] sm:$0xff] %vm6969_vm7, %v6932_v20 }
 0xd77   : > { %7219 = vrot.lane.b32.xlu1 %v14419_v3, %s8003_s17  ;;  %v6934_v17 = vpop.permute.xlu0 %6933 }
 0xd78   : > { %6988 = vst.msk [vmem:[%s8230_s26 + $0xd48] sm:$0xff] %vm6969_vm7, %v6934_v17 }
 0xd79   : > { %v6936_v59 = vpop.permute.xlu1 %6935  ;;  %7221 = vrot.lane.b32.xlu0 %v14427_v53, %s8003_s17 }
 0xd7a   : > { %6989 = vst.msk [vmem:[%s8230_s26 + $0xe00] sm:$0xff] %vm6969_vm7, %v6936_v59 }
 0xd7b   : > { %7223 = vrot.lane.b32.xlu1 %v14435_v21, %s8003_s17  ;;  %v6938_v12 = vpop.permute.xlu0 %6937 }
 0xd7c   : > { %6990 = vst.msk [vmem:[%s8230_s26 + $0xeb8] sm:$0xff] %vm6969_vm7, %v6938_v12 }
 0xd7d   : > { %v6940_v13 = vpop.permute.xlu1 %6939  ;;  %7225 = vrot.lane.b32.xlu0 %v14443_v60, %s8003_s17 }
 0xd7e   : > { %6991 = vst.msk [vmem:[%s8230_s26 + $0xf70] sm:$0xff] %vm6969_vm7, %v6940_v13 }
 0xd7f   : > { %7227 = vrot.lane.b32.xlu1 %v14451_v46, %s8003_s17  ;;  %v6942_v2 = vpop.permute.xlu0 %6941 }
 0xd80   : > { %6992 = vst.msk [vmem:[%s8230_s26 + $0x1028] sm:$0xff] %vm6969_vm7, %v6942_v2 }
 0xd81   : > { %v6944_v6 = vpop.permute.xlu1 %6943  ;;  %7229 = vrot.lane.b32.xlu0 %v14459_v48, %s8003_s17 }
 0xd82   : > { %6993 = vst.msk [vmem:[%s8230_s26 + $0x10e0] sm:$0xff] %vm6969_vm7, %v6944_v6 }
 0xd83   : > { %7231 = vrot.lane.b32.xlu1 %v14467_v45, %s8003_s17  ;;  %v6995_v61 = vpop.permute.xlu0 %6994 }
 0xd84   : > { %7067 = vst.msk [vmem:[%s8230_s26 + $0x58] sm:$0xff] %vm7066_vm8, %v6995_v61 }
 0xd85   : > { %7069 = vst.msk [vmem:[%s8230_s26 + $0x60] sm:$0xff] %vm7068_vm4, %v6995_v61  ;;  %v6997_v26 = vpop.permute.xlu1 %6996  ;;  %7233 = vrot.lane.b32.xlu0 %v14475_v49, %s8003_s17 }
 0xd86   : > { %7070 = vst.msk [vmem:[%s8230_s26 + $0x110] sm:$0xff] %vm7066_vm8, %v6997_v26 }
 0xd87   : > { %7071 = vst.msk [vmem:[%s8230_s26 + $0x118] sm:$0xff] %vm7068_vm4, %v6997_v26  ;;  %7235 = vrot.lane.b32.xlu1 %v14483_v29, %s8003_s17  ;;  %v6999_v39 = vpop.permute.xlu0 %6998 }
 0xd88   : > { %7072 = vst.msk [vmem:[%s8230_s26 + $0x1c8] sm:$0xff] %vm7066_vm8, %v6999_v39 }
 0xd89   : > { %7073 = vst.msk [vmem:[%s8230_s26 + $0x1d0] sm:$0xff] %vm7068_vm4, %v6999_v39  ;;  %v7001_v44 = vpop.permute.xlu1 %7000  ;;  %7237 = vrot.lane.b32.xlu0 %v14493_v55, %s8003_s17 }
 0xd8a   : > { %7074 = vst.msk [vmem:[%s8230_s26 + $0x280] sm:$0xff] %vm7066_vm8, %v7001_v44 }
 0xd8b   : > { %7075 = vst.msk [vmem:[%s8230_s26 + $0x288] sm:$0xff] %vm7068_vm4, %v7001_v44  ;;  %7239 = vrot.lane.b32.xlu1 %v14501_v51, %s8003_s17  ;;  %v7003_v33 = vpop.permute.xlu0 %7002 }
 0xd8c   : > { %7076 = vst.msk [vmem:[%s8230_s26 + $0x338] sm:$0xff] %vm7066_vm8, %v7003_v33 }
 0xd8d   : > { %7077 = vst.msk [vmem:[%s8230_s26 + $0x340] sm:$0xff] %vm7068_vm4, %v7003_v33  ;;  %v7005_v50 = vpop.permute.xlu1 %7004  ;;  %7241 = vrot.lane.b32.xlu0 %v14507_v52, %s8003_s17 }
 0xd8e   : > { %7078 = vst.msk [vmem:[%s8230_s26 + $0x3f0] sm:$0xff] %vm7066_vm8, %v7005_v50 }
 0xd8f   : > { %7079 = vst.msk [vmem:[%s8230_s26 + $0x3f8] sm:$0xff] %vm7068_vm4, %v7005_v50  ;;  %7243 = vrot.lane.b32.xlu1 %v14515_v4, %s8003_s17  ;;  %v7007_v38 = vpop.permute.xlu0 %7006 }
 0xd90   : > { %7080 = vst.msk [vmem:[%s8230_s26 + $0x4a8] sm:$0xff] %vm7066_vm8, %v7007_v38 }
 0xd91   : > { %7081 = vst.msk [vmem:[%s8230_s26 + $0x4b0] sm:$0xff] %vm7068_vm4, %v7007_v38  ;;  %v7009_v57 = vpop.permute.xlu1 %7008  ;;  %7245 = vrot.lane.b32.xlu0 %v14523_v19, %s8003_s17 }
 0xd92   : > { %7082 = vst.msk [vmem:[%s8230_s26 + $0x560] sm:$0xff] %vm7066_vm8, %v7009_v57 }
 0xd93   : > { %7083 = vst.msk [vmem:[%s8230_s26 + $0x568] sm:$0xff] %vm7068_vm4, %v7009_v57  ;;  %7247 = vrot.lane.b32.xlu1 %v14531_v47, %s8003_s17  ;;  %v7011_v35 = vpop.permute.xlu0 %7010 }
 0xd94   : > { %7084 = vst.msk [vmem:[%s8230_s26 + $0x618] sm:$0xff] %vm7066_vm8, %v7011_v35 }
 0xd95   : > { %7085 = vst.msk [vmem:[%s8230_s26 + $0x620] sm:$0xff] %vm7068_vm4, %v7011_v35  ;;  %v7013_v34 = vpop.permute.xlu1 %7012  ;;  %7249 = vrot.lane.b32.xlu0 %v14539_v28, %s8003_s17 }
 0xd96   : > { %7086 = vst.msk [vmem:[%s8230_s26 + $0x6d0] sm:$0xff] %vm7066_vm8, %v7013_v34 }
 0xd97   : > { %7087 = vst.msk [vmem:[%s8230_s26 + $0x6d8] sm:$0xff] %vm7068_vm4, %v7013_v34  ;;  %7251 = vrot.lane.b32.xlu1 %v14547_v15, %s8003_s17  ;;  %v7015_v11 = vpop.permute.xlu0 %7014 }
 0xd98   : > { %7088 = vst.msk [vmem:[%s8230_s26 + $0x788] sm:$0xff] %vm7066_vm8, %v7015_v11 }
 0xd99   : > { %7089 = vst.msk [vmem:[%s8230_s26 + $0x790] sm:$0xff] %vm7068_vm4, %v7015_v11  ;;  %v7017_v10 = vpop.permute.xlu1 %7016  ;;  %7253 = vrot.lane.b32.xlu0 %v14555_v23, %s8003_s17 }
 0xd9a   : > { %7090 = vst.msk [vmem:[%s8230_s26 + $0x840] sm:$0xff] %vm7066_vm8, %v7017_v10 }
 0xd9b   : > { %7091 = vst.msk [vmem:[%s8230_s26 + $0x848] sm:$0xff] %vm7068_vm4, %v7017_v10  ;;  %7255 = vrot.lane.b32.xlu1 %v14563_v16, %s8003_s17  ;;  %v7019_v43 = vpop.permute.xlu0 %7018 }
 0xd9c   : > { %7092 = vst.msk [vmem:[%s8230_s26 + $0x8f8] sm:$0xff] %vm7066_vm8, %v7019_v43 }
 0xd9d   : > { %7093 = vst.msk [vmem:[%s8230_s26 + $0x900] sm:$0xff] %vm7068_vm4, %v7019_v43  ;;  %v7021_v27 = vpop.permute.xlu1 %7020  ;;  %7257 = vrot.lane.b32.xlu0 %v14571_v5, %s8003_s17 }
 0xd9e   : > { %7094 = vst.msk [vmem:[%s8230_s26 + $0x9b0] sm:$0xff] %vm7066_vm8, %v7021_v27 }
 0xd9f   : > { %7095 = vst.msk [vmem:[%s8230_s26 + $0x9b8] sm:$0xff] %vm7068_vm4, %v7021_v27  ;;  %7259 = vrot.lane.b32.xlu1 %v14577_v24, %s8003_s17  ;;  %v7023_v25 = vpop.permute.xlu0 %7022 }
 0xda0   : > { %7096 = vst.msk [vmem:[%s8230_s26 + $0xa68] sm:$0xff] %vm7066_vm8, %v7023_v25 }
 0xda1   : > { %7097 = vst.msk [vmem:[%s8230_s26 + $0xa70] sm:$0xff] %vm7068_vm4, %v7023_v25  ;;  %v7025_v54 = vpop.permute.xlu1 %7024  ;;  %7310 = vrot.lane.b32.xlu0 %v14395_v8, %s8004_s18 }
 0xda2   : > { %7098 = vst.msk [vmem:[%s8230_s26 + $0xb20] sm:$0xff] %vm7066_vm8, %v7025_v54 }
 0xda3   : > { %7099 = vst.msk [vmem:[%s8230_s26 + $0xb28] sm:$0xff] %vm7068_vm4, %v7025_v54  ;;  %7312 = vrot.lane.b32.xlu1 %v14403_v22, %s8004_s18  ;;  %v7027_v9 = vpop.permute.xlu0 %7026 }
 0xda4   : > { %7100 = vst.msk [vmem:[%s8230_s26 + $0xbd8] sm:$0xff] %vm7066_vm8, %v7027_v9 }
 0xda5   : > { %7101 = vst.msk [vmem:[%s8230_s26 + $0xbe0] sm:$0xff] %vm7068_vm4, %v7027_v9  ;;  %v7029_v62 = vpop.permute.xlu1 %7028  ;;  %7314 = vrot.lane.b32.xlu0 %v14411_v40, %s8004_s18 }
 0xda6   : > { %7102 = vst.msk [vmem:[%s8230_s26 + $0xc90] sm:$0xff] %vm7066_vm8, %v7029_v62 }
 0xda7   : > { %7103 = vst.msk [vmem:[%s8230_s26 + $0xc98] sm:$0xff] %vm7068_vm4, %v7029_v62  ;;  %7316 = vrot.lane.b32.xlu1 %v14419_v3, %s8004_s18  ;;  %v7031_v18 = vpop.permute.xlu0 %7030 }
 0xda8   : > { %7104 = vst.msk [vmem:[%s8230_s26 + $0xd48] sm:$0xff] %vm7066_vm8, %v7031_v18 }
 0xda9   : > { %7105 = vst.msk [vmem:[%s8230_s26 + $0xd50] sm:$0xff] %vm7068_vm4, %v7031_v18  ;;  %v7033_v1 = vpop.permute.xlu1 %7032  ;;  %7318 = vrot.lane.b32.xlu0 %v14427_v53, %s8004_s18 }
 0xdaa   : > { %7106 = vst.msk [vmem:[%s8230_s26 + $0xe00] sm:$0xff] %vm7066_vm8, %v7033_v1 }
 0xdab   : > { %7107 = vst.msk [vmem:[%s8230_s26 + $0xe08] sm:$0xff] %vm7068_vm4, %v7033_v1  ;;  %7320 = vrot.lane.b32.xlu1 %v14435_v21, %s8004_s18  ;;  %v7035_v30 = vpop.permute.xlu0 %7034 }
 0xdac   : > { %7108 = vst.msk [vmem:[%s8230_s26 + $0xeb8] sm:$0xff] %vm7066_vm8, %v7035_v30 }
 0xdad   : > { %7109 = vst.msk [vmem:[%s8230_s26 + $0xec0] sm:$0xff] %vm7068_vm4, %v7035_v30  ;;  %v7037_v56 = vpop.permute.xlu1 %7036  ;;  %7322 = vrot.lane.b32.xlu0 %v14443_v60, %s8004_s18 }
 0xdae   : > { %7110 = vst.msk [vmem:[%s8230_s26 + $0xf70] sm:$0xff] %vm7066_vm8, %v7037_v56 }
 0xdaf   : > { %7111 = vst.msk [vmem:[%s8230_s26 + $0xf78] sm:$0xff] %vm7068_vm4, %v7037_v56  ;;  %7324 = vrot.lane.b32.xlu1 %v14451_v46, %s8004_s18  ;;  %v7039_v32 = vpop.permute.xlu0 %7038 }
 0xdb0   : > { %7112 = vst.msk [vmem:[%s8230_s26 + $0x1028] sm:$0xff] %vm7066_vm8, %v7039_v32 }
 0xdb1   : > { %7113 = vst.msk [vmem:[%s8230_s26 + $0x1030] sm:$0xff] %vm7068_vm4, %v7039_v32  ;;  %v7041_v37 = vpop.permute.xlu1 %7040  ;;  %7326 = vrot.lane.b32.xlu0 %v14459_v48, %s8004_s18 }
 0xdb2   : > { %7114 = vst.msk [vmem:[%s8230_s26 + $0x10e0] sm:$0xff] %vm7066_vm8, %v7041_v37 }
 0xdb3   : > { %7115 = vst.msk [vmem:[%s8230_s26 + $0x10e8] sm:$0xff] %vm7068_vm4, %v7041_v37  ;;  %7328 = vrot.lane.b32.xlu1 %v14467_v45, %s8004_s18  ;;  %v7117_v63 = vpop.permute.xlu0 %7116 }
 0xdb4   : > { %7189 = vst.msk [vmem:[%s8230_s26 + $0x60] sm:$0xff] %vm7188_vm9, %v7117_v63 }
 0xdb5   : > { %v7119_v36 = vpop.permute.xlu1 %7118  ;;  %7330 = vrot.lane.b32.xlu0 %v14475_v49, %s8004_s18 }
 0xdb6   : > { %7190 = vst.msk [vmem:[%s8230_s26 + $0x118] sm:$0xff] %vm7188_vm9, %v7119_v36 }
 0xdb7   : > { %7332 = vrot.lane.b32.xlu1 %v14483_v29, %s8004_s18  ;;  %v7121_v31 = vpop.permute.xlu0 %7120 }
 0xdb8   : > { %7191 = vst.msk [vmem:[%s8230_s26 + $0x1d0] sm:$0xff] %vm7188_vm9, %v7121_v31 }
 0xdb9   : > { %v7123_v42 = vpop.permute.xlu1 %7122  ;;  %7334 = vrot.lane.b32.xlu0 %v14493_v55, %s8004_s18 }
 0xdba   : > { %7192 = vst.msk [vmem:[%s8230_s26 + $0x288] sm:$0xff] %vm7188_vm9, %v7123_v42 }
 0xdbb   : > { %7336 = vrot.lane.b32.xlu1 %v14501_v51, %s8004_s18  ;;  %v7125_v14 = vpop.permute.xlu0 %7124 }
 0xdbc   : > { %7193 = vst.msk [vmem:[%s8230_s26 + $0x340] sm:$0xff] %vm7188_vm9, %v7125_v14 }
 0xdbd   : > { %v7127_v41 = vpop.permute.xlu1 %7126  ;;  %7338 = vrot.lane.b32.xlu0 %v14507_v52, %s8004_s18 }
 0xdbe   : > { %7194 = vst.msk [vmem:[%s8230_s26 + $0x3f8] sm:$0xff] %vm7188_vm9, %v7127_v41 }
 0xdbf   : > { %7340 = vrot.lane.b32.xlu1 %v14515_v4, %s8004_s18  ;;  %v7129_v7 = vpop.permute.xlu0 %7128 }
 0xdc0   : > { %7195 = vst.msk [vmem:[%s8230_s26 + $0x4b0] sm:$0xff] %vm7188_vm9, %v7129_v7 }
 0xdc1   : > { %v7131_v58 = vpop.permute.xlu1 %7130  ;;  %7342 = vrot.lane.b32.xlu0 %v14523_v19, %s8004_s18 }
 0xdc2   : > { %7196 = vst.msk [vmem:[%s8230_s26 + $0x568] sm:$0xff] %vm7188_vm9, %v7131_v58 }
 0xdc3   : > { %7344 = vrot.lane.b32.xlu1 %v14531_v47, %s8004_s18  ;;  %v7133_v0 = vpop.permute.xlu0 %7132 }
 0xdc4   : > { %7197 = vst.msk [vmem:[%s8230_s26 + $0x620] sm:$0xff] %vm7188_vm9, %v7133_v0 }
 0xdc5   : > { %v7135_v20 = vpop.permute.xlu1 %7134  ;;  %7346 = vrot.lane.b32.xlu0 %v14539_v28, %s8004_s18 }
 0xdc6   : > { %7198 = vst.msk [vmem:[%s8230_s26 + $0x6d8] sm:$0xff] %vm7188_vm9, %v7135_v20 }
 0xdc7   : > { %7348 = vrot.lane.b32.xlu1 %v14547_v15, %s8004_s18  ;;  %v7137_v17 = vpop.permute.xlu0 %7136 }
 0xdc8   : > { %7199 = vst.msk [vmem:[%s8230_s26 + $0x790] sm:$0xff] %vm7188_vm9, %v7137_v17 }
 0xdc9   : > { %v7139_v59 = vpop.permute.xlu1 %7138  ;;  %7350 = vrot.lane.b32.xlu0 %v14555_v23, %s8004_s18 }
 0xdca   : > { %7200 = vst.msk [vmem:[%s8230_s26 + $0x848] sm:$0xff] %vm7188_vm9, %v7139_v59 }
 0xdcb   : > { %7352 = vrot.lane.b32.xlu1 %v14563_v16, %s8004_s18  ;;  %v7141_v12 = vpop.permute.xlu0 %7140 }
 0xdcc   : > { %7201 = vst.msk [vmem:[%s8230_s26 + $0x900] sm:$0xff] %vm7188_vm9, %v7141_v12 }
 0xdcd   : > { %v7143_v13 = vpop.permute.xlu1 %7142  ;;  %7354 = vrot.lane.b32.xlu0 %v14571_v5, %s8004_s18 }
 0xdce   : > { %7202 = vst.msk [vmem:[%s8230_s26 + $0x9b8] sm:$0xff] %vm7188_vm9, %v7143_v13 }
 0xdcf   : > { %7356 = vrot.lane.b32.xlu1 %v14577_v24, %s8004_s18  ;;  %v7145_v2 = vpop.permute.xlu0 %7144 }
 0xdd0   : > { %7203 = vst.msk [vmem:[%s8230_s26 + $0xa70] sm:$0xff] %vm7188_vm9, %v7145_v2 }
 0xdd1   : > { %v7147_v6 = vpop.permute.xlu1 %7146  ;;  %7407 = vrot.lane.b32.xlu0 %v14395_v8, %s8005_s19 }
 0xdd2   : > { %7204 = vst.msk [vmem:[%s8230_s26 + $0xb28] sm:$0xff] %vm7188_vm9, %v7147_v6 }
 0xdd3   : > { %7409 = vrot.lane.b32.xlu1 %v14403_v22, %s8005_s19  ;;  %v7149_v61 = vpop.permute.xlu0 %7148 }
 0xdd4   : > { %7205 = vst.msk [vmem:[%s8230_s26 + $0xbe0] sm:$0xff] %vm7188_vm9, %v7149_v61 }
 0xdd5   : > { %v7151_v26 = vpop.permute.xlu1 %7150  ;;  %7411 = vrot.lane.b32.xlu0 %v14411_v40, %s8005_s19 }
 0xdd6   : > { %7206 = vst.msk [vmem:[%s8230_s26 + $0xc98] sm:$0xff] %vm7188_vm9, %v7151_v26 }
 0xdd7   : > { %7413 = vrot.lane.b32.xlu1 %v14419_v3, %s8005_s19  ;;  %v7153_v39 = vpop.permute.xlu0 %7152 }
 0xdd8   : > { %7207 = vst.msk [vmem:[%s8230_s26 + $0xd50] sm:$0xff] %vm7188_vm9, %v7153_v39 }
 0xdd9   : > { %v7155_v44 = vpop.permute.xlu1 %7154  ;;  %7415 = vrot.lane.b32.xlu0 %v14427_v53, %s8005_s19 }
 0xdda   : > { %7208 = vst.msk [vmem:[%s8230_s26 + $0xe08] sm:$0xff] %vm7188_vm9, %v7155_v44 }
 0xddb   : > { %7417 = vrot.lane.b32.xlu1 %v14435_v21, %s8005_s19  ;;  %v7157_v33 = vpop.permute.xlu0 %7156 }
 0xddc   : > { %7209 = vst.msk [vmem:[%s8230_s26 + $0xec0] sm:$0xff] %vm7188_vm9, %v7157_v33 }
 0xddd   : > { %v7159_v50 = vpop.permute.xlu1 %7158  ;;  %7419 = vrot.lane.b32.xlu0 %v14443_v60, %s8005_s19 }
 0xdde   : > { %7210 = vst.msk [vmem:[%s8230_s26 + $0xf78] sm:$0xff] %vm7188_vm9, %v7159_v50 }
 0xddf   : > { %7421 = vrot.lane.b32.xlu1 %v14451_v46, %s8005_s19  ;;  %v7161_v38 = vpop.permute.xlu0 %7160 }
 0xde0   : > { %7211 = vst.msk [vmem:[%s8230_s26 + $0x1030] sm:$0xff] %vm7188_vm9, %v7161_v38 }
 0xde1   : > { %v7163_v57 = vpop.permute.xlu1 %7162  ;;  %7423 = vrot.lane.b32.xlu0 %v14459_v48, %s8005_s19 }
 0xde2   : > { %7212 = vst.msk [vmem:[%s8230_s26 + $0x10e8] sm:$0xff] %vm7188_vm9, %v7163_v57 }
 0xde3   : > { %7425 = vrot.lane.b32.xlu1 %v14467_v45, %s8005_s19  ;;  %v7214_v35 = vpop.permute.xlu0 %7213 }
 0xde4   : > { %7286 = vst.msk [vmem:[%s8230_s26 + $0x60] sm:$0xff] %vm7285_vm11, %v7214_v35 }
 0xde5   : > { %v7216_v34 = vpop.permute.xlu1 %7215  ;;  %7427 = vrot.lane.b32.xlu0 %v14475_v49, %s8005_s19 }
 0xde6   : > { %7287 = vst.msk [vmem:[%s8230_s26 + $0x118] sm:$0xff] %vm7285_vm11, %v7216_v34 }
 0xde7   : > { %7429 = vrot.lane.b32.xlu1 %v14483_v29, %s8005_s19  ;;  %v7218_v11 = vpop.permute.xlu0 %7217 }
 0xde8   : > { %7288 = vst.msk [vmem:[%s8230_s26 + $0x1d0] sm:$0xff] %vm7285_vm11, %v7218_v11 }
 0xde9   : > { %v7220_v10 = vpop.permute.xlu1 %7219  ;;  %7431 = vrot.lane.b32.xlu0 %v14493_v55, %s8005_s19 }
 0xdea   : > { %7289 = vst.msk [vmem:[%s8230_s26 + $0x288] sm:$0xff] %vm7285_vm11, %v7220_v10 }
 0xdeb   : > { %7433 = vrot.lane.b32.xlu1 %v14501_v51, %s8005_s19  ;;  %v7222_v43 = vpop.permute.xlu0 %7221 }
 0xdec   : > { %7290 = vst.msk [vmem:[%s8230_s26 + $0x340] sm:$0xff] %vm7285_vm11, %v7222_v43 }
 0xded   : > { %v7224_v27 = vpop.permute.xlu1 %7223  ;;  %7435 = vrot.lane.b32.xlu0 %v14507_v52, %s8005_s19 }
 0xdee   : > { %7291 = vst.msk [vmem:[%s8230_s26 + $0x3f8] sm:$0xff] %vm7285_vm11, %v7224_v27 }
 0xdef   : > { %7437 = vrot.lane.b32.xlu1 %v14515_v4, %s8005_s19  ;;  %v7226_v25 = vpop.permute.xlu0 %7225 }
 0xdf0   : > { %7292 = vst.msk [vmem:[%s8230_s26 + $0x4b0] sm:$0xff] %vm7285_vm11, %v7226_v25 }
 0xdf1   : > { %v7228_v54 = vpop.permute.xlu1 %7227  ;;  %7439 = vrot.lane.b32.xlu0 %v14523_v19, %s8005_s19 }
 0xdf2   : > { %7293 = vst.msk [vmem:[%s8230_s26 + $0x568] sm:$0xff] %vm7285_vm11, %v7228_v54 }
 0xdf3   : > { %7441 = vrot.lane.b32.xlu1 %v14531_v47, %s8005_s19  ;;  %v7230_v9 = vpop.permute.xlu0 %7229 }
 0xdf4   : > { %7294 = vst.msk [vmem:[%s8230_s26 + $0x620] sm:$0xff] %vm7285_vm11, %v7230_v9 }
 0xdf5   : > { %v7232_v62 = vpop.permute.xlu1 %7231  ;;  %7443 = vrot.lane.b32.xlu0 %v14539_v28, %s8005_s19 }
 0xdf6   : > { %7295 = vst.msk [vmem:[%s8230_s26 + $0x6d8] sm:$0xff] %vm7285_vm11, %v7232_v62 }
 0xdf7   : > { %7445 = vrot.lane.b32.xlu1 %v14547_v15, %s8005_s19  ;;  %v7234_v18 = vpop.permute.xlu0 %7233 }
 0xdf8   : > { %7296 = vst.msk [vmem:[%s8230_s26 + $0x790] sm:$0xff] %vm7285_vm11, %v7234_v18 }
 0xdf9   : > { %v7236_v1 = vpop.permute.xlu1 %7235  ;;  %7447 = vrot.lane.b32.xlu0 %v14555_v23, %s8005_s19 }
 0xdfa   : > { %7297 = vst.msk [vmem:[%s8230_s26 + $0x848] sm:$0xff] %vm7285_vm11, %v7236_v1 }
 0xdfb   : > { %7449 = vrot.lane.b32.xlu1 %v14563_v16, %s8005_s19  ;;  %v7238_v30 = vpop.permute.xlu0 %7237 }
 0xdfc   : > { %7298 = vst.msk [vmem:[%s8230_s26 + $0x900] sm:$0xff] %vm7285_vm11, %v7238_v30 }
 0xdfd   : > { %v7240_v56 = vpop.permute.xlu1 %7239  ;;  %7451 = vrot.lane.b32.xlu0 %v14571_v5, %s8005_s19 }
 0xdfe   : > { %7299 = vst.msk [vmem:[%s8230_s26 + $0x9b8] sm:$0xff] %vm7285_vm11, %v7240_v56 }
 0xdff   : > { %7453 = vrot.lane.b32.xlu1 %v14577_v24, %s8005_s19  ;;  %v7242_v32 = vpop.permute.xlu0 %7241 }
 0xe00   : > { %7300 = vst.msk [vmem:[%s8230_s26 + $0xa70] sm:$0xff] %vm7285_vm11, %v7242_v32 }
 0xe01   : > { %v7244_v37 = vpop.permute.xlu1 %7243  ;;  %7504 = vrot.lane.b32.xlu0 %v14395_v8, %s8006_s20 }
 0xe02   : > { %7301 = vst.msk [vmem:[%s8230_s26 + $0xb28] sm:$0xff] %vm7285_vm11, %v7244_v37 }
 0xe03   : > { %7506 = vrot.lane.b32.xlu1 %v14403_v22, %s8006_s20  ;;  %v7246_v63 = vpop.permute.xlu0 %7245 }
 0xe04   : > { %7302 = vst.msk [vmem:[%s8230_s26 + $0xbe0] sm:$0xff] %vm7285_vm11, %v7246_v63 }
 0xe05   : > { %v7248_v36 = vpop.permute.xlu1 %7247  ;;  %7508 = vrot.lane.b32.xlu0 %v14411_v40, %s8006_s20 }
 0xe06   : > { %7303 = vst.msk [vmem:[%s8230_s26 + $0xc98] sm:$0xff] %vm7285_vm11, %v7248_v36 }
 0xe07   : > { %7510 = vrot.lane.b32.xlu1 %v14419_v3, %s8006_s20  ;;  %v7250_v31 = vpop.permute.xlu0 %7249 }
 0xe08   : > { %7304 = vst.msk [vmem:[%s8230_s26 + $0xd50] sm:$0xff] %vm7285_vm11, %v7250_v31 }
 0xe09   : > { %v7252_v42 = vpop.permute.xlu1 %7251  ;;  %7512 = vrot.lane.b32.xlu0 %v14427_v53, %s8006_s20 }
 0xe0a   : > { %7305 = vst.msk [vmem:[%s8230_s26 + $0xe08] sm:$0xff] %vm7285_vm11, %v7252_v42 }
 0xe0b   : > { %7514 = vrot.lane.b32.xlu1 %v14435_v21, %s8006_s20  ;;  %v7254_v14 = vpop.permute.xlu0 %7253 }
 0xe0c   : > { %7306 = vst.msk [vmem:[%s8230_s26 + $0xec0] sm:$0xff] %vm7285_vm11, %v7254_v14 }
 0xe0d   : > { %v7256_v41 = vpop.permute.xlu1 %7255  ;;  %7516 = vrot.lane.b32.xlu0 %v14443_v60, %s8006_s20 }
 0xe0e   : > { %7307 = vst.msk [vmem:[%s8230_s26 + $0xf78] sm:$0xff] %vm7285_vm11, %v7256_v41 }
 0xe0f   : > { %7518 = vrot.lane.b32.xlu1 %v14451_v46, %s8006_s20  ;;  %v7258_v7 = vpop.permute.xlu0 %7257 }
 0xe10   : > { %7308 = vst.msk [vmem:[%s8230_s26 + $0x1030] sm:$0xff] %vm7285_vm11, %v7258_v7 }
 0xe11   : > { %v7260_v58 = vpop.permute.xlu1 %7259  ;;  %7520 = vrot.lane.b32.xlu0 %v14459_v48, %s8006_s20 }
 0xe12   : > { %7309 = vst.msk [vmem:[%s8230_s26 + $0x10e8] sm:$0xff] %vm7285_vm11, %v7260_v58 }
 0xe13   : > { %7522 = vrot.lane.b32.xlu1 %v14467_v45, %s8006_s20  ;;  %v7311_v0 = vpop.permute.xlu0 %7310 }
 0xe14   : > { %7383 = vst.msk [vmem:[%s8230_s26 + $0x68] sm:$0xff] %vm7382_vm10, %v7311_v0 }
 0xe15   : > { %v7313_v20 = vpop.permute.xlu1 %7312  ;;  %7524 = vrot.lane.b32.xlu0 %v14475_v49, %s8006_s20 }
 0xe16   : > { %7384 = vst.msk [vmem:[%s8230_s26 + $0x120] sm:$0xff] %vm7382_vm10, %v7313_v20 }
 0xe17   : > { %7526 = vrot.lane.b32.xlu1 %v14483_v29, %s8006_s20  ;;  %v7315_v17 = vpop.permute.xlu0 %7314 }
 0xe18   : > { %7385 = vst.msk [vmem:[%s8230_s26 + $0x1d8] sm:$0xff] %vm7382_vm10, %v7315_v17 }
 0xe19   : > { %v7317_v59 = vpop.permute.xlu1 %7316  ;;  %7528 = vrot.lane.b32.xlu0 %v14493_v55, %s8006_s20 }
 0xe1a   : > { %7386 = vst.msk [vmem:[%s8230_s26 + $0x290] sm:$0xff] %vm7382_vm10, %v7317_v59 }
 0xe1b   : > { %7530 = vrot.lane.b32.xlu1 %v14501_v51, %s8006_s20  ;;  %v7319_v12 = vpop.permute.xlu0 %7318 }
 0xe1c   : > { %7387 = vst.msk [vmem:[%s8230_s26 + $0x348] sm:$0xff] %vm7382_vm10, %v7319_v12 }
 0xe1d   : > { %v7321_v13 = vpop.permute.xlu1 %7320  ;;  %7532 = vrot.lane.b32.xlu0 %v14507_v52, %s8006_s20 }
 0xe1e   : > { %7388 = vst.msk [vmem:[%s8230_s26 + $0x400] sm:$0xff] %vm7382_vm10, %v7321_v13 }
 0xe1f   : > { %7534 = vrot.lane.b32.xlu1 %v14515_v4, %s8006_s20  ;;  %v7323_v2 = vpop.permute.xlu0 %7322 }
 0xe20   : > { %7389 = vst.msk [vmem:[%s8230_s26 + $0x4b8] sm:$0xff] %vm7382_vm10, %v7323_v2 }
 0xe21   : > { %v7325_v6 = vpop.permute.xlu1 %7324  ;;  %7536 = vrot.lane.b32.xlu0 %v14523_v19, %s8006_s20 }
 0xe22   : > { %7390 = vst.msk [vmem:[%s8230_s26 + $0x570] sm:$0xff] %vm7382_vm10, %v7325_v6 }
 0xe23   : > { %7538 = vrot.lane.b32.xlu1 %v14531_v47, %s8006_s20  ;;  %v7327_v61 = vpop.permute.xlu0 %7326 }
 0xe24   : > { %7391 = vst.msk [vmem:[%s8230_s26 + $0x628] sm:$0xff] %vm7382_vm10, %v7327_v61 }
 0xe25   : > { %v7329_v26 = vpop.permute.xlu1 %7328  ;;  %7540 = vrot.lane.b32.xlu0 %v14539_v28, %s8006_s20 }
 0xe26   : > { %7392 = vst.msk [vmem:[%s8230_s26 + $0x6e0] sm:$0xff] %vm7382_vm10, %v7329_v26 }
 0xe27   : > { %7542 = vrot.lane.b32.xlu1 %v14547_v15, %s8006_s20  ;;  %v7331_v39 = vpop.permute.xlu0 %7330 }
 0xe28   : > { %7393 = vst.msk [vmem:[%s8230_s26 + $0x798] sm:$0xff] %vm7382_vm10, %v7331_v39 }
 0xe29   : > { %v7333_v44 = vpop.permute.xlu1 %7332  ;;  %7544 = vrot.lane.b32.xlu0 %v14555_v23, %s8006_s20 }
 0xe2a   : > { %7394 = vst.msk [vmem:[%s8230_s26 + $0x850] sm:$0xff] %vm7382_vm10, %v7333_v44 }
 0xe2b   : > { %7546 = vrot.lane.b32.xlu1 %v14563_v16, %s8006_s20  ;;  %v7335_v33 = vpop.permute.xlu0 %7334 }
 0xe2c   : > { %7395 = vst.msk [vmem:[%s8230_s26 + $0x908] sm:$0xff] %vm7382_vm10, %v7335_v33 }
 0xe2d   : > { %v7337_v50 = vpop.permute.xlu1 %7336  ;;  %7548 = vrot.lane.b32.xlu0 %v14571_v5, %s8006_s20 }
 0xe2e   : > { %7396 = vst.msk [vmem:[%s8230_s26 + $0x9c0] sm:$0xff] %vm7382_vm10, %v7337_v50 }
 0xe2f   : > { %7550 = vrot.lane.b32.xlu1 %v14577_v24, %s8006_s20  ;;  %v7339_v38 = vpop.permute.xlu0 %7338 }
 0xe30   : > { %7397 = vst.msk [vmem:[%s8230_s26 + $0xa78] sm:$0xff] %vm7382_vm10, %v7339_v38 }
 0xe31   : > { %v7341_v57 = vpop.permute.xlu1 %7340  ;;  %7601 = vrot.lane.b32.xlu0 %v14395_v8, %s8007_s23 }
 0xe32   : > { %7398 = vst.msk [vmem:[%s8230_s26 + $0xb30] sm:$0xff] %vm7382_vm10, %v7341_v57 }
 0xe33   : > { %7603 = vrot.lane.b32.xlu1 %v14403_v22, %s8007_s23  ;;  %v7343_v35 = vpop.permute.xlu0 %7342 }
 0xe34   : > { %7399 = vst.msk [vmem:[%s8230_s26 + $0xbe8] sm:$0xff] %vm7382_vm10, %v7343_v35 }
 0xe35   : > { %v7345_v34 = vpop.permute.xlu1 %7344  ;;  %7605 = vrot.lane.b32.xlu0 %v14411_v40, %s8007_s23 }
 0xe36   : > { %7400 = vst.msk [vmem:[%s8230_s26 + $0xca0] sm:$0xff] %vm7382_vm10, %v7345_v34 }
 0xe37   : > { %7607 = vrot.lane.b32.xlu1 %v14419_v3, %s8007_s23  ;;  %v7347_v8 = vpop.permute.xlu0 %7346 }
 0xe38   : > { %7401 = vst.msk [vmem:[%s8230_s26 + $0xd58] sm:$0xff] %vm7382_vm10, %v7347_v8 }
 0xe39   : > { %v7349_v11 = vpop.permute.xlu1 %7348  ;;  %7609 = vrot.lane.b32.xlu0 %v14427_v53, %s8007_s23 }
 0xe3a   : > { %7402 = vst.msk [vmem:[%s8230_s26 + $0xe10] sm:$0xff] %vm7382_vm10, %v7349_v11 }
 0xe3b   : > { %7611 = vrot.lane.b32.xlu1 %v14435_v21, %s8007_s23  ;;  %v7351_v22 = vpop.permute.xlu0 %7350 }
 0xe3c   : > { %7403 = vst.msk [vmem:[%s8230_s26 + $0xec8] sm:$0xff] %vm7382_vm10, %v7351_v22 }
 0xe3d   : > { %v7353_v40 = vpop.permute.xlu1 %7352  ;;  %7613 = vrot.lane.b32.xlu0 %v14443_v60, %s8007_s23 }
 0xe3e   : > { %7404 = vst.msk [vmem:[%s8230_s26 + $0xf80] sm:$0xff] %vm7382_vm10, %v7353_v40 }
 0xe3f   : > { %7615 = vrot.lane.b32.xlu1 %v14451_v46, %s8007_s23  ;;  %v7355_v3 = vpop.permute.xlu0 %7354 }
 0xe40   : > { %7405 = vst.msk [vmem:[%s8230_s26 + $0x1038] sm:$0xff] %vm7382_vm10, %v7355_v3 }
 0xe41   : > { %v7357_v53 = vpop.permute.xlu1 %7356  ;;  %7617 = vrot.lane.b32.xlu0 %v14459_v48, %s8007_s23 }
 0xe42   : > { %7406 = vst.msk [vmem:[%s8230_s26 + $0x10f0] sm:$0xff] %vm7382_vm10, %v7357_v53 }
 0xe43   : > { %7619 = vrot.lane.b32.xlu1 %v14467_v45, %s8007_s23  ;;  %v7408_v21 = vpop.permute.xlu0 %7407 }
 0xe44   : > { %7480 = vst.msk [vmem:[%s8230_s26 + $0x68] sm:$0xff] %vm7479_vm12, %v7408_v21 }
 0xe45   : > { %v7410_v60 = vpop.permute.xlu1 %7409  ;;  %7621 = vrot.lane.b32.xlu0 %v14475_v49, %s8007_s23 }
 0xe46   : > { %7481 = vst.msk [vmem:[%s8230_s26 + $0x120] sm:$0xff] %vm7479_vm12, %v7410_v60 }
 0xe47   : > { %7623 = vrot.lane.b32.xlu1 %v14483_v29, %s8007_s23  ;;  %v7412_v46 = vpop.permute.xlu0 %7411 }
 0xe48   : > { %7482 = vst.msk [vmem:[%s8230_s26 + $0x1d8] sm:$0xff] %vm7479_vm12, %v7412_v46 }
 0xe49   : > { %v7414_v48 = vpop.permute.xlu1 %7413  ;;  %7625 = vrot.lane.b32.xlu0 %v14493_v55, %s8007_s23 }
 0xe4a   : > { %7483 = vst.msk [vmem:[%s8230_s26 + $0x290] sm:$0xff] %vm7479_vm12, %v7414_v48 }
 0xe4b   : > { %7627 = vrot.lane.b32.xlu1 %v14501_v51, %s8007_s23  ;;  %v7416_v45 = vpop.permute.xlu0 %7415 }
 0xe4c   : > { %7484 = vst.msk [vmem:[%s8230_s26 + $0x348] sm:$0xff] %vm7479_vm12, %v7416_v45 }
 0xe4d   : > { %v7418_v49 = vpop.permute.xlu1 %7417  ;;  %7629 = vrot.lane.b32.xlu0 %v14507_v52, %s8007_s23 }
 0xe4e   : > { %7485 = vst.msk [vmem:[%s8230_s26 + $0x400] sm:$0xff] %vm7479_vm12, %v7418_v49 }
 0xe4f   : > { %7631 = vrot.lane.b32.xlu1 %v14515_v4, %s8007_s23  ;;  %v7420_v29 = vpop.permute.xlu0 %7419 }
 0xe50   : > { %7486 = vst.msk [vmem:[%s8230_s26 + $0x4b8] sm:$0xff] %vm7479_vm12, %v7420_v29 }
 0xe51   : > { %v7422_v55 = vpop.permute.xlu1 %7421  ;;  %7633 = vrot.lane.b32.xlu0 %v14523_v19, %s8007_s23 }
 0xe52   : > { %7487 = vst.msk [vmem:[%s8230_s26 + $0x570] sm:$0xff] %vm7479_vm12, %v7422_v55 }
 0xe53   : > { %7635 = vrot.lane.b32.xlu1 %v14531_v47, %s8007_s23  ;;  %v7424_v51 = vpop.permute.xlu0 %7423 }
 0xe54   : > { %7488 = vst.msk [vmem:[%s8230_s26 + $0x628] sm:$0xff] %vm7479_vm12, %v7424_v51 }
 0xe55   : > { %v7426_v52 = vpop.permute.xlu1 %7425  ;;  %7637 = vrot.lane.b32.xlu0 %v14539_v28, %s8007_s23 }
 0xe56   : > { %7489 = vst.msk [vmem:[%s8230_s26 + $0x6e0] sm:$0xff] %vm7479_vm12, %v7426_v52 }
 0xe57   : > { %7639 = vrot.lane.b32.xlu1 %v14547_v15, %s8007_s23  ;;  %v7428_v4 = vpop.permute.xlu0 %7427 }
 0xe58   : > { %7490 = vst.msk [vmem:[%s8230_s26 + $0x798] sm:$0xff] %vm7479_vm12, %v7428_v4 }
 0xe59   : > { %v7430_v19 = vpop.permute.xlu1 %7429  ;;  %7641 = vrot.lane.b32.xlu0 %v14555_v23, %s8007_s23 }
 0xe5a   : > { %7491 = vst.msk [vmem:[%s8230_s26 + $0x850] sm:$0xff] %vm7479_vm12, %v7430_v19 }
 0xe5b   : > { %7643 = vrot.lane.b32.xlu1 %v14563_v16, %s8007_s23  ;;  %v7432_v47 = vpop.permute.xlu0 %7431 }
 0xe5c   : > { %7492 = vst.msk [vmem:[%s8230_s26 + $0x908] sm:$0xff] %vm7479_vm12, %v7432_v47 }
 0xe5d   : > { %v7434_v28 = vpop.permute.xlu1 %7433  ;;  %7645 = vrot.lane.b32.xlu0 %v14571_v5, %s8007_s23 }
 0xe5e   : > { %7493 = vst.msk [vmem:[%s8230_s26 + $0x9c0] sm:$0xff] %vm7479_vm12, %v7434_v28 }
 0xe5f   : > { %7647 = vrot.lane.b32.xlu1 %v14577_v24, %s8007_s23  ;;  %v7436_v15 = vpop.permute.xlu0 %7435 }
 0xe60   : > { %7494 = vst.msk [vmem:[%s8230_s26 + $0xa78] sm:$0xff] %vm7479_vm12, %v7436_v15 }
 0xe61   : > { %v7438_v23 = vpop.permute.xlu1 %7437 }
 0xe62   : > { %7495 = vst.msk [vmem:[%s8230_s26 + $0xb30] sm:$0xff] %vm7479_vm12, %v7438_v23 }
 0xe63   : > { %v7440_v16 = vpop.permute.xlu0 %7439 }
 0xe64   : > { %7496 = vst.msk [vmem:[%s8230_s26 + $0xbe8] sm:$0xff] %vm7479_vm12, %v7440_v16 }
 0xe65   : > { %v7442_v10 = vpop.permute.xlu1 %7441 }
 0xe66   : > { %7497 = vst.msk [vmem:[%s8230_s26 + $0xca0] sm:$0xff] %vm7479_vm12, %v7442_v10 }
 0xe67   : > { %v7444_v5 = vpop.permute.xlu0 %7443 }
 0xe68   : > { %7498 = vst.msk [vmem:[%s8230_s26 + $0xd58] sm:$0xff] %vm7479_vm12, %v7444_v5 }
 0xe69   : > { %v7446_v24 = vpop.permute.xlu1 %7445 }
 0xe6a   : > { %7499 = vst.msk [vmem:[%s8230_s26 + $0xe10] sm:$0xff] %vm7479_vm12, %v7446_v24 }
 0xe6b   : > { %v7448_v43 = vpop.permute.xlu0 %7447 }
 0xe6c   : > { %7500 = vst.msk [vmem:[%s8230_s26 + $0xec8] sm:$0xff] %vm7479_vm12, %v7448_v43 }
 0xe6d   : > { %v7450_v27 = vpop.permute.xlu1 %7449 }
 0xe6e   : > { %7501 = vst.msk [vmem:[%s8230_s26 + $0xf80] sm:$0xff] %vm7479_vm12, %v7450_v27 }
 0xe6f   : > { %v7452_v25 = vpop.permute.xlu0 %7451 }
 0xe70   : > { %7502 = vst.msk [vmem:[%s8230_s26 + $0x1038] sm:$0xff] %vm7479_vm12, %v7452_v25 }
 0xe71   : > { %v7454_v54 = vpop.permute.xlu1 %7453 }
 0xe72   : > { %7503 = vst.msk [vmem:[%s8230_s26 + $0x10f0] sm:$0xff] %vm7479_vm12, %v7454_v54 }
 0xe73   : > { %v7505_v9 = vpop.permute.xlu0 %7504 }
 0xe74   : > { %7577 = vst.msk [vmem:[%s8230_s26 + $0x70] sm:$0xff] %vm7576_vm13, %v7505_v9 }
 0xe75   : > { %v7507_v62 = vpop.permute.xlu1 %7506 }
 0xe76   : > { %7578 = vst.msk [vmem:[%s8230_s26 + $0x128] sm:$0xff] %vm7576_vm13, %v7507_v62 }
 0xe77   : > { %v7509_v18 = vpop.permute.xlu0 %7508 }
 0xe78   : > { %7579 = vst.msk [vmem:[%s8230_s26 + $0x1e0] sm:$0xff] %vm7576_vm13, %v7509_v18 }
 0xe79   : > { %v7511_v1 = vpop.permute.xlu1 %7510 }
 0xe7a   : > { %7580 = vst.msk [vmem:[%s8230_s26 + $0x298] sm:$0xff] %vm7576_vm13, %v7511_v1 }
 0xe7b   : > { %v7513_v30 = vpop.permute.xlu0 %7512 }
 0xe7c   : > { %7581 = vst.msk [vmem:[%s8230_s26 + $0x350] sm:$0xff] %vm7576_vm13, %v7513_v30 }
 0xe7d   : > { %v7515_v56 = vpop.permute.xlu1 %7514 }
 0xe7e   : > { %7582 = vst.msk [vmem:[%s8230_s26 + $0x408] sm:$0xff] %vm7576_vm13, %v7515_v56 }
 0xe7f   : > { %v7517_v32 = vpop.permute.xlu0 %7516 }
 0xe80   : > { %7583 = vst.msk [vmem:[%s8230_s26 + $0x4c0] sm:$0xff] %vm7576_vm13, %v7517_v32 }
 0xe81   : > { %v7519_v37 = vpop.permute.xlu1 %7518 }
 0xe82   : > { %7584 = vst.msk [vmem:[%s8230_s26 + $0x578] sm:$0xff] %vm7576_vm13, %v7519_v37 }
 0xe83   : > { %v7521_v63 = vpop.permute.xlu0 %7520 }
 0xe84   : > { %7585 = vst.msk [vmem:[%s8230_s26 + $0x630] sm:$0xff] %vm7576_vm13, %v7521_v63 }
 0xe85   : > { %v7523_v36 = vpop.permute.xlu1 %7522 }
 0xe86   : > { %7586 = vst.msk [vmem:[%s8230_s26 + $0x6e8] sm:$0xff] %vm7576_vm13, %v7523_v36 }
 0xe87   : > { %v7525_v31 = vpop.permute.xlu0 %7524 }
 0xe88   : > { %7587 = vst.msk [vmem:[%s8230_s26 + $0x7a0] sm:$0xff] %vm7576_vm13, %v7525_v31 }
 0xe89   : > { %v7527_v42 = vpop.permute.xlu1 %7526 }
 0xe8a   : > { %7588 = vst.msk [vmem:[%s8230_s26 + $0x858] sm:$0xff] %vm7576_vm13, %v7527_v42 }
 0xe8b   : > { %v7529_v14 = vpop.permute.xlu0 %7528 }
 0xe8c   : > { %7589 = vst.msk [vmem:[%s8230_s26 + $0x910] sm:$0xff] %vm7576_vm13, %v7529_v14 }
 0xe8d   : > { %v7531_v41 = vpop.permute.xlu1 %7530 }
 0xe8e   : > { %7590 = vst.msk [vmem:[%s8230_s26 + $0x9c8] sm:$0xff] %vm7576_vm13, %v7531_v41 }
 0xe8f   : > { %v7533_v7 = vpop.permute.xlu0 %7532 }
 0xe90   : > { %7591 = vst.msk [vmem:[%s8230_s26 + $0xa80] sm:$0xff] %vm7576_vm13, %v7533_v7 }
 0xe91   : > { %v7535_v58 = vpop.permute.xlu1 %7534 }
 0xe92   : > { %7592 = vst.msk [vmem:[%s8230_s26 + $0xb38] sm:$0xff] %vm7576_vm13, %v7535_v58 }
 0xe93   : > { %v7537_v0 = vpop.permute.xlu0 %7536 }
 0xe94   : > { %7593 = vst.msk [vmem:[%s8230_s26 + $0xbf0] sm:$0xff] %vm7576_vm13, %v7537_v0 }
 0xe95   : > { %v7539_v20 = vpop.permute.xlu1 %7538 }
 0xe96   : > { %7594 = vst.msk [vmem:[%s8230_s26 + $0xca8] sm:$0xff] %vm7576_vm13, %v7539_v20 }
 0xe97   : > { %v7541_v17 = vpop.permute.xlu0 %7540 }
 0xe98   : > { %7595 = vst.msk [vmem:[%s8230_s26 + $0xd60] sm:$0xff] %vm7576_vm13, %v7541_v17 }
 0xe99   : > { %v7543_v59 = vpop.permute.xlu1 %7542 }
 0xe9a   : > { %7596 = vst.msk [vmem:[%s8230_s26 + $0xe18] sm:$0xff] %vm7576_vm13, %v7543_v59 }
 0xe9b   : > { %v7545_v12 = vpop.permute.xlu0 %7544 }
 0xe9c   : > { %7597 = vst.msk [vmem:[%s8230_s26 + $0xed0] sm:$0xff] %vm7576_vm13, %v7545_v12 }
 0xe9d   : > { %v7547_v13 = vpop.permute.xlu1 %7546 }
 0xe9e   : > { %7598 = vst.msk [vmem:[%s8230_s26 + $0xf88] sm:$0xff] %vm7576_vm13, %v7547_v13 }
 0xe9f   : > { %v7549_v2 = vpop.permute.xlu0 %7548 }
 0xea0   : > { %7599 = vst.msk [vmem:[%s8230_s26 + $0x1040] sm:$0xff] %vm7576_vm13, %v7549_v2 }
 0xea1   : > { %v7551_v6 = vpop.permute.xlu1 %7550 }
 0xea2   : > { %7600 = vst.msk [vmem:[%s8230_s26 + $0x10f8] sm:$0xff] %vm7576_vm13, %v7551_v6 }
 0xea3   : > { %v7602_v61 = vpop.permute.xlu0 %7601 }
 0xea4   : > { %7674 = vst.msk [vmem:[%s8230_s26 + $0x70] sm:$0xff] %vm7673_vm14, %v7602_v61 }
 0xea5   : > { %v7604_v26 = vpop.permute.xlu1 %7603 }
 0xea6   : > { %7675 = vst.msk [vmem:[%s8230_s26 + $0x128] sm:$0xff] %vm7673_vm14, %v7604_v26 }
 0xea7   : > { %v7606_v39 = vpop.permute.xlu0 %7605 }
 0xea8   : > { %7676 = vst.msk [vmem:[%s8230_s26 + $0x1e0] sm:$0xff] %vm7673_vm14, %v7606_v39 }
 0xea9   : > { %v7608_v44 = vpop.permute.xlu1 %7607 }
 0xeaa   : > { %7677 = vst.msk [vmem:[%s8230_s26 + $0x298] sm:$0xff] %vm7673_vm14, %v7608_v44 }
 0xeab   : > { %v7610_v33 = vpop.permute.xlu0 %7609 }
 0xeac   : > { %7678 = vst.msk [vmem:[%s8230_s26 + $0x350] sm:$0xff] %vm7673_vm14, %v7610_v33 }
 0xead   : > { %v7612_v50 = vpop.permute.xlu1 %7611 }
 0xeae   : > { %7679 = vst.msk [vmem:[%s8230_s26 + $0x408] sm:$0xff] %vm7673_vm14, %v7612_v50 }
 0xeaf   : > { %v7614_v38 = vpop.permute.xlu0 %7613 }
 0xeb0   : > { %7680 = vst.msk [vmem:[%s8230_s26 + $0x4c0] sm:$0xff] %vm7673_vm14, %v7614_v38 }
 0xeb1   : > { %v7616_v57 = vpop.permute.xlu1 %7615 }
 0xeb2   : > { %7681 = vst.msk [vmem:[%s8230_s26 + $0x578] sm:$0xff] %vm7673_vm14, %v7616_v57 }
 0xeb3   : > { %v7618_v35 = vpop.permute.xlu0 %7617 }
 0xeb4   : > { %7682 = vst.msk [vmem:[%s8230_s26 + $0x630] sm:$0xff] %vm7673_vm14, %v7618_v35 }
 0xeb5   : > { %v7620_v34 = vpop.permute.xlu1 %7619 }
 0xeb6   : > { %7683 = vst.msk [vmem:[%s8230_s26 + $0x6e8] sm:$0xff] %vm7673_vm14, %v7620_v34 }
 0xeb7   : > { %v7622_v8 = vpop.permute.xlu0 %7621 }
 0xeb8   : > { %7684 = vst.msk [vmem:[%s8230_s26 + $0x7a0] sm:$0xff] %vm7673_vm14, %v7622_v8 }
 0xeb9   : > { %v7624_v11 = vpop.permute.xlu1 %7623 }
 0xeba   : > { %7685 = vst.msk [vmem:[%s8230_s26 + $0x858] sm:$0xff] %vm7673_vm14, %v7624_v11 }
 0xebb   : > { %v7626_v22 = vpop.permute.xlu0 %7625 }
 0xebc   : > { %7686 = vst.msk [vmem:[%s8230_s26 + $0x910] sm:$0xff] %vm7673_vm14, %v7626_v22 }
 0xebd   : > { %v7628_v40 = vpop.permute.xlu1 %7627 }
 0xebe   : > { %7687 = vst.msk [vmem:[%s8230_s26 + $0x9c8] sm:$0xff] %vm7673_vm14, %v7628_v40 }
 0xebf   : > { %v7630_v3 = vpop.permute.xlu0 %7629 }
 0xec0   : > { %7688 = vst.msk [vmem:[%s8230_s26 + $0xa80] sm:$0xff] %vm7673_vm14, %v7630_v3 }
 0xec1   : > { %v7632_v53 = vpop.permute.xlu1 %7631 }
 0xec2   : > { %7689 = vst.msk [vmem:[%s8230_s26 + $0xb38] sm:$0xff] %vm7673_vm14, %v7632_v53 }
 0xec3   : > { %v7634_v21 = vpop.permute.xlu0 %7633 }
 0xec4   : > { %7690 = vst.msk [vmem:[%s8230_s26 + $0xbf0] sm:$0xff] %vm7673_vm14, %v7634_v21 }
 0xec5   : > { %v7636_v60 = vpop.permute.xlu1 %7635 }
 0xec6   : > { %7691 = vst.msk [vmem:[%s8230_s26 + $0xca8] sm:$0xff] %vm7673_vm14, %v7636_v60 }
 0xec7   : > { %v7638_v46 = vpop.permute.xlu0 %7637 }
 0xec8   : > { %7692 = vst.msk [vmem:[%s8230_s26 + $0xd60] sm:$0xff] %vm7673_vm14, %v7638_v46 }
 0xec9   : > { %v7640_v48 = vpop.permute.xlu1 %7639 }
 0xeca   : > { %7693 = vst.msk [vmem:[%s8230_s26 + $0xe18] sm:$0xff] %vm7673_vm14, %v7640_v48 }
 0xecb   : > { %v7642_v45 = vpop.permute.xlu0 %7641 }
 0xecc   : > { %7694 = vst.msk [vmem:[%s8230_s26 + $0xed0] sm:$0xff] %vm7673_vm14, %v7642_v45 }
 0xecd   : > { %v7644_v49 = vpop.permute.xlu1 %7643 }
 0xece   : > { %7695 = vst.msk [vmem:[%s8230_s26 + $0xf88] sm:$0xff] %vm7673_vm14, %v7644_v49 }
 0xecf   : > { %v7646_v29 = vpop.permute.xlu0 %7645 }
 0xed0   : > { %7696 = vst.msk [vmem:[%s8230_s26 + $0x1040] sm:$0xff] %vm7673_vm14, %v7646_v29 }
 0xed1   : > { %v7648_v55 = vpop.permute.xlu1 %7647 }
 0xed2   : > { %7697 = vst.msk [vmem:[%s8230_s26 + $0x10f8] sm:$0xff] %vm7673_vm14, %v7648_v55 }
 0xed3 PF: > { %s22_s21 = sadd.s32 1, %s7951_s21  }
 0xed4   : > { %p19_p4 = scmp.ge.s32.totalorder %s22_s21, 4  }
 0xed6   :  { %21 = sbr.rel (!%p19_p4) target bundleno = 1 (0x1), region = 98 }

</bundles_post_ra>
